<compile_context>
chip_gen: v7x
topology: tpu7x:2x2x1
jax: 0.10.0
libtpu: 0.0.40
codegen_flags: <defaults>
</compile_context>

<pallas_src>
import functools

import numpy as np
import jax
import jax.numpy as jnp
from jax.experimental import pallas as pl
from jax.experimental.pallas import tpu as pltpu


_NEG_FILL = 1e30     # magnitude of the "minus infinity" max-pool fill
_CLAMP = -1e29       # anything below this came from an all-padding window


# ----------------------------------------------------------------------------
# Pallas kernel: all four Inception branches for one batch element.
#   Wp      : padded image width (multiple of 8)
#   R_out   : rows of the output slab (= H * Wp); row i <-> pixel (i//Wp, i%Wp)
#   Rs      : rows of each shifted copy (= (H+4) * Wp)
#   cin_aug : Cin + 1 (last input channel is the validity / ones channel)
# ----------------------------------------------------------------------------
def _inception_kernel(Wp, R_out, Rs, cin_aug,
                      x_ref, w23_ref, wtap_ref, w1_ref, w4_ref, bias_ref,
                      out_ref):
    f32, bf16 = jnp.float32, jnp.bfloat16
    x = x_ref[0]                               # (R, Cin+1) bf16, padded-flat

    # ---- fused 1x1 for branches 2 & 3, over ALL padded rows ----------------
    # Bias lives in the ones-channel weight row, so padding rows are exactly 0
    # after the ReLU (zero-padded conv semantics for the 3x3 / 5x5 that follow).
    a23 = jnp.maximum(jnp.dot(x, w23_ref[...], preferred_element_type=f32),
                      0.0).astype(bf16)        # (R, c20 + c30)

    # ---- column-shifted copies: the only sublane-misaligned ops ------------
    s23 = [a23[j:j + Rs, :] for j in range(5)]           # 5x5 col-parts 0..4

    xf = x.astype(f32)
    valid = xf[:, cin_aug - 1:cin_aug]                   # (R, 1): 1 real, 0 pad
    xneg = xf + (valid - 1.0) * _NEG_FILL                # padding -> -1e30
    sneg = [xneg[j:j + Rs, :] for j in (1, 2, 3)]        # 3x3 pool col-parts
    sx2 = xf[2:2 + Rs, :]                                # centre col-part (1x1s)

    # ---- single output accumulator: bias-init, Cout-padded weights ---------
    # branch 1: 1x1 conv of x (centre tap).
    acc = jnp.dot(sx2[2 * Wp:2 * Wp + R_out].astype(bf16), w1_ref[...],
                  preferred_element_type=f32) + bias_ref[...]

    # branch 4: 3x3/s1/p1 max pool (f32) -> 1x1 conv.
    pooled = sneg[0][Wp:Wp + R_out]
    for dy in range(3):
        for dx in range(3):
            if dy == 0 and dx == 0:
                continue
            pooled = jnp.maximum(
                pooled, sneg[dx][(1 + dy) * Wp:(1 + dy) * Wp + R_out])
    pooled = jnp.where(pooled < _CLAMP, 0.0, pooled)     # keep junk rows finite
    acc = acc + jnp.dot(pooled.astype(bf16), w4_ref[...],
                        preferred_element_type=f32)

    # branches 2 & 3: accumulate-over-taps (the 3x3 weights live in the centre
    # 3x3 taps of the shared 25-tap weight stack; nothing is concatenated).
    for dy in range(5):
        row = dy * Wp                                    # 8-aligned row offset
        for dx in range(5):
            acc = acc + jnp.dot(s23[dx][row:row + R_out, :],
                                wtap_ref[dy * 5 + dx],
                                preferred_element_type=f32)

    out_ref[0] = jnp.maximum(acc, 0.0).astype(out_ref.dtype)


# ----------------------------------------------------------------------------
# Compact weight packing (plain numpy glue).
# ----------------------------------------------------------------------------
def _prep_weights(params, Cin):
    (w1, b1), (w21, b21), (w22, b22), (w31, b31), (w32, b32), (w4, b4) = params
    np32 = lambda a: np.asarray(a, np.float32)
    c1, c20, c21 = w1.shape[0], w21.shape[0], w22.shape[0]
    c30, c31, c4 = w31.shape[0], w32.shape[0], w4.shape[0]
    assert w22.shape[1] == c20 and w32.shape[1] == c30, (
        "reference module requires c2[0] == c3[0] == in_c")
    Cin1, Cf = Cin + 1, c20 + c30
    Ctot = c1 + c21 + c31 + c4
    o2, o3, o4 = c1, c1 + c21, c1 + c21 + c31

    # fused inner 1x1 (branches 2 & 3); biases folded into the ones-channel row
    w23 = np.zeros((Cin1, Cf), np.float32)
    w23[:Cin, :c20] = np32(w21)[:, :, 0, 0].T
    w23[:Cin, c20:] = np32(w31)[:, :, 0, 0].T
    w23[Cin, :c20] = np32(b21)
    w23[Cin, c20:] = np32(b31)

    # outer 1x1s, zero-padded along Cout to the full torch.cat channel range
    w1p = np.zeros((Cin1, Ctot), np.float32)
    w1p[:Cin, :c1] = np32(w1)[:, :, 0, 0].T
    w4p = np.zeros((Cin1, Ctot), np.float32)
    w4p[:Cin, o4:] = np32(w4)[:, :, 0, 0].T

    # merged per-tap weights for the 3x3 (branch 2) and 5x5 (branch 3) convs
    w22n, w32n = np32(w22), np32(w32)
    wtap = np.zeros((25, Cf, Ctot), np.float32)
    for dy in range(5):
        for dx in range(5):
            t = dy * 5 + dx
            wtap[t, c20:, o3:o3 + c31] = w32n[:, :, dy, dx].T
            if 1 <= dy <= 3 and 1 <= dx <= 3:
                wtap[t, :c20, o2:o2 + c21] = w22n[:, :, dy - 1, dx - 1].T

    # outer biases, applied once via accumulator init (f32)
    bias = np.zeros((1, Ctot), np.float32)
    bias[0, :c1] = np32(b1)
    bias[0, o2:o2 + c21] = np32(b22)
    bias[0, o3:o3 + c31] = np32(b32)
    bias[0, o4:] = np32(b4)

    bf = lambda a: jnp.asarray(a).astype(jnp.bfloat16)
    return bf(w23), bf(wtap), bf(w1p), bf(w4p), jnp.asarray(bias), Ctot


# ----------------------------------------------------------------------------
# Wrapper: NCHW in -> NCHW out (channel concat of the four branches).
# ----------------------------------------------------------------------------
def inception_forward(x_nchw, params):
    N, Cin, H, W = x_nchw.shape
    w23, wtap, w1p, w4p, bias, Ctot = _prep_weights(params, Cin)

    pad_t, pad_l = 2, 2
    Wp = ((W + 4 + 7) // 8) * 8      # padded width, multiple of 8
    Hp = H + 5                       # 2 top + 3 bottom pad rows (incl. slack)
    R = Hp * Wp                      # padded-flat rows per image
    R_out = H * Wp                   # output-slab rows; row i <-> y*Wp + x
    Rs = (H + 4) * Wp                # rows of each in-kernel shifted copy

    # Channels-last, +ones (validity) channel, zero-padded, flattened, bf16.
    # TODO(synk): keeping activations NHWC end-to-end would drop the transposes.
    x_nhwc = jnp.transpose(x_nchw, (0, 2, 3, 1))
    x_aug = jnp.concatenate(
        [x_nhwc, jnp.ones((N, H, W, 1), x_nhwc.dtype)], axis=-1)
    x_pad = jnp.pad(x_aug, ((0, 0), (pad_t, Hp - H - pad_t),
                            (pad_l, Wp - W - pad_l), (0, 0)))
    x_flat = x_pad.reshape(N, R, Cin + 1).astype(jnp.bfloat16)

    def const_spec(a):
        nd = a.ndim
        return pl.BlockSpec(a.shape, lambda n, _nd=nd: (0,) * _nd)

    kernel = functools.partial(_inception_kernel, Wp, R_out, Rs, Cin + 1)

    out = pl.pallas_call(
        kernel,
        out_shape=jax.ShapeDtypeStruct((N, R_out, Ctot), jnp.bfloat16),
        grid_spec=pltpu.PrefetchScalarGridSpec(
            num_scalar_prefetch=0,
            grid=(N,),
            in_specs=[
                pl.BlockSpec((1, R, Cin + 1), lambda n: (n, 0, 0)),
                const_spec(w23), const_spec(wtap),
                const_spec(w1p), const_spec(w4p), const_spec(bias),
            ],
            out_specs=pl.BlockSpec((1, R_out, Ctot), lambda n: (n, 0, 0)),
        ),
        compiler_params=pltpu.CompilerParams(
            dimension_semantics=("parallel",),
            vmem_limit_bytes=32 * 1024 * 1024),
    )(x_flat, w23, wtap, w1p, w4p, bias)

    # Row i of the output slab <-> padded column layout y*Wp + x; keep the
    # first W columns of every row block and go NHWC -> NCHW.
    nhwc = out.reshape(N, H, Wp, Ctot)[:, :, :W, :]
    return jnp.transpose(nhwc, (0, 3, 1, 2)).astype(jnp.float32)


# ----------------------------------------------------------------------------
# Pure-JAX reference (for a correctness check).
# ----------------------------------------------------------------------------
def inception_reference(x, params):
    (w1, b1), (w21, b21), (w22, b22), (w31, b31), (w32, b32), (w4, b4) = params

    def conv(inp, w, b, pad):
        y = jax.lax.conv_general_dilated(
            inp, w, window_strides=(1, 1),
            padding=((pad, pad), (pad, pad)),
            dimension_numbers=('NCHW', 'OIHW', 'NCHW'))
        return y + b[None, :, None, None]

    relu = jax.nn.relu
    p1 = relu(conv(x, w1, b1, 0))
    p2 = relu(conv(relu(conv(x, w21, b21, 0)), w22, b22, 1))
    p3 = relu(conv(relu(conv(x, w31, b31, 0)), w32, b32, 2))
    pooled = jax.lax.reduce_window(
        x, -jnp.inf, jax.lax.max, (1, 1, 3, 3), (1, 1, 1, 1),
        padding=((0, 0), (0, 0), (1, 1), (1, 1)))
    p4 = relu(conv(pooled, w4, b4, 0))
    return jnp.concatenate([p1, p2, p3, p4], axis=1)


if __name__ == "__main__":
    N, Cin, H, W = 2, 4, 16, 16
    # c2[0] and c3[0] must equal in_c for the reference module to be shape-valid.
    c1, c2, c3, c4 = 8, (4, 8), (4, 8), 8

    key = jax.random.PRNGKey(0)
    ks = jax.random.split(key, 13)
    x = jax.random.normal(ks[0], (N, Cin, H, W), jnp.float32)

    def init(kw, kb, co, ci, k):
        w = 0.1 * jax.random.normal(kw, (co, ci, k, k), jnp.float32)
        b = 0.1 * jax.random.normal(kb, (co,), jnp.float32)
        return w, b

    params = (
        init(ks[1], ks[2], c1, Cin, 1),        # p1_1
        init(ks[3], ks[4], c2[0], Cin, 1),     # p2_1
        init(ks[5], ks[6], c2[1], Cin, 3),     # p2_2 (in_channels = in_c, as declared)
        init(ks[7], ks[8], c3[0], Cin, 1),     # p3_1
        init(ks[9], ks[10], c3[1], Cin, 5),    # p3_2 (in_channels = in_c, as declared)
        init(ks[11], ks[12], c4, Cin, 1),      # p4_2
    )

    out = jax.block_until_ready(inception_forward(x, params))
    ref = jax.block_until_ready(inception_reference(x, params))
    # bf16 matmul operands + bf16 output slab -> looser tolerance than pure fp32.
    np.testing.assert_allclose(np.asarray(out), np.asarray(ref),
                               rtol=2e-2, atol=2e-2)
    print("KERNEL_OK")
</pallas_src>

<mosaic_0001>
module attributes {stable_mosaic.version = 11 : i64} {
  func.func @_inception_kernel(%arg0: i32, %arg1: memref<1x504x5xbf16, #tpu.memory_space<vmem>>, %arg2: memref<5x8xbf16, #tpu.memory_space<vmem>>, %arg3: memref<25x8x32xbf16, #tpu.memory_space<vmem>>, %arg4: memref<5x32xbf16, #tpu.memory_space<vmem>>, %arg5: memref<5x32xbf16, #tpu.memory_space<vmem>>, %arg6: memref<1x32xf32, #tpu.memory_space<vmem>>, %arg7: memref<1x384x32xbf16, #tpu.memory_space<vmem>>) attributes {dimension_semantics = [#tpu.dimension_semantics<parallel>], iteration_bounds = array<i64: 2>, scalar_prefetch = 0 : i64, scratch_operands = 0 : i64, tpu.core_type = #tpu.core_type<tc>, window_params = [{transform_indices = @transform_0, window_bounds = array<i64: 1, 504, 5>}, {pipeline_mode = #tpu.pipeline_mode<synchronous>, transform_indices = @transform_1, window_bounds = array<i64: 5, 8>}, {pipeline_mode = #tpu.pipeline_mode<synchronous>, transform_indices = @transform_2, window_bounds = array<i64: 25, 8, 32>}, {pipeline_mode = #tpu.pipeline_mode<synchronous>, transform_indices = @transform_3, window_bounds = array<i64: 5, 32>}, {pipeline_mode = #tpu.pipeline_mode<synchronous>, transform_indices = @transform_4, window_bounds = array<i64: 5, 32>}, {pipeline_mode = #tpu.pipeline_mode<synchronous>, transform_indices = @transform_5, window_bounds = array<i64: 1, 32>}, {transform_indices = @transform_6, window_bounds = array<i64: 1, 384, 32>}]} {
    %c0 = arith.constant 0 : index
    %c0_0 = arith.constant 0 : index
    %c0_1 = arith.constant 0 : index
    %0 = vector.load %arg1[%c0, %c0_0, %c0_1] : memref<1x504x5xbf16, #tpu.memory_space<vmem>>, vector<1x504x5xbf16>
    %1 = vector.shape_cast %0 : vector<1x504x5xbf16> to vector<504x5xbf16>
    %c0_2 = arith.constant 0 : index
    %c0_3 = arith.constant 0 : index
    %2 = vector.load %arg2[%c0_2, %c0_3] : memref<5x8xbf16, #tpu.memory_space<vmem>>, vector<5x8xbf16>
    %cst = arith.constant dense<0.000000e+00> : vector<504x8xf32>
    %3 = tpu.matmul %1, %2, %cst {dimension_numbers = #tpu.dot_dimension_numbers<[1], [0], [0], [1], [0, 0, 1, 1], [], []>} : vector<504x5xbf16>, vector<5x8xbf16>, vector<504x8xf32> -> vector<504x8xf32>
    %cst_4 = arith.constant 0.000000e+00 : f32
    %4 = vector.broadcast %cst_4 : f32 to vector<504x8xf32>
    %5 = arith.maximumf %3, %4 : vector<504x8xf32>
    %6 = arith.truncf %5 : vector<504x8xf32> to vector<504x8xbf16>
    %7 = vector.extract_strided_slice %6 {offsets = [0, 0], sizes = [480, 8], strides = [1, 1]} : vector<504x8xbf16> to vector<480x8xbf16>
    %8 = vector.extract_strided_slice %6 {offsets = [1, 0], sizes = [480, 8], strides = [1, 1]} : vector<504x8xbf16> to vector<480x8xbf16>
    %9 = vector.extract_strided_slice %6 {offsets = [2, 0], sizes = [480, 8], strides = [1, 1]} : vector<504x8xbf16> to vector<480x8xbf16>
    %10 = vector.extract_strided_slice %6 {offsets = [3, 0], sizes = [480, 8], strides = [1, 1]} : vector<504x8xbf16> to vector<480x8xbf16>
    %11 = vector.extract_strided_slice %6 {offsets = [4, 0], sizes = [480, 8], strides = [1, 1]} : vector<504x8xbf16> to vector<480x8xbf16>
    %12 = arith.extf %1 : vector<504x5xbf16> to vector<504x5xf32>
    %13 = vector.extract_strided_slice %12 {offsets = [0, 4], sizes = [504, 1], strides = [1, 1]} : vector<504x5xf32> to vector<504x1xf32>
    %cst_5 = arith.constant 1.000000e+00 : f32
    %14 = vector.broadcast %cst_5 : f32 to vector<504x1xf32>
    %15 = arith.subf %13, %14 : vector<504x1xf32>
    %cst_6 = arith.constant 1.000000e+30 : f32
    %16 = vector.broadcast %cst_6 : f32 to vector<504x1xf32>
    %17 = arith.mulf %15, %16 : vector<504x1xf32>
    %18 = vector.broadcast %17 : vector<504x1xf32> to vector<504x5xf32>
    %19 = arith.addf %12, %18 : vector<504x5xf32>
    %20 = vector.extract_strided_slice %19 {offsets = [1, 0], sizes = [480, 5], strides = [1, 1]} : vector<504x5xf32> to vector<480x5xf32>
    %21 = vector.extract_strided_slice %19 {offsets = [2, 0], sizes = [480, 5], strides = [1, 1]} : vector<504x5xf32> to vector<480x5xf32>
    %22 = vector.extract_strided_slice %19 {offsets = [3, 0], sizes = [480, 5], strides = [1, 1]} : vector<504x5xf32> to vector<480x5xf32>
    %23 = vector.extract_strided_slice %12 {offsets = [2, 0], sizes = [480, 5], strides = [1, 1]} : vector<504x5xf32> to vector<480x5xf32>
    %24 = vector.extract_strided_slice %23 {offsets = [48, 0], sizes = [384, 5], strides = [1, 1]} : vector<480x5xf32> to vector<384x5xf32>
    %25 = arith.truncf %24 : vector<384x5xf32> to vector<384x5xbf16>
    %c0_7 = arith.constant 0 : index
    %c0_8 = arith.constant 0 : index
    %26 = vector.load %arg4[%c0_7, %c0_8] : memref<5x32xbf16, #tpu.memory_space<vmem>>, vector<5x32xbf16>
    %cst_9 = arith.constant dense<0.000000e+00> : vector<384x32xf32>
    %27 = tpu.matmul %25, %26, %cst_9 {dimension_numbers = #tpu.dot_dimension_numbers<[1], [0], [0], [1], [0, 0, 1, 1], [], []>} : vector<384x5xbf16>, vector<5x32xbf16>, vector<384x32xf32> -> vector<384x32xf32>
    %c0_10 = arith.constant 0 : index
    %c0_11 = arith.constant 0 : index
    %28 = vector.load %arg6[%c0_10, %c0_11] : memref<1x32xf32, #tpu.memory_space<vmem>>, vector<1x32xf32>
    %29 = vector.broadcast %28 : vector<1x32xf32> to vector<384x32xf32>
    %30 = arith.addf %27, %29 : vector<384x32xf32>
    %31 = vector.extract_strided_slice %20 {offsets = [24, 0], sizes = [384, 5], strides = [1, 1]} : vector<480x5xf32> to vector<384x5xf32>
    %32 = vector.extract_strided_slice %21 {offsets = [24, 0], sizes = [384, 5], strides = [1, 1]} : vector<480x5xf32> to vector<384x5xf32>
    %33 = arith.maximumf %31, %32 : vector<384x5xf32>
    %34 = vector.extract_strided_slice %22 {offsets = [24, 0], sizes = [384, 5], strides = [1, 1]} : vector<480x5xf32> to vector<384x5xf32>
    %35 = arith.maximumf %33, %34 : vector<384x5xf32>
    %36 = vector.extract_strided_slice %20 {offsets = [48, 0], sizes = [384, 5], strides = [1, 1]} : vector<480x5xf32> to vector<384x5xf32>
    %37 = arith.maximumf %35, %36 : vector<384x5xf32>
    %38 = vector.extract_strided_slice %21 {offsets = [48, 0], sizes = [384, 5], strides = [1, 1]} : vector<480x5xf32> to vector<384x5xf32>
    %39 = arith.maximumf %37, %38 : vector<384x5xf32>
    %40 = vector.extract_strided_slice %22 {offsets = [48, 0], sizes = [384, 5], strides = [1, 1]} : vector<480x5xf32> to vector<384x5xf32>
    %41 = arith.maximumf %39, %40 : vector<384x5xf32>
    %42 = vector.extract_strided_slice %20 {offsets = [72, 0], sizes = [384, 5], strides = [1, 1]} : vector<480x5xf32> to vector<384x5xf32>
    %43 = arith.maximumf %41, %42 : vector<384x5xf32>
    %44 = vector.extract_strided_slice %21 {offsets = [72, 0], sizes = [384, 5], strides = [1, 1]} : vector<480x5xf32> to vector<384x5xf32>
    %45 = arith.maximumf %43, %44 : vector<384x5xf32>
    %46 = vector.extract_strided_slice %22 {offsets = [72, 0], sizes = [384, 5], strides = [1, 1]} : vector<480x5xf32> to vector<384x5xf32>
    %47 = arith.maximumf %45, %46 : vector<384x5xf32>
    %cst_12 = arith.constant -1.000000e+29 : f32
    %48 = vector.broadcast %cst_12 : f32 to vector<384x5xf32>
    %49 = arith.cmpf olt, %47, %48 : vector<384x5xf32>
    %cst_13 = arith.constant 0.000000e+00 : f32
    %50 = vector.broadcast %cst_13 : f32 to vector<384x5xf32>
    %51 = arith.select %49, %50, %47 : vector<384x5xi1>, vector<384x5xf32>
    %52 = arith.truncf %51 : vector<384x5xf32> to vector<384x5xbf16>
    %c0_14 = arith.constant 0 : index
    %c0_15 = arith.constant 0 : index
    %53 = vector.load %arg5[%c0_14, %c0_15] : memref<5x32xbf16, #tpu.memory_space<vmem>>, vector<5x32xbf16>
    %cst_16 = arith.constant dense<0.000000e+00> : vector<384x32xf32>
    %54 = tpu.matmul %52, %53, %cst_16 {dimension_numbers = #tpu.dot_dimension_numbers<[1], [0], [0], [1], [0, 0, 1, 1], [], []>} : vector<384x5xbf16>, vector<5x32xbf16>, vector<384x32xf32> -> vector<384x32xf32>
    %55 = arith.addf %30, %54 : vector<384x32xf32>
    %56 = vector.extract_strided_slice %7 {offsets = [0, 0], sizes = [384, 8], strides = [1, 1]} : vector<480x8xbf16> to vector<384x8xbf16>
    %c0_17 = arith.constant 0 : index
    %c0_18 = arith.constant 0 : index
    %c0_19 = arith.constant 0 : index
    %57 = vector.load %arg3[%c0_17, %c0_18, %c0_19] : memref<25x8x32xbf16, #tpu.memory_space<vmem>>, vector<1x8x32xbf16>
    %58 = vector.shape_cast %57 : vector<1x8x32xbf16> to vector<8x32xbf16>
    %cst_20 = arith.constant dense<0.000000e+00> : vector<384x32xf32>
    %59 = tpu.matmul %56, %58, %cst_20 {dimension_numbers = #tpu.dot_dimension_numbers<[1], [0], [0], [1], [0, 0, 1, 1], [], []>} : vector<384x8xbf16>, vector<8x32xbf16>, vector<384x32xf32> -> vector<384x32xf32>
    %60 = arith.addf %55, %59 : vector<384x32xf32>
    %61 = vector.extract_strided_slice %8 {offsets = [0, 0], sizes = [384, 8], strides = [1, 1]} : vector<480x8xbf16> to vector<384x8xbf16>
    %c1 = arith.constant 1 : index
    %c0_21 = arith.constant 0 : index
    %c0_22 = arith.constant 0 : index
    %62 = vector.load %arg3[%c1, %c0_21, %c0_22] : memref<25x8x32xbf16, #tpu.memory_space<vmem>>, vector<1x8x32xbf16>
    %63 = vector.shape_cast %62 : vector<1x8x32xbf16> to vector<8x32xbf16>
    %cst_23 = arith.constant dense<0.000000e+00> : vector<384x32xf32>
    %64 = tpu.matmul %61, %63, %cst_23 {dimension_numbers = #tpu.dot_dimension_numbers<[1], [0], [0], [1], [0, 0, 1, 1], [], []>} : vector<384x8xbf16>, vector<8x32xbf16>, vector<384x32xf32> -> vector<384x32xf32>
    %65 = arith.addf %60, %64 : vector<384x32xf32>
    %66 = vector.extract_strided_slice %9 {offsets = [0, 0], sizes = [384, 8], strides = [1, 1]} : vector<480x8xbf16> to vector<384x8xbf16>
    %c2 = arith.constant 2 : index
    %c0_24 = arith.constant 0 : index
    %c0_25 = arith.constant 0 : index
    %67 = vector.load %arg3[%c2, %c0_24, %c0_25] : memref<25x8x32xbf16, #tpu.memory_space<vmem>>, vector<1x8x32xbf16>
    %68 = vector.shape_cast %67 : vector<1x8x32xbf16> to vector<8x32xbf16>
    %cst_26 = arith.constant dense<0.000000e+00> : vector<384x32xf32>
    %69 = tpu.matmul %66, %68, %cst_26 {dimension_numbers = #tpu.dot_dimension_numbers<[1], [0], [0], [1], [0, 0, 1, 1], [], []>} : vector<384x8xbf16>, vector<8x32xbf16>, vector<384x32xf32> -> vector<384x32xf32>
    %70 = arith.addf %65, %69 : vector<384x32xf32>
    %71 = vector.extract_strided_slice %10 {offsets = [0, 0], sizes = [384, 8], strides = [1, 1]} : vector<480x8xbf16> to vector<384x8xbf16>
    %c3 = arith.constant 3 : index
    %c0_27 = arith.constant 0 : index
    %c0_28 = arith.constant 0 : index
    %72 = vector.load %arg3[%c3, %c0_27, %c0_28] : memref<25x8x32xbf16, #tpu.memory_space<vmem>>, vector<1x8x32xbf16>
    %73 = vector.shape_cast %72 : vector<1x8x32xbf16> to vector<8x32xbf16>
    %cst_29 = arith.constant dense<0.000000e+00> : vector<384x32xf32>
    %74 = tpu.matmul %71, %73, %cst_29 {dimension_numbers = #tpu.dot_dimension_numbers<[1], [0], [0], [1], [0, 0, 1, 1], [], []>} : vector<384x8xbf16>, vector<8x32xbf16>, vector<384x32xf32> -> vector<384x32xf32>
    %75 = arith.addf %70, %74 : vector<384x32xf32>
    %76 = vector.extract_strided_slice %11 {offsets = [0, 0], sizes = [384, 8], strides = [1, 1]} : vector<480x8xbf16> to vector<384x8xbf16>
    %c4 = arith.constant 4 : index
    %c0_30 = arith.constant 0 : index
    %c0_31 = arith.constant 0 : index
    %77 = vector.load %arg3[%c4, %c0_30, %c0_31] : memref<25x8x32xbf16, #tpu.memory_space<vmem>>, vector<1x8x32xbf16>
    %78 = vector.shape_cast %77 : vector<1x8x32xbf16> to vector<8x32xbf16>
    %cst_32 = arith.constant dense<0.000000e+00> : vector<384x32xf32>
    %79 = tpu.matmul %76, %78, %cst_32 {dimension_numbers = #tpu.dot_dimension_numbers<[1], [0], [0], [1], [0, 0, 1, 1], [], []>} : vector<384x8xbf16>, vector<8x32xbf16>, vector<384x32xf32> -> vector<384x32xf32>
    %80 = arith.addf %75, %79 : vector<384x32xf32>
    %81 = vector.extract_strided_slice %7 {offsets = [24, 0], sizes = [384, 8], strides = [1, 1]} : vector<480x8xbf16> to vector<384x8xbf16>
    %c5 = arith.constant 5 : index
    %c0_33 = arith.constant 0 : index
    %c0_34 = arith.constant 0 : index
    %82 = vector.load %arg3[%c5, %c0_33, %c0_34] : memref<25x8x32xbf16, #tpu.memory_space<vmem>>, vector<1x8x32xbf16>
    %83 = vector.shape_cast %82 : vector<1x8x32xbf16> to vector<8x32xbf16>
    %cst_35 = arith.constant dense<0.000000e+00> : vector<384x32xf32>
    %84 = tpu.matmul %81, %83, %cst_35 {dimension_numbers = #tpu.dot_dimension_numbers<[1], [0], [0], [1], [0, 0, 1, 1], [], []>} : vector<384x8xbf16>, vector<8x32xbf16>, vector<384x32xf32> -> vector<384x32xf32>
    %85 = arith.addf %80, %84 : vector<384x32xf32>
    %86 = vector.extract_strided_slice %8 {offsets = [24, 0], sizes = [384, 8], strides = [1, 1]} : vector<480x8xbf16> to vector<384x8xbf16>
    %c6 = arith.constant 6 : index
    %c0_36 = arith.constant 0 : index
    %c0_37 = arith.constant 0 : index
    %87 = vector.load %arg3[%c6, %c0_36, %c0_37] : memref<25x8x32xbf16, #tpu.memory_space<vmem>>, vector<1x8x32xbf16>
    %88 = vector.shape_cast %87 : vector<1x8x32xbf16> to vector<8x32xbf16>
    %cst_38 = arith.constant dense<0.000000e+00> : vector<384x32xf32>
    %89 = tpu.matmul %86, %88, %cst_38 {dimension_numbers = #tpu.dot_dimension_numbers<[1], [0], [0], [1], [0, 0, 1, 1], [], []>} : vector<384x8xbf16>, vector<8x32xbf16>, vector<384x32xf32> -> vector<384x32xf32>
    %90 = arith.addf %85, %89 : vector<384x32xf32>
    %91 = vector.extract_strided_slice %9 {offsets = [24, 0], sizes = [384, 8], strides = [1, 1]} : vector<480x8xbf16> to vector<384x8xbf16>
    %c7 = arith.constant 7 : index
    %c0_39 = arith.constant 0 : index
    %c0_40 = arith.constant 0 : index
    %92 = vector.load %arg3[%c7, %c0_39, %c0_40] : memref<25x8x32xbf16, #tpu.memory_space<vmem>>, vector<1x8x32xbf16>
    %93 = vector.shape_cast %92 : vector<1x8x32xbf16> to vector<8x32xbf16>
    %cst_41 = arith.constant dense<0.000000e+00> : vector<384x32xf32>
    %94 = tpu.matmul %91, %93, %cst_41 {dimension_numbers = #tpu.dot_dimension_numbers<[1], [0], [0], [1], [0, 0, 1, 1], [], []>} : vector<384x8xbf16>, vector<8x32xbf16>, vector<384x32xf32> -> vector<384x32xf32>
    %95 = arith.addf %90, %94 : vector<384x32xf32>
    %96 = vector.extract_strided_slice %10 {offsets = [24, 0], sizes = [384, 8], strides = [1, 1]} : vector<480x8xbf16> to vector<384x8xbf16>
    %c8 = arith.constant 8 : index
    %c0_42 = arith.constant 0 : index
    %c0_43 = arith.constant 0 : index
    %97 = vector.load %arg3[%c8, %c0_42, %c0_43] : memref<25x8x32xbf16, #tpu.memory_space<vmem>>, vector<1x8x32xbf16>
    %98 = vector.shape_cast %97 : vector<1x8x32xbf16> to vector<8x32xbf16>
    %cst_44 = arith.constant dense<0.000000e+00> : vector<384x32xf32>
    %99 = tpu.matmul %96, %98, %cst_44 {dimension_numbers = #tpu.dot_dimension_numbers<[1], [0], [0], [1], [0, 0, 1, 1], [], []>} : vector<384x8xbf16>, vector<8x32xbf16>, vector<384x32xf32> -> vector<384x32xf32>
    %100 = arith.addf %95, %99 : vector<384x32xf32>
    %101 = vector.extract_strided_slice %11 {offsets = [24, 0], sizes = [384, 8], strides = [1, 1]} : vector<480x8xbf16> to vector<384x8xbf16>
    %c9 = arith.constant 9 : index
    %c0_45 = arith.constant 0 : index
    %c0_46 = arith.constant 0 : index
    %102 = vector.load %arg3[%c9, %c0_45, %c0_46] : memref<25x8x32xbf16, #tpu.memory_space<vmem>>, vector<1x8x32xbf16>
    %103 = vector.shape_cast %102 : vector<1x8x32xbf16> to vector<8x32xbf16>
    %cst_47 = arith.constant dense<0.000000e+00> : vector<384x32xf32>
    %104 = tpu.matmul %101, %103, %cst_47 {dimension_numbers = #tpu.dot_dimension_numbers<[1], [0], [0], [1], [0, 0, 1, 1], [], []>} : vector<384x8xbf16>, vector<8x32xbf16>, vector<384x32xf32> -> vector<384x32xf32>
    %105 = arith.addf %100, %104 : vector<384x32xf32>
    %106 = vector.extract_strided_slice %7 {offsets = [48, 0], sizes = [384, 8], strides = [1, 1]} : vector<480x8xbf16> to vector<384x8xbf16>
    %c10 = arith.constant 10 : index
    %c0_48 = arith.constant 0 : index
    %c0_49 = arith.constant 0 : index
    %107 = vector.load %arg3[%c10, %c0_48, %c0_49] : memref<25x8x32xbf16, #tpu.memory_space<vmem>>, vector<1x8x32xbf16>
    %108 = vector.shape_cast %107 : vector<1x8x32xbf16> to vector<8x32xbf16>
    %cst_50 = arith.constant dense<0.000000e+00> : vector<384x32xf32>
    %109 = tpu.matmul %106, %108, %cst_50 {dimension_numbers = #tpu.dot_dimension_numbers<[1], [0], [0], [1], [0, 0, 1, 1], [], []>} : vector<384x8xbf16>, vector<8x32xbf16>, vector<384x32xf32> -> vector<384x32xf32>
    %110 = arith.addf %105, %109 : vector<384x32xf32>
    %111 = vector.extract_strided_slice %8 {offsets = [48, 0], sizes = [384, 8], strides = [1, 1]} : vector<480x8xbf16> to vector<384x8xbf16>
    %c11 = arith.constant 11 : index
    %c0_51 = arith.constant 0 : index
    %c0_52 = arith.constant 0 : index
    %112 = vector.load %arg3[%c11, %c0_51, %c0_52] : memref<25x8x32xbf16, #tpu.memory_space<vmem>>, vector<1x8x32xbf16>
    %113 = vector.shape_cast %112 : vector<1x8x32xbf16> to vector<8x32xbf16>
    %cst_53 = arith.constant dense<0.000000e+00> : vector<384x32xf32>
    %114 = tpu.matmul %111, %113, %cst_53 {dimension_numbers = #tpu.dot_dimension_numbers<[1], [0], [0], [1], [0, 0, 1, 1], [], []>} : vector<384x8xbf16>, vector<8x32xbf16>, vector<384x32xf32> -> vector<384x32xf32>
    %115 = arith.addf %110, %114 : vector<384x32xf32>
    %116 = vector.extract_strided_slice %9 {offsets = [48, 0], sizes = [384, 8], strides = [1, 1]} : vector<480x8xbf16> to vector<384x8xbf16>
    %c12 = arith.constant 12 : index
    %c0_54 = arith.constant 0 : index
    %c0_55 = arith.constant 0 : index
    %117 = vector.load %arg3[%c12, %c0_54, %c0_55] : memref<25x8x32xbf16, #tpu.memory_space<vmem>>, vector<1x8x32xbf16>
    %118 = vector.shape_cast %117 : vector<1x8x32xbf16> to vector<8x32xbf16>
    %cst_56 = arith.constant dense<0.000000e+00> : vector<384x32xf32>
    %119 = tpu.matmul %116, %118, %cst_56 {dimension_numbers = #tpu.dot_dimension_numbers<[1], [0], [0], [1], [0, 0, 1, 1], [], []>} : vector<384x8xbf16>, vector<8x32xbf16>, vector<384x32xf32> -> vector<384x32xf32>
    %120 = arith.addf %115, %119 : vector<384x32xf32>
    %121 = vector.extract_strided_slice %10 {offsets = [48, 0], sizes = [384, 8], strides = [1, 1]} : vector<480x8xbf16> to vector<384x8xbf16>
    %c13 = arith.constant 13 : index
    %c0_57 = arith.constant 0 : index
    %c0_58 = arith.constant 0 : index
    %122 = vector.load %arg3[%c13, %c0_57, %c0_58] : memref<25x8x32xbf16, #tpu.memory_space<vmem>>, vector<1x8x32xbf16>
    %123 = vector.shape_cast %122 : vector<1x8x32xbf16> to vector<8x32xbf16>
    %cst_59 = arith.constant dense<0.000000e+00> : vector<384x32xf32>
    %124 = tpu.matmul %121, %123, %cst_59 {dimension_numbers = #tpu.dot_dimension_numbers<[1], [0], [0], [1], [0, 0, 1, 1], [], []>} : vector<384x8xbf16>, vector<8x32xbf16>, vector<384x32xf32> -> vector<384x32xf32>
    %125 = arith.addf %120, %124 : vector<384x32xf32>
    %126 = vector.extract_strided_slice %11 {offsets = [48, 0], sizes = [384, 8], strides = [1, 1]} : vector<480x8xbf16> to vector<384x8xbf16>
    %c14 = arith.constant 14 : index
    %c0_60 = arith.constant 0 : index
    %c0_61 = arith.constant 0 : index
    %127 = vector.load %arg3[%c14, %c0_60, %c0_61] : memref<25x8x32xbf16, #tpu.memory_space<vmem>>, vector<1x8x32xbf16>
    %128 = vector.shape_cast %127 : vector<1x8x32xbf16> to vector<8x32xbf16>
    %cst_62 = arith.constant dense<0.000000e+00> : vector<384x32xf32>
    %129 = tpu.matmul %126, %128, %cst_62 {dimension_numbers = #tpu.dot_dimension_numbers<[1], [0], [0], [1], [0, 0, 1, 1], [], []>} : vector<384x8xbf16>, vector<8x32xbf16>, vector<384x32xf32> -> vector<384x32xf32>
    %130 = arith.addf %125, %129 : vector<384x32xf32>
    %131 = vector.extract_strided_slice %7 {offsets = [72, 0], sizes = [384, 8], strides = [1, 1]} : vector<480x8xbf16> to vector<384x8xbf16>
    %c15 = arith.constant 15 : index
    %c0_63 = arith.constant 0 : index
    %c0_64 = arith.constant 0 : index
    %132 = vector.load %arg3[%c15, %c0_63, %c0_64] : memref<25x8x32xbf16, #tpu.memory_space<vmem>>, vector<1x8x32xbf16>
    %133 = vector.shape_cast %132 : vector<1x8x32xbf16> to vector<8x32xbf16>
    %cst_65 = arith.constant dense<0.000000e+00> : vector<384x32xf32>
    %134 = tpu.matmul %131, %133, %cst_65 {dimension_numbers = #tpu.dot_dimension_numbers<[1], [0], [0], [1], [0, 0, 1, 1], [], []>} : vector<384x8xbf16>, vector<8x32xbf16>, vector<384x32xf32> -> vector<384x32xf32>
    %135 = arith.addf %130, %134 : vector<384x32xf32>
    %136 = vector.extract_strided_slice %8 {offsets = [72, 0], sizes = [384, 8], strides = [1, 1]} : vector<480x8xbf16> to vector<384x8xbf16>
    %c16 = arith.constant 16 : index
    %c0_66 = arith.constant 0 : index
    %c0_67 = arith.constant 0 : index
    %137 = vector.load %arg3[%c16, %c0_66, %c0_67] : memref<25x8x32xbf16, #tpu.memory_space<vmem>>, vector<1x8x32xbf16>
    %138 = vector.shape_cast %137 : vector<1x8x32xbf16> to vector<8x32xbf16>
    %cst_68 = arith.constant dense<0.000000e+00> : vector<384x32xf32>
    %139 = tpu.matmul %136, %138, %cst_68 {dimension_numbers = #tpu.dot_dimension_numbers<[1], [0], [0], [1], [0, 0, 1, 1], [], []>} : vector<384x8xbf16>, vector<8x32xbf16>, vector<384x32xf32> -> vector<384x32xf32>
    %140 = arith.addf %135, %139 : vector<384x32xf32>
    %141 = vector.extract_strided_slice %9 {offsets = [72, 0], sizes = [384, 8], strides = [1, 1]} : vector<480x8xbf16> to vector<384x8xbf16>
    %c17 = arith.constant 17 : index
    %c0_69 = arith.constant 0 : index
    %c0_70 = arith.constant 0 : index
    %142 = vector.load %arg3[%c17, %c0_69, %c0_70] : memref<25x8x32xbf16, #tpu.memory_space<vmem>>, vector<1x8x32xbf16>
    %143 = vector.shape_cast %142 : vector<1x8x32xbf16> to vector<8x32xbf16>
    %cst_71 = arith.constant dense<0.000000e+00> : vector<384x32xf32>
    %144 = tpu.matmul %141, %143, %cst_71 {dimension_numbers = #tpu.dot_dimension_numbers<[1], [0], [0], [1], [0, 0, 1, 1], [], []>} : vector<384x8xbf16>, vector<8x32xbf16>, vector<384x32xf32> -> vector<384x32xf32>
    %145 = arith.addf %140, %144 : vector<384x32xf32>
    %146 = vector.extract_strided_slice %10 {offsets = [72, 0], sizes = [384, 8], strides = [1, 1]} : vector<480x8xbf16> to vector<384x8xbf16>
    %c18 = arith.constant 18 : index
    %c0_72 = arith.constant 0 : index
    %c0_73 = arith.constant 0 : index
    %147 = vector.load %arg3[%c18, %c0_72, %c0_73] : memref<25x8x32xbf16, #tpu.memory_space<vmem>>, vector<1x8x32xbf16>
    %148 = vector.shape_cast %147 : vector<1x8x32xbf16> to vector<8x32xbf16>
    %cst_74 = arith.constant dense<0.000000e+00> : vector<384x32xf32>
    %149 = tpu.matmul %146, %148, %cst_74 {dimension_numbers = #tpu.dot_dimension_numbers<[1], [0], [0], [1], [0, 0, 1, 1], [], []>} : vector<384x8xbf16>, vector<8x32xbf16>, vector<384x32xf32> -> vector<384x32xf32>
    %150 = arith.addf %145, %149 : vector<384x32xf32>
    %151 = vector.extract_strided_slice %11 {offsets = [72, 0], sizes = [384, 8], strides = [1, 1]} : vector<480x8xbf16> to vector<384x8xbf16>
    %c19 = arith.constant 19 : index
    %c0_75 = arith.constant 0 : index
    %c0_76 = arith.constant 0 : index
    %152 = vector.load %arg3[%c19, %c0_75, %c0_76] : memref<25x8x32xbf16, #tpu.memory_space<vmem>>, vector<1x8x32xbf16>
    %153 = vector.shape_cast %152 : vector<1x8x32xbf16> to vector<8x32xbf16>
    %cst_77 = arith.constant dense<0.000000e+00> : vector<384x32xf32>
    %154 = tpu.matmul %151, %153, %cst_77 {dimension_numbers = #tpu.dot_dimension_numbers<[1], [0], [0], [1], [0, 0, 1, 1], [], []>} : vector<384x8xbf16>, vector<8x32xbf16>, vector<384x32xf32> -> vector<384x32xf32>
    %155 = arith.addf %150, %154 : vector<384x32xf32>
    %156 = vector.extract_strided_slice %7 {offsets = [96, 0], sizes = [384, 8], strides = [1, 1]} : vector<480x8xbf16> to vector<384x8xbf16>
    %c20 = arith.constant 20 : index
    %c0_78 = arith.constant 0 : index
    %c0_79 = arith.constant 0 : index
    %157 = vector.load %arg3[%c20, %c0_78, %c0_79] : memref<25x8x32xbf16, #tpu.memory_space<vmem>>, vector<1x8x32xbf16>
    %158 = vector.shape_cast %157 : vector<1x8x32xbf16> to vector<8x32xbf16>
    %cst_80 = arith.constant dense<0.000000e+00> : vector<384x32xf32>
    %159 = tpu.matmul %156, %158, %cst_80 {dimension_numbers = #tpu.dot_dimension_numbers<[1], [0], [0], [1], [0, 0, 1, 1], [], []>} : vector<384x8xbf16>, vector<8x32xbf16>, vector<384x32xf32> -> vector<384x32xf32>
    %160 = arith.addf %155, %159 : vector<384x32xf32>
    %161 = vector.extract_strided_slice %8 {offsets = [96, 0], sizes = [384, 8], strides = [1, 1]} : vector<480x8xbf16> to vector<384x8xbf16>
    %c21 = arith.constant 21 : index
    %c0_81 = arith.constant 0 : index
    %c0_82 = arith.constant 0 : index
    %162 = vector.load %arg3[%c21, %c0_81, %c0_82] : memref<25x8x32xbf16, #tpu.memory_space<vmem>>, vector<1x8x32xbf16>
    %163 = vector.shape_cast %162 : vector<1x8x32xbf16> to vector<8x32xbf16>
    %cst_83 = arith.constant dense<0.000000e+00> : vector<384x32xf32>
    %164 = tpu.matmul %161, %163, %cst_83 {dimension_numbers = #tpu.dot_dimension_numbers<[1], [0], [0], [1], [0, 0, 1, 1], [], []>} : vector<384x8xbf16>, vector<8x32xbf16>, vector<384x32xf32> -> vector<384x32xf32>
    %165 = arith.addf %160, %164 : vector<384x32xf32>
    %166 = vector.extract_strided_slice %9 {offsets = [96, 0], sizes = [384, 8], strides = [1, 1]} : vector<480x8xbf16> to vector<384x8xbf16>
    %c22 = arith.constant 22 : index
    %c0_84 = arith.constant 0 : index
    %c0_85 = arith.constant 0 : index
    %167 = vector.load %arg3[%c22, %c0_84, %c0_85] : memref<25x8x32xbf16, #tpu.memory_space<vmem>>, vector<1x8x32xbf16>
    %168 = vector.shape_cast %167 : vector<1x8x32xbf16> to vector<8x32xbf16>
    %cst_86 = arith.constant dense<0.000000e+00> : vector<384x32xf32>
    %169 = tpu.matmul %166, %168, %cst_86 {dimension_numbers = #tpu.dot_dimension_numbers<[1], [0], [0], [1], [0, 0, 1, 1], [], []>} : vector<384x8xbf16>, vector<8x32xbf16>, vector<384x32xf32> -> vector<384x32xf32>
    %170 = arith.addf %165, %169 : vector<384x32xf32>
    %171 = vector.extract_strided_slice %10 {offsets = [96, 0], sizes = [384, 8], strides = [1, 1]} : vector<480x8xbf16> to vector<384x8xbf16>
    %c23 = arith.constant 23 : index
    %c0_87 = arith.constant 0 : index
    %c0_88 = arith.constant 0 : index
    %172 = vector.load %arg3[%c23, %c0_87, %c0_88] : memref<25x8x32xbf16, #tpu.memory_space<vmem>>, vector<1x8x32xbf16>
    %173 = vector.shape_cast %172 : vector<1x8x32xbf16> to vector<8x32xbf16>
    %cst_89 = arith.constant dense<0.000000e+00> : vector<384x32xf32>
    %174 = tpu.matmul %171, %173, %cst_89 {dimension_numbers = #tpu.dot_dimension_numbers<[1], [0], [0], [1], [0, 0, 1, 1], [], []>} : vector<384x8xbf16>, vector<8x32xbf16>, vector<384x32xf32> -> vector<384x32xf32>
    %175 = arith.addf %170, %174 : vector<384x32xf32>
    %176 = vector.extract_strided_slice %11 {offsets = [96, 0], sizes = [384, 8], strides = [1, 1]} : vector<480x8xbf16> to vector<384x8xbf16>
    %c24 = arith.constant 24 : index
    %c0_90 = arith.constant 0 : index
    %c0_91 = arith.constant 0 : index
    %177 = vector.load %arg3[%c24, %c0_90, %c0_91] : memref<25x8x32xbf16, #tpu.memory_space<vmem>>, vector<1x8x32xbf16>
    %178 = vector.shape_cast %177 : vector<1x8x32xbf16> to vector<8x32xbf16>
    %cst_92 = arith.constant dense<0.000000e+00> : vector<384x32xf32>
    %179 = tpu.matmul %176, %178, %cst_92 {dimension_numbers = #tpu.dot_dimension_numbers<[1], [0], [0], [1], [0, 0, 1, 1], [], []>} : vector<384x8xbf16>, vector<8x32xbf16>, vector<384x32xf32> -> vector<384x32xf32>
    %180 = arith.addf %175, %179 : vector<384x32xf32>
    %cst_93 = arith.constant 0.000000e+00 : f32
    %181 = vector.broadcast %cst_93 : f32 to vector<384x32xf32>
    %182 = arith.maximumf %180, %181 : vector<384x32xf32>
    %183 = arith.truncf %182 : vector<384x32xf32> to vector<384x32xbf16>
    %c0_94 = arith.constant 0 : index
    %c0_95 = arith.constant 0 : index
    %c0_96 = arith.constant 0 : index
    %184 = vector.load %arg7[%c0_94, %c0_95, %c0_96] : memref<1x384x32xbf16, #tpu.memory_space<vmem>>, vector<1x384x32xbf16>
    %185 = vector.shape_cast %184 : vector<1x384x32xbf16> to vector<384x32xbf16>
    %186 = vector.shape_cast %183 : vector<384x32xbf16> to vector<1x384x32xbf16>
    tpu.vector_store %arg7[%c0_94, %c0_95, %c0_96], %186 {strides = array<i32>} : memref<1x384x32xbf16, #tpu.memory_space<vmem>>, vector<1x384x32xbf16>,
    return
  }
  func.func @transform_0(%arg0: i32) -> (i32, i32, i32) {
    %c0_i32 = arith.constant 0 : i32
    %c0_i32_0 = arith.constant 0 : i32
    %c0_i32_1 = arith.constant 0 : i32
    return %arg0, %c0_i32, %c0_i32_0 : i32, i32, i32
  }
  func.func @transform_1(%arg0: i32) -> (i32, i32) {
    %c0_i32 = arith.constant 0 : i32
    %c0_i32_0 = arith.constant 0 : i32
    %c0_i32_1 = arith.constant 0 : i32
    return %c0_i32, %c0_i32_0 : i32, i32
  }
  func.func @transform_2(%arg0: i32) -> (i32, i32, i32) {
    %c0_i32 = arith.constant 0 : i32
    %c0_i32_0 = arith.constant 0 : i32
    %c0_i32_1 = arith.constant 0 : i32
    %c0_i32_2 = arith.constant 0 : i32
    return %c0_i32, %c0_i32_0, %c0_i32_1 : i32, i32, i32
  }
  func.func @transform_3(%arg0: i32) -> (i32, i32) {
    %c0_i32 = arith.constant 0 : i32
    %c0_i32_0 = arith.constant 0 : i32
    %c0_i32_1 = arith.constant 0 : i32
    return %c0_i32, %c0_i32_0 : i32, i32
  }
  func.func @transform_4(%arg0: i32) -> (i32, i32) {
    %c0_i32 = arith.constant 0 : i32
    %c0_i32_0 = arith.constant 0 : i32
    %c0_i32_1 = arith.constant 0 : i32
    return %c0_i32, %c0_i32_0 : i32, i32
  }
  func.func @transform_5(%arg0: i32) -> (i32, i32) {
    %c0_i32 = arith.constant 0 : i32
    %c0_i32_0 = arith.constant 0 : i32
    %c0_i32_1 = arith.constant 0 : i32
    return %c0_i32, %c0_i32_0 : i32, i32
  }
  func.func @transform_6(%arg0: i32) -> (i32, i32, i32) {
    %c0_i32 = arith.constant 0 : i32
    %c0_i32_0 = arith.constant 0 : i32
    %c0_i32_1 = arith.constant 0 : i32
    return %arg0, %c0_i32, %c0_i32_0 : i32, i32, i32
  }
}

</mosaic_0001>

<bundles_post_ra>
// kernel: tpu_custom_call.1
= control target key start
LH: loop header
LB: loop body
LE: loop exit
PB: predicated region body
PF: predicated region fallthrough
CT: control target
= control target key end

     0   :  { %s16838_s21 = smov 0   ;;  %s21742_s0 = inlined_call_operand.vmem [shape: bf16[2,504,5], index: 0, kind: input, shape index: {}]   ;;  %s21743_s1 = inlined_call_operand.vmem [shape: bf16[5,8], index: 1, kind: input, shape index: {}]   ;;  %s21744_s2 = inlined_call_operand.vmem [shape: bf16[25,8,32], index: 2, kind: input, shape index: {}]   ;;  %s21745_s3 = inlined_call_operand.vmem [shape: bf16[5,32], index: 3, kind: input, shape index: {}]   ;;  %s21746_s4 = inlined_call_operand.vmem [shape: bf16[5,32], index: 4, kind: input, shape index: {}]   ;;  %s21747_s5 = inlined_call_operand.vmem [shape: f32[1,32], index: 5, kind: input, shape index: {}]   ;;  %s21748_s6 = inlined_call_operand.vmem [shape: bf16[2,384,32], index: 6, kind: output, shape index: {}]  }
   0x1 LB: > { %s12348_s22 = sadd.s32 4294967295, %s16799_s21   ;;  %p12352_p0 = scmp.ge.s32.totalorder %s16799_s21, 1  ;;  %s16799_s21 = sphi %s16838_s21, %s16_s21  }
   0x2   : > { %p212_p1 = scmp.lt.s32.totalorder %s16799_s21, 3 }
   0x4   : > { %p213_p2 = pnand %p12352_p0, %p212_p1 }
   0x6   : > { %216 = sbr.rel (%p213_p2) target bundleno = 2000 (0x7d0), region = 44 }
   0xd   : > { %v316_v0 = vld [vmem:[%s21743_s1] sm:$0x7]  ;;  %vm572_vm0 = vcmask 1041408   ;;  %vm573_vm1 = vcmask 1042432   ;;  %p242_p3 = scmp.lt.s32.totalorder %s12348_s22, 1  ;;  %v16801_v1 = vmov 65535  }
   0xe   : > { %v574_v2 = vsel %vm572_vm0, 4294967295, %v16801_v1  ;;  %v16802_v4 = vmov 4   ;;  %v1479_v6 = vld [vmem:[%s21745_s3] sm:$0x7]  ;;  %vm475_vm2 = vcmask 39936   ;;  %vm1512_vm3 = vcmask 1046528  }
   0xf   : > { %v16851_v3 = vsel %vm573_vm1, %v574_v2, 0  ;;  %s22808_s22 = smov (!%p242_p3, %s12348_s22), 1  ;;  %16730 = vset.pattern.permute.xlu0 %v16802_v4  ;;  %16731 = vset.pattern.permute.xlu1 %v16802_v4  ;;  %vm2107_vm4 = vcmask 1045504   ;;  %vm2767_vm6 = vsmask.f32 7424 }
  0x10   : > { %v577_v5 = vand.u32 %v16851_v3, %v316_v0  ;;  %s16718_s27 = smul.u32 252, %s22808_s22  ;;  %v1635_v7 = vand.u32 %v1479_v6, %v16851_v3 }
  0x11   : > { %s16719_s19 = smul.u32 192, %s22808_s22 }
  0x12   : > { %13978 = vmatprep.subr.bf16.mxu0 %v577_v5  ;;  %s16864_s30 = scalar_lea.vmem %s21742_s0, %s16718_s27 }
  0x13   : > { %13979 = vmatpush3.bf16.msra.mxu0 %v577_v5  ;;  %v16732_v8 = vld [vmem:[%s16864_s30] sm:$0xff]   ;;  %v16868_v9 = vld [vmem:[%s16864_s30 + $0x8] sm:$0xff]   ;;  %v16871_v10 = vld [vmem:[%s16864_s30 + $0x10] sm:$0xff]   ;;  %s21553_s24 = scalar_lea.vmem %s21748_s6, %s16719_s19 }
  0x14   : > { %14044 = vmatprep.subr.bf16.mxu0 %v1635_v7  ;;  %13980 = vmatprep.mubr.msk.bf16.mxu0 %vm475_vm2, %v16732_v8  ;;  %v21790_v11 = vunpack.c.h.bf16 %v16868_v9  ;;  %v21787_v12 = vunpack.c.h.bf16 %v16871_v10  ;;  %v16883_v14 = vld [vmem:[%s16864_s30 + $0x18] sm:$0xff]   ;;  %v16886_v15 = vld [vmem:[%s16864_s30 + $0x20] sm:$0xff]   ;;  %v21784_v18 = vunpack.c.l.bf16 %v16871_v10  ;;  %v16895_v23 = vld [vmem:[%s16864_s30 + $0x28] sm:$0xff]  }
  0x15   : > { %v21783_v19 = vunpack.c.l.bf16 %v16883_v14  ;;  %v21780_v20 = vunpack.c.h.bf16 %v16883_v14  ;;  %v21777_v22 = vunpack.c.l.bf16 %v16886_v15  ;;  %v21776_v27 = vunpack.c.h.bf16 %v16886_v15  ;;  %v16912_v33 = vld [vmem:[%s16864_s30 + $0x30] sm:$0xff]   ;;  %v16921_v39 = vld [vmem:[%s16864_s30 + $0x38] sm:$0xff]   ;;  %v16934_v46 = vld [vmem:[%s16864_s30 + $0x40] sm:$0xff]  }
  0x16   : > { %13981 = vmatmul.mubr.msk.bf16.vlgmr.msra.gmra.mrb[0].mxu0 %vm475_vm2, %v16868_v9  ;;  %v12419_v13 = vadd.f32 -1.0, %v21790_v11  ;;  %v12421_v17 = vadd.f32 -1.0, %v21787_v12  ;;  %v12420_v24 = vadd.f32 -1.0, %v21784_v18  ;;  %v21775_v29 = vunpack.c.l.bf16 %v16895_v23  ;;  %v16943_v53 = vld [vmem:[%s16864_s30 + $0x48] sm:$0xff]   ;;  %v16956_v60 = vld [vmem:[%s16864_s30 + $0x50] sm:$0xff]   ;;  %v16965_v4 = vld [vmem:[%s16864_s30 + $0x58] sm:$0xff]  }
  0x17   : > { %13984 = vmatprep.mubr.msk.bf16.mxu0 %vm475_vm2, %v16871_v10  ;;  %14045 = vmatpush3.bf16.msra.mxu0 %v1635_v7  ;;  %v12422_v25 = vadd.f32 -1.0, %v21783_v19  ;;  %v12423_v26 = vadd.f32 -1.0, %v21780_v20  ;;  %v12424_v28 = vadd.f32 -1.0, %v21777_v22  ;;  %v12425_v34 = vadd.f32 -1.0, %v21776_v27  ;;  %v17162_v22 = vld [vmem:[%s16864_s30 + $0xc0] sm:$0xff]  }
  0x18   : > { %v1069_v16 = vmul.f32 1e+30, %v12419_v13  ;;  %v1071_v21 = vmul.f32 1e+30, %v12421_v17  ;;  %v1070_v30 = vmul.f32 1e+30, %v12420_v24  ;;  %v21772_v35 = vunpack.c.h.bf16 %v16895_v23 }
  0x19   : > { %v1072_v31 = vmul.f32 1e+30, %v12422_v25  ;;  %v1073_v32 = vmul.f32 1e+30, %v12423_v26  ;;  %v1074_v36 = vmul.f32 1e+30, %v12424_v28  ;;  %v21769_v38 = vunpack.c.l.bf16 %v16912_v33 }
  0x1a   : > { %1126 = vperm.xlu0 %16730, %v1069_v16   ;;  %1136 = vperm.xlu1 %16731, %v1071_v21   ;;  %v12426_v37 = vadd.f32 -1.0, %v21775_v29  ;;  %v1075_v40 = vmul.f32 1e+30, %v12425_v34  ;;  %v12427_v41 = vadd.f32 -1.0, %v21772_v35  ;;  %v21768_v42 = vunpack.c.h.bf16 %v16912_v33  ;;  %v16981_v25 = vld [vmem:[%s16864_s30 + $0x60] sm:$0xff]   ;;  %22130 = vst [vmem:[#allocation11_spill] sm:$0xff] %v17162_v22 }
  0x1b   : > { %v12428_v44 = vadd.f32 -1.0, %v21769_v38  ;;  %v21767_v45 = vunpack.c.l.bf16 %v16921_v39  ;;  %v21765_v49 = vunpack.c.h.bf16 %v16921_v39  ;;  %v21764_v52 = vunpack.c.l.bf16 %v16934_v46  ;;  %v17132_v38 = vld [vmem:[%s16864_s30 + $0xb0] sm:$0xff]  }
  0x1c   : > { %v1076_v43 = vmul.f32 1e+30, %v12426_v37  ;;  %v1077_v47 = vmul.f32 1e+30, %v12427_v41  ;;  %v12429_v48 = vadd.f32 -1.0, %v21768_v42  ;;  %v21763_v56 = vunpack.c.h.bf16 %v16934_v46  ;;  %22128 = vst [vmem:[#allocation9_spill] sm:$0xff] %v17132_v38 }
  0x1d   : > { %v1078_v50 = vmul.f32 1e+30, %v12428_v44  ;;  %v12430_v51 = vadd.f32 -1.0, %v21767_v45  ;;  %v12431_v55 = vadd.f32 -1.0, %v21765_v49  ;;  %v12432_v58 = vadd.f32 -1.0, %v21764_v52 }
  0x1e   : > { %13985 = vmatmul.mubr.msk.bf16.gmra.mrb[4].mxu0 %vm475_vm2, %v16883_v14  ;;  %1131 = vperm.xlu0 %16730, %v1070_v30   ;;  %v1079_v54 = vmul.f32 1e+30, %v12429_v48  ;;  %v21761_v59 = vunpack.c.l.bf16 %v16943_v53  ;;  %v12433_v62 = vadd.f32 -1.0, %v21763_v56  ;;  %v21760_v63 = vunpack.c.h.bf16 %v16943_v53 }
  0x1f   : > { %13988 = vmatprep.mubr.msk.bf16.mxu0 %vm475_vm2, %v16886_v15  ;;  %1141 = vperm.xlu1 %16731, %v1072_v31   ;;  %v1080_v57 = vmul.f32 1e+30, %v12430_v51  ;;  %v1081_v61 = vmul.f32 1e+30, %v12431_v55  ;;  %v1082_v0 = vmul.f32 1e+30, %v12432_v58  ;;  %v21758_v2 = vunpack.c.l.bf16 %v16956_v60 }
  0x20   : > { %v12434_v1 = vadd.f32 -1.0, %v21761_v59  ;;  %v1083_v5 = vmul.f32 1e+30, %v12433_v62  ;;  %v12435_v6 = vadd.f32 -1.0, %v21760_v63  ;;  %v21757_v7 = vunpack.c.h.bf16 %v16956_v60  ;;  %v17019_v62 = vld [vmem:[%s16864_s30 + $0x70] sm:$0xff]  }
  0x21   : > { %v21755_v8 = vunpack.c.l.bf16 %v16965_v4  ;;  %v1516_v13 = vrot.slane %v16895_v23, 1  ;;  %v12436_v17 = vadd.f32 -1.0, %v21758_v2  ;;  %v1513_v21 = vrot.slane %v16883_v14, 1 }
  0x22   : > { %1146 = vperm.xlu0 %16730, %v1073_v32   ;;  %v1084_v16 = vmul.f32 1e+30, %v12434_v1  ;;  %v1514_v24 = vrot.slane %v16886_v15, 1  ;;  %v1085_v26 = vmul.f32 1e+30, %v12435_v6  ;;  %v12437_v28 = vadd.f32 -1.0, %v21757_v7 }
  0x23   : > { %1151 = vperm.xlu1 %16731, %v1074_v36   ;;  %v12438_v30 = vadd.f32 -1.0, %v21755_v8  ;;  %v21752_v31 = vunpack.c.h.bf16 %v16965_v4  ;;  %v1086_v32 = vmul.f32 1e+30, %v12436_v17  ;;  %v21751_v34 = vunpack.c.l.bf16 %v16981_v25 }
  0x24   : > { %v16990_v36 = vsel %vm1512_vm3, %v1513_v21, %v1514_v24  ;;  %v16993_v37 = vsel %vm1512_vm3, %v1514_v24, %v1516_v13  ;;  %v1520_v41 = vrot.slane %v16921_v39, 1  ;;  %v1087_v44 = vmul.f32 1e+30, %v12437_v28  ;;  %v17034_v24 = vld [vmem:[%s16864_s30 + $0x78] sm:$0xff]   ;;  %v17038_v28 = vld [vmem:[%s16864_s30 + $0x80] sm:$0xff]  }
  0x25   : > { %v21750_v48 = vunpack.c.h.bf16 %v16981_v25  ;;  %v1088_v51 = vmul.f32 1e+30, %v12438_v30  ;;  %v1522_v58 = vrot.slane %v16934_v46, 1  ;;  %v21753_v17 = vunpack.c.l.bf16 %v17019_v62  ;;  %22121 = vst [vmem:[#allocation2_spill] sm:$0xff] %v17034_v24  ;;  %22122 = vst [vmem:[#allocation3_spill] sm:$0xff] %v17038_v28  ;;  %v17041_v30 = vld [vmem:[%s16864_s30 + $0x88] sm:$0xff]  }
  0x26   : > { %13989 = vmatmul.mubr.msk.bf16.gmra.mrb[8].mxu0 %vm475_vm2, %v16895_v23  ;;  %1156 = vperm.xlu0 %16730, %v1075_v40   ;;  %v1518_v40 = vrot.slane %v16912_v33, 1  ;;  %22123 = vst [vmem:[#allocation4_spill] sm:$0xff] %v17041_v30  ;;  %v21766_v8 = vunpack.c.l.bf16 %v17038_v28  ;;  %v1534_v7 = vrot.slane %v17019_v62, 1  ;;  %v21771_v49 = vunpack.c.l.bf16 %v17041_v30 }
  0x27   : > { %13992 = vmatprep.mubr.msk.bf16.mxu0 %vm475_vm2, %v16912_v33  ;;  %1161 = vperm.xlu1 %16731, %v1076_v43   ;;  %v16998_v43 = vld [vmem:[%s16864_s30 + $0x68] sm:$0xff]   ;;  %v12441_v1 = vadd.f32 -1.0, %v21750_v48  ;;  %v17025_v6 = vsel %vm1512_vm3, %v1520_v41, %v1522_v58  ;;  %v21788_v19 = vunpack.c.l.bf16 %v17132_v38 }
  0x28   : > { %v21749_v55 = vunpack.c.l.bf16 %v16998_v43 }
  0x2a   : > { %1166 = vperm.xlu0 %16730, %v1077_v47   ;;  %v12439_v47 = vadd.f32 -1.0, %v21752_v31 }
  0x2b   : > { %1171 = vperm.xlu1 %16731, %v1078_v50   ;;  %v17004_v50 = vsel %vm1512_vm3, %v1516_v13, %v1518_v40 }
  0x2e   : > { %13993 = vmatmul.mubr.msk.bf16.gmra.mrb[12].mxu0 %vm475_vm2, %v16921_v39  ;;  %1176 = vperm.xlu0 %16730, %v1079_v54   ;;  %v12440_v54 = vadd.f32 -1.0, %v21751_v34  ;;  %v12444_v34 = vadd.f32 -1.0, %v21753_v17 }
  0x2f   : > { %13996 = vmatprep.mubr.msk.bf16.mxu0 %vm475_vm2, %v16934_v46  ;;  %1181 = vperm.xlu1 %16731, %v1080_v57   ;;  %v17010_v57 = vsel %vm1512_vm3, %v1518_v40, %v1520_v41  ;;  %v1528_v40 = vrot.slane %v16965_v4, 1  ;;  %v17046_v41 = vld [vmem:[%s16864_s30 + $0x90] sm:$0xff]  }
  0x30   : > { %v1090_v13 = vmul.f32 1e+30, %v12440_v54  ;;  %22124 = vst [vmem:[#allocation5_spill] sm:$0xff] %v17046_v41  ;;  %v21759_v54 = vunpack.c.l.bf16 %v17034_v24  ;;  %v21773_v45 = vunpack.c.l.bf16 %v17046_v41 }
  0x32   : > { %1186 = vperm.xlu0 %16730, %v1081_v61   ;;  %v1524_v61 = vrot.slane %v16943_v53, 1 }
  0x33   : > { %1191 = vperm.xlu1 %16731, %v1082_v0   ;;  %v1089_v0 = vmul.f32 1e+30, %v12439_v47  ;;  %v1091_v47 = vmul.f32 1e+30, %v12441_v1  ;;  %v1530_v1 = vrot.slane %v16981_v25, 1 }
  0x34   : > { %v17031_v21 = vsel %vm1512_vm3, %v1522_v58, %v1524_v61 }
  0x35   : > { %v17077_v17 = vsel %vm1512_vm3, %v1528_v40, %v1530_v1 }
  0x36   : > { %13997 = vmatmul.mubr.msk.bf16.gmra.mrb[16].mxu0 %vm475_vm2, %v16943_v53  ;;  %1196 = vperm.xlu0 %16730, %v1083_v5   ;;  %v21754_v5 = vunpack.c.h.bf16 %v16998_v43 }
  0x37   : > { %14000 = vmatprep.mubr.msk.bf16.mxu0 %vm475_vm2, %v16956_v60  ;;  %1201 = vperm.xlu1 %16731, %v1084_v16   ;;  %v12442_v16 = vadd.f32 -1.0, %v21749_v55  ;;  %v17058_v55 = vld [vmem:[%s16864_s30 + $0xa0] sm:$0xff]  }
  0x38   : > { %22126 = vst [vmem:[#allocation7_spill] sm:$0xff] %v17058_v55  ;;  %v21781_v29 = vunpack.c.l.bf16 %v17058_v55 }
  0x39   : > { %v1092_v48 = vmul.f32 1e+30, %v12442_v16 }
  0x3a   : > { %1206 = vperm.xlu0 %16730, %v1085_v26   ;;  %v1526_v26 = vrot.slane %v16956_v60, 1 }
  0x3b   : > { %1211 = vperm.xlu1 %16731, %v1086_v32   ;;  %v21756_v32 = vunpack.c.h.bf16 %v17019_v62 }
  0x3c   : > { %v17055_v58 = vsel %vm1512_vm3, %v1524_v61, %v1526_v26  ;;  %v17063_v31 = vsel %vm1512_vm3, %v1526_v26, %v1528_v40  ;;  %v12446_v26 = vadd.f32 -1.0, %v21759_v54  ;;  %v1540_v54 = vrot.slane %v17041_v30, 1  ;;  %v17090_v40 = vld [vmem:[%s16864_s30 + $0xa8] sm:$0xff]  }
  0x3d   : > { %v12445_v61 = vadd.f32 -1.0, %v21756_v32  ;;  %22127 = vst [vmem:[#allocation8_spill] sm:$0xff] %v17090_v40  ;;  %v21786_v20 = vunpack.c.l.bf16 %v17090_v40 }
  0x3e   : > { %14001 = vmatmul.mubr.msk.bf16.gmra.mrb[20].mxu0 %vm475_vm2, %v16965_v4  ;;  %1216 = vperm.xlu0 %16730, %v1087_v44   ;;  %v17049_v44 = vld [vmem:[%s16864_s30 + $0x98] sm:$0xff]  }
  0x3f   : > { %14004 = vmatprep.mubr.msk.bf16.mxu0 %vm475_vm2, %v16981_v25  ;;  %1221 = vperm.xlu1 %16731, %v1088_v51   ;;  %22125 = vst [vmem:[#allocation6_spill] sm:$0xff] %v17049_v44  ;;  %v12443_v51 = vadd.f32 -1.0, %v21754_v5  ;;  %v1094_v5 = vmul.f32 1e+30, %v12444_v34  ;;  %v21770_v34 = vunpack.c.h.bf16 %v17038_v28  ;;  %v1544_v52 = vrot.slane %v17049_v44, 1 }
  0x40   : > { %v21779_v35 = vunpack.c.l.bf16 %v17049_v44 }
  0x41   : > { %v1093_v16 = vmul.f32 1e+30, %v12443_v51  ;;  %v1538_v51 = vrot.slane %v17038_v28, 1 }
  0x42   : > { %1226 = vperm.xlu0 %16730, %v1089_v0   ;;  %v21762_v0 = vunpack.c.h.bf16 %v17034_v24 }
  0x43   : > { %1231 = vperm.xlu1 %16731, %v1090_v13   ;;  %v1532_v13 = vrot.slane %v16998_v43, 1  ;;  %v17104_v56 = vsel %vm1512_vm3, %v1538_v51, %v1540_v54 }
  0x44   : > { %v12447_v2 = vadd.f32 -1.0, %v21762_v0 }
  0x45   : > { %v17081_v32 = vsel %vm1512_vm3, %v1530_v1, %v1532_v13  ;;  %v17094_v63 = vsel %vm1512_vm3, %v1532_v13, %v1534_v7  ;;  %v1542_v1 = vrot.slane %v17046_v41, 1  ;;  %v12448_v13 = vadd.f32 -1.0, %v21766_v8 }
  0x46   : > { %14005 = vmatmul.mubr.msk.bf16.gmra.mrb[24].mxu0 %vm475_vm2, %v16998_v43  ;;  %1236 = vperm.xlu0 %16730, %v1091_v47   ;;  %v1536_v47 = vrot.slane %v17034_v24, 1  ;;  %v12450_v8 = vadd.f32 -1.0, %v21771_v49 }
  0x47   : > { %14008 = vmatprep.mubr.msk.bf16.mxu0 %vm475_vm2, %v17019_v62  ;;  %1241 = vperm.xlu1 %16731, %v1092_v48   ;;  %v1095_v48 = vmul.f32 1e+30, %v12445_v61  ;;  %v1096_v61 = vmul.f32 1e+30, %v12446_v26  ;;  %v12449_v26 = vadd.f32 -1.0, %v21770_v34 }
  0x48   : > { %v17098_v59 = vsel %vm1512_vm3, %v1534_v7, %v1536_v47  ;;  %v17101_v0 = vsel %vm1512_vm3, %v1536_v47, %v1538_v51  ;;  %v17114_v7 = vsel %vm1512_vm3, %v1542_v1, %v1544_v52  ;;  %v1546_v47 = vrot.slane %v17058_v55, 1 }
  0x49   : > { %v1548_v51 = vrot.slane %v17090_v40, 1  ;;  %v1099_v34 = vmul.f32 1e+30, %v12449_v26  ;;  %v1100_v49 = vmul.f32 1e+30, %v12450_v8  ;;  %v21782_v26 = vunpack.c.h.bf16 %v17049_v44 }
  0x4a   : > { %1246 = vperm.xlu0 %16730, %v1093_v16   ;;  %v17111_v16 = vsel %vm1512_vm3, %v1540_v54, %v1542_v1  ;;  %v21774_v54 = vunpack.c.h.bf16 %v17041_v30  ;;  %v1098_v1 = vmul.f32 1e+30, %v12448_v13  ;;  %v17129_v42 = vsel %vm1512_vm3, %v1544_v52, %v1546_v47 }
  0x4b   : > { %1251 = vperm.xlu1 %16731, %v1094_v5   ;;  %v1097_v5 = vmul.f32 1e+30, %v12447_v2  ;;  %v17135_v2 = vsel %vm1512_vm3, %v1546_v47, %v1548_v51  ;;  %v21778_v13 = vunpack.c.h.bf16 %v17046_v41  ;;  %v12452_v52 = vadd.f32 -1.0, %v21773_v45 }
  0x4c   : > { %v1550_v47 = vrot.slane %v17132_v38, 1 }
  0x4d   : > { %v12453_v8 = vadd.f32 -1.0, %v21778_v13  ;;  %v1102_v45 = vmul.f32 1e+30, %v12452_v52  ;;  %v21785_v52 = vunpack.c.h.bf16 %v17058_v55 }
  0x4e   : > { %14009 = vmatmul.mubr.msk.bf16.gmra.mrb[28].mxu0 %vm475_vm2, %v17034_v24  ;;  %1256 = vperm.xlu0 %16730, %v1095_v48   ;;  %v17138_v48 = vld [vmem:[%s16864_s30 + $0xb8] sm:$0xff]   ;;  %v17159_v27 = vsel %vm1512_vm3, %v1548_v51, %v1550_v47  ;;  %v12456_v51 = vadd.f32 -1.0, %v21781_v29 }
  0x4f   : > { %14012 = vmatprep.mubr.msk.bf16.mxu0 %vm475_vm2, %v17038_v28  ;;  %1261 = vperm.xlu1 %16731, %v1096_v61   ;;  %22129 = vst [vmem:[#allocation10_spill] sm:$0xff] %v17138_v48  ;;  %v12451_v61 = vadd.f32 -1.0, %v21774_v54  ;;  %v12454_v54 = vadd.f32 -1.0, %v21779_v35  ;;  %v1103_v13 = vmul.f32 1e+30, %v12453_v8  ;;  %v12457_v8 = vadd.f32 -1.0, %v21785_v52 }
  0x50   : > { %v1106_v29 = vmul.f32 1e+30, %v12456_v51  ;;  %v21796_v12 = vunpack.c.l.bf16 %v17138_v48 }
  0x51   : > { %v1104_v35 = vmul.f32 1e+30, %v12454_v54 }
  0x52   : > { %1266 = vperm.xlu0 %16730, %v1097_v5   ;;  %v1101_v5 = vmul.f32 1e+30, %v12451_v61  ;;  %v17168_v61 = vld [vmem:[%s16864_s30 + $0xc8] sm:$0xff]  }
  0x53   : > { %1271 = vperm.xlu1 %16731, %v1098_v1   ;;  %v1552_v1 = vrot.slane %v17138_v48, 1  ;;  %22131 = vst [vmem:[#allocation12_spill] sm:$0xff] %v17168_v61  ;;  %v1556_v54 = vrot.slane %v17168_v61, 1 }
  0x56   : > { %14013 = vmatmul.mubr.msk.bf16.gmra.mrb[32].mxu0 %vm475_vm2, %v17041_v30  ;;  %1276 = vperm.xlu0 %16730, %v1099_v34   ;;  %v17165_v34 = vsel %vm1512_vm3, %v1550_v47, %v1552_v1  ;;  %v1554_v47 = vrot.slane %v17162_v22, 1 }
  0x57   : > { %14016 = vmatprep.mubr.msk.bf16.mxu0 %vm475_vm2, %v17046_v41  ;;  %1281 = vperm.xlu1 %16731, %v1100_v49   ;;  %v12455_v49 = vadd.f32 -1.0, %v21782_v26  ;;  %v12458_v26 = vadd.f32 -1.0, %v21786_v20  ;;  %v12460_v20 = vadd.f32 -1.0, %v21788_v19  ;;  %v12462_v19 = vadd.f32 -1.0, %v21796_v12 }
  0x58   : > { %v17189_v18 = vsel %vm1512_vm3, %v1552_v1, %v1554_v47  ;;  %v17201_v1 = vld [vmem:[%s16864_s30 + $0xd0] sm:$0xff]   ;;  %v21803_v12 = vunpack.c.l.bf16 %v17168_v61 }
  0x59   : > { %v1108_v51 = vmul.f32 1e+30, %v12458_v26  ;;  %22132 = vst [vmem:[#allocation13_spill] sm:$0xff] %v17201_v1  ;;  %v17211_v26 = vld [vmem:[%s16864_s30 + $0xd8] sm:$0xf] }
  0x5a   : > { %1286 = vperm.xlu0 %16730, %v1101_v5   ;;  %v1105_v5 = vmul.f32 1e+30, %v12455_v49  ;;  %v1107_v49 = vmul.f32 1e+30, %v12457_v8  ;;  %22133 = vst [vmem:[#allocation14_spill] sm:$0xff] %v17211_v26  ;;  %v12498_v11 = vcombine.low %v17211_v26, %v17211_v26 }
  0x5b   : > { %1291 = vperm.xlu1 %16731, %v1102_v45   ;;  %v21789_v45 = vunpack.c.h.bf16 %v17090_v40  ;;  %v1110_v8 = vmul.f32 1e+30, %v12460_v20  ;;  %v1112_v20 = vmul.f32 1e+30, %v12462_v19 }
  0x5d   : > { %v12459_v52 = vadd.f32 -1.0, %v21789_v45  ;;  %v21802_v45 = vunpack.c.l.bf16 %v17162_v22 }
  0x5e   : > { %14017 = vmatmul.mubr.msk.bf16.gmra.mrb[36].mxu0 %vm475_vm2, %v17049_v44  ;;  %1296 = vperm.xlu0 %16730, %v1103_v13   ;;  %v17192_v13 = vsel %vm1512_vm3, %v1554_v47, %v1556_v54 }
  0x5f   : > { %14020 = vmatprep.mubr.msk.bf16.mxu0 %vm475_vm2, %v17058_v55  ;;  %1301 = vperm.xlu1 %16731, %v1104_v35   ;;  %v21791_v35 = vunpack.c.h.bf16 %v17132_v38  ;;  %v1109_v47 = vmul.f32 1e+30, %v12459_v52 }
  0x62   : > { %1306 = vperm.xlu0 %16730, %v1105_v5   ;;  %v12461_v5 = vadd.f32 -1.0, %v21791_v35 }
  0x63   : > { %1311 = vperm.xlu1 %16731, %v1106_v29   ;;  %v21809_v29 = vunpack.c.h.bf16 %v17138_v48 }
  0x64   : > { %v1111_v52 = vmul.f32 1e+30, %v12461_v5  ;;  %v12466_v5 = vadd.f32 -1.0, %v21803_v12  ;;  %v17254_v12 = vld [vmem:[%s16864_s30 + $0xdc] sm:$0xf] }
  0x65   : > { %v12463_v35 = vadd.f32 -1.0, %v21809_v29  ;;  %22135 = vst [vmem:[#allocation16_spill] sm:$0xff] %v17254_v12  ;;  %v16762_v29 = vld [vmem:[%s16864_s30 + $0xf0] sm:$0xff]  }
  0x66   : > { %14021 = vmatmul.mubr.msk.bf16.gmra.mrb[40].mxu0 %vm475_vm2, %v17090_v40  ;;  %1316 = vperm.xlu0 %16730, %v1107_v49   ;;  %v1558_v49 = vrot.slane %v17201_v1, 1  ;;  %v1560_v40 = vrot.slane %v12498_v11, 1 }
  0x67   : > { %14024 = vmatprep.mubr.msk.bf16.mxu0 %vm475_vm2, %v17132_v38  ;;  %1321 = vperm.xlu1 %16731, %v1108_v51   ;;  %v21801_v38 = vunpack.c.h.bf16 %v17162_v22  ;;  %v12464_v51 = vadd.f32 -1.0, %v21802_v45  ;;  %v1113_v11 = vmul.f32 1e+30, %v12463_v35  ;;  %v1116_v45 = vmul.f32 1e+30, %v12466_v5 }
  0x68   : > { %v17226_v55 = vsel %vm1512_vm3, %v1556_v54, %v1558_v49  ;;  %v17229_v44 = vsel %vm1512_vm3, %v1558_v49, %v1560_v40  ;;  %v2766_v54 = vld [vmem:[%s21746_s4] sm:$0x7] }
  0x69   : > { %22134 = vst [vmem:[#allocation15_spill] sm:$0xff] %v17229_v44  ;;  %v12465_v19 = vadd.f32 -1.0, %v21801_v38  ;;  %v1114_v40 = vmul.f32 1e+30, %v12464_v51  ;;  %v3037_v35 = vand.u32 %v2766_v54, %v16851_v3  ;;  %v21806_v38 = vunpack.c.h.bf16 %v17201_v1  ;;  %v17259_v3 = vld [vmem:[%s16864_s30 + $0xe0] sm:$0xff]  }
  0x6a   : > { %1326 = vperm.xlu0 %16730, %v1109_v47   ;;  %v21805_v47 = vunpack.c.h.bf16 %v17168_v61  ;;  %v21807_v51 = vunpack.c.l.bf16 %v17211_v26  ;;  %22136 = vst [vmem:[#allocation17_spill] sm:$0xff] %v17259_v3  ;;  %v21808_v54 = vunpack.c.l.bf16 %v17254_v12 }
  0x6b   : > { %1331 = vperm.xlu1 %16731, %v1110_v8   ;;  %v21804_v8 = vunpack.c.l.bf16 %v17201_v1  ;;  %14094 = vmatprep.subr.bf16.mxu0 %v3037_v35  ;;  %v1115_v49 = vmul.f32 1e+30, %v12465_v19  ;;  %v12469_v19 = vadd.f32 -1.0, %v21806_v38  ;;  %v21810_v38 = vunpack.c.h.bf16 %v17259_v3 }
  0x6c   : > { %v12470_v5 = vadd.f32 -1.0, %v21807_v51 }
  0x6e   : > { %14025 = vmatmul.mubr.msk.bf16.gmra.mrb[44].mxu0 %vm475_vm2, %v17138_v48  ;;  %1336 = vperm.xlu0 %16730, %v1111_v52   ;;  %v12467_v52 = vadd.f32 -1.0, %v21805_v47  ;;  %v12382_v47 = vcombine.low %v17211_v26, %v17254_v12 }
  0x6f   : > { %14028 = vmatprep.mubr.msk.bf16.mxu0 %vm475_vm2, %v17162_v22  ;;  %1341 = vperm.xlu1 %16731, %v1112_v20   ;;  %v12468_v20 = vadd.f32 -1.0, %v21804_v8  ;;  %v21811_v8 = vunpack.c.l.bf16 %v17259_v3 }
  0x72   : > { %1346 = vperm.xlu0 %16730, %v1113_v11   ;;  %v1117_v11 = vmul.f32 1e+30, %v12467_v52  ;;  %v12471_v52 = vadd.f32 -1.0, %v21808_v54  ;;  %v16761_v54 = vld [vmem:[%s16864_s30 + $0xe8] sm:$0xff]  }
  0x73   : > { %1351 = vperm.xlu1 %16731, %v1114_v40   ;;  %v1118_v40 = vmul.f32 1e+30, %v12468_v20  ;;  %v12472_v20 = vadd.f32 -1.0, %v21811_v8 }
  0x74   : > { %v1121_v51 = vmul.f32 1e+30, %v12471_v52 }
  0x76   : > { %14029 = vmatmul.mubr.msk.bf16.gmra.mrb[48].mxu0 %vm475_vm2, %v17168_v61  ;;  %1356 = vperm.xlu0 %16730, %v1115_v49   ;;  %v1119_v49 = vmul.f32 1e+30, %v12469_v19  ;;  %v1122_v19 = vmul.f32 1e+30, %v12472_v20 }
  0x77   : > { %14032 = vmatprep.mubr.msk.bf16.mxu0 %vm475_vm2, %v17201_v1  ;;  %1361 = vperm.xlu1 %16731, %v1116_v45   ;;  %v1120_v45 = vmul.f32 1e+30, %v12470_v5  ;;  %v22137_v5 = vunpack.c.h.bf16 %v16868_v9  ;;  %v22142_v1 = vunpack.c.l.bf16 %v16886_v15 }
  0x7a   : > { %1366 = vperm.xlu0 %16730, %v1117_v11   ;;  %v12473_v11 = vadd.f32 -1.0, %v21810_v38 }
  0x7b   : > { %1371 = vperm.xlu1 %16731, %v1118_v40  }
  0x7c   : > { %v1123_v40 = vmul.f32 1e+30, %v12473_v11 }
  0x7e   : > { %14033 = vmatmul.mubr.msk.bf16.gmra.mrb[52].mxu0 %vm475_vm2, %v12382_v47  ;;  %1376 = vperm.xlu0 %16730, %v1119_v49   ;;  %v16763_v47 = vld [vmem:[%s16864_s30 + $0xf8] ss:$0 sps:$4 sm:$0xff]  }
  0x7f   : > { %14036 = vmatprep.mubr.msk.bf16.mxu0 %vm475_vm2, %v17259_v3  ;;  %1381 = vperm.xlu1 %16731, %v1120_v45  }
  0x82   : > { %1386 = vperm.xlu0 %16730, %v1121_v51  }
  0x83   : > { %1391 = vperm.xlu1 %16731, %v1122_v19   ;;  %v22140_v19 = vunpack.c.l.bf16 %v16883_v14 }
  0x86   : > { %14037 = vmatmul.mubr.msk.bf16.gmra.mrb[56].mxu0 %vm475_vm2, %v16761_v54  ;;  %1396 = vperm.xlu0 %16730, %v1123_v40  }
  0x87   : > { %14040 = vmatprep.mubr.msk.bf16.mxu0 %vm475_vm2, %v16762_v29  ;;  %v22138_v29 = vunpack.c.h.bf16 %v16871_v10 }
  0x8e   : > { %14041 = vmatmul.mubr.msk.bf16.gmra.mrb[60].mxu0 %vm475_vm2, %v16763_v47 }
  0x8f   : > { %14046 = vmatprep.mubr.msk.bf16.mxu0 %vm475_vm2, %v16990_v36 }
  0x96   : > { %14047 = vmatmul.mubr.msk.bf16.vlgmr.msra.gmra.mrb[64].mxu0 %vm475_vm2, %v16993_v37 }
  0x97   : > { %14050 = vmatprep.mubr.msk.bf16.mxu0 %vm475_vm2, %v17004_v50  ;;  %14095 = vmatpush3.bf16.msra.mxu0 %v3037_v35  ;;  %v22139_v35 = vunpack.c.l.bf16 %v16871_v10 }
  0x99   : > { %v1127_v51 = vpop.permute.xlu0 %1126  ;;  %v1137_v49 = vpop.permute.xlu1 %1136 }
  0x9a   : > { %v1399_v54 = vadd.f32 %v1127_v51, %v22137_v5  ;;  %v1401_v52 = vadd.f32 %v1137_v49, %v22138_v29 }
  0x9c   : > { %v1912_v45 = vrot.slane %v1399_v54, 1  ;;  %v2108_v37 = vrot.slane %v1399_v54, 2  ;;  %v1915_v20 = vrot.slane %v1401_v52, 1  ;;  %v2111_v50 = vrot.slane %v1401_v52, 2 }
  0x9d   : > { %v1132_v36 = vpop.permute.xlu0 %1131 }
  0x9e   : > { %14051 = vmatmul.mubr.msk.bf16.gmra.mrb[68].mxu0 %vm475_vm2, %v17010_v57  ;;  %v1400_v11 = vadd.f32 %v1132_v36, %v22139_v35  ;;  %v1142_v9 = vpop.permute.xlu1 %1141 }
  0x9f   : > { %14054 = vmatprep.mubr.msk.bf16.mxu0 %vm475_vm2, %v17025_v6  ;;  %v1402_v40 = vadd.f32 %v1142_v9, %v22140_v19  ;;  %v22141_v9 = vunpack.c.h.bf16 %v16883_v14 }
  0xa0   : > { %v1913_v47 = vrot.slane %v1400_v11, 1  ;;  %v2109_v51 = vrot.slane %v1400_v11, 2 }
  0xa1   : > { %v1917_v5 = vrot.slane %v1402_v40, 1  ;;  %v2113_v57 = vrot.slane %v1402_v40, 2  ;;  %v1147_v49 = vpop.permute.xlu0 %1146 }
  0xa2   : > { %v1914_v29 = vsel %vm1512_vm3, %v1912_v45, %v1913_v47  ;;  %v1916_v6 = vsel %vm1512_vm3, %v1913_v47, %v1915_v20  ;;  %v2110_v38 = vsel %vm2107_vm4, %v2108_v37, %v2109_v51  ;;  %v2112_v8 = vsel %vm2107_vm4, %v2109_v51, %v2111_v50  ;;  %v1152_v10 = vpop.permute.xlu1 %1151 }
  0xa3   : > { %v2058_v36 = vmax.f32 %v1399_v54, %v1914_v29  ;;  %v2059_v35 = vmax.f32 %v1400_v11, %v1916_v6  ;;  %v1918_v3 = vsel %vm1512_vm3, %v1915_v20, %v1917_v5  ;;  %v1403_v19 = vadd.f32 %v1147_v49, %v22141_v9 }
  0xa4   : > { %v2060_v12 = vmax.f32 %v1401_v52, %v1918_v3  ;;  %v2114_v26 = vsel %vm2107_vm4, %v2111_v50, %v2113_v57  ;;  %v1404_v45 = vadd.f32 %v1152_v10, %v22142_v1  ;;  %v22143_v3 = vunpack.c.h.bf16 %v16886_v15 }
  0xa5   : > { %v2255_v37 = vmax.f32 %v2059_v35, %v2112_v8  ;;  %v2254_v47 = vmax.f32 %v2058_v36, %v2110_v38  ;;  %v1919_v51 = vrot.slane %v1403_v19, 1  ;;  %v2115_v61 = vrot.slane %v1403_v19, 2  ;;  %v1157_v54 = vpop.permute.xlu0 %1156 }
  0xa6   : > { %14055 = vmatmul.mubr.msk.bf16.gmra.mrb[72].mxu0 %vm475_vm2, %v17031_v21  ;;  %v2256_v20 = vmax.f32 %v2060_v12, %v2114_v26  ;;  %v1921_v14 = vrot.slane %v1404_v45, 1  ;;  %v2117_v11 = vrot.slane %v1404_v45, 2  ;;  %v1405_v52 = vadd.f32 %v1157_v54, %v22143_v3  ;;  %v1162_v50 = vpop.permute.xlu1 %1161 }
  0xa7   : > { %14058 = vmatprep.mubr.msk.bf16.mxu0 %vm475_vm2, %v17055_v58  ;;  %v2303_v49 = vmax.f32 %v2254_v47, %v1402_v40  ;;  %v1920_v1 = vsel %vm1512_vm3, %v1917_v5, %v1919_v51  ;;  %v2116_v21 = vsel %vm2107_vm4, %v2113_v57, %v2115_v61  ;;  %v2304_v8 = vmax.f32 %v2255_v37, %v1403_v19 }
  0xa8   : > { %v2061_v38 = vmax.f32 %v1402_v40, %v1920_v1  ;;  %v1922_v29 = vsel %vm1512_vm3, %v1919_v51, %v1921_v14  ;;  %v2118_v6 = vsel %vm2107_vm4, %v2115_v61, %v2117_v11  ;;  %v2305_v10 = vmax.f32 %v2256_v20, %v1404_v45 }
  0xa9   : > { %v2365_v58 = vmax.f32 %v2303_v49, %v1920_v1  ;;  %v2062_v12 = vmax.f32 %v1403_v19, %v1922_v29  ;;  %v2366_v26 = vmax.f32 %v2304_v8, %v1922_v29  ;;  %v1923_v36 = vrot.slane %v1405_v52, 1  ;;  %v1167_v35 = vpop.permute.xlu0 %1166 }
  0xaa   : > { %v2257_v15 = vmax.f32 %v2061_v38, %v2116_v21  ;;  %v2119_v9 = vrot.slane %v1405_v52, 2  ;;  %v22144_v47 = vunpack.c.l.bf16 %v16895_v23  ;;  %v22145_v5 = vunpack.c.h.bf16 %v16895_v23  ;;  %v1172_v37 = vpop.permute.xlu1 %1171 }
  0xab   : > { %v2424_v40 = vmax.f32 %v2365_v58, %v2116_v21  ;;  %v2258_v3 = vmax.f32 %v2062_v12, %v2118_v6  ;;  %v2425_v51 = vmax.f32 %v2366_v26, %v2118_v6  ;;  %v1924_v61 = vsel %vm1512_vm3, %v1921_v14, %v1923_v36 }
  0xac   : > { %v1406_v54 = vadd.f32 %v1162_v50, %v22144_v47  ;;  %v1407_v57 = vadd.f32 %v1167_v35, %v22145_v5  ;;  %v2306_v20 = vmax.f32 %v2257_v15, %v1405_v52  ;;  %v2063_v1 = vmax.f32 %v1404_v45, %v1924_v61 }
  0xad   : > { %v17330_v8 = vmax.f32 %v2424_v40, %v1405_v52  ;;  %v2120_v23 = vsel %vm2107_vm4, %v2117_v11, %v2119_v9  ;;  %v2367_v29 = vmax.f32 %v2305_v10, %v1924_v61  ;;  %v1177_v45 = vpop.permute.xlu0 %1176 }
  0xae   : > { %v1925_v49 = vrot.slane %v1406_v54, 1  ;;  %v2121_v19 = vrot.slane %v1406_v54, 2  ;;  %14059 = vmatmul.mubr.msk.bf16.gmra.mrb[76].mxu0 %vm475_vm2, %v17063_v31  ;;  %v2307_v38 = vmax.f32 %v2258_v3, %v1406_v54  ;;  %v17332_v50 = vmax.f32 %v2425_v51, %v1406_v54  ;;  %v1182_v58 = vpop.permute.xlu1 %1181 }
  0xaf   : > { %14062 = vmatprep.mubr.msk.bf16.mxu0 %vm475_vm2, %v17077_v17  ;;  %v2259_v14 = vmax.f32 %v2063_v1, %v2120_v23  ;;  %v1927_v6 = vrot.slane %v1407_v57, 1  ;;  %v2123_v12 = vrot.slane %v1407_v57, 2  ;;  %v22146_v31 = vunpack.c.l.bf16 %v16912_v33 }
  0xb0   : > { %v17338_v21 = vsel %vm1512_vm3, %v1923_v36, %v1925_v49  ;;  %v17344_v15 = vsel %vm2107_vm4, %v2119_v9, %v2121_v19  ;;  %v2426_v11 = vmax.f32 %v2367_v29, %v2120_v23  ;;  %v22147_v1 = vunpack.c.h.bf16 %v16912_v33 }
  0xb1   : > { %v1408_v26 = vadd.f32 %v1172_v37, %v22146_v31  ;;  %v2064_v35 = vmax.f32 %v1405_v52, %v17338_v21  ;;  %v17347_v17 = vsel %vm1512_vm3, %v1925_v49, %v1927_v6  ;;  %v2308_v36 = vmax.f32 %v2259_v14, %v1407_v57 }
  0xb2   : > { %v2368_v47 = vmax.f32 %v2306_v20, %v17338_v21  ;;  %v2065_v3 = vmax.f32 %v1406_v54, %v17347_v17  ;;  %v17352_v51 = vmax.f32 %v2426_v11, %v1407_v57  ;;  %v17356_v9 = vsel %vm2107_vm4, %v2121_v19, %v2123_v12 }
  0xb3   : > { %v1929_v10 = vrot.slane %v1408_v26, 1  ;;  %v2125_v5 = vrot.slane %v1408_v26, 2  ;;  %v2260_v40 = vmax.f32 %v2064_v35, %v17344_v15  ;;  %v2369_v37 = vmax.f32 %v2307_v38, %v17347_v17  ;;  %v1187_v35 = vpop.permute.xlu0 %1186  ;;  %v1192_v38 = vpop.permute.xlu1 %1191 }
  0xb4   : > { %v2427_v52 = vmax.f32 %v2368_v47, %v17344_v15  ;;  %v2261_v20 = vmax.f32 %v2065_v3, %v17356_v9  ;;  %v1409_v23 = vadd.f32 %v1177_v45, %v22147_v1  ;;  %v22148_v29 = vunpack.c.l.bf16 %v16921_v39 }
  0xb5   : > { %v17360_v61 = vsel %vm1512_vm3, %v1927_v6, %v1929_v10  ;;  %v2309_v49 = vmax.f32 %v2260_v40, %v1408_v26  ;;  %v2428_v54 = vmax.f32 %v2369_v37, %v17356_v9  ;;  %v17374_v33 = vsel %vm2107_vm4, %v2123_v12, %v2125_v5 }
  0xb6   : > { %v17365_v14 = vmax.f32 %v2427_v52, %v1408_v26  ;;  %v1410_v31 = vadd.f32 %v1182_v58, %v22148_v29  ;;  %v2066_v19 = vmax.f32 %v1407_v57, %v17360_v61  ;;  %14063 = vmatmul.mubr.msk.bf16.gmra.mrb[80].mxu0 %vm475_vm2, %v17081_v32  ;;  %v1931_v6 = vrot.slane %v1409_v23, 1 }
  0xb7   : > { %v2127_v11 = vrot.slane %v1409_v23, 2  ;;  %v2310_v47 = vmax.f32 %v2261_v20, %v1409_v23  ;;  %14066 = vmatprep.mubr.msk.bf16.mxu0 %vm475_vm2, %v17094_v63  ;;  %v17378_v45 = vmax.f32 %v2428_v54, %v1409_v23  ;;  %v2370_v32 = vmax.f32 %v2308_v36, %v17360_v61 }
  0xb8   : > { %v1933_v40 = vrot.slane %v1410_v31, 1  ;;  %v2129_v58 = vrot.slane %v1410_v31, 2  ;;  %v2262_v57 = vmax.f32 %v2066_v19, %v17374_v33  ;;  %v17382_v3 = vsel %vm1512_vm3, %v1929_v10, %v1931_v6 }
  0xb9   : > { %v17386_v52 = vsel %vm2107_vm4, %v2125_v5, %v2127_v11  ;;  %v22149_v12 = vunpack.c.h.bf16 %v16921_v39  ;;  %v2067_v1 = vmax.f32 %v1408_v26, %v17382_v3  ;;  %v2371_v54 = vmax.f32 %v2309_v49, %v17382_v3  ;;  %v1202_v26 = vpop.permute.xlu1 %1201 }
  0xba   : > { %v17391_v20 = vsel %vm1512_vm3, %v1931_v6, %v1933_v40  ;;  %v2311_v63 = vmax.f32 %v2262_v57, %v1410_v31  ;;  %v2429_v29 = vmax.f32 %v2370_v32, %v17374_v33  ;;  %v17409_v32 = vsel %vm2107_vm4, %v2127_v11, %v2129_v58 }
  0xbb   : > { %v1411_v37 = vadd.f32 %v1187_v35, %v22149_v12  ;;  %v2263_v5 = vmax.f32 %v2067_v1, %v17386_v52  ;;  %v2430_v39 = vmax.f32 %v2371_v54, %v17386_v52  ;;  %v22150_v35 = vunpack.c.l.bf16 %v16934_v46  ;;  %v1197_v12 = vpop.permute.xlu0 %1196 }
  0xbc   : > { %v2068_v57 = vmax.f32 %v1409_v23, %v17391_v20  ;;  %v17403_v22 = vmax.f32 %v2429_v29, %v1410_v31  ;;  %v2372_v10 = vmax.f32 %v2310_v47, %v17391_v20 }
  0xbd   : > { %v1935_v36 = vrot.slane %v1411_v37, 1  ;;  %v2131_v19 = vrot.slane %v1411_v37, 2  ;;  %v1412_v6 = vadd.f32 %v1192_v38, %v22150_v35  ;;  %v2312_v1 = vmax.f32 %v2263_v5, %v1411_v37  ;;  %v1212_v24 = vpop.permute.xlu1 %1211 }
  0xbe   : > { %v17412_v48 = vmax.f32 %v2430_v39, %v1411_v37  ;;  %14067 = vmatmul.mubr.msk.bf16.gmra.mrb[84].mxu0 %vm475_vm2, %v17098_v59  ;;  %v2264_v38 = vmax.f32 %v2068_v57, %v17409_v32  ;;  %v22151_v5 = vunpack.c.h.bf16 %v16934_v46 }
  0xbf   : > { %v17406_v49 = vsel %vm1512_vm3, %v1933_v40, %v1935_v36  ;;  %v1937_v54 = vrot.slane %v1412_v6, 1  ;;  %v2133_v41 = vrot.slane %v1412_v6, 2  ;;  %v2431_v40 = vmax.f32 %v2372_v10, %v17409_v32  ;;  %14070 = vmatprep.mubr.msk.bf16.mxu0 %vm475_vm2, %v17101_v0  ;;  %v1207_v28 = vpop.permute.xlu0 %1206 }
  0xc0   : > { %v2069_v11 = vmax.f32 %v1410_v31, %v17406_v49  ;;  %v17427_v29 = vsel %vm2107_vm4, %v2129_v58, %v2131_v19  ;;  %v2373_v59 = vmax.f32 %v2311_v63, %v17406_v49  ;;  %v1413_v39 = vadd.f32 %v1197_v12, %v22151_v5 }
  0xc1   : > { %v17424_v47 = vsel %vm1512_vm3, %v1935_v36, %v1937_v54  ;;  %v2313_v35 = vmax.f32 %v2264_v38, %v1412_v6  ;;  %v17432_v57 = vmax.f32 %v2431_v40, %v1412_v6  ;;  %v22152_v31 = vunpack.c.l.bf16 %v16943_v53 }
  0xc2   : > { %v2265_v10 = vmax.f32 %v2069_v11, %v17427_v29  ;;  %v2432_v0 = vmax.f32 %v2373_v59, %v17427_v29  ;;  %v1939_v36 = vrot.slane %v1413_v39, 1  ;;  %v2135_v30 = vrot.slane %v1413_v39, 2 }
  0xc3   : > { %v1414_v23 = vadd.f32 %v1202_v26, %v22152_v31  ;;  %v2070_v58 = vmax.f32 %v1411_v37, %v17424_v47  ;;  %v17440_v46 = vsel %vm2107_vm4, %v2131_v19, %v2133_v41  ;;  %v2374_v11 = vmax.f32 %v2312_v1, %v17424_v47 }
  0xc4   : > { %v2314_v63 = vmax.f32 %v2265_v10, %v1413_v39  ;;  %v17443_v38 = vsel %vm1512_vm3, %v1937_v54, %v1939_v36  ;;  %v17445_v40 = vmax.f32 %v2432_v0, %v1413_v39  ;;  %v17454_v5 = vsel %vm2107_vm4, %v2133_v41, %v2135_v30 }
  0xc5   : > { %v1941_v44 = vrot.slane %v1414_v23, 1  ;;  %v2137_v12 = vrot.slane %v1414_v23, 2  ;;  %v2266_v26 = vmax.f32 %v2070_v58, %v17440_v46  ;;  %v2071_v37 = vmax.f32 %v1412_v6, %v17443_v38  ;;  %22154 = vst [vmem:[#allocation19_spill] sm:$0xff] %v17454_v5 }
  0xc6   : > { %22153 = vst [vmem:[#allocation18_spill] sm:$0xff] %v17445_v40  ;;  %v2375_v19 = vmax.f32 %v2313_v35, %v17443_v38  ;;  %v2433_v54 = vmax.f32 %v2374_v11, %v17440_v46  ;;  %v22155_v31 = vunpack.c.h.bf16 %v16943_v53  ;;  %v22156_v58 = vunpack.c.l.bf16 %v16956_v60  ;;  %14071 = vmatmul.mubr.msk.bf16.gmra.mrb[88].mxu0 %vm475_vm2, %v17104_v56  ;;  %v1222_v11 = vpop.permute.xlu1 %1221 }
  0xc7   : > { %v17450_v59 = vsel %vm1512_vm3, %v1939_v36, %v1941_v44  ;;  %v2315_v10 = vmax.f32 %v2266_v26, %v1414_v23  ;;  %v2267_v1 = vmax.f32 %v2071_v37, %v17454_v5  ;;  %v17468_v35 = vsel %vm2107_vm4, %v2135_v30, %v2137_v12  ;;  %14074 = vmatprep.mubr.msk.bf16.mxu0 %vm475_vm2, %v17111_v16  ;;  %v1217_v26 = vpop.permute.xlu0 %1216 }
  0xc8   : > { %v1415_v0 = vadd.f32 %v1207_v28, %v22155_v31  ;;  %v1416_v40 = vadd.f32 %v1212_v24, %v22156_v58  ;;  %v2434_v6 = vmax.f32 %v2375_v19, %v17454_v5  ;;  %v2072_v41 = vmax.f32 %v1413_v39, %v17450_v59 }
  0xc9   : > { %v17472_v53 = vmax.f32 %v2433_v54, %v1414_v23  ;;  %v2376_v16 = vmax.f32 %v2314_v63, %v17450_v59 }
  0xca   : > { %v1943_v28 = vrot.slane %v1415_v0, 1  ;;  %v2139_v36 = vrot.slane %v1415_v0, 2  ;;  %v1945_v24 = vrot.slane %v1416_v40, 1  ;;  %v2316_v56 = vmax.f32 %v2267_v1, %v1415_v0 }
  0xcb   : > { %22157 = vst [vmem:[#allocation20_spill] sm:$0xff] %v17472_v53  ;;  %v17474_v31 = vmax.f32 %v2434_v6, %v1415_v0  ;;  %v2141_v37 = vrot.slane %v1416_v40, 2  ;;  %v2268_v19 = vmax.f32 %v2072_v41, %v17468_v35  ;;  %v22160_v6 = vunpack.c.h.bf16 %v16956_v60 }
  0xcc   : > { %v17478_v39 = vsel %vm1512_vm3, %v1941_v44, %v1943_v28  ;;  %v17481_v30 = vsel %vm1512_vm3, %v1943_v28, %v1945_v24  ;;  %v17485_v54 = vsel %vm2107_vm4, %v2137_v12, %v2139_v36  ;;  %v2435_v41 = vmax.f32 %v2376_v16, %v17468_v35  ;;  %v1227_v16 = vpop.permute.xlu0 %1226 }
  0xcd   : > { %22158 = vst [vmem:[#allocation21_spill] sm:$0xff] %v17474_v31  ;;  %22159 = vst [vmem:[#allocation22_spill] sm:$0xff] %v17478_v39  ;;  %v2317_v58 = vmax.f32 %v2268_v19, %v1416_v40  ;;  %v2073_v53 = vmax.f32 %v1414_v23, %v17478_v39  ;;  %v2377_v1 = vmax.f32 %v2315_v10, %v17478_v39  ;;  %v22161_v44 = vunpack.c.l.bf16 %v16965_v4 }
  0xce   : > { %v1417_v31 = vadd.f32 %v1217_v26, %v22160_v6  ;;  %v2074_v28 = vmax.f32 %v1415_v0, %v17481_v30  ;;  %v17498_v63 = vsel %vm2107_vm4, %v2139_v36, %v2141_v37  ;;  %v17502_v39 = vmax.f32 %v2435_v41, %v1416_v40  ;;  %v1232_v0 = vpop.permute.xlu1 %1231  ;;  %14075 = vmatmul.mubr.msk.bf16.gmra.mrb[92].mxu0 %vm475_vm2, %v17114_v7 }
  0xcf   : > { %v17494_v5 = vadd.f32 %v1222_v11, %v22161_v44  ;;  %v2269_v12 = vmax.f32 %v2073_v53, %v17485_v54  ;;  %v2436_v23 = vmax.f32 %v2377_v1, %v17485_v54  ;;  %v2378_v6 = vmax.f32 %v2316_v56, %v17481_v30  ;;  %14078 = vmatprep.mubr.msk.bf16.mxu0 %vm475_vm2, %v17129_v42 }
  0xd0   : > { %v1947_v19 = vrot.slane %v1417_v31, 1  ;;  %v2143_v10 = vrot.slane %v1417_v31, 2  ;;  %v17507_v11 = vmax.f32 %v2074_v28, %v17498_v63  ;;  %v22163_v56 = vunpack.c.h.bf16 %v16965_v4 }
  0xd1   : > { %v1949_v60 = vrot.slane %v17494_v5, 1  ;;  %v2145_v26 = vrot.slane %v17494_v5, 2  ;;  %v2318_v36 = vmax.f32 %v2269_v12, %v1417_v31  ;;  %v17514_v1 = vmax.f32 %v2436_v23, %v1417_v31 }
  0xd2   : > { %v17512_v53 = vsel %vm1512_vm3, %v1945_v24, %v1947_v19  ;;  %v2319_v44 = vmax.f32 %v17507_v11, %v17494_v5  ;;  %v17526_v7 = vsel %vm2107_vm4, %v2141_v37, %v2143_v10  ;;  %v2437_v24 = vmax.f32 %v2378_v6, %v17498_v63 }
  0xd3   : > { %22162 = vst [vmem:[#allocation23_spill] sm:$0xff] %v17514_v1  ;;  %v17520_v41 = vsel %vm1512_vm3, %v1947_v19, %v1949_v60  ;;  %v2075_v28 = vmax.f32 %v1416_v40, %v17512_v53  ;;  %v2379_v12 = vmax.f32 %v2317_v58, %v17512_v53  ;;  %v17532_v23 = vadd.f32 %v1227_v16, %v22163_v56 }
  0xd4   : > { %v22164_v42 = vunpack.c.l.bf16 %v16981_v25  ;;  %v2076_v40 = vmax.f32 %v1417_v31, %v17520_v41  ;;  %v17543_v37 = vsel %vm2107_vm4, %v2143_v10, %v2145_v26  ;;  %v2380_v11 = vmax.f32 %v2318_v36, %v17520_v41 }
  0xd5   : > { %v17539_v1 = vmax.f32 %v2075_v28, %v17526_v7  ;;  %v17547_v58 = vmax.f32 %v2437_v24, %v17494_v5  ;;  %v2438_v4 = vmax.f32 %v2379_v12, %v17526_v7  ;;  %v1951_v16 = vrot.slane %v17532_v23, 1 }
  0xd6   : > { %v17536_v19 = vadd.f32 %v1232_v0, %v22164_v42  ;;  %v2147_v0 = vrot.slane %v17532_v23, 2  ;;  %v17557_v10 = vmax.f32 %v2076_v40, %v17543_v37  ;;  %v2439_v12 = vmax.f32 %v2380_v11, %v17543_v37  ;;  %14079 = vmatmul.mubr.msk.bf16.gmra.mrb[96].mxu0 %vm475_vm2, %v17135_v2 }
  0xd7   : > { %v2320_v6 = vmax.f32 %v17539_v1, %v17532_v23  ;;  %v17560_v36 = vsel %vm1512_vm3, %v1949_v60, %v1951_v16  ;;  %v17563_v24 = vmax.f32 %v2438_v4, %v17532_v23  ;;  %v2535_v56 = vmax.f32 %v17330_v8, %v17338_v21  ;;  %14082 = vmatprep.mubr.msk.bf16.mxu0 %vm475_vm2, %v17159_v27 }
  0xd8   : > { %v1953_v28 = vrot.slane %v17536_v19, 1  ;;  %v2149_v31 = vrot.slane %v17536_v19, 2  ;;  %v2536_v60 = vmax.f32 %v17332_v50, %v17347_v17  ;;  %v2537_v4 = vmax.f32 %v17352_v51, %v17360_v61 }
  0xd9   : > { %v17582_v11 = vmax.f32 %v2439_v12, %v17536_v19  ;;  %v2538_v8 = vmax.f32 %v17365_v14, %v17382_v3  ;;  %v2594_v21 = vmax.f32 %v2535_v56, %v17344_v15  ;;  %v22166_v17 = vmax.f32 %v17403_v22, %v17406_v49  ;;  %v1242_v56 = vpop.permute.xlu1 %1241 }
  0xda   : > { %v17571_v42 = vsel %vm1512_vm3, %v1951_v16, %v1953_v28  ;;  %v22165_v16 = vmax.f32 %v17378_v45, %v17391_v20  ;;  %v2595_v50 = vmax.f32 %v2536_v60, %v17356_v9  ;;  %v2596_v2 = vmax.f32 %v2537_v4, %v17374_v33  ;;  %v1237_v33 = vpop.permute.xlu0 %1236 }
  0xdb   : > { %v2599_v51 = vmax.f32 %v22166_v17, %v17427_v29  ;;  %v2077_v15 = vmax.f32 %v17494_v5, %v17560_v36  ;;  %v2597_v61 = vmax.f32 %v2538_v8, %v17386_v52  ;;  %vm2643_vm5 = vcmp.lt.f32.partialorder %v2594_v21, -1e+29 }
  0xdc   : > { %v2598_v40 = vmax.f32 %v22165_v16, %v17409_v32  ;;  %v17605_v27 = vsel %vm2107_vm4, %v2145_v26, %v2147_v0  ;;  %vm2644_vm8 = vcmp.lt.f32.partialorder %v2595_v50, -1e+29  ;;  %vm2645_vm9 = vcmp.lt.f32.partialorder %v2596_v2, -1e+29 }
  0xdd   : > { %v2692_v9 = vsel %vm2643_vm5, 0.0, %v2594_v21  ;;  %vm2646_vm10 = vcmp.lt.f32.partialorder %v2597_v61, -1e+29  ;;  %v2693_v22 = vsel %vm2644_vm8, 0.0, %v2595_v50  ;;  %v2694_v45 = vsel %vm2645_vm9, 0.0, %v2596_v2 }
  0xde   : > { %vm2647_vm7 = vcmp.lt.f32.partialorder %v2598_v40, -1e+29  ;;  %vm2648_vm11 = vcmp.lt.f32.partialorder %v2599_v51, -1e+29  ;;  %v2695_v3 = vsel %vm2646_vm10, 0.0, %v2597_v61  ;;  %v2741_v20 = vpack.c.bf16 %v2693_v22, %v2692_v9  ;;  %14083 = vmatmul.mubr.msk.bf16.gmra.mrb[100].mxu0 %vm475_vm2, %v17165_v34 }
  0xdf   : > { %v2696_v14 = vsel %vm2647_vm7, 0.0, %v2598_v40  ;;  %v2697_v52 = vsel %vm2648_vm11, 0.0, %v2599_v51  ;;  %v2273_v49 = vmax.f32 %v2077_v15, %v17605_v27  ;;  %v2742_v32 = vpack.c.bf16 %v2695_v3, %v2694_v45  ;;  %14086 = vmatprep.mubr.msk.bf16.mxu0 %vm475_vm2, %v17189_v18  ;;  %v1247_v3 = vpop.permute.xlu0 %1246 }
  0xe0   : > { %v17608_v29 = vpack.c.bf16 %v2697_v52, %v2696_v14  ;;  %v2381_v5 = vmax.f32 %v2319_v44, %v17560_v36  ;;  %v22167_v26 = vunpack.c.h.bf16 %v16981_v25  ;;  %v2769_v40 = vshrl.u32 %v2741_v20, 16 }
  0xe1   : > { %v2771_v60 = vshll.u32 %v2741_v20, 16  ;;  %v22168_v4 = vunpack.c.l.bf16 %v16998_v43  ;;  %v2078_v21 = vmax.f32 %v17532_v23, %v17571_v42  ;;  %v2776_v16 = vshll.u32 %v2742_v32, 16 }
  0xe2   : > { %v1421_v12 = vadd.f32 %v1237_v33, %v22167_v26  ;;  %v2780_v50 = vshrl.u32 %v2742_v32, 16  ;;  %v2784_v44 = vshll.u32 %v17608_v29, 16  ;;  %v2440_v25 = vmax.f32 %v2381_v5, %v17605_v27  ;;  %v1252_v32 = vpop.permute.xlu1 %1251 }
  0xe3   : > { %v17615_v8 = vadd.f32 %v1242_v56, %v22168_v4  ;;  %v2773_v2 = vrot.slane %v2771_v60, 1  ;;  %v2778_v61 = vrot.slane %v2776_v16, 1  ;;  %v17638_v18 = vsel %vm2107_vm4, %v2147_v0, %v2149_v31 }
  0xe4   : > { %v1955_v17 = vrot.slane %v1421_v12, 1  ;;  %v2151_v51 = vrot.slane %v1421_v12, 2  ;;  %v2322_v15 = vmax.f32 %v2273_v49, %v1421_v12  ;;  %v2786_v9 = vrot.slane %v2784_v44, 1 }
  0xe5   : > { %v17625_v14 = vmax.f32 %v2440_v25, %v1421_v12  ;;  %v1957_v33 = vrot.slane %v17615_v8, 1  ;;  %v2774_v34 = vor.u32 %v2773_v2, %v2769_v40  ;;  %v2153_v45 = vrot.slane %v17615_v8, 2 }
  0xe6   : > { %v17631_v22 = vsel %vm1512_vm3, %v1953_v28, %v1955_v17  ;;  %v2782_v20 = vor.u32 %v2780_v50, %v2778_v61  ;;  %v17645_v49 = vmax.f32 %v2078_v21, %v17638_v18  ;;  %v2382_v28 = vmax.f32 %v2320_v6, %v17571_v42  ;;  %14087 = vmatmul.mubr.msk.bf16.gmra.mrb[104].mxu0 %vm475_vm2, %v17192_v13 }
  0xe7   : > { %v17642_v52 = vsel %vm1512_vm3, %v1955_v17, %v1957_v33  ;;  %v2779_v5 = vsel %vm2767_vm6, %v2774_v34, %v2778_v61  ;;  %v2079_v0 = vmax.f32 %v17536_v19, %v17631_v22  ;;  %v17657_v26 = vsel %vm2107_vm4, %v2149_v31, %v2151_v51  ;;  %14090 = vmatprep.mubr.msk.bf16.mxu0 %vm475_vm2, %v17226_v55 }
  0xe8   : > { %v22169_v56 = vmax.f32 %v17557_v10, %v17536_v19  ;;  %v17664_v60 = vsel %vm2767_vm6, %v2782_v20, %v2786_v9  ;;  %v2323_v1 = vmax.f32 %v17645_v49, %v17615_v8  ;;  %v2441_v23 = vmax.f32 %v2382_v28, %v17638_v18  ;;  %v22172_v28 = vld [vmem:[#allocation18_spill] sm:$0xff] }
  0xe9   : > { %v22170_v6 = vunpack.c.h.bf16 %v16998_v43  ;;  %v17674_v31 = vmax.f32 %v2079_v0, %v17657_v26  ;;  %v22171_v19 = vunpack.c.l.bf16 %v17019_v62  ;;  %v2080_v16 = vmax.f32 %v1421_v12, %v17642_v52 }
  0xea   : > { %v2383_v40 = vmax.f32 %v22169_v56, %v17631_v22  ;;  %v17685_v50 = vmax.f32 %v2441_v23, %v17615_v8  ;;  %v17692_v25 = vsel %vm2107_vm4, %v2151_v51, %v2153_v45  ;;  %v2384_v51 = vmax.f32 %v2322_v15, %v17642_v52 }
  0xeb   : > { %v17671_v4 = vadd.f32 %v1247_v3, %v22170_v6  ;;  %v17679_v10 = vadd.f32 %v1252_v32, %v22171_v19  ;;  %v17707_v34 = vmax.f32 %v2080_v16, %v17692_v25  ;;  %v2541_v55 = vmax.f32 %v17412_v48, %v17424_v47  ;;  %v13982_v3 = vpop.f32.mrb[0].mxu0  ;;  %v22173_v6 = vld [vmem:[#allocation19_spill] sm:$0xff] }
  0xec   : > { %v2442_v21 = vmax.f32 %v2383_v40, %v17657_v26  ;;  %v2542_v49 = vmax.f32 %v17432_v57, %v17443_v38  ;;  %v2543_v32 = vmax.f32 %v22172_v28, %v17450_v59  ;;  %v868_v0 = vmax.f32 %v13982_v3, 0.0  ;;  %v613_v56 = vpop.f32.mrb[1].mxu0  ;;  %v22174_v57 = vld [vmem:[#allocation22_spill] sm:$0xff]  ;;  %v22175_v38 = vld [vmem:[#allocation20_spill] sm:$0xff] }
  0xed   : > { %v1959_v43 = vrot.slane %v17671_v4, 1  ;;  %v2155_v44 = vrot.slane %v17671_v4, 2  ;;  %v2324_v12 = vmax.f32 %v17674_v31, %v17671_v4  ;;  %v1961_v2 = vrot.slane %v17679_v10, 1  ;;  %v13983_v23 = vpop.f32.mrb[2].mxu0 }
  0xee   : > { %v17699_v13 = vmax.f32 %v2442_v21, %v17671_v4  ;;  %v2157_v17 = vrot.slane %v17679_v10, 2  ;;  %v2325_v15 = vmax.f32 %v17707_v34, %v17679_v10  ;;  %v2443_v48 = vmax.f32 %v2384_v51, %v17692_v25 }
  0xef   : > { %v17704_v61 = vsel %vm1512_vm3, %v1957_v33, %v1959_v43  ;;  %v17715_v20 = vsel %vm1512_vm3, %v1959_v43, %v1961_v2  ;;  %v2788_v33 = vshrl.u32 %v17608_v29, 16  ;;  %v2600_v47 = vmax.f32 %v2541_v55, %v17440_v46  ;;  %v616_v43 = vpop.f32.mrb[3].mxu0  ;;  %v1257_v55 = vpop.permute.xlu0 %1256 }
  0xf0   : > { %v866_v40 = vmax.f32 %v613_v56, 0.0  ;;  %v2601_v21 = vmax.f32 %v2542_v49, %v22173_v6  ;;  %v2544_v29 = vmax.f32 %v22175_v38, %v22174_v57  ;;  %v869_v16 = vmax.f32 %v13983_v23, 0.0 }
  0xf1   : > { %v2790_v19 = vor.u32 %v2788_v33, %v2786_v9  ;;  %v17730_v59 = vmax.f32 %v2443_v48, %v17679_v10  ;;  %vm2649_vm12 = vcmp.lt.f32.partialorder %v2600_v47, -1e+29  ;;  %v2602_v3 = vmax.f32 %v2543_v32, %v17468_v35  ;;  %v22177_v9 = vld [vmem:[#allocation15_spill] sm:$0xff] }
  0xf2   : > { %v867_v28 = vmax.f32 %v616_v43, 0.0  ;;  %vm2650_vm13 = vcmp.lt.f32.partialorder %v2601_v21, -1e+29  ;;  %v2698_v51 = vsel %vm2649_vm12, 0.0, %v2600_v47  ;;  %v2603_v46 = vmax.f32 %v2544_v29, %v17485_v54  ;;  %14091 = vmatmul.mubr.msk.bf16.gmra.mrb[108].mxu0 %vm475_vm2, %v22177_v9 }
  0xf3   : > { %v17734_v56 = vpack.c.bf16 %v869_v16, %v868_v0  ;;  %v2699_v49 = vsel %vm2650_vm13, 0.0, %v2601_v21  ;;  %vm2651_vm14 = vcmp.lt.f32.partialorder %v2602_v3, -1e+29  ;;  %v2081_v33 = vmax.f32 %v17615_v8, %v17704_v61  ;;  %14096 = vmatprep.mubr.msk.bf16.mxu0 %vm475_vm2, %v2779_v5  ;;  %v13986_v21 = vpop.f32.mrb[4].mxu0 }
  0xf4   : > { %v17740_v48 = vpack.c.bf16 %v867_v28, %v866_v40  ;;  %v2744_v35 = vpack.c.bf16 %v2699_v49, %v2698_v51  ;;  %vm2652_vm15 = vcmp.lt.f32.partialorder %v2603_v46, -1e+29  ;;  %v2700_v32 = vsel %vm2651_vm14, 0.0, %v2602_v3  ;;  %v1262_v40 = vpop.permute.xlu1 %1261  ;;  %v629_v8 = vpop.f32.mrb[5].mxu0 }
  0xf5   : > { %22176 = vst [vmem:[#allocation18_spill] sm:$0xff] %v17734_v56  ;;  %v2701_v47 = vsel %vm2652_vm15, 0.0, %v2603_v46  ;;  %v17748_v54 = vsel %vm2107_vm4, %v2153_v45, %v2155_v44  ;;  %v2385_v0 = vmax.f32 %v2323_v1, %v17704_v61  ;;  %v22179_v23 = vunpack.c.h.bf16 %v17019_v62  ;;  %v13987_v3 = vpop.f32.mrb[6].mxu0 }
  0xf6   : > { %22178 = vst [vmem:[#allocation19_spill] sm:$0xff] %v17740_v48  ;;  %v2792_v5 = vshll.u32 %v2744_v35, 16  ;;  %v17755_v57 = vpack.c.bf16 %v2701_v47, %v2700_v32  ;;  %v2796_v38 = vshrl.u32 %v2744_v35, 16  ;;  %v17758_v29 = vmax.f32 %v2081_v33, %v17748_v54  ;;  %v632_v9 = vpop.f32.mrb[7].mxu0  ;;  %v22180_v35 = vld [vmem:[#allocation2_spill] sm:$0xff] }
  0xf7   : > { %v17753_v6 = vadd.f32 %v1257_v55, %v22179_v23  ;;  %v872_v16 = vmax.f32 %v13986_v21, 0.0  ;;  %v2444_v45 = vmax.f32 %v2385_v0, %v17748_v54  ;;  %v870_v62 = vmax.f32 %v629_v8, 0.0 }
  0xf8   : > { %v2794_v28 = vrot.slane %v2792_v5, 1  ;;  %v2800_v51 = vshll.u32 %v17755_v57, 16  ;;  %v873_v55 = vmax.f32 %v13987_v3, 0.0  ;;  %v22181_v32 = vunpack.c.l.bf16 %v22180_v35 }
  0xf9   : > { %v1963_v43 = vrot.slane %v17753_v6, 1  ;;  %v2159_v1 = vrot.slane %v17753_v6, 2  ;;  %v2326_v46 = vmax.f32 %v17758_v29, %v17753_v6  ;;  %v17772_v33 = vmax.f32 %v2444_v45, %v17753_v6 }
  0xfa   : > { %v17776_v47 = vadd.f32 %v1262_v40, %v22181_v32  ;;  %v871_v0 = vmax.f32 %v632_v9, 0.0  ;;  %v2795_v23 = vsel %vm2767_vm6, %v2790_v19, %v2794_v28  ;;  %v2798_v21 = vor.u32 %v2796_v38, %v2794_v28  ;;  %14097 = vmatmul.mubr.msk.bf16.vlgmr.msra.gmra.mrb[64].mxu0 %vm475_vm2, %v17664_v60  ;;  %v1267_v19 = vpop.permute.xlu0 %1266  ;;  %v1272_v38 = vpop.permute.xlu1 %1271 }
  0xfb   : > { %v17769_v49 = vsel %vm1512_vm3, %v1961_v2, %v1963_v43  ;;  %v2802_v5 = vrot.slane %v2800_v51, 1  ;;  %v17779_v29 = vpack.c.bf16 %v873_v55, %v872_v16  ;;  %v2082_v8 = vmax.f32 %v17671_v4, %v17715_v20  ;;  %14100 = vmatprep.mubr.msk.bf16.mxu0 %vm475_vm2, %v2795_v23  ;;  %v13990_v55 = vpop.f32.mrb[8].mxu0 }
  0xfc   : > { %v1965_v2 = vrot.slane %v17776_v47, 1  ;;  %v17791_v40 = vsel %vm2107_vm4, %v2155_v44, %v2157_v17  ;;  %v17793_v45 = vpack.c.bf16 %v871_v0, %v870_v62  ;;  %v21835_v16 = vrot.slane %v17776_v47, 2 }
  0xfd   : > { %22182 = vst [vmem:[#allocation22_spill] sm:$0xff] %v17779_v29  ;;  %v2803_v60 = vsel %vm2767_vm6, %v2798_v21, %v2802_v5  ;;  %v2386_v3 = vmax.f32 %v2324_v12, %v17715_v20  ;;  %v17806_v44 = vmax.f32 %v2082_v8, %v17791_v40  ;;  %v2083_v62 = vmax.f32 %v17679_v10, %v17769_v49  ;;  %v645_v21 = vpop.f32.mrb[9].mxu0 }
  0xfe   : > { %22183 = vst [vmem:[#allocation20_spill] sm:$0xff] %v17793_v45  ;;  %v17803_v28 = vsel %vm1512_vm3, %v1963_v43, %v1965_v2  ;;  %v17813_v51 = vsel %vm2107_vm4, %v2157_v17, %v2159_v1  ;;  %v2387_v4 = vmax.f32 %v2325_v15, %v17769_v49  ;;  %v22184_v31 = vunpack.c.h.bf16 %v22180_v35  ;;  %v22185_v43 = vld [vmem:[#allocation3_spill] sm:$0xff]  ;;  %v13991_v15 = vpop.f32.mrb[10].mxu0 }
  0xff   : > { %v2445_v9 = vmax.f32 %v2386_v3, %v17791_v40  ;;  %v22186_v32 = vunpack.c.l.bf16 %v22185_v43  ;;  %v876_v23 = vmax.f32 %v13990_v55, 0.0  ;;  %v2327_v17 = vmax.f32 %v17806_v44, %v17776_v47  ;;  %v648_v55 = vpop.f32.mrb[11].mxu0 }
 0x100   : > { %v17822_v12 = vadd.f32 %v1267_v19, %v22184_v31  ;;  %v17831_v8 = vmax.f32 %v2083_v62, %v17813_v51  ;;  %v2084_v10 = vmax.f32 %v17753_v6, %v17803_v28  ;;  %v874_v34 = vmax.f32 %v645_v21, 0.0 }
 0x101   : > { %v17826_v0 = vadd.f32 %v1272_v38, %v22186_v32  ;;  %v17836_v35 = vmax.f32 %v2445_v9, %v17776_v47  ;;  %v2446_v19 = vmax.f32 %v2387_v4, %v17813_v51  ;;  %v877_v3 = vmax.f32 %v13991_v15, 0.0 }
 0x102   : > { %v1967_v38 = vrot.slane %v17822_v12, 1  ;;  %v2163_v31 = vrot.slane %v17822_v12, 2  ;;  %v875_v32 = vmax.f32 %v648_v55, 0.0  ;;  %v17853_v4 = vsel %vm2107_vm4, %v2159_v1, %v21835_v16  ;;  %14101 = vmatmul.mubr.msk.bf16.gmra.mrb[68].mxu0 %vm475_vm2, %v2803_v60  ;;  %v22189_v1 = vld [vmem:[#allocation21_spill] sm:$0xff] }
 0x103   : > { %v21834_v62 = vrot.slane %v17826_v0, 1  ;;  %v17848_v9 = vmax.f32 %v2446_v19, %v17822_v12  ;;  %v17855_v21 = vpack.c.bf16 %v877_v3, %v876_v23  ;;  %v17865_v55 = vmax.f32 %v2084_v10, %v17853_v4 }
 0x104   : > { %v17845_v6 = vsel %vm1512_vm3, %v1965_v2, %v1967_v38  ;;  %v17867_v19 = vpack.c.bf16 %v875_v32, %v874_v34  ;;  %v2388_v44 = vmax.f32 %v2326_v46, %v17803_v28  ;;  %v2545_v23 = vmax.f32 %v22189_v1, %v17481_v30  ;;  %v13994_v34 = vpop.f32.mrb[12].mxu0 }
 0x105   : > { %22187 = vst [vmem:[#allocation15_spill] sm:$0xff] %v17855_v21  ;;  %v17861_v15 = vsel %vm1512_vm3, %v1967_v38, %v21834_v62  ;;  %v2546_v60 = vmax.f32 %v17502_v39, %v17512_v53  ;;  %v2804_v38 = vshrl.u32 %v17755_v57, 16  ;;  %v22190_v62 = vld [vmem:[#allocation23_spill] sm:$0xff]  ;;  %v2548_v10 = vmax.f32 %v17547_v58, %v17560_v36  ;;  %v661_v1 = vpop.f32.mrb[13].mxu0  ;;  %v22203_v21 = vld [vmem:[#allocation5_spill] sm:$0xff] }
 0x106   : > { %22188 = vst [vmem:[#allocation2_spill] sm:$0xff] %v17867_v19  ;;  %v2547_v2 = vmax.f32 %v22190_v62, %v17520_v41  ;;  %v2447_v46 = vmax.f32 %v2388_v44, %v17853_v4  ;;  %v2604_v32 = vmax.f32 %v2545_v23, %v17498_v63  ;;  %v2085_v39 = vmax.f32 %v17776_v47, %v17845_v6  ;;  %v13995_v16 = vpop.f32.mrb[14].mxu0 }
 0x107   : > { %v2605_v30 = vmax.f32 %v2546_v60, %v17526_v7  ;;  %v880_v53 = vmax.f32 %v13994_v34, 0.0  ;;  %v2806_v3 = vor.u32 %v2804_v38, %v2802_v5  ;;  %v2607_v41 = vmax.f32 %v2548_v10, %v17605_v27  ;;  %v664_v36 = vpop.f32.mrb[15].mxu0  ;;  %v1277_v38 = vpop.permute.xlu0 %1276 }
 0x108   : > { %v2606_v57 = vmax.f32 %v2547_v2, %v17543_v37  ;;  %v878_v62 = vmax.f32 %v661_v1, 0.0  ;;  %v17889_v58 = vmax.f32 %v2447_v46, %v17826_v0  ;;  %vm2653_vm5 = vcmp.lt.f32.partialorder %v2604_v32, -1e+29  ;;  %v1282_v1 = vpop.permute.xlu1 %1281 }
 0x109   : > { %vm2654_vm7 = vcmp.lt.f32.partialorder %v2605_v30, -1e+29  ;;  %v881_v63 = vmax.f32 %v13995_v16, 0.0  ;;  %v2702_v7 = vsel %vm2653_vm5, 0.0, %v2604_v32  ;;  %v879_v23 = vmax.f32 %v664_v36, 0.0 }
 0x10a   : > { %v2703_v44 = vsel %vm2654_vm7, 0.0, %v2605_v30  ;;  %vm2655_vm8 = vcmp.lt.f32.partialorder %v2606_v57, -1e+29  ;;  %vm2656_vm9 = vcmp.lt.f32.partialorder %v2607_v41, -1e+29  ;;  %v22192_v2 = vrot.slane %v17776_v47, 2 }
 0x10b   : > { %v2746_v60 = vpack.c.bf16 %v2703_v44, %v2702_v7  ;;  %v2704_v5 = vsel %vm2655_vm8, 0.0, %v2606_v57  ;;  %v17891_v37 = vpack.c.bf16 %v881_v63, %v880_v53  ;;  %v2705_v27 = vsel %vm2656_vm9, 0.0, %v2607_v41  ;;  %v22195_v47 = vld [vmem:[#allocation4_spill] sm:$0xff] }
 0x10c   : > { %v17896_v10 = vsel %vm2107_vm4, %v22192_v2, %v2163_v31  ;;  %v2389_v34 = vmax.f32 %v2327_v17, %v17845_v6  ;;  %v17899_v16 = vpack.c.bf16 %v879_v23, %v878_v62  ;;  %v17901_v32 = vpack.c.bf16 %v2705_v27, %v2704_v5 }
 0x10d   : > { %22191 = vst [vmem:[#allocation3_spill] sm:$0xff] %v17891_v37  ;;  %v2808_v46 = vshll.u32 %v2746_v60, 16  ;;  %v2812_v30 = vshrl.u32 %v2746_v60, 16  ;;  %v2281_v57 = vmax.f32 %v2085_v39, %v17896_v10  ;;  %v22194_v41 = vunpack.c.h.bf16 %v22185_v43  ;;  %v13998_v39 = vpop.f32.mrb[16].mxu0  ;;  %v1292_v37 = vpop.permute.xlu1 %1291 }
 0x10e   : > { %22193 = vst [vmem:[#allocation21_spill] sm:$0xff] %v17899_v16  ;;  %v2448_v53 = vmax.f32 %v2389_v34, %v17896_v10  ;;  %v22196_v36 = vunpack.c.l.bf16 %v22195_v47  ;;  %v2816_v17 = vshll.u32 %v17901_v32, 16  ;;  %v2086_v62 = vmax.f32 %v17822_v12, %v17861_v15  ;;  %v677_v2 = vpop.f32.mrb[17].mxu0 }
 0x10f   : > { %v1429_v63 = vadd.f32 %v1277_v38, %v22194_v41  ;;  %v2810_v44 = vrot.slane %v2808_v46, 1  ;;  %v22197_v23 = vrot.slane %v17826_v0, 2  ;;  %v22198_v45 = vrot.slane %v17826_v0, 1 }
 0x110   : > { %v17909_v7 = vadd.f32 %v1282_v1, %v22196_v36  ;;  %v2818_v1 = vrot.slane %v2816_v17, 1  ;;  %v13999_v36 = vpop.f32.mrb[18].mxu0  ;;  %v884_v56 = vmax.f32 %v13998_v39, 0.0  ;;  %v22201_v39 = vmax.f32 %v17865_v55, %v17826_v0 }
 0x111   : > { %v17917_v60 = vsel %vm2107_vm4, %v2163_v31, %v22197_v23  ;;  %v1971_v5 = vrot.slane %v1429_v63, 1  ;;  %v2167_v27 = vrot.slane %v1429_v63, 2  ;;  %v2330_v43 = vmax.f32 %v2281_v57, %v1429_v63 }
 0x112   : > { %v17919_v38 = vmax.f32 %v2448_v53, %v1429_v63  ;;  %v2811_v34 = vsel %vm2767_vm6, %v2806_v3, %v2810_v44  ;;  %v2814_v46 = vor.u32 %v2812_v30, %v2810_v44  ;;  %v1973_v41 = vrot.slane %v17909_v7, 1  ;;  %v1287_v53 = vpop.permute.xlu0 %1286  ;;  %v680_v44 = vpop.f32.mrb[19].mxu0 }
 0x113   : > { %14104 = vmatprep.mubr.msk.bf16.mxu0 %vm475_vm2, %v2811_v34  ;;  %v17927_v31 = vsel %vm1512_vm3, %v22198_v45, %v1971_v5  ;;  %v2169_v23 = vrot.slane %v17909_v7, 2  ;;  %v17931_v57 = vmax.f32 %v2086_v62, %v17917_v60  ;;  %v22199_v3 = vmax.f32 %v17831_v8, %v17822_v12 }
 0x114   : > { %v2819_v17 = vsel %vm2767_vm6, %v2814_v46, %v2818_v1  ;;  %v17939_v34 = vsel %vm1512_vm3, %v1971_v5, %v1973_v41  ;;  %v882_v45 = vmax.f32 %v677_v2, 0.0  ;;  %v2087_v12 = vmax.f32 %v17826_v0, %v17927_v31 }
 0x115   : > { %v2390_v30 = vmax.f32 %v22199_v3, %v17861_v15  ;;  %14105 = vmatmul.mubr.msk.bf16.gmra.mrb[72].mxu0 %vm475_vm2, %v2819_v17  ;;  %v2331_v62 = vmax.f32 %v17931_v57, %v17909_v7  ;;  %v22200_v8 = vrot.slane %v17826_v0, 2  ;;  %v2391_v5 = vmax.f32 %v22201_v39, %v17927_v31 }
 0x116   : > { %v22202_v2 = vunpack.c.h.bf16 %v22195_v47  ;;  %v885_v57 = vmax.f32 %v13999_v36, 0.0  ;;  %v883_v17 = vmax.f32 %v680_v44, 0.0  ;;  %v2088_v29 = vmax.f32 %v1429_v63, %v17939_v34 }
 0x117   : > { %v2449_v48 = vmax.f32 %v2390_v30, %v17917_v60  ;;  %v17950_v46 = vsel %vm2107_vm4, %v22200_v8, %v2167_v27  ;;  %v22204_v8 = vunpack.c.l.bf16 %v22203_v21 }
 0x118   : > { %v17958_v3 = vadd.f32 %v1287_v53, %v22202_v2  ;;  %v17964_v16 = vmax.f32 %v2087_v12, %v17950_v46  ;;  %v2450_v0 = vmax.f32 %v2391_v5, %v17950_v46  ;;  %v17974_v36 = vpack.c.bf16 %v885_v57, %v884_v56  ;;  %v17976_v53 = vpop.f32.mrb[20].mxu0 }
 0x119   : > { %v17961_v30 = vmax.f32 %v2449_v48, %v17909_v7  ;;  %v17968_v19 = vadd.f32 %v1292_v37, %v22204_v8  ;;  %v17980_v44 = vpack.c.bf16 %v883_v17, %v882_v45  ;;  %v17984_v12 = vsel %vm2107_vm4, %v2167_v27, %v2169_v23  ;;  %v17986_v63 = vpop.f32.mrb[21].mxu0 }
 0x11a   : > { %v1975_v55 = vrot.slane %v17958_v3, 1  ;;  %v2171_v47 = vrot.slane %v17958_v3, 2  ;;  %22205 = vst [vmem:[#allocation23_spill] sm:$0xff] %v17974_v36  ;;  %v17992_v56 = vmax.f32 %v2450_v0, %v17958_v3  ;;  %v17996_v2 = vmax.f32 %v2088_v29, %v17984_v12  ;;  %v17998_v45 = vpop.f32.mrb[22].mxu0 }
 0x11b   : > { %22206 = vst [vmem:[#allocation4_spill] sm:$0xff] %v17980_v44  ;;  %v1977_v37 = vrot.slane %v17968_v19, 1  ;;  %v2392_v27 = vmax.f32 %v2330_v43, %v17939_v34  ;;  %v2549_v17 = vmax.f32 %v17563_v24, %v17571_v42  ;;  %v18008_v8 = vpop.f32.mrb[23].mxu0  ;;  %v2820_v29 = vshrl.u32 %v17901_v32, 16 }
 0x11c   : > { %v17989_v39 = vsel %vm1512_vm3, %v1973_v41, %v1975_v55  ;;  %v2550_v41 = vmax.f32 %v17582_v11, %v17631_v22  ;;  %v2551_v48 = vmax.f32 %v17625_v14, %v17642_v52  ;;  %v18025_v5 = vsel %vm2107_vm4, %v2169_v23, %v2171_v47  ;;  %v1297_v52 = vpop.permute.xlu0 %1296  ;;  %v18034_v23 = vpop.f32.mrb[24].mxu0 }
 0x11d   : > { %v18001_v57 = vsel %vm1512_vm3, %v1975_v55, %v1977_v37  ;;  %v2552_v55 = vmax.f32 %v17685_v50, %v17704_v61  ;;  %v2451_v43 = vmax.f32 %v2392_v27, %v17984_v12  ;;  %v2608_v24 = vmax.f32 %v2549_v17, %v17638_v18 }
 0x11e   : > { %v2609_v42 = vmax.f32 %v2550_v41, %v17657_v26  ;;  %v2089_v11 = vmax.f32 %v17909_v7, %v17989_v39  ;;  %v2822_v22 = vor.u32 %v2820_v29, %v2818_v1  ;;  %v2610_v0 = vmax.f32 %v2551_v48, %v17692_v25  ;;  %v1302_v1 = vpop.permute.xlu1 %1301  ;;  %v22209_v41 = vld [vmem:[#allocation6_spill] sm:$0xff] }
 0x11f   : > { %v2611_v32 = vmax.f32 %v2552_v55, %v17748_v54  ;;  %v18028_v14 = vmax.f32 %v2451_v43, %v17968_v19  ;;  %vm2657_vm10 = vcmp.lt.f32.partialorder %v2608_v24, -1e+29  ;;  %v2393_v54 = vmax.f32 %v2331_v62, %v17989_v39 }
 0x120   : > { %vm2658_vm11 = vcmp.lt.f32.partialorder %v2609_v42, -1e+29  ;;  %v18031_v18 = vmax.f32 %v2089_v11, %v18025_v5  ;;  %v2706_v26 = vsel %vm2657_vm10, 0.0, %v2608_v24  ;;  %vm2659_vm12 = vcmp.lt.f32.partialorder %v2610_v0, -1e+29  ;;  %v18046_v24 = vpop.f32.mrb[25].mxu0  ;;  %v1307_v44 = vpop.permute.xlu0 %1306 }
 0x121   : > { %22207 = vst [vmem:[#allocation5_spill] sm:$0xff] %v18028_v14  ;;  %v2707_v50 = vsel %vm2658_vm11, 0.0, %v2609_v42  ;;  %vm2660_vm13 = vcmp.lt.f32.partialorder %v2611_v32, -1e+29  ;;  %v2708_v25 = vsel %vm2659_vm12, 0.0, %v2610_v0  ;;  %v22208_v27 = vunpack.c.h.bf16 %v22203_v21  ;;  %v18054_v21 = vpop.f32.mrb[26].mxu0 }
 0x122   : > { %v2748_v61 = vpack.c.bf16 %v2707_v50, %v2706_v26  ;;  %v2709_v7 = vsel %vm2660_vm13, 0.0, %v2611_v32  ;;  %v22210_v29 = vunpack.c.l.bf16 %v22209_v41  ;;  %v2090_v43 = vmax.f32 %v17958_v3, %v18001_v57 }
 0x123   : > { %v18036_v48 = vpack.c.bf16 %v2709_v7, %v2708_v25  ;;  %v1433_v17 = vadd.f32 %v1297_v52, %v22208_v27  ;;  %v2452_v62 = vmax.f32 %v2393_v54, %v18025_v5  ;;  %v22211_v11 = vrot.slane %v17968_v19, 2  ;;  %v18058_v7 = vpop.f32.mrb[27].mxu0 }
 0x124   : > { %v18042_v55 = vadd.f32 %v1302_v1, %v22210_v29  ;;  %v2824_v0 = vshll.u32 %v2748_v61, 16  ;;  %v2828_v42 = vshrl.u32 %v2748_v61, 16  ;;  %v886_v54 = vmax.f32 %v17986_v63, 0.0 }
 0x125   : > { %v18052_v32 = vsel %vm2107_vm4, %v2171_v47, %v22211_v11  ;;  %v2832_v52 = vshll.u32 %v18036_v48, 16  ;;  %v1979_v26 = vrot.slane %v1433_v17, 1  ;;  %v2175_v50 = vrot.slane %v1433_v17, 2 }
 0x126   : > { %22212 = vst [vmem:[#allocation6_spill] sm:$0xff] %v18052_v32  ;;  %v2334_v25 = vmax.f32 %v18031_v18, %v1433_v17  ;;  %v2826_v1 = vrot.slane %v2824_v0, 1  ;;  %v18060_v27 = vmax.f32 %v2452_v62, %v1433_v17  ;;  %v1981_v61 = vrot.slane %v18042_v55, 1 }
 0x127   : > { %v2834_v29 = vrot.slane %v2832_v52, 1  ;;  %v18065_v47 = vsel %vm1512_vm3, %v1977_v37, %v1979_v26  ;;  %v18068_v11 = vmax.f32 %v2090_v43, %v18052_v32  ;;  %v22214_v18 = vmax.f32 %v17964_v16, %v17958_v3  ;;  %v1312_v3 = vpop.permute.xlu1 %1311 }
 0x128   : > { %22213 = vst [vmem:[#allocation24_spill] sm:$0xff] %v18060_v27  ;;  %v2827_v0 = vsel %vm2767_vm6, %v2822_v22, %v2826_v1  ;;  %v2830_v62 = vor.u32 %v2828_v42, %v2826_v1  ;;  %v18076_v27 = vsel %vm1512_vm3, %v1979_v26, %v1981_v61  ;;  %v888_v52 = vmax.f32 %v17976_v53, 0.0  ;;  %v18086_v22 = vpop.f32.mrb[28].mxu0 }
 0x129   : > { %v2394_v36 = vmax.f32 %v22214_v18, %v18001_v57  ;;  %14108 = vmatprep.mubr.msk.bf16.mxu0 %vm475_vm2, %v2827_v0  ;;  %v2335_v37 = vmax.f32 %v18068_v11, %v18042_v55  ;;  %v2091_v16 = vmax.f32 %v17968_v19, %v18065_v47  ;;  %v22215_v26 = vrot.slane %v17968_v19, 2  ;;  %v18102_v18 = vpop.f32.mrb[29].mxu0 }
 0x12a   : > { %v2835_v42 = vsel %vm2767_vm6, %v2830_v62, %v2834_v29  ;;  %v22217_v1 = vmax.f32 %v17996_v2, %v17968_v19  ;;  %v22218_v63 = vunpack.c.h.bf16 %v22209_v41  ;;  %v18113_v19 = vpop.f32.mrb[30].mxu0 }
 0x12b   : > { %v2453_v43 = vmax.f32 %v2394_v36, %v18052_v32  ;;  %v18092_v53 = vsel %vm2107_vm4, %v22215_v26, %v2175_v50  ;;  %14109 = vmatmul.mubr.msk.bf16.gmra.mrb[76].mxu0 %vm475_vm2, %v2835_v42  ;;  %v889_v26 = vmax.f32 %v17998_v45, 0.0  ;;  %v887_v32 = vmax.f32 %v18008_v8, 0.0 }
 0x12c   : > { %22216 = vst [vmem:[#allocation25_spill] sm:$0xff] %v18092_v53  ;;  %v2395_v36 = vmax.f32 %v22217_v1, %v18065_v47  ;;  %v18100_v11 = vadd.f32 %v1307_v44, %v22218_v63  ;;  %v18109_v62 = vmax.f32 %v2091_v16, %v18092_v53  ;;  %v22220_v1 = vld [vmem:[#allocation7_spill] sm:$0xff] }
 0x12d   : > { %v18106_v0 = vmax.f32 %v2453_v43, %v18042_v55  ;;  %v22221_v42 = vunpack.c.l.bf16 %v22220_v1  ;;  %v18122_v43 = vpop.f32.mrb[31].mxu0  ;;  %v18126_v45 = vpack.c.bf16 %v889_v26, %v888_v52  ;;  %v18128_v8 = vpack.c.bf16 %v887_v32, %v886_v54 }
 0x12e   : > { %v2454_v2 = vmax.f32 %v2395_v36, %v18092_v53  ;;  %v1983_v44 = vrot.slane %v18100_v11, 1  ;;  %v2179_v41 = vrot.slane %v18100_v11, 2  ;;  %v2554_v26 = vmax.f32 %v17730_v59, %v17769_v49 }
 0x12f   : > { %22219 = vst [vmem:[#allocation26_spill] sm:$0xff] %v18106_v0  ;;  %v18120_v63 = vadd.f32 %v1312_v3, %v22221_v42  ;;  %22222 = vst [vmem:[#allocation7_spill] sm:$0xff] %v18126_v45  ;;  %v2092_v0 = vmax.f32 %v1433_v17, %v18076_v27  ;;  %v22224_v42 = vrot.slane %v18042_v55, 2  ;;  %v2396_v17 = vmax.f32 %v2334_v25, %v18076_v27 }
 0x130   : > { %22223 = vst [vmem:[#allocation27_spill] sm:$0xff] %v18128_v8  ;;  %v18132_v36 = vsel %vm1512_vm3, %v1981_v61, %v1983_v44  ;;  %v18135_v53 = vmax.f32 %v2454_v2, %v18100_v11  ;;  %v2553_v61 = vmax.f32 %v17699_v13, %v17715_v20  ;;  %v2836_v2 = vshrl.u32 %v18036_v48, 16  ;;  %v18164_v20 = vpop.f32.mrb[32].mxu0 }
 0x131   : > { %v1985_v3 = vrot.slane %v18120_v63, 1  ;;  %v18141_v14 = vsel %vm2107_vm4, %v2175_v50, %v22224_v42  ;;  %v2555_v50 = vmax.f32 %v17772_v33, %v17803_v28  ;;  %v2556_v13 = vmax.f32 %v17836_v35, %v17845_v6  ;;  %v18170_v28 = vpop.f32.mrb[33].mxu0 }
 0x132   : > { %v18145_v32 = vmax.f32 %v2092_v0, %v18141_v14  ;;  %v2455_v42 = vmax.f32 %v2396_v17, %v18141_v14  ;;  %v2612_v25 = vmax.f32 %v2553_v61, %v17791_v40  ;;  %v2838_v59 = vor.u32 %v2836_v2, %v2834_v29  ;;  %v18181_v29 = vpop.f32.mrb[34].mxu0  ;;  %v22227_v0 = vld [vmem:[#allocation8_spill] sm:$0xff] }
 0x133   : > { %v18151_v54 = vsel %vm1512_vm3, %v1983_v44, %v1985_v3  ;;  %v2613_v44 = vmax.f32 %v2554_v26, %v17813_v51  ;;  %v2614_v49 = vmax.f32 %v2555_v50, %v17853_v4  ;;  %v2093_v33 = vmax.f32 %v18042_v55, %v18132_v36  ;;  %v1317_v51 = vpop.permute.xlu0 %1316  ;;  %v18186_v61 = vpop.f32.mrb[35].mxu0 }
 0x134   : > { %v18173_v48 = vmax.f32 %v2455_v42, %v18120_v63  ;;  %vm2661_vm14 = vcmp.lt.f32.partialorder %v2612_v25, -1e+29  ;;  %v2615_v40 = vmax.f32 %v2556_v13, %v17896_v10  ;;  %v22225_v35 = vrot.slane %v18042_v55, 2  ;;  %v1322_v55 = vpop.permute.xlu1 %1321 }
 0x135   : > { %vm2662_vm15 = vcmp.lt.f32.partialorder %v2613_v44, -1e+29  ;;  %v2710_v4 = vsel %vm2661_vm14, 0.0, %v2612_v25  ;;  %vm2663_vm5 = vcmp.lt.f32.partialorder %v2614_v49, -1e+29  ;;  %v2397_v10 = vmax.f32 %v2335_v37, %v18132_v36 }
 0x136   : > { %v18179_v6 = vsel %vm2107_vm4, %v22225_v35, %v2179_v41  ;;  %v2711_v26 = vsel %vm2662_vm15, 0.0, %v2613_v44  ;;  %vm2664_vm7 = vcmp.lt.f32.partialorder %v2615_v40, -1e+29  ;;  %v2712_v2 = vsel %vm2663_vm5, 0.0, %v2614_v49 }
 0x137   : > { %v18184_v17 = vmax.f32 %v2093_v33, %v18179_v6  ;;  %v2750_v50 = vpack.c.bf16 %v2711_v26, %v2710_v4  ;;  %v2713_v42 = vsel %vm2664_vm7, 0.0, %v2615_v40  ;;  %v22226_v13 = vunpack.c.h.bf16 %v22220_v1 }
 0x138   : > { %v22228_v16 = vunpack.c.l.bf16 %v22227_v0  ;;  %v18195_v52 = vpack.c.bf16 %v2713_v42, %v2712_v2  ;;  %v2456_v33 = vmax.f32 %v2397_v10, %v18179_v6  ;;  %v2094_v44 = vmax.f32 %v18100_v11, %v18151_v54 }
 0x139   : > { %v1437_v35 = vadd.f32 %v1317_v51, %v22226_v13  ;;  %v22229_v49 = vrot.slane %v18120_v63, 2  ;;  %v2840_v40 = vshll.u32 %v2750_v50, 16  ;;  %v2844_v4 = vshrl.u32 %v2750_v50, 16 }
 0x13a   : > { %v18193_v25 = vadd.f32 %v1322_v55, %v22228_v16  ;;  %v2848_v26 = vshll.u32 %v18195_v52, 16  ;;  %v18210_v55 = vpop.f32.mrb[36].mxu0 }
 0x13b   : > { %v18203_v37 = vsel %vm2107_vm4, %v2179_v41, %v22229_v49  ;;  %v1987_v1 = vrot.slane %v1437_v35, 1  ;;  %v2183_v51 = vrot.slane %v1437_v35, 2  ;;  %v2338_v16 = vmax.f32 %v18184_v17, %v1437_v35  ;;  %22231 = vst [vmem:[#allocation28_spill] sm:$0xff] %v18210_v55  ;;  %v18219_v49 = vpop.f32.mrb[37].mxu0 }
 0x13c   : > { %v18207_v2 = vmax.f32 %v2456_v33, %v1437_v35  ;;  %v1989_v10 = vrot.slane %v18193_v25, 1  ;;  %v2842_v42 = vrot.slane %v2840_v40, 1  ;;  %v18217_v50 = vmax.f32 %v2094_v44, %v18203_v37  ;;  %22232 = vst [vmem:[#allocation29_spill] sm:$0xff] %v18219_v49  ;;  %v18229_v55 = vpop.f32.mrb[38].mxu0 }
 0x13d   : > { %v18213_v13 = vsel %vm1512_vm3, %v1985_v3, %v1987_v1  ;;  %v2850_v45 = vrot.slane %v2848_v26, 1  ;;  %v22233_v33 = vmax.f32 %v18109_v62, %v18100_v11  ;;  %v892_v40 = vmax.f32 %v18034_v23, 0.0  ;;  %v1327_v3 = vpop.permute.xlu0 %1326 }
 0x13e   : > { %22230 = vst [vmem:[#allocation8_spill] sm:$0xff] %v18207_v2  ;;  %v18222_v17 = vsel %vm1512_vm3, %v1987_v1, %v1989_v10  ;;  %v2843_v41 = vsel %vm2767_vm6, %v2838_v59, %v2842_v42  ;;  %v2846_v44 = vor.u32 %v2844_v4, %v2842_v42  ;;  %v2339_v49 = vmax.f32 %v18217_v50, %v18193_v25  ;;  %v1332_v1 = vpop.permute.xlu1 %1331  ;;  %v18235_v2 = vpop.f32.mrb[39].mxu0 }
 0x13f   : > { %v2398_v8 = vmax.f32 %v22233_v33, %v18151_v54  ;;  %v890_v26 = vmax.f32 %v18046_v24, 0.0  ;;  %22234 = vst [vmem:[#allocation30_spill] sm:$0xff] %v18235_v2  ;;  %14112 = vmatprep.mubr.msk.bf16.mxu0 %vm475_vm2, %v2843_v41  ;;  %v2095_v23 = vmax.f32 %v18120_v63, %v18213_v13  ;;  %v22235_v62 = vrot.slane %v18120_v63, 2 }
 0x140   : > { %v22236_v4 = vmax.f32 %v18145_v32, %v18120_v63  ;;  %v2851_v42 = vsel %vm2767_vm6, %v2846_v44, %v2850_v45  ;;  %v22237_v50 = vunpack.c.h.bf16 %v22227_v0  ;;  %v891_v33 = vmax.f32 %v18058_v7, 0.0  ;;  %v22238_v32 = vld [vmem:[#allocation9_spill] sm:$0xff] }
 0x141   : > { %v2457_v11 = vmax.f32 %v2398_v8, %v18203_v37  ;;  %v18244_v59 = vsel %vm2107_vm4, %v22235_v62, %v2183_v51  ;;  %v893_v8 = vmax.f32 %v18054_v21, 0.0  ;;  %14113 = vmatmul.mubr.msk.bf16.gmra.mrb[80].mxu0 %vm475_vm2, %v2851_v42  ;;  %v22239_v44 = vunpack.c.l.bf16 %v22238_v32 }
 0x142   : > { %v2399_v24 = vmax.f32 %v22236_v4, %v18213_v13  ;;  %v18253_v41 = vadd.f32 %v1327_v3, %v22237_v50  ;;  %v18262_v2 = vmax.f32 %v2095_v23, %v18244_v59  ;;  %v18273_v7 = vpack.c.bf16 %v891_v33, %v890_v26 }
 0x143   : > { %v18259_v62 = vmax.f32 %v2457_v11, %v18193_v25  ;;  %v18267_v4 = vadd.f32 %v1332_v1, %v22239_v44  ;;  %v18271_v3 = vpack.c.bf16 %v893_v8, %v892_v40  ;;  %v2096_v42 = vmax.f32 %v1437_v35, %v18222_v17  ;;  %v18282_v1 = vpop.f32.mrb[40].mxu0 }
 0x144   : > { %v2458_v63 = vmax.f32 %v2399_v24, %v18244_v59  ;;  %v1991_v0 = vrot.slane %v18253_v41, 1  ;;  %v2187_v21 = vrot.slane %v18253_v41, 2  ;;  %22241 = vst [vmem:[#allocation31_spill] sm:$0xff] %v18273_v7  ;;  %v22242_v40 = vrot.slane %v18193_v25, 2 }
 0x145   : > { %22240 = vst [vmem:[#allocation9_spill] sm:$0xff] %v18271_v3  ;;  %v1993_v24 = vrot.slane %v18267_v4, 1  ;;  %v2400_v33 = vmax.f32 %v2338_v16, %v18222_v17  ;;  %v2558_v11 = vmax.f32 %v17889_v58, %v17927_v31  ;;  %v2852_v16 = vshrl.u32 %v18195_v52, 16 }
 0x146   : > { %v18278_v23 = vmax.f32 %v2458_v63, %v18253_v41  ;;  %v18285_v50 = vsel %vm1512_vm3, %v1989_v10, %v1991_v0  ;;  %v18290_v26 = vsel %vm2107_vm4, %v2183_v51, %v22242_v40  ;;  %v18294_v63 = vpop.f32.mrb[41].mxu0  ;;  %v2557_v10 = vmax.f32 %v17848_v9, %v17861_v15 }
 0x147   : > { %v18297_v44 = vsel %vm1512_vm3, %v1991_v0, %v1993_v24  ;;  %v18300_v35 = vmax.f32 %v2096_v42, %v18290_v26  ;;  %v18306_v51 = vpop.f32.mrb[42].mxu0  ;;  %v2459_v40 = vmax.f32 %v2400_v33, %v18290_v26  ;;  %v2559_v8 = vmax.f32 %v17919_v38, %v17939_v34 }
 0x148   : > { %22243 = vst [vmem:[#allocation32_spill] sm:$0xff] %v18306_v51  ;;  %v2560_v0 = vmax.f32 %v17961_v30, %v17989_v39  ;;  %v18314_v42 = vpop.f32.mrb[43].mxu0  ;;  %v2616_v15 = vmax.f32 %v2557_v10, %v17917_v60  ;;  %v2617_v58 = vmax.f32 %v2558_v11, %v17950_v46  ;;  %v2097_v31 = vmax.f32 %v18193_v25, %v18285_v50  ;;  %v1337_v46 = vpop.permute.xlu0 %1336 }
 0x149   : > { %22244 = vst [vmem:[#allocation33_spill] sm:$0xff] %v18314_v42  ;;  %v2341_v9 = vmax.f32 %v18300_v35, %v18267_v4  ;;  %v18323_v52 = vmax.f32 %v2459_v40, %v18267_v4  ;;  %v2854_v33 = vor.u32 %v2852_v16, %v2850_v45  ;;  %v2618_v38 = vmax.f32 %v2559_v8, %v17984_v12  ;;  %v18336_v8 = vpop.f32.mrb[44].mxu0 }
 0x14a   : > { %v2619_v34 = vmax.f32 %v2560_v0, %v18025_v5  ;;  %vm2665_vm8 = vcmp.lt.f32.partialorder %v2616_v15, -1e+29  ;;  %vm2666_vm9 = vcmp.lt.f32.partialorder %v2617_v58, -1e+29  ;;  %v22245_v30 = vrot.slane %v18193_v25, 2  ;;  %v1342_v5 = vpop.permute.xlu1 %1341  ;;  %22246 = vst [vmem:[#allocation34_spill] sm:$0xff] %v18336_v8 }
 0x14b   : > { %v2401_v60 = vmax.f32 %v2339_v49, %v18285_v50  ;;  %v2714_v11 = vsel %vm2665_vm8, 0.0, %v2616_v15  ;;  %v2715_v35 = vsel %vm2666_vm9, 0.0, %v2617_v58  ;;  %vm2667_vm10 = vcmp.lt.f32.partialorder %v2618_v38, -1e+29  ;;  %v22248_v15 = vld [vmem:[#allocation10_spill] sm:$0xff] }
 0x14c   : > { %v18330_v39 = vsel %vm2107_vm4, %v22245_v30, %v2187_v21  ;;  %vm2668_vm11 = vcmp.lt.f32.partialorder %v2619_v34, -1e+29  ;;  %v2752_v10 = vpack.c.bf16 %v2715_v35, %v2714_v11  ;;  %v2716_v45 = vsel %vm2667_vm10, 0.0, %v2618_v38  ;;  %v18347_v11 = vpop.f32.mrb[45].mxu0 }
 0x14d   : > { %v2717_v40 = vsel %vm2668_vm11, 0.0, %v2619_v34  ;;  %v18334_v12 = vmax.f32 %v2097_v31, %v18330_v39  ;;  %v2460_v16 = vmax.f32 %v2401_v60, %v18330_v39  ;;  %v22247_v49 = vunpack.c.h.bf16 %v22238_v32  ;;  %22250 = vst [vmem:[#allocation10_spill] sm:$0xff] %v18347_v11  ;;  %v18356_v60 = vpop.f32.mrb[46].mxu0 }
 0x14e   : > { %v18338_v25 = vpack.c.bf16 %v2717_v40, %v2716_v45  ;;  %v22249_v58 = vunpack.c.l.bf16 %v22248_v15  ;;  %v2856_v38 = vshll.u32 %v2752_v10, 16  ;;  %v2860_v34 = vshrl.u32 %v2752_v10, 16  ;;  %22252 = vst [vmem:[#allocation35_spill] sm:$0xff] %v18356_v60 }
 0x14f   : > { %v1441_v0 = vadd.f32 %v1337_v46, %v22247_v49  ;;  %v2098_v31 = vmax.f32 %v18253_v41, %v18297_v44  ;;  %v22251_v35 = vrot.slane %v18267_v4, 2  ;;  %v18360_v49 = vpop.f32.mrb[47].mxu0  ;;  %v894_v42 = vmax.f32 %v18102_v18, 0.0 }
 0x150   : > { %v18345_v30 = vadd.f32 %v1342_v5, %v22249_v58  ;;  %v2864_v32 = vshll.u32 %v18338_v25, 16  ;;  %22253 = vst [vmem:[#allocation36_spill] sm:$0xff] %v18360_v49  ;;  %v2858_v58 = vrot.slane %v2856_v38, 1  ;;  %v1347_v49 = vpop.permute.xlu0 %1346 }
 0x151   : > { %v18354_v45 = vsel %vm2107_vm4, %v2187_v21, %v22251_v35  ;;  %v1995_v46 = vrot.slane %v1441_v0, 1  ;;  %v2191_v40 = vrot.slane %v1441_v0, 2  ;;  %v2342_v5 = vmax.f32 %v18334_v12, %v1441_v0 }
 0x152   : > { %v18362_v10 = vmax.f32 %v2460_v16, %v1441_v0  ;;  %v1997_v3 = vrot.slane %v18345_v30, 1  ;;  %v2193_v7 = vrot.slane %v18345_v30, 2  ;;  %v2866_v11 = vrot.slane %v2864_v32, 1 }
 0x153   : > { %v18367_v21 = vsel %vm1512_vm3, %v1993_v24, %v1995_v46  ;;  %v18370_v35 = vmax.f32 %v2098_v31, %v18354_v45  ;;  %v22254_v12 = vmax.f32 %v18262_v2, %v18253_v41  ;;  %v2859_v16 = vsel %vm2767_vm6, %v2854_v33, %v2858_v58  ;;  %v1352_v41 = vpop.permute.xlu1 %1351 }
 0x154   : > { %v2862_v38 = vor.u32 %v2860_v34, %v2858_v58  ;;  %v18378_v8 = vsel %vm1512_vm3, %v1995_v46, %v1997_v3  ;;  %v896_v32 = vmax.f32 %v18086_v22, 0.0  ;;  %14116 = vmatprep.mubr.msk.bf16.mxu0 %vm475_vm2, %v2859_v16  ;;  %v2099_v2 = vmax.f32 %v18267_v4, %v18367_v21 }
 0x155   : > { %v2402_v60 = vmax.f32 %v22254_v12, %v18297_v44  ;;  %v2343_v24 = vmax.f32 %v18370_v35, %v18345_v30  ;;  %v22255_v34 = vrot.slane %v18267_v4, 2  ;;  %v2403_v22 = vmax.f32 %v2341_v9, %v18367_v21 }
 0x156   : > { %v2867_v33 = vsel %vm2767_vm6, %v2862_v38, %v2866_v11  ;;  %v22256_v58 = vunpack.c.h.bf16 %v22248_v15  ;;  %v897_v4 = vmax.f32 %v18113_v19, 0.0  ;;  %v895_v16 = vmax.f32 %v18122_v43, 0.0 }
 0x157   : > { %v2461_v31 = vmax.f32 %v2402_v60, %v18354_v45  ;;  %v18392_v46 = vsel %vm2107_vm4, %v22255_v34, %v2191_v40  ;;  %v18399_v60 = vpop.f32.mrb[48].mxu0  ;;  %14117 = vmatmul.mubr.msk.bf16.gmra.mrb[84].mxu0 %vm475_vm2, %v2867_v33  ;;  %v22259_v34 = vld [vmem:[#allocation11_spill] sm:$0xff] }
 0x158   : > { %v18397_v35 = vadd.f32 %v1347_v49, %v22256_v58  ;;  %22257 = vst [vmem:[#allocation37_spill] sm:$0xff] %v18399_v60  ;;  %v18406_v12 = vmax.f32 %v2099_v2, %v18392_v46  ;;  %v18410_v38 = vpop.f32.mrb[49].mxu0  ;;  %v2462_v9 = vmax.f32 %v2403_v22, %v18392_v46  ;;  %v22260_v33 = vunpack.c.l.bf16 %v22259_v34 }
 0x159   : > { %v18403_v18 = vmax.f32 %v2461_v31, %v18345_v30  ;;  %22258 = vst [vmem:[#allocation38_spill] sm:$0xff] %v18410_v38  ;;  %v18419_v31 = vpop.f32.mrb[50].mxu0  ;;  %v18423_v19 = vpack.c.bf16 %v897_v4, %v896_v32  ;;  %v18425_v43 = vpack.c.bf16 %v895_v16, %v894_v42  ;;  %v2100_v38 = vmax.f32 %v1441_v0, %v18378_v8  ;;  %v22265_v16 = vld [vmem:[#allocation5_spill] sm:$0xff] }
 0x15a   : > { %v1999_v15 = vrot.slane %v18397_v35, 1  ;;  %v2195_v49 = vrot.slane %v18397_v35, 2  ;;  %v18417_v58 = vadd.f32 %v1352_v41, %v22260_v33  ;;  %22261 = vst [vmem:[#allocation11_spill] sm:$0xff] %v18419_v31  ;;  %v18428_v22 = vpop.f32.mrb[51].mxu0  ;;  %v18434_v51 = vmax.f32 %v2462_v9, %v18397_v35 }
 0x15b   : > { %22262 = vst [vmem:[#allocation39_spill] sm:$0xff] %v18423_v19  ;;  %22263 = vst [vmem:[#allocation40_spill] sm:$0xff] %v18425_v43  ;;  %v18438_v33 = vsel %vm2107_vm4, %v2191_v40, %v2193_v7  ;;  %v2404_v0 = vmax.f32 %v2342_v5, %v18378_v8  ;;  %v2561_v4 = vmax.f32 %v17992_v56, %v18001_v57  ;;  %v2868_v2 = vshrl.u32 %v18338_v25, 16  ;;  %v22266_v40 = vld [vmem:[#allocation24_spill] sm:$0xff]  ;;  %v22267_v5 = vld [vmem:[#allocation6_spill] sm:$0xff] }
 0x15c   : > { %22264 = vst [vmem:[#allocation41_spill] sm:$0xff] %v18428_v22  ;;  %v18431_v60 = vsel %vm1512_vm3, %v1997_v3, %v1999_v15  ;;  %v2001_v41 = vrot.slane %v18417_v58, 1  ;;  %v18442_v42 = vmax.f32 %v2100_v38, %v18438_v33  ;;  %v2562_v9 = vmax.f32 %v22265_v16, %v18065_v47  ;;  %v22268_v56 = vld [vmem:[#allocation26_spill] sm:$0xff]  ;;  %v18465_v16 = vpop.f32.mrb[52].mxu0 }
 0x15d   : > { %v2563_v19 = vmax.f32 %v22266_v40, %v18076_v27  ;;  %v2463_v32 = vmax.f32 %v2404_v0, %v18438_v33  ;;  %v2620_v43 = vmax.f32 %v2561_v4, %v22267_v5  ;;  %v2564_v57 = vmax.f32 %v22268_v56, %v18132_v36  ;;  %v1357_v36 = vpop.permute.xlu0 %1356  ;;  %v18474_v4 = vpop.f32.mrb[53].mxu0 }
 0x15e   : > { %v18448_v3 = vsel %vm1512_vm3, %v1999_v15, %v2001_v41  ;;  %v2345_v38 = vmax.f32 %v18442_v42, %v18417_v58  ;;  %v22269_v15 = vld [vmem:[#allocation25_spill] sm:$0xff]  ;;  %v2870_v31 = vor.u32 %v2868_v2, %v2866_v11  ;;  %v2101_v25 = vmax.f32 %v18345_v30, %v18431_v60  ;;  %22270 = vst [vmem:[#allocation5_spill] sm:$0xff] %v18474_v4  ;;  %v18479_v30 = vpop.f32.mrb[54].mxu0 }
 0x15f   : > { %v2621_v22 = vmax.f32 %v2562_v9, %v22269_v15  ;;  %v2622_v47 = vmax.f32 %v2563_v19, %v18141_v14  ;;  %v18468_v27 = vmax.f32 %v2463_v32, %v18417_v58  ;;  %vm2669_vm12 = vcmp.lt.f32.partialorder %v2620_v43, -1e+29  ;;  %22271 = vst [vmem:[#allocation24_spill] sm:$0xff] %v18479_v30  ;;  %v18482_v9 = vpop.f32.mrb[55].mxu0 }
 0x160   : > { %v2623_v42 = vmax.f32 %v2564_v57, %v18179_v6  ;;  %v18472_v0 = vsel %vm2107_vm4, %v2193_v7, %v2195_v49  ;;  %v2718_v11 = vsel %vm2669_vm12, 0.0, %v2620_v43  ;;  %v2405_v32 = vmax.f32 %v2343_v24, %v18431_v60  ;;  %v1362_v6 = vpop.permute.xlu1 %1361  ;;  %22272 = vst [vmem:[#allocation6_spill] sm:$0xff] %v18482_v9  ;;  %v22274_v43 = vld [vmem:[#allocation12_spill] sm:$0xff]  ;;  %v18518_v9 = vpop.f32.mrb[56].mxu0 }
 0x161   : > { %vm2670_vm13 = vcmp.lt.f32.partialorder %v2621_v22, -1e+29  ;;  %vm2671_vm14 = vcmp.lt.f32.partialorder %v2622_v47, -1e+29  ;;  %v18477_v14 = vmax.f32 %v2101_v25, %v18472_v0  ;;  %v22273_v5 = vunpack.c.h.bf16 %v22259_v34  ;;  %22277 = vst [vmem:[#allocation26_spill] sm:$0xff] %v18518_v9 }
 0x162   : > { %v2719_v2 = vsel %vm2670_vm13, 0.0, %v2621_v22  ;;  %vm2672_vm15 = vcmp.lt.f32.partialorder %v2623_v42, -1e+29  ;;  %v2720_v19 = vsel %vm2671_vm14, 0.0, %v2622_v47  ;;  %v22275_v57 = vunpack.c.l.bf16 %v22274_v43 }
 0x163   : > { %v2754_v7 = vpack.c.bf16 %v2719_v2, %v2718_v11  ;;  %v2721_v40 = vsel %vm2672_vm15, 0.0, %v2623_v42  ;;  %v18486_v56 = vadd.f32 %v1357_v36, %v22273_v5  ;;  %v2464_v22 = vmax.f32 %v2405_v32, %v18472_v0 }
 0x164   : > { %v18490_v15 = vadd.f32 %v1362_v6, %v22275_v57  ;;  %v18492_v25 = vpack.c.bf16 %v2721_v40, %v2720_v19  ;;  %v2102_v24 = vmax.f32 %v18397_v35, %v18448_v3  ;;  %v22276_v47 = vrot.slane %v18417_v58, 2 }
 0x165   : > { %v2872_v42 = vshll.u32 %v2754_v7, 16  ;;  %v2876_v34 = vshrl.u32 %v2754_v7, 16  ;;  %v2003_v36 = vrot.slane %v18486_v56, 1  ;;  %v2199_v2 = vrot.slane %v18486_v56, 2 }
 0x166   : > { %v18500_v11 = vsel %vm2107_vm4, %v2195_v49, %v22276_v47  ;;  %v2880_v6 = vshll.u32 %v18492_v25, 16  ;;  %v2346_v19 = vmax.f32 %v18477_v14, %v18486_v56  ;;  %v18508_v32 = vmax.f32 %v2464_v22, %v18486_v56  ;;  %v1367_v47 = vpop.permute.xlu0 %1366 }
 0x167   : > { %v2874_v5 = vrot.slane %v2872_v42, 1  ;;  %v18512_v49 = vsel %vm1512_vm3, %v2001_v41, %v2003_v36  ;;  %v18516_v57 = vmax.f32 %v2102_v24, %v18500_v11  ;;  %v22278_v14 = vmax.f32 %v18406_v12, %v18397_v35  ;;  %v18526_v41 = vpop.f32.mrb[57].mxu0 }
 0x168   : > { %v2882_v30 = vrot.slane %v2880_v6, 1  ;;  %v900_v40 = vmax.f32 %v18164_v20, 0.0  ;;  %v898_v42 = vmax.f32 %v18170_v28, 0.0  ;;  %22279 = vst [vmem:[#allocation25_spill] sm:$0xff] %v18526_v41  ;;  %v2103_v6 = vmax.f32 %v18417_v58, %v18512_v49  ;;  %v18533_v9 = vpop.f32.mrb[58].mxu0 }
 0x169   : > { %v2406_v22 = vmax.f32 %v22278_v14, %v18448_v3  ;;  %v2875_v7 = vsel %vm2767_vm6, %v2870_v31, %v2874_v5  ;;  %v2878_v4 = vor.u32 %v2876_v34, %v2874_v5  ;;  %v2347_v24 = vmax.f32 %v18516_v57, %v18490_v15  ;;  %22280 = vst [vmem:[#allocation12_spill] sm:$0xff] %v18533_v9  ;;  %v1372_v5 = vpop.permute.xlu1 %1371  ;;  %v18547_v57 = vpop.f32.mrb[59].mxu0 }
 0x16a   : > { %14120 = vmatprep.mubr.msk.bf16.mxu0 %vm475_vm2, %v2875_v7  ;;  %v22281_v20 = vrot.slane %v18417_v58, 2  ;;  %v2407_v12 = vmax.f32 %v2345_v38, %v18512_v49  ;;  %v22282_v31 = vunpack.c.h.bf16 %v22274_v43  ;;  %22283 = vst [vmem:[#allocation42_spill] sm:$0xff] %v18547_v57  ;;  %v899_v58 = vmax.f32 %v18186_v61, 0.0  ;;  %v22286_v61 = vld [vmem:[#allocation13_spill] sm:$0xff] }
 0x16b   : > { %v2465_v35 = vmax.f32 %v2406_v22, %v18500_v11  ;;  %v2883_v14 = vsel %vm2767_vm6, %v2878_v4, %v2882_v30  ;;  %v901_v22 = vmax.f32 %v18181_v29, 0.0  ;;  %v22289_v9 = vrot.slane %v18490_v15, 2 }
 0x16c   : > { %v18540_v28 = vsel %vm2107_vm4, %v22281_v20, %v2199_v2  ;;  %v18545_v34 = vadd.f32 %v1367_v47, %v22282_v31  ;;  %14121 = vmatmul.mubr.msk.bf16.gmra.mrb[88].mxu0 %vm475_vm2, %v2883_v14  ;;  %v18570_v29 = vpack.c.bf16 %v899_v58, %v898_v42  ;;  %v22287_v31 = vunpack.c.l.bf16 %v22286_v61 }
 0x16d   : > { %v18551_v7 = vmax.f32 %v2103_v6, %v18540_v28  ;;  %v18557_v38 = vmax.f32 %v2465_v35, %v18490_v15  ;;  %v2466_v43 = vmax.f32 %v2407_v12, %v18540_v28  ;;  %v18568_v6 = vpack.c.bf16 %v901_v22, %v900_v40 }
 0x16e   : > { %v18561_v47 = vrot.slane %v18545_v34, 1  ;;  %v18564_v20 = vrot.slane %v18545_v34, 2  ;;  %22285 = vst [vmem:[#allocation44_spill] sm:$0xff] %v18570_v29  ;;  %v18574_v14 = vadd.f32 %v1372_v5, %v22287_v31  ;;  %v22288_v12 = vrot.slane %v18490_v15, 1 }
 0x16f   : > { %v2348_v4 = vmax.f32 %v18551_v7, %v18545_v34  ;;  %22284 = vst [vmem:[#allocation43_spill] sm:$0xff] %v18568_v6  ;;  %v18577_v35 = vmax.f32 %v2466_v43, %v18545_v34  ;;  %v18587_v7 = vsel %vm2107_vm4, %v2199_v2, %v22289_v9  ;;  %v2565_v40 = vmax.f32 %v18135_v53, %v18151_v54  ;;  %v14042_v43 = vpop.f32.mrb[60].mxu0  ;;  %v22290_v2 = vld [vmem:[#allocation8_spill] sm:$0xff] }
 0x170   : > { %v18582_v57 = vsel %vm1512_vm3, %v2003_v36, %v22288_v12  ;;  %v2355_v5 = vrot.slane %v18574_v14, 1  ;;  %v2414_v58 = vrot.slane %v18574_v14, 2  ;;  %v2566_v36 = vmax.f32 %v18173_v48, %v18213_v13 }
 0x171   : > { %v2104_v42 = vmax.f32 %v18486_v56, %v18582_v57  ;;  %v2408_v22 = vmax.f32 %v2346_v19, %v18582_v57  ;;  %v2624_v31 = vmax.f32 %v2565_v40, %v18203_v37  ;;  %v2884_v9 = vshrl.u32 %v18492_v25, 16 }
 0x172   : > { %v2567_v53 = vmax.f32 %v22290_v2, %v18222_v17  ;;  %v2356_v56 = vsel %vm1512_vm3, %v18561_v47, %v2355_v5  ;;  %v2568_v12 = vmax.f32 %v18259_v62, %v18285_v50  ;;  %v2625_v48 = vmax.f32 %v2566_v36, %v18244_v59 }
 0x173   : > { %v2300_v54 = vmax.f32 %v2104_v42, %v18587_v7  ;;  %v2467_v19 = vmax.f32 %v2408_v22, %v18587_v7  ;;  %v2577_v43 = vmax.f32 %v18577_v35, %v2356_v56  ;;  %vm2673_vm5 = vcmp.lt.f32.partialorder %v2624_v31, -1e+29 }
 0x174   : > { %v2886_v37 = vor.u32 %v2884_v9, %v2882_v30  ;;  %v2722_v25 = vsel %vm2673_vm5, 0.0, %v2624_v31  ;;  %v2626_v40 = vmax.f32 %v2567_v53, %v18290_v26  ;;  %vm2674_vm7 = vcmp.lt.f32.partialorder %v2625_v48, -1e+29 }
 0x175   : > { %v2349_v13 = vmax.f32 %v2300_v54, %v18574_v14  ;;  %v2516_v17 = vmax.f32 %v2467_v19, %v18574_v14  ;;  %v2627_v42 = vmax.f32 %v2568_v12, %v18330_v39  ;;  %v22291_v22 = vrot.slane %v18490_v15, 1  ;;  %v1377_v39 = vpop.permute.xlu0 %1376  ;;  %v22294_v19 = vld [vmem:[#allocation28_spill] sm:$0xff] }
 0x176   : > { %v22292_v59 = vrot.slane %v18490_v15, 2  ;;  %v2723_v30 = vsel %vm2674_vm7, 0.0, %v2625_v48  ;;  %vm2675_vm8 = vcmp.lt.f32.partialorder %v2626_v40, -1e+29  ;;  %v22293_v31 = vunpack.c.h.bf16 %v22286_v61  ;;  %v1382_v48 = vpop.permute.xlu1 %1381 }
 0x177   : > { %v18618_v62 = vsel %vm1512_vm3, %v22291_v22, %v18561_v47  ;;  %v2756_v35 = vpack.c.bf16 %v2723_v30, %v2722_v25  ;;  %vm2676_vm9 = vcmp.lt.f32.partialorder %v2627_v42, -1e+29  ;;  %v2724_v36 = vsel %vm2675_vm8, 0.0, %v2626_v40 }
 0x178   : > { %v18624_v50 = vsel %vm2107_vm4, %v22292_v59, %v18564_v20  ;;  %v2105_v26 = vmax.f32 %v18490_v15, %v18618_v62  ;;  %v2409_v14 = vmax.f32 %v2347_v24, %v18618_v62  ;;  %v18631_v9 = vadd.f32 %v1377_v39, %v22293_v31  ;;  %v22295_v59 = vld [vmem:[#allocation29_spill] sm:$0xff]  ;;  %v22296_v39 = vld [vmem:[#allocation14_spill] sm:$0xff] }
 0x179   : > { %v2725_v2 = vsel %vm2676_vm9, 0.0, %v2627_v42  ;;  %v904_v12 = vmax.f32 %v22294_v19, 0.0  ;;  %v2888_v15 = vshll.u32 %v2756_v35, 16  ;;  %v2892_v24 = vshrl.u32 %v2756_v35, 16 }
 0x17a   : > { %v18634_v53 = vmax.f32 %v2105_v26, %v18624_v50  ;;  %v2468_v54 = vmax.f32 %v2409_v14, %v18624_v50  ;;  %v2757_v22 = vpack.c.bf16 %v2725_v2, %v2724_v36  ;;  %v21855_v25 = vrot.slane %v18631_v9, 1 }
 0x17b   : > { %v2416_v61 = vrot.slane %v18631_v9, 2  ;;  %v902_v30 = vmax.f32 %v22295_v59, 0.0  ;;  %v2890_v26 = vrot.slane %v2888_v15, 1  ;;  %v22297_v31 = vunpack.c.l.bf16 %v22296_v39 }
 0x17c   : > { %v18643_v42 = vmax.f32 %v2468_v54, %v18631_v9  ;;  %v2896_v14 = vshll.u32 %v2757_v22, 16  ;;  %v2106_v35 = vmax.f32 %v18545_v34, %v18561_v47  ;;  %v2410_v36 = vmax.f32 %v2348_v4, %v2356_v56 }
 0x17d   : > { %v1450_v19 = vadd.f32 %v1382_v48, %v22297_v31  ;;  %v2415_v2 = vsel %vm2107_vm4, %v18564_v20, %v2414_v58  ;;  %v2358_v40 = vsel %vm1512_vm3, %v2355_v5, %v21855_v25  ;;  %v2417_v54 = vsel %vm2107_vm4, %v2414_v58, %v2416_v61  ;;  %v1387_v48 = vpop.permute.xlu0 %1386 }
 0x17e   : > { %v2891_v59 = vsel %vm2767_vm6, %v2886_v37, %v2890_v26  ;;  %v2894_v15 = vor.u32 %v2892_v24, %v2890_v26  ;;  %v2898_v6 = vrot.slane %v2896_v14, 1  ;;  %v2302_v39 = vmax.f32 %v2106_v35, %v18564_v20  ;;  %v22298_v24 = vld [vmem:[#allocation16_spill] sm:$0xff]  ;;  %v22300_v35 = vld [vmem:[#allocation30_spill] sm:$0xff] }
 0x17f   : > { %14124 = vmatprep.mubr.msk.bf16.mxu0 %vm475_vm2, %v2891_v59  ;;  %v2359_v34 = vrot.slane %v1450_v19, 1  ;;  %v18659_v47 = vrot.slane %v1450_v19, 2  ;;  %v2469_v4 = vmax.f32 %v2410_v36, %v2415_v2  ;;  %v18661_v56 = vmax.f32 %v2577_v43, %v2415_v2 }
 0x180   : > { %v2899_v31 = vsel %vm2767_vm6, %v2894_v15, %v2898_v6  ;;  %v2351_v5 = vmax.f32 %v2302_v39, %v1450_v19  ;;  %v2411_v25 = vmax.f32 %v2349_v13, %v2358_v40  ;;  %v2578_v58 = vmax.f32 %v2516_v17, %v2358_v40 }
 0x181   : > { %14125 = vmatmul.mubr.msk.bf16.gmra.mrb[92].mxu0 %vm475_vm2, %v2899_v31  ;;  %v2518_v37 = vmax.f32 %v2469_v4, %v1450_v19  ;;  %v22299_v26 = vunpack.c.l.bf16 %v22298_v24  ;;  %v905_v14 = vmax.f32 %v18229_v55, 0.0  ;;  %v903_v59 = vmax.f32 %v22300_v35, 0.0  ;;  %v22303_v4 = vld [vmem:[#allocation17_spill] sm:$0xff] }
 0x182   : > { %v2470_v29 = vmax.f32 %v2411_v25, %v2417_v54  ;;  %v2637_v41 = vmax.f32 %v2578_v58, %v2417_v54  ;;  %v2569_v43 = vmax.f32 %v18278_v23, %v18297_v44  ;;  %v2570_v36 = vmax.f32 %v18323_v52, %v18367_v21  ;;  %v1392_v52 = vpop.permute.xlu1 %1391 }
 0x183   : > { %v1451_v20 = vadd.f32 %v1387_v48, %v22299_v26  ;;  %v18673_v40 = vpack.c.bf16 %v905_v14, %v904_v12  ;;  %v18675_v19 = vpack.c.bf16 %v903_v59, %v902_v30  ;;  %v2900_v44 = vshrl.u32 %v2757_v22, 16 }
 0x184   : > { %vm2686_vm10 = vcmp.lt.f32.partialorder %v2637_v41, -1e+29  ;;  %v2628_v55 = vmax.f32 %v2569_v43, %v18354_v45  ;;  %v2629_v15 = vmax.f32 %v2570_v36, %v18392_v46  ;;  %v2571_v12 = vmax.f32 %v18362_v10, %v18378_v8  ;;  %v1397_v36 = vpop.permute.xlu0 %1396 }
 0x185   : > { %v2525_v13 = vrot.slane %v1451_v20, 1  ;;  %v2584_v17 = vrot.slane %v1451_v20, 2  ;;  %22301 = vst [vmem:[#allocation13_spill] sm:$0xff] %v18673_v40  ;;  %22302 = vst [vmem:[#allocation8_spill] sm:$0xff] %v18675_v19  ;;  %v2519_v2 = vmax.f32 %v2470_v29, %v1451_v20  ;;  %v18679_v25 = vsel %vm2686_vm10, 0.0, %v2637_v41 }
 0x186   : > { %vm2677_vm11 = vcmp.lt.f32.partialorder %v2628_v55, -1e+29  ;;  %vm2678_vm12 = vcmp.lt.f32.partialorder %v2629_v15, -1e+29  ;;  %v2902_v45 = vor.u32 %v2900_v44, %v2898_v6  ;;  %v2572_v46 = vmax.f32 %v18403_v18, %v18431_v60 }
 0x187   : > { %v2526_v54 = vsel %vm1512_vm3, %v2359_v34, %v2525_v13  ;;  %v2585_v23 = vsel %vm2107_vm4, %v18659_v47, %v2584_v17  ;;  %v2726_v29 = vsel %vm2677_vm11, 0.0, %v2628_v55  ;;  %v2727_v30 = vsel %vm2678_vm12, 0.0, %v2629_v15 }
 0x188   : > { %v2580_v21 = vmax.f32 %v2518_v37, %v2526_v54  ;;  %v2758_v39 = vpack.c.bf16 %v2727_v30, %v2726_v29  ;;  %v2630_v48 = vmax.f32 %v2571_v12, %v18438_v33  ;;  %v22304_v22 = vunpack.c.l.bf16 %v22303_v4 }
 0x189   : > { %v2631_v58 = vmax.f32 %v2572_v46, %v18472_v0  ;;  %v22305_v37 = vrot.slane %v18631_v9, 1  ;;  %v2419_v10 = vsel %vm2107_vm4, %v2416_v61, %v18659_v47  ;;  %v2413_v6 = vmax.f32 %v2351_v5, %v2359_v34  ;;  %v22308_v46 = vld [vmem:[#allocation32_spill] sm:$0xff] }
 0x18a   : > { %v18688_v41 = vmax.f32 %v2580_v21, %v2585_v23  ;;  %v1452_v31 = vadd.f32 %v1392_v52, %v22304_v22  ;;  %v2904_v24 = vshll.u32 %v2758_v39, 16  ;;  %vm2679_vm13 = vcmp.lt.f32.partialorder %v2630_v48, -1e+29 }
 0x18b   : > { %v2360_v8 = vsel %vm1512_vm3, %v22305_v37, %v2359_v34  ;;  %v2908_v60 = vshrl.u32 %v2758_v39, 16  ;;  %v22306_v18 = vmax.f32 %v18634_v53, %v18631_v9  ;;  %vm2680_vm14 = vcmp.lt.f32.partialorder %v2631_v58, -1e+29 }
 0x18c   : > { %v2728_v26 = vsel %vm2679_vm13, 0.0, %v2630_v48  ;;  %v2527_v20 = vrot.slane %v1452_v31, 1  ;;  %v2579_v0 = vmax.f32 %v18643_v42, %v2360_v8  ;;  %v2906_v14 = vrot.slane %v2904_v24, 1  ;;  %v22309_v48 = vld [vmem:[#allocation33_spill] sm:$0xff] }
 0x18d   : > { %v2412_v33 = vmax.f32 %v22306_v18, %v2360_v8  ;;  %v2729_v35 = vsel %vm2680_vm14, 0.0, %v2631_v58  ;;  %v2586_v43 = vrot.slane %v1452_v31, 2  ;;  %v2472_v5 = vmax.f32 %v2413_v6, %v18659_v47  ;;  %v22312_v18 = vld [vmem:[#allocation34_spill] sm:$0xff] }
 0x18e   : > { %v2759_v55 = vpack.c.bf16 %v2729_v35, %v2728_v26  ;;  %v2528_v61 = vsel %vm1512_vm3, %v2525_v13, %v2527_v20  ;;  %v2638_v34 = vmax.f32 %v2579_v0, %v2419_v10  ;;  %v2907_v15 = vsel %vm2767_vm6, %v2902_v45, %v2906_v14 }
 0x18f   : > { %v2471_v59 = vmax.f32 %v2412_v33, %v2419_v10  ;;  %v2910_v9 = vor.u32 %v2908_v60, %v2906_v14  ;;  %v2581_v54 = vmax.f32 %v2519_v2, %v2528_v61  ;;  %14128 = vmatprep.mubr.msk.bf16.mxu0 %vm475_vm2, %v2907_v15  ;;  %v2587_v42 = vsel %vm2107_vm4, %v2584_v17, %v2586_v43 }
 0x190   : > { %v2912_v23 = vshll.u32 %v2759_v55, 16  ;;  %vm2687_vm15 = vcmp.lt.f32.partialorder %v2638_v34, -1e+29  ;;  %v22307_v44 = vunpack.c.h.bf16 %v22303_v4  ;;  %v908_v47 = vmax.f32 %v18282_v1, 0.0 }
 0x191   : > { %v2520_v53 = vmax.f32 %v2471_v59, %v1452_v31  ;;  %v18710_v21 = vmax.f32 %v2581_v54, %v2587_v42  ;;  %v18712_v13 = vsel %vm2687_vm15, 0.0, %v2638_v34  ;;  %v906_v12 = vmax.f32 %v18294_v63, 0.0  ;;  %v22314_v59 = vld [vmem:[#allocation35_spill] sm:$0xff] }
 0x192   : > { %v1453_v52 = vadd.f32 %v1397_v36, %v22307_v44  ;;  %v2914_v29 = vrot.slane %v2912_v23, 1  ;;  %v909_v39 = vmax.f32 %v22308_v46, 0.0  ;;  %v907_v17 = vmax.f32 %v22309_v48, 0.0  ;;  %v22315_v36 = vld [vmem:[#allocation36_spill] sm:$0xff]  ;;  %v22319_v46 = vld [vmem:[#allocation38_spill] sm:$0xff]  ;;  %v22320_v48 = vld [vmem:[#allocation11_spill] sm:$0xff] }
 0x193   : > { %v2573_v4 = vmax.f32 %v18434_v51, %v18448_v3  ;;  %v2574_v22 = vmax.f32 %v18468_v27, %v18512_v49  ;;  %v2916_v27 = vshrl.u32 %v2759_v55, 16  ;;  %v2575_v49 = vmax.f32 %v18508_v32, %v18582_v57  ;;  %v22313_v57 = vld [vmem:[#allocation10_spill] sm:$0xff] }
 0x194   : > { %v2521_v30 = vmax.f32 %v2472_v5, %v1453_v52  ;;  %v2529_v2 = vrot.slane %v1453_v52, 1  ;;  %v2588_v45 = vrot.slane %v1453_v52, 2  ;;  %v2915_v31 = vsel %vm2767_vm6, %v2910_v9, %v2914_v29  ;;  %v22318_v52 = vld [vmem:[#allocation37_spill] sm:$0xff] }
 0x195   : > { %14129 = vmatmul.mubr.msk.bf16.gmra.mrb[96].mxu0 %vm475_vm2, %v2915_v31  ;;  %v18726_v8 = vpack.c.bf16 %v909_v39, %v908_v47  ;;  %v18728_v10 = vpack.c.bf16 %v907_v17, %v906_v12  ;;  %v2632_v6 = vmax.f32 %v2573_v4, %v18500_v11  ;;  %v2633_v3 = vmax.f32 %v2574_v22, %v18540_v28  ;;  %v22321_v31 = vld [vmem:[#allocation41_spill] sm:$0xff] }
 0x196   : > { %v2530_v1 = vsel %vm1512_vm3, %v2527_v20, %v2529_v2  ;;  %v2583_v58 = vmax.f32 %v2521_v30, %v2529_v2  ;;  %v2589_v63 = vsel %vm2107_vm4, %v2586_v43, %v2588_v45  ;;  %v2576_v60 = vmax.f32 %v18557_v38, %v18618_v62  ;;  %v3312_v2 = vld [vmem:[%s21744_s2] sm:$0xf] }
 0x197   : > { %v2582_v37 = vmax.f32 %v2520_v53, %v2530_v1  ;;  %22310 = vst [vmem:[#allocation28_spill] sm:$0xff] %v18726_v8  ;;  %22311 = vst [vmem:[#allocation29_spill] sm:$0xff] %v18728_v10  ;;  %vm2681_vm5 = vcmp.lt.f32.partialorder %v2632_v6, -1e+29  ;;  %v912_v33 = vmax.f32 %v22312_v18, 0.0  ;;  %v2918_v20 = vor.u32 %v2916_v27, %v2914_v29 }
 0x198   : > { %v2642_v51 = vmax.f32 %v2583_v58, %v2588_v45  ;;  %vm2682_vm8 = vcmp.lt.f32.partialorder %v2633_v3, -1e+29  ;;  %v2730_v26 = vsel %vm2681_vm5, 0.0, %v2632_v6  ;;  %v2634_v28 = vmax.f32 %v2575_v49, %v18587_v7  ;;  %v12822_v18 = vld [vmem:[%s21744_s2 + $0x2c] sm:$0xf] }
 0x199   : > { %v18734_v24 = vmax.f32 %v2582_v37, %v2589_v63  ;;  %v2731_v0 = vsel %vm2682_vm8, 0.0, %v2633_v3  ;;  %v2635_v14 = vmax.f32 %v2576_v60, %v18624_v50  ;;  %v910_v35 = vmax.f32 %v22313_v57, 0.0  ;;  %v22326_v57 = vld [vmem:[#allocation24_spill] sm:$0xff] }
 0x19a   : > { %vm2691_vm7 = vcmp.lt.f32.partialorder %v2642_v51, -1e+29  ;;  %v2760_v32 = vpack.c.bf16 %v2731_v0, %v2730_v26  ;;  %v913_v43 = vmax.f32 %v22314_v59, 0.0  ;;  %v911_v38 = vmax.f32 %v22315_v36, 0.0  ;;  %v22327_v36 = vld [vmem:[#allocation6_spill] sm:$0xff] }
 0x19b   : > { %v18739_v11 = vsel %vm2691_vm7, 0.0, %v2642_v51  ;;  %vm2683_vm9 = vcmp.lt.f32.partialorder %v2634_v28, -1e+29  ;;  %vm2684_vm10 = vcmp.lt.f32.partialorder %v2635_v14, -1e+29  ;;  %vm3313_vm13 = vcmask 64512  }
 0x19c   : > { %vm2685_vm11 = vcmp.lt.f32.partialorder %v18661_v56, -1e+29  ;;  %v2765_v62 = vpack.c.bf16 %v18739_v11, %v18739_v11  ;;  %v2920_v55 = vshll.u32 %v2760_v32, 16  ;;  %v2732_v61 = vsel %vm2683_vm9, 0.0, %v2634_v28 }
 0x19d   : > { %v2733_v34 = vsel %vm2684_vm10, 0.0, %v2635_v14  ;;  %v2924_v7 = vshrl.u32 %v2760_v32, 16  ;;  %v18749_v50 = vpack.c.bf16 %v913_v43, %v912_v33  ;;  %v18751_v15 = vpack.c.bf16 %v911_v38, %v910_v35  ;;  %v22325_v14 = vld [vmem:[#allocation5_spill] sm:$0xff] }
 0x19e   : > { %v2761_v5 = vpack.c.bf16 %v2733_v34, %v2732_v61  ;;  %v2734_v9 = vsel %vm2685_vm11, 0.0, %v18661_v56  ;;  %v2922_v53 = vrot.slane %v2920_v55, 1  ;;  %vm2688_vm12 = vcmp.lt.f32.partialorder %v18688_v41, -1e+29  ;;  %v22328_v55 = vld [vmem:[#allocation26_spill] sm:$0xff] }
 0x19f   : > { %22316 = vst [vmem:[#allocation14_spill] sm:$0xff] %v18749_v50  ;;  %22317 = vst [vmem:[#allocation16_spill] sm:$0xff] %v18751_v15  ;;  %v2762_v54 = vpack.c.bf16 %v18679_v25, %v2734_v9  ;;  %v2737_v44 = vsel %vm2688_vm12, 0.0, %v18688_v41  ;;  %14686 = vmatprep.mubr.msk.bf16.mxu1 %vm3313_vm13, %v18749_v50  ;;  %v916_v47 = vmax.f32 %v22318_v52, 0.0  ;;  %v12797_v25 = vld [vmem:[%s21744_s2 + $0x28] sm:$0xf] }
 0x1a0   : > { %v2928_v23 = vshll.u32 %v2761_v5, 16  ;;  %v2932_v42 = vshrl.u32 %v2761_v5, 16  ;;  %v2923_v12 = vsel %vm2767_vm6, %v2918_v20, %v2922_v53  ;;  %v2926_v29 = vor.u32 %v2924_v7, %v2922_v53  ;;  %v22330_v7 = vld [vmem:[#allocation25_spill] sm:$0xff]  ;;  %v22331_v9 = vld [vmem:[#allocation22_spill] sm:$0xff]  ;;  %v22334_v52 = vld [vmem:[#allocation12_spill] sm:$0xff] }
 0x1a1   : > { %v2936_v30 = vshll.u32 %v2762_v54, 16  ;;  %v2763_v56 = vpack.c.bf16 %v2737_v44, %v18712_v13  ;;  %14132 = vmatprep.mubr.msk.bf16.mxu0 %vm475_vm2, %v2923_v12  ;;  %v2940_v45 = vshrl.u32 %v2762_v54, 16  ;;  %v914_v39 = vmax.f32 %v22319_v46, 0.0  ;;  %v18816_v54 = vld [vmem:[%s21744_s2 + $0x4] sm:$0xf] }
 0x1a2   : > { %v2930_v41 = vrot.slane %v2928_v23, 1  ;;  %v917_v17 = vmax.f32 %v22320_v48, 0.0  ;;  %v915_v13 = vmax.f32 %v22321_v31, 0.0  ;;  %vm3386_vm14 = vcmask 1043456  }
 0x1a3   : > { %v2938_v4 = vrot.slane %v2936_v30, 1  ;;  %v2944_v22 = vshll.u32 %v2763_v56, 16  ;;  %16703 = vmatprep.subr.msk.bf16.mxu1 %vm3386_vm14, %v12797_v25  ;;  %vm2689_vm15 = vcmp.lt.f32.partialorder %v18710_v21, -1e+29  ;;  %16692 = vmatprep.subr.msk.bf16.mxu0 %vm3386_vm14, %v3312_v2  ;;  %vm2690_vm5 = vcmp.lt.f32.partialorder %v18734_v24, -1e+29 }
 0x1a4   : > { %v2931_v1 = vsel %vm2767_vm6, %v2926_v29, %v2930_v41  ;;  %v2934_v58 = vor.u32 %v2932_v42, %v2930_v41  ;;  %v18773_v63 = vpack.c.bf16 %v917_v17, %v916_v47  ;;  %v18779_v51 = vpack.c.bf16 %v915_v13, %v914_v39  ;;  %v22333_v42 = vld [vmem:[#allocation2_spill] sm:$0xff]  ;;  %v22338_v17 = vld [vmem:[#allocation15_spill] sm:$0xff]  ;;  %v22340_v13 = vld [vmem:[#allocation21_spill] sm:$0xff] }
 0x1a5   : > { %14133 = vmatmul.mubr.msk.bf16.gmra.mrb[100].mxu0 %vm475_vm2, %v2931_v1  ;;  %v2942_v37 = vor.u32 %v2940_v45, %v2938_v4  ;;  %v2946_v6 = vrot.slane %v2944_v22, 1  ;;  %v2738_v27 = vsel %vm2689_vm15, 0.0, %v18710_v21  ;;  %v2739_v49 = vsel %vm2690_vm5, 0.0, %v18734_v24  ;;  %v22335_v30 = vld [vmem:[#allocation42_spill] sm:$0xff] }
 0x1a6   : > { %22322 = vst [vmem:[#allocation30_spill] sm:$0xff] %v18773_v63  ;;  %22323 = vst [vmem:[#allocation17_spill] sm:$0xff] %v18779_v51  ;;  %v2939_v3 = vsel %vm2767_vm6, %v2934_v58, %v2938_v4  ;;  %v2948_v60 = vshrl.u32 %v2763_v56, 16  ;;  %v2764_v33 = vpack.c.bf16 %v2739_v49, %v2738_v27  ;;  %v18790_v26 = vsel %vm3386_vm14, %v12797_v25, 0 }
 0x1a7   : > { %14136 = vmatprep.mubr.msk.bf16.mxu0 %vm475_vm2, %v2939_v3  ;;  %22324 = vst [vmem:[#allocation32_spill] sm:$0xff] %v18790_v26  ;;  %v2947_v20 = vsel %vm2767_vm6, %v2942_v37, %v2946_v6  ;;  %15395 = vmatpush3.bf16.msra.mxu1 %v18790_v26  ;;  %v2960_v0 = vshll.u32 %v2765_v62, 16  ;;  %v920_v21 = vmax.f32 %v18465_v16, 0.0  ;;  %v7880_v28 = vsel %vm3386_vm14, %v12822_v18, 0  ;;  %v12847_v16 = vld [vmem:[%s21744_s2 + $0x30] sm:$0xf] }
 0x1a8   : > { %v2950_v11 = vor.u32 %v2948_v60, %v2946_v6  ;;  %v2952_v24 = vshll.u32 %v2764_v33, 16  ;;  %16704 = vmatprep.subr.msk.bf16.mxu1 %vm3386_vm14, %v12822_v18  ;;  %v918_v32 = vmax.f32 %v22325_v14, 0.0  ;;  %v921_v35 = vmax.f32 %v22326_v57, 0.0  ;;  %v22342_v6 = vld [vmem:[#allocation19_spill] sm:$0xff] }
 0x1a9   : > { %v2956_v59 = vshrl.u32 %v2764_v33, 16  ;;  %v3388_v43 = vsel %vm3386_vm14, %v3312_v2, 0  ;;  %v919_v38 = vmax.f32 %v22327_v36, 0.0  ;;  %v924_v61 = vmax.f32 %v22328_v55, 0.0  ;;  %v22344_v33 = vld [vmem:[#allocation3_spill] sm:$0xff] }
 0x1aa   : > { %v2954_v62 = vrot.slane %v2952_v24, 1  ;;  %14687 = vmatmul.mubr.msk.bf16.vlgmr.msra.gmra.mrb[0].mxu1 %vm3313_vm13, %v18779_v51  ;;  %v18807_v34 = vpack.c.bf16 %v921_v35, %v920_v21  ;;  %14145 = vmatpush3.bf16.msra.mxu0 %v3388_v43  ;;  %v922_v5 = vmax.f32 %v22330_v7, 0.0  ;;  %v18811_v53 = vshll.u32 %v22331_v9, 16  ;;  %v22346_v24 = vld [vmem:[#allocation4_spill] sm:$0xff]  ;;  %v22352_v55 = vld [vmem:[#allocation23_spill] sm:$0xff] }
 0x1ab   : > { %14695 = vmatpush3.bf16.msra.mxu1 %v7880_v28  ;;  %14690 = vmatprep.mubr.msk.bf16.mxu1 %vm3313_vm13, %v18773_v63  ;;  %v18820_v23 = vpack.c.bf16 %v919_v38, %v918_v32  ;;  %v18823_v44 = vshll.u32 %v22333_v42, 16  ;;  %v925_v47 = vmax.f32 %v22334_v52, 0.0  ;;  %v923_v56 = vmax.f32 %v22335_v30, 0.0  ;;  %v22349_v32 = vld [vmem:[#allocation18_spill] sm:$0xff]  ;;  %v22350_v35 = vld [vmem:[#allocation20_spill] sm:$0xff]  ;;  %v22356_v7 = vld [vmem:[#allocation27_spill] sm:$0xff] }
 0x1ac   : > { %22329 = vst [vmem:[#allocation33_spill] sm:$0xff] %v18807_v34  ;;  %v2955_v12 = vsel %vm2767_vm6, %v2950_v11, %v2954_v62  ;;  %v21857_v29 = vrot.slane %v18811_v53, 1  ;;  %16705 = vmatprep.subr.msk.bf16.mxu1 %vm3386_vm14, %v12847_v16  ;;  %v2958_v25 = vor.u32 %v2956_v59, %v2954_v62  ;;  %v2962_v2 = vrot.slane %v2960_v0, 1  ;;  %16693 = vmatprep.subr.msk.bf16.mxu0 %vm3386_vm14, %v18816_v54  ;;  %v18882_v0 = vld [vmem:[%s21744_s2 + $0x34] sm:$0xf] }
 0x1ad   : > { %22332 = vst [vmem:[#allocation34_spill] sm:$0xff] %v18820_v23  ;;  %14137 = vmatmul.mubr.msk.bf16.gmra.mrb[104].mxu0 %vm475_vm2, %v2947_v20  ;;  %v18832_v41 = vpack.c.bf16 %v925_v47, %v924_v61  ;;  %v18837_v45 = vshrl.u32 %v22331_v9, 16  ;;  %v3694_v46 = vrot.slane %v18823_v44, 1  ;;  %v18840_v39 = vpack.c.bf16 %v923_v56, %v922_v5 }
 0x1ae   : > { %14140 = vmatprep.mubr.msk.bf16.mxu0 %vm475_vm2, %v2955_v12  ;;  %v18846_v4 = vshll.u32 %v22338_v17, 16  ;;  %v2963_v22 = vsel %vm2767_vm6, %v2958_v25, %v2962_v2  ;;  %v18855_v1 = vshll.u32 %v22340_v13, 16  ;;  %v18858_v58 = vshrl.u32 %v22333_v42, 16  ;;  %v22360_v2 = vld [vmem:[#allocation7_spill] sm:$0xff] }
 0x1af   : > { %22336 = vst [vmem:[#allocation10_spill] sm:$0xff] %v18832_v41  ;;  %22337 = vst [vmem:[#allocation35_spill] sm:$0xff] %v18840_v39  ;;  %v3691_v48 = vor.u32 %v18837_v45, %v21857_v29  ;;  %v18868_v27 = vshrl.u32 %v22338_v17, 16  ;;  %v8175_v60 = vsel %vm3386_vm14, %v12847_v16, 0  ;;  %v18874_v20 = vshll.u32 %v22344_v33, 16 }
 0x1b0   : > { %22339 = vst [vmem:[#allocation36_spill] sm:$0xff] %v18846_v4  ;;  %22341 = vst [vmem:[#allocation37_spill] sm:$0xff] %v18855_v1  ;;  %v3701_v37 = vrot.slane %v18846_v4, 1  ;;  %v3698_v3 = vor.u32 %v18858_v58, %v3694_v46  ;;  %v3708_v49 = vrot.slane %v18855_v1, 1  ;;  %v18890_v28 = vshll.u32 %v22346_v24, 16 }
 0x1b1   : > { %v18852_v31 = vsel %vm2767_vm6, %v3691_v48, %v3694_v46  ;;  %22343 = vst [vmem:[#allocation38_spill] sm:$0xff] %v18868_v27  ;;  %22345 = vst [vmem:[#allocation11_spill] sm:$0xff] %v18874_v20  ;;  %v18895_v14 = vshrl.u32 %v22340_v13, 16  ;;  %v3715_v57 = vrot.slane %v18874_v20, 1  ;;  %v18906_v43 = vshrl.u32 %v22344_v33, 16 }
 0x1b2   : > { %14691 = vmatmul.mubr.msk.bf16.gmra.mrb[4].mxu1 %vm3313_vm13, %v18820_v23  ;;  %v3705_v18 = vor.u32 %v18868_v27, %v3701_v37  ;;  %v18877_v11 = vsel %vm2767_vm6, %v3698_v3, %v3701_v37  ;;  %22347 = vst [vmem:[#allocation41_spill] sm:$0xff] %v18890_v28  ;;  %v3722_v36 = vrot.slane %v18890_v28, 1  ;;  %v18911_v61 = vshll.u32 %v22352_v55, 16  ;;  %v22364_v37 = vld [vmem:[#allocation31_spill] sm:$0xff] }
 0x1b3   : > { %14696 = vmatprep.mubr.msk.bf16.mxu1 %vm3313_vm13, %v18852_v31  ;;  %22348 = vst [vmem:[#allocation5_spill] sm:$0xff] %v18895_v14  ;;  %v3712_v59 = vor.u32 %v18895_v14, %v3708_v49  ;;  %22351 = vst [vmem:[#allocation24_spill] sm:$0xff] %v18906_v43  ;;  %v3719_v38 = vor.u32 %v18906_v43, %v3715_v57  ;;  %v18922_v5 = vshll.u32 %v22356_v7, 16  ;;  %v18927_v52 = vshrl.u32 %v22346_v24, 16  ;;  %v19130_v14 = vld [vmem:[%s21744_s2 + $0x8] sm:$0xf] }
 0x1b4   : > { %v18887_v21 = vsel %vm2767_vm6, %v3705_v18, %v3708_v49  ;;  %22353 = vst [vmem:[#allocation6_spill] sm:$0xff] %v18911_v61  ;;  %v3729_v47 = vrot.slane %v18911_v61, 1  ;;  %v18936_v30 = vshrl.u32 %v22352_v55, 16  ;;  %v18941_v46 = vshll.u32 %v22360_v2, 16 }
 0x1b5   : > { %14141 = vmatmul.mubr.msk.bf16.gmra.mrb[108].mxu0 %vm475_vm2, %v2963_v22  ;;  %v18914_v16 = vsel %vm2767_vm6, %v3712_v59, %v3715_v57  ;;  %v18919_v62 = vsel %vm2767_vm6, %v3719_v38, %v3722_v36  ;;  %22357 = vst [vmem:[#allocation22_spill] sm:$0xff] %v18922_v5  ;;  %22358 = vst [vmem:[#allocation12_spill] sm:$0xff] %v18927_v52  ;;  %v3726_v12 = vor.u32 %v18927_v52, %v3722_v36  ;;  %v22368_v38 = vld [vmem:[#allocation9_spill] sm:$0xff]  ;;  %vm5864_vm2 = vsmask.f32 3328 }
 0x1b6   : > { %14146 = vmatprep.mubr.msk.bf16.mxu0 %vm3313_vm13, %v22342_v6  ;;  %22354 = vst [vmem:[#allocation26_spill] sm:$0xff] %v18914_v16  ;;  %22355 = vst [vmem:[#allocation25_spill] sm:$0xff] %v18919_v62  ;;  %v3736_v56 = vrot.slane %v18922_v5, 1  ;;  %v3733_v25 = vor.u32 %v18936_v30, %v3729_v47  ;;  %v18952_v3 = vshll.u32 %v22364_v37, 16  ;;  %v3910_v49 = vsel %vm3386_vm14, %v18816_v54, 0 }
 0x1b7   : > { %22359 = vst [vmem:[#allocation42_spill] sm:$0xff] %v18936_v30  ;;  %22361 = vst [vmem:[#allocation4_spill] sm:$0xff] %v18941_v46  ;;  %v18944_v48 = vsel %vm2767_vm6, %v3726_v12, %v3729_v47  ;;  %v3743_v18 = vrot.slane %v18941_v46, 1  ;;  %v18968_v59 = vshrl.u32 %v22360_v2, 16  ;;  %v18973_v47 = vshll.u32 %v22368_v38, 16 }
 0x1b8   : > { %22362 = vst [vmem:[#allocation23_spill] sm:$0xff] %v18944_v48  ;;  %v18949_v22 = vsel %vm2767_vm6, %v3733_v25, %v3736_v56  ;;  %22365 = vst [vmem:[#allocation31_spill] sm:$0xff] %v18952_v3  ;;  %v3750_v54 = vrot.slane %v18952_v3, 1  ;;  %v18989_v29 = vshrl.u32 %v22364_v37, 16  ;;  %v22376_v3 = vld [vmem:[#allocation39_spill] sm:$0xff]  ;;  %v19063_v28 = vshll.u32 %v18673_v40, 16 }
 0x1b9   : > { %22363 = vst [vmem:[#allocation7_spill] sm:$0xff] %v18949_v22  ;;  %22367 = vst [vmem:[#allocation46_spill] sm:$0xff] %v18968_v59  ;;  %v3747_v36 = vor.u32 %v18968_v59, %v3743_v18  ;;  %v19003_v46 = vshll.u32 %v22376_v3, 16  ;;  %v3667_v20 = vshll.u32 %v22342_v6, 16  ;;  %v19095_v1 = vshll.u32 %v18726_v8, 16 }
 0x1ba   : > { %14697 = vmatmul.mubr.msk.bf16.vlgmr.msra.gmra.mrb[8].mxu1 %vm3313_vm13, %v18877_v11  ;;  %22369 = vst [vmem:[#allocation9_spill] sm:$0xff] %v18973_v47  ;;  %22374 = vst [vmem:[#allocation50_spill] sm:$0xff] %v18989_v29  ;;  %v19133_v4 = vshrl.u32 %v18726_v8, 16  ;;  %vm6719_vm7 = vsmask.f32 2304 }
 0x1bb   : > { %14745 = vmatpush3.bf16.msra.mxu1 %v8175_v60  ;;  %14700 = vmatprep.mubr.msk.bf16.mxu1 %vm3313_vm13, %v18887_v21  ;;  %v18959_v60 = vshrl.u32 %v22356_v7, 16  ;;  %v18981_v25 = vsel %vm2767_vm6, %v3747_v36, %v3750_v54  ;;  %v18998_v36 = vshrl.u32 %v22368_v38, 16  ;;  %22377 = vst [vmem:[#allocation52_spill] sm:$0xff] %v19003_v46  ;;  %22391 = vst [vmem:[#allocation64_spill] sm:$0xff] %v19063_v28  ;;  %vm4611_vm8 = vsmask.f32 6400 }
 0x1bc   : > { %16706 = vmatprep.subr.msk.bf16.mxu1 %vm3386_vm14, %v18882_v0  ;;  %22371 = vst [vmem:[#allocation48_spill] sm:$0xff] %v18981_v25  ;;  %22397 = vst [vmem:[#allocation70_spill] sm:$0xff] %v19095_v1 }
 0x1bd   : > { %14147 = vmatmul.mubr.msk.bf16.vlgmr.msra.gmra.mrb[64].mxu0 %vm3313_vm13, %v22349_v32  ;;  %22366 = vst [vmem:[#allocation45_spill] sm:$0xff] %v18959_v60  ;;  %v3740_v57 = vor.u32 %v18959_v60, %v3736_v56  ;;  %v22372_v56 = vld [vmem:[#allocation40_spill] sm:$0xff]  ;;  %22375 = vst [vmem:[#allocation51_spill] sm:$0xff] %v18998_v36  ;;  %v22384_v60 = vld [vmem:[#allocation43_spill] sm:$0xff] }
 0x1be   : > { %14150 = vmatprep.mubr.msk.bf16.mxu0 %vm3313_vm13, %v22350_v35  ;;  %14195 = vmatpush3.bf16.msra.mxu0 %v3910_v49  ;;  %v18984_v49 = vshll.u32 %v22372_v56, 16  ;;  %v19033_v61 = vshll.u32 %v22384_v60, 16  ;;  %22404 = vst [vmem:[#allocation77_spill] sm:$0xff] %v19133_v4 }
 0x1bf   : > { %v18976_v12 = vsel %vm2767_vm6, %v3740_v57, %v3743_v18  ;;  %v3757_v18 = vrot.slane %v18973_v47, 1  ;;  %v3754_v57 = vor.u32 %v18989_v29, %v3750_v54  ;;  %v22380_v54 = vld [vmem:[#allocation44_spill] sm:$0xff]  ;;  %16694 = vmatprep.subr.msk.bf16.mxu0 %vm3386_vm14, %v19130_v14 }
 0x1c0   : > { %22370 = vst [vmem:[#allocation47_spill] sm:$0xff] %v18976_v12  ;;  %22373 = vst [vmem:[#allocation49_spill] sm:$0xff] %v18984_v49  ;;  %v3764_v26 = vrot.slane %v18984_v49, 1  ;;  %v19014_v29 = vshll.u32 %v22380_v54, 16  ;;  %v19019_v49 = vshrl.u32 %v22372_v56, 16 }
 0x1c1   : > { %v3761_v41 = vor.u32 %v18998_v36, %v3757_v18  ;;  %v19006_v59 = vsel %vm2767_vm6, %v3754_v57, %v3757_v18  ;;  %v3771_v18 = vrot.slane %v19003_v46, 1  ;;  %v19028_v57 = vshrl.u32 %v22376_v3, 16  ;;  %22385 = vst [vmem:[#allocation58_spill] sm:$0xff] %v19033_v61 }
 0x1c2   : > { %14701 = vmatmul.mubr.msk.bf16.gmra.mrb[12].mxu1 %vm3313_vm13, %v18914_v16  ;;  %22378 = vst [vmem:[#allocation53_spill] sm:$0xff] %v19006_v59  ;;  %22381 = vst [vmem:[#allocation55_spill] sm:$0xff] %v19014_v29  ;;  %v3778_v36 = vrot.slane %v19014_v29, 1  ;;  %v19049_v29 = vshrl.u32 %v22380_v54, 16 }
 0x1c3   : > { %14704 = vmatprep.mubr.msk.bf16.mxu1 %vm3313_vm13, %v18919_v62  ;;  %v19011_v47 = vsel %vm2767_vm6, %v3761_v41, %v3764_v26  ;;  %22382 = vst [vmem:[#allocation56_spill] sm:$0xff] %v19019_v49  ;;  %v3768_v41 = vor.u32 %v19019_v49, %v3764_v26  ;;  %22383 = vst [vmem:[#allocation57_spill] sm:$0xff] %v19028_v57  ;;  %v3775_v5 = vor.u32 %v19028_v57, %v3771_v18 }
 0x1c4   : > { %22379 = vst [vmem:[#allocation54_spill] sm:$0xff] %v19011_v47  ;;  %v19044_v26 = vshll.u32 %v18675_v19, 16  ;;  %22389 = vst [vmem:[#allocation62_spill] sm:$0xff] %v19049_v29 }
 0x1c5   : > { %14151 = vmatmul.mubr.msk.bf16.gmra.mrb[68].mxu0 %vm3313_vm13, %v22331_v9  ;;  %v19036_v30 = vsel %vm2767_vm6, %v3768_v41, %v3771_v18  ;;  %v19041_v46 = vsel %vm2767_vm6, %v3775_v5, %v3778_v36  ;;  %v3785_v18 = vrot.slane %v19033_v61, 1  ;;  %v3782_v5 = vor.u32 %v19049_v29, %v3778_v36 }
 0x1c6   : > { %14154 = vmatprep.mubr.msk.bf16.mxu0 %vm3313_vm13, %v22333_v42  ;;  %22386 = vst [vmem:[#allocation59_spill] sm:$0xff] %v19036_v30  ;;  %22387 = vst [vmem:[#allocation60_spill] sm:$0xff] %v19041_v46  ;;  %v19058_v41 = vshrl.u32 %v22384_v60, 16  ;;  %v3792_v57 = vrot.slane %v19044_v26, 1  ;;  %v19074_v36 = vshll.u32 %v18728_v10, 16 }
 0x1c7   : > { %22388 = vst [vmem:[#allocation61_spill] sm:$0xff] %v19044_v26  ;;  %v19066_v52 = vsel %vm2767_vm6, %v3782_v5, %v3785_v18  ;;  %v19079_v26 = vshrl.u32 %v18675_v19, 16  ;;  %v21916_v5 = vshrl.u32 %v22342_v6, 16 }
 0x1c8   : > { %22390 = vst [vmem:[#allocation63_spill] sm:$0xff] %v19058_v41  ;;  %v3789_v49 = vor.u32 %v19058_v41, %v3785_v18  ;;  %22392 = vst [vmem:[#allocation65_spill] sm:$0xff] %v19066_v52  ;;  %v3799_v18 = vrot.slane %v19063_v28, 1  ;;  %v19089_v41 = vshrl.u32 %v18673_v40, 16  ;;  %v3806_v29 = vrot.slane %v19074_v36, 1 }
 0x1c9   : > { %22394 = vst [vmem:[#allocation67_spill] sm:$0xff] %v19074_v36  ;;  %22395 = vst [vmem:[#allocation68_spill] sm:$0xff] %v19079_v26  ;;  %v19110_v36 = vshll.u32 %v18751_v15, 16 }
 0x1ca   : > { %14705 = vmatmul.mubr.msk.bf16.gmra.mrb[16].mxu1 %vm3313_vm13, %v18944_v48  ;;  %v19071_v61 = vsel %vm2767_vm6, %v3789_v49, %v3792_v57  ;;  %v3796_v49 = vor.u32 %v19079_v26, %v3792_v57  ;;  %22396 = vst [vmem:[#allocation69_spill] sm:$0xff] %v19089_v41  ;;  %v3803_v43 = vor.u32 %v19089_v41, %v3799_v18  ;;  %v19102_v57 = vrot.slane %v21916_v5, 1 }
 0x1cb   : > { %14708 = vmatprep.mubr.msk.bf16.mxu1 %vm3313_vm13, %v18949_v22  ;;  %22393 = vst [vmem:[#allocation66_spill] sm:$0xff] %v19071_v61  ;;  %22401 = vst [vmem:[#allocation74_spill] sm:$0xff] %v19110_v36  ;;  %v19112_v41 = vrot.slane %v3667_v20, 2  ;;  %v3820_v27 = vrot.slane %v19110_v36, 1  ;;  %v19156_v36 = vshrl.u32 %v18751_v15, 16 }
 0x1cc   : > { %v19098_v28 = vsel %vm2767_vm6, %v3796_v49, %v3799_v18  ;;  %22399 = vst [vmem:[#allocation72_spill] sm:$0xff] %v19102_v57  ;;  %v19107_v26 = vsel %vm2767_vm6, %v3803_v43, %v3806_v29  ;;  %v19117_v18 = vshrl.u32 %v18728_v10, 16  ;;  %v3813_v49 = vrot.slane %v19095_v1, 1 }
 0x1cd   : > { %14155 = vmatmul.mubr.msk.bf16.gmra.mrb[72].mxu0 %vm3313_vm13, %v22338_v17  ;;  %22398 = vst [vmem:[#allocation71_spill] sm:$0xff] %v19098_v28  ;;  %22400 = vst [vmem:[#allocation73_spill] sm:$0xff] %v19107_v26  ;;  %v19140_v57 = vshll.u32 %v18749_v50, 16  ;;  %v19151_v1 = vshll.u32 %v18779_v51, 16 }
 0x1ce   : > { %14158 = vmatprep.mubr.msk.bf16.mxu0 %vm3313_vm13, %v22340_v13  ;;  %22402 = vst [vmem:[#allocation75_spill] sm:$0xff] %v19112_v41  ;;  %22403 = vst [vmem:[#allocation76_spill] sm:$0xff] %v19117_v18  ;;  %v3810_v5 = vor.u32 %v19117_v18, %v3806_v29  ;;  %v3817_v43 = vor.u32 %v19133_v4, %v3813_v49 }
 0x1cf   : > { %22405 = vst [vmem:[#allocation78_spill] sm:$0xff] %v19140_v57  ;;  %22408 = vst [vmem:[#allocation81_spill] sm:$0xff] %v19151_v1  ;;  %v3835_v4 = vrot.slane %v19151_v1, 1  ;;  %v19186_v1 = vshrl.u32 %v18779_v51, 16 }
 0x1d0   : > { %v19143_v29 = vsel %vm2767_vm6, %v3810_v5, %v3813_v49  ;;  %v19148_v41 = vsel %vm2767_vm6, %v3817_v43, %v3820_v27  ;;  %22409 = vst [vmem:[#allocation82_spill] sm:$0xff] %v19156_v36  ;;  %v3827_v5 = vrot.slane %v19140_v57, 1  ;;  %v3824_v49 = vor.u32 %v19156_v36, %v3820_v27 }
 0x1d1   : > { %22406 = vst [vmem:[#allocation79_spill] sm:$0xff] %v19143_v29  ;;  %22407 = vst [vmem:[#allocation80_spill] sm:$0xff] %v19148_v41  ;;  %v19165_v43 = vshrl.u32 %v18749_v50, 16  ;;  %v19181_v27 = vshll.u32 %v18820_v23, 16 }
 0x1d2   : > { %14709 = vmatmul.mubr.msk.bf16.gmra.mrb[20].mxu1 %vm3313_vm13, %v18976_v12  ;;  %22415 = vst [vmem:[#allocation88_spill] sm:$0xff] %v19186_v1 }
 0x1d3   : > { %14712 = vmatprep.mubr.msk.bf16.mxu1 %vm3313_vm13, %v18981_v25  ;;  %22410 = vst [vmem:[#allocation83_spill] sm:$0xff] %v19165_v43  ;;  %v3831_v18 = vor.u32 %v19165_v43, %v3827_v5  ;;  %22414 = vst [vmem:[#allocation87_spill] sm:$0xff] %v19181_v27  ;;  %v7860_v43 = vrot.slane %v19181_v27, 1  ;;  %v22422_v27 = vshrl.u32 %v22342_v6, 16 }
 0x1d5   : > { %14159 = vmatmul.mubr.msk.bf16.gmra.mrb[76].mxu0 %vm3313_vm13, %v22344_v33  ;;  %v19178_v57 = vsel %vm2767_vm6, %v3831_v18, %v3835_v4  ;;  %v7854_v18 = vor.u32 %v19186_v1, %v3835_v4  ;;  %v19210_v4 = vshrl.u32 %v18820_v23, 16  ;;  %v19213_v1 = vshll.u32 %v18807_v34, 16 }
 0x1d6   : > { %14162 = vmatprep.mubr.msk.bf16.mxu0 %vm3313_vm13, %v22346_v24  ;;  %22413 = vst [vmem:[#allocation86_spill] sm:$0xff] %v19178_v57 }
 0x1d7   : > { %22419 = vst [vmem:[#allocation92_spill] sm:$0xff] %v19210_v4  ;;  %22420 = vst [vmem:[#allocation93_spill] sm:$0xff] %v19213_v1 }
 0x1da   : > { %14713 = vmatmul.mubr.msk.bf16.gmra.mrb[24].mxu1 %vm3313_vm13, %v19006_v59 }
 0x1db   : > { %14716 = vmatprep.mubr.msk.bf16.mxu1 %vm3313_vm13, %v19011_v47 }
 0x1dd   : > { %14163 = vmatmul.mubr.msk.bf16.gmra.mrb[80].mxu0 %vm3313_vm13, %v22352_v55 }
 0x1de   : > { %14166 = vmatprep.mubr.msk.bf16.mxu0 %vm3313_vm13, %v22356_v7 }
 0x1e2   : > { %14717 = vmatmul.mubr.msk.bf16.gmra.mrb[28].mxu1 %vm3313_vm13, %v19036_v30 }
 0x1e3   : > { %14720 = vmatprep.mubr.msk.bf16.mxu1 %vm3313_vm13, %v19041_v46 }
 0x1e5   : > { %14167 = vmatmul.mubr.msk.bf16.gmra.mrb[84].mxu0 %vm3313_vm13, %v22360_v2 }
 0x1e6   : > { %14170 = vmatprep.mubr.msk.bf16.mxu0 %vm3313_vm13, %v22364_v37 }
 0x1ea   : > { %14721 = vmatmul.mubr.msk.bf16.gmra.mrb[32].mxu1 %vm3313_vm13, %v19066_v52 }
 0x1eb   : > { %14724 = vmatprep.mubr.msk.bf16.mxu1 %vm3313_vm13, %v19071_v61 }
 0x1ed   : > { %14171 = vmatmul.mubr.msk.bf16.gmra.mrb[88].mxu0 %vm3313_vm13, %v22368_v38 }
 0x1ee   : > { %14174 = vmatprep.mubr.msk.bf16.mxu0 %vm3313_vm13, %v22372_v56 }
 0x1f2   : > { %14725 = vmatmul.mubr.msk.bf16.gmra.mrb[36].mxu1 %vm3313_vm13, %v19098_v28 }
 0x1f3   : > { %14728 = vmatprep.mubr.msk.bf16.mxu1 %vm3313_vm13, %v19107_v26 }
 0x1f5   : > { %14175 = vmatmul.mubr.msk.bf16.gmra.mrb[92].mxu0 %vm3313_vm13, %v22376_v3 }
 0x1f6   : > { %14178 = vmatprep.mubr.msk.bf16.mxu0 %vm3313_vm13, %v22380_v54 }
 0x1fa   : > { %14729 = vmatmul.mubr.msk.bf16.gmra.mrb[40].mxu1 %vm3313_vm13, %v19143_v29  ;;  %v19173_v29 = vsel %vm2767_vm6, %v3824_v49, %v3827_v5  ;;  %v19195_v49 = vshrl.u32 %v18773_v63, 16 }
 0x1fb   : > { %14732 = vmatprep.mubr.msk.bf16.mxu1 %vm3313_vm13, %v19148_v41  ;;  %v19170_v41 = vshll.u32 %v18773_v63, 16  ;;  %22412 = vst [vmem:[#allocation85_spill] sm:$0xff] %v19173_v29 }
 0x1fc   : > { %22416 = vst [vmem:[#allocation89_spill] sm:$0xff] %v19195_v49 }
 0x1fd   : > { %14179 = vmatmul.mubr.msk.bf16.gmra.mrb[96].mxu0 %vm3313_vm13, %v22384_v60  ;;  %22411 = vst [vmem:[#allocation84_spill] sm:$0xff] %v19170_v41  ;;  %v7855_v5 = vrot.slane %v19170_v41, 1 }
 0x1fe   : > { %14182 = vmatprep.mubr.msk.bf16.mxu0 %vm3313_vm13, %v18675_v19 }
 0x1ff   : > { %v7857_v36 = vor.u32 %v7855_v5, %v19195_v49 }
 0x201   : > { %v19205_v41 = vsel %vm2767_vm6, %v7857_v36, %v7860_v43  ;;  %v19221_v36 = vshll.u32 %v22349_v32, 16 }
 0x202   : > { %14733 = vmatmul.mubr.msk.bf16.gmra.mrb[44].mxu1 %vm3313_vm13, %v19173_v29  ;;  %22418 = vst [vmem:[#allocation91_spill] sm:$0xff] %v19205_v41  ;;  %v19228_v29 = vshll.u32 %v22350_v35, 16 }
 0x203   : > { %14736 = vmatprep.mubr.msk.bf16.mxu1 %vm3313_vm13, %v19178_v57  ;;  %v19200_v57 = vsel %vm2767_vm6, %v7854_v18, %v7855_v5  ;;  %v3669_v5 = vrot.slane %v3667_v20, 1  ;;  %v7864_v18 = vor.u32 %v19210_v4, %v7860_v43  ;;  %22421 = vst [vmem:[#allocation94_spill] sm:$0xff] %v19221_v36  ;;  %v21963_v20 = vrot.slane %v22331_v9, 1 }
 0x204   : > { %22417 = vst [vmem:[#allocation90_spill] sm:$0xff] %v19200_v57  ;;  %22423 = vst [vmem:[#allocation95_spill] sm:$0xff] %v19228_v29  ;;  %v3673_v43 = vrot.slane %v19221_v36, 1  ;;  %v8476_v4 = vsel %vm3386_vm14, %v18882_v0, 0 }
 0x205   : > { %14183 = vmatmul.mubr.msk.bf16.gmra.mrb[100].mxu0 %vm3313_vm13, %v18673_v40  ;;  %v3670_v49 = vor.u32 %v3669_v5, %v22422_v27  ;;  %v3680_v5 = vrot.slane %v19228_v29, 1 }
 0x206   : > { %14186 = vmatprep.mubr.msk.bf16.mxu0 %vm3313_vm13, %v18728_v10 }
 0x207   : > { %v3674_v27 = vsel %vm2767_vm6, %v3670_v49, %v3673_v43 }
 0x20a   : > { %14737 = vmatmul.mubr.msk.bf16.gmra.mrb[0].mxu1 %vm3313_vm13, %v19200_v57  ;;  %v21962_v57 = vrot.slane %v19213_v1, 1 }
 0x20b   : > { %14740 = vmatprep.mubr.msk.bf16.mxu1 %vm3313_vm13, %v19205_v41  ;;  %v4219_v41 = vrot.slane %v22333_v42, 1 }
 0x20c   : > { %v19234_v23 = vsel %vm2767_vm6, %v7864_v18, %v21962_v57  ;;  %v4221_v18 = vrot.slane %v22338_v17, 1  ;;  %v19253_v57 = vshrl.u32 %v22350_v35, 16  ;;  %v4334_v17 = vsel %vm3386_vm14, %v19130_v14, 0 }
 0x20d   : > { %14187 = vmatmul.mubr.msk.bf16.gmra.mrb[104].mxu0 %vm3313_vm13, %v18726_v8  ;;  %22424 = vst [vmem:[#allocation96_spill] sm:$0xff] %v19234_v23  ;;  %v19242_v42 = vsel %vm1512_vm3, %v21963_v20, %v4219_v41  ;;  %v4223_v20 = vrot.slane %v22340_v13, 1  ;;  %v4227_v14 = vrot.slane %v22346_v24, 1 }
 0x20e   : > { %14190 = vmatprep.mubr.msk.bf16.mxu0 %vm3313_vm13, %v18751_v15  ;;  %22425 = vst [vmem:[#allocation97_spill] sm:$0xff] %v19253_v57  ;;  %v3684_v36 = vor.u32 %v19253_v57, %v3680_v5  ;;  %v19264_v29 = vsel %vm1512_vm3, %v4219_v41, %v4221_v18  ;;  %v22427_v41 = vrot.slane %v18811_v53, 1 }
 0x20f   : > { %v19274_v13 = vsel %vm1512_vm3, %v4221_v18, %v4223_v20  ;;  %v4225_v18 = vrot.slane %v22344_v33, 1 }
 0x212   : > { %14741 = vmatmul.mubr.msk.bf16.gmra.mrb[4].mxu1 %vm3313_vm13, %v19234_v23  ;;  %v19257_v23 = vshrl.u32 %v22349_v32, 16 }
 0x213   : > { %14746 = vmatprep.mubr.msk.bf16.mxu1 %vm3313_vm13, %v19242_v42 }
 0x214   : > { %22426 = vst [vmem:[#allocation98_spill] sm:$0xff] %v19257_v23  ;;  %v3677_v49 = vor.u32 %v19257_v23, %v3673_v43  ;;  %v3688_v43 = vsel %vm2767_vm6, %v3684_v36, %v22427_v41  ;;  %v4231_v36 = vrot.slane %v22356_v7, 1  ;;  %v4235_v41 = vrot.slane %v22364_v37, 1 }
 0x215   : > { %14191 = vmatmul.mubr.msk.bf16.gmra.mrb[108].mxu0 %vm3313_vm13, %v18749_v50 }
 0x216   : > { %14196 = vmatprep.mubr.msk.bf16.mxu0 %vm3313_vm13, %v3674_v27  ;;  %v19269_v27 = vld [vmem:[%s21744_s2 + $0x38] sm:$0xf]  ;;  %v3681_v0 = vsel %vm2767_vm6, %v3677_v49, %v3680_v5  ;;  %v19296_v5 = vsel %vm1512_vm3, %v4225_v18, %v4227_v14 }
 0x217   : > { %22429 = vst [vmem:[#allocation100_spill] sm:$0xff] %v19296_v5 }
 0x21a   : > { %14747 = vmatmul.mubr.msk.bf16.vlgmr.msra.gmra.mrb[8].mxu1 %vm3313_vm13, %v19264_v29 }
 0x21b   : > { %14795 = vmatpush3.bf16.msra.mxu1 %v8476_v4  ;;  %14750 = vmatprep.mubr.msk.bf16.mxu1 %vm3313_vm13, %v19274_v13  ;;  %v19291_v4 = vsel %vm1512_vm3, %v4223_v20, %v4225_v18  ;;  %v5872_v18 = vrot.slane %v18837_v45, 4 }
 0x21c   : > { %16707 = vmatprep.subr.msk.bf16.mxu1 %vm3386_vm14, %v19269_v27  ;;  %22428 = vst [vmem:[#allocation99_spill] sm:$0xff] %v19291_v4 }
 0x21d   : > { %14197 = vmatmul.mubr.msk.bf16.vlgmr.msra.gmra.mrb[64].mxu0 %vm3313_vm13, %v3681_v0  ;;  %v5876_v0 = vrot.slane %v18858_v58, 4 }
 0x21e   : > { %14200 = vmatprep.mubr.msk.bf16.mxu0 %vm3313_vm13, %v3688_v43  ;;  %14245 = vmatpush3.bf16.msra.mxu0 %v4334_v17  ;;  %v4229_v17 = vrot.slane %v22352_v55, 1 }
 0x220   : > { %v19307_v20 = vsel %vm1512_vm3, %v4227_v14, %v4229_v17  ;;  %v19312_v49 = vsel %vm1512_vm3, %v4229_v17, %v4231_v36  ;;  %v5873_v14 = vrot.slane %v18811_v53, 5 }
 0x221   : > { %22430 = vst [vmem:[#allocation101_spill] sm:$0xff] %v19307_v20  ;;  %22431 = vst [vmem:[#allocation102_spill] sm:$0xff] %v19312_v49 }
 0x222   : > { %14751 = vmatmul.mubr.msk.bf16.gmra.mrb[12].mxu1 %vm3313_vm13, %v19291_v4  ;;  %v19328_v17 = vor.u32 %v5873_v14, %v5872_v18  ;;  %v4241_v14 = vrot.slane %v22376_v3, 1 }
 0x223   : > { %14754 = vmatprep.mubr.msk.bf16.mxu1 %vm3313_vm13, %v19296_v5 }
 0x224   : > { %22433 = vst [vmem:[#allocation104_spill] sm:$0xff] %v19328_v17 }
 0x225   : > { %14201 = vmatmul.mubr.msk.bf16.gmra.mrb[68].mxu0 %vm3313_vm13, %v18852_v31  ;;  %v5877_v31 = vrot.slane %v18823_v44, 5 }
 0x226   : > { %14204 = vmatprep.mubr.msk.bf16.mxu0 %vm3313_vm13, %v18877_v11  ;;  %v4233_v11 = vrot.slane %v22360_v2, 1 }
 0x227   : > { %v19324_v43 = vor.u32 %v5877_v31, %v5876_v0  ;;  %v4239_v31 = vrot.slane %v22372_v56, 1 }
 0x228   : > { %v19331_v7 = vsel %vm1512_vm3, %v4231_v36, %v4233_v11  ;;  %v4237_v36 = vrot.slane %v22368_v38, 1 }
 0x229   : > { %22432 = vst [vmem:[#allocation103_spill] sm:$0xff] %v19324_v43  ;;  %22434 = vst [vmem:[#allocation105_spill] sm:$0xff] %v19331_v7  ;;  %v19341_v0 = vsel %vm5864_vm2, %v19328_v17, %v19324_v43  ;;  %v9942_v43 = vrot.slane %v19213_v1, 6 }
 0x22a   : > { %14755 = vmatmul.mubr.msk.bf16.gmra.mrb[16].mxu1 %vm3313_vm13, %v19307_v20  ;;  %22436 = vst [vmem:[#allocation107_spill] sm:$0xff] %v19341_v0  ;;  %v19357_v18 = vsel %vm1512_vm3, %v4237_v36, %v4239_v31  ;;  %v19428_v0 = vshll.u32 %v18840_v39, 16 }
 0x22b   : > { %14758 = vmatprep.mubr.msk.bf16.mxu1 %vm3313_vm13, %v19312_v49  ;;  %22438 = vst [vmem:[#allocation109_spill] sm:$0xff] %v19357_v18 }
 0x22c   : > { %22447 = vst [vmem:[#allocation118_spill] sm:$0xff] %v19428_v0 }
 0x22d   : > { %14205 = vmatmul.mubr.msk.bf16.gmra.mrb[72].mxu0 %vm3313_vm13, %v18887_v21  ;;  %v19336_v21 = vsel %vm1512_vm3, %v4233_v11, %v4235_v41  ;;  %v19352_v11 = vsel %vm1512_vm3, %v4235_v41, %v4237_v36  ;;  %v4243_v41 = vrot.slane %v22380_v54, 1 }
 0x22e   : > { %14208 = vmatprep.mubr.msk.bf16.mxu0 %vm3313_vm13, %v18914_v16  ;;  %22435 = vst [vmem:[#allocation106_spill] sm:$0xff] %v19336_v21  ;;  %22437 = vst [vmem:[#allocation108_spill] sm:$0xff] %v19352_v11  ;;  %v19425_v16 = vshrl.u32 %v18840_v39, 16 }
 0x22f   : > { %v19373_v36 = vsel %vm1512_vm3, %v4241_v14, %v4243_v41 }
 0x230   : > { %22440 = vst [vmem:[#allocation111_spill] sm:$0xff] %v19373_v36  ;;  %22446 = vst [vmem:[#allocation117_spill] sm:$0xff] %v19425_v16  ;;  %v9945_v39 = vrot.slane %v19425_v16, 5 }
 0x232   : > { %14759 = vmatmul.mubr.msk.bf16.gmra.mrb[20].mxu1 %vm3313_vm13, %v19331_v7 }
 0x233   : > { %14762 = vmatprep.mubr.msk.bf16.mxu1 %vm3313_vm13, %v19336_v21 }
 0x235   : > { %14209 = vmatmul.mubr.msk.bf16.gmra.mrb[76].mxu0 %vm3313_vm13, %v18919_v62  ;;  %v19414_v62 = vshrl.u32 %v18807_v34, 16 }
 0x236   : > { %14212 = vmatprep.mubr.msk.bf16.mxu0 %vm3313_vm13, %v18944_v48  ;;  %v19368_v48 = vsel %vm1512_vm3, %v4239_v31, %v4241_v14  ;;  %v4247_v31 = vrot.slane %v18675_v19, 1 }
 0x237   : > { %22439 = vst [vmem:[#allocation110_spill] sm:$0xff] %v19368_v48  ;;  %22445 = vst [vmem:[#allocation116_spill] sm:$0xff] %v19414_v62 }
 0x23a   : > { %14763 = vmatmul.mubr.msk.bf16.gmra.mrb[24].mxu1 %vm3313_vm13, %v19352_v11 }
 0x23b   : > { %14766 = vmatprep.mubr.msk.bf16.mxu1 %vm3313_vm13, %v19357_v18 }
 0x23d   : > { %14213 = vmatmul.mubr.msk.bf16.gmra.mrb[80].mxu0 %vm3313_vm13, %v18949_v22 }
 0x23e   : > { %14216 = vmatprep.mubr.msk.bf16.mxu0 %vm3313_vm13, %v18976_v12  ;;  %v4245_v12 = vrot.slane %v22384_v60, 1 }
 0x240   : > { %v19384_v22 = vsel %vm1512_vm3, %v4243_v41, %v4245_v12  ;;  %v19389_v14 = vsel %vm1512_vm3, %v4245_v12, %v4247_v31  ;;  %v4251_v41 = vrot.slane %v18728_v10, 1  ;;  %v6728_v10 = vrot.slane %v18811_v53, 6 }
 0x241   : > { %22441 = vst [vmem:[#allocation112_spill] sm:$0xff] %v19384_v22  ;;  %22442 = vst [vmem:[#allocation113_spill] sm:$0xff] %v19389_v14 }
 0x242   : > { %14767 = vmatmul.mubr.msk.bf16.gmra.mrb[28].mxu1 %vm3313_vm13, %v19368_v48 }
 0x243   : > { %14770 = vmatprep.mubr.msk.bf16.mxu1 %vm3313_vm13, %v19373_v36 }
 0x245   : > { %14217 = vmatmul.mubr.msk.bf16.gmra.mrb[84].mxu0 %vm3313_vm13, %v18981_v25 }
 0x246   : > { %14220 = vmatprep.mubr.msk.bf16.mxu0 %vm3313_vm13, %v19006_v59  ;;  %v4249_v59 = vrot.slane %v18673_v40, 1 }
 0x248   : > { %v19400_v25 = vsel %vm1512_vm3, %v4247_v31, %v4249_v59  ;;  %v19405_v12 = vsel %vm1512_vm3, %v4249_v59, %v4251_v41  ;;  %v4253_v31 = vrot.slane %v18726_v8, 1  ;;  %v19422_v59 = vld [vmem:[%s21744_s2 + $0xc] sm:$0xf]  ;;  %v6727_v8 = vrot.slane %v18837_v45, 5 }
 0x249   : > { %22443 = vst [vmem:[#allocation114_spill] sm:$0xff] %v19400_v25  ;;  %22444 = vst [vmem:[#allocation115_spill] sm:$0xff] %v19405_v12  ;;  %16695 = vmatprep.subr.msk.bf16.mxu0 %vm3386_vm14, %v19422_v59 }
 0x24a   : > { %14771 = vmatmul.mubr.msk.bf16.gmra.mrb[32].mxu1 %vm3313_vm13, %v19384_v22  ;;  %v19440_v40 = vsel %vm1512_vm3, %v4251_v41, %v4253_v31 }
 0x24b   : > { %14774 = vmatprep.mubr.msk.bf16.mxu1 %vm3313_vm13, %v19389_v14  ;;  %22449 = vst [vmem:[#allocation120_spill] sm:$0xff] %v19440_v40 }
 0x24d   : > { %14221 = vmatmul.mubr.msk.bf16.gmra.mrb[88].mxu0 %vm3313_vm13, %v19011_v47  ;;  %v6731_v47 = vrot.slane %v18858_v58, 5 }
 0x24e   : > { %14224 = vmatprep.mubr.msk.bf16.mxu0 %vm3313_vm13, %v19036_v30  ;;  %v6732_v30 = vrot.slane %v18823_v44, 6 }
 0x250   : > { %v19433_v17 = vor.u32 %v6732_v30, %v6731_v47  ;;  %v19449_v47 = vor.u32 %v6728_v10, %v6727_v8  ;;  %v4257_v8 = vrot.slane %v18749_v50, 1 }
 0x252   : > { %14775 = vmatmul.mubr.msk.bf16.gmra.mrb[36].mxu1 %vm3313_vm13, %v19400_v25  ;;  %22448 = vst [vmem:[#allocation119_spill] sm:$0xff] %v19433_v17  ;;  %22451 = vst [vmem:[#allocation122_spill] sm:$0xff] %v19449_v47 }
 0x253   : > { %14778 = vmatprep.mubr.msk.bf16.mxu1 %vm3313_vm13, %v19405_v12 }
 0x255   : > { %14225 = vmatmul.mubr.msk.bf16.gmra.mrb[92].mxu0 %vm3313_vm13, %v19041_v46  ;;  %v4255_v46 = vrot.slane %v18751_v15, 1  ;;  %v9946_v15 = vrot.slane %v19428_v0, 6  ;;  %v19460_v0 = vsel %vm6719_vm7, %v19449_v47, %v19433_v17  ;;  %v22462_v47 = vld [vmem:[#allocation85_spill] sm:$0xff] }
 0x256   : > { %14228 = vmatprep.mubr.msk.bf16.mxu0 %vm3313_vm13, %v19066_v52  ;;  %v9941_v52 = vrot.slane %v19414_v62, 5  ;;  %22453 = vst [vmem:[#allocation124_spill] sm:$0xff] %v19460_v0  ;;  %v4623_v0 = vrot.slane %v18837_v45, 1  ;;  %v22464_v45 = vld [vmem:[#allocation38_spill] sm:$0xff] }
 0x257   : > { %v19447_v30 = vsel %vm1512_vm3, %v4253_v31, %v4255_v46  ;;  %v9947_v41 = vor.u32 %v9946_v15, %v9945_v39  ;;  %v19471_v15 = vsel %vm1512_vm3, %v4255_v46, %v4257_v8  ;;  %v8159_v31 = vrot.slane %v18773_v63, 1 }
 0x258   : > { %22450 = vst [vmem:[#allocation121_spill] sm:$0xff] %v19447_v30  ;;  %v19453_v19 = vor.u32 %v9942_v43, %v9941_v52  ;;  %v4259_v52 = vrot.slane %v18779_v51, 1  ;;  %22455 = vst [vmem:[#allocation126_spill] sm:$0xff] %v19471_v15  ;;  %v22457_v43 = vld [vmem:[#allocation79_spill] sm:$0xff] }
 0x25a   : > { %14779 = vmatmul.mubr.msk.bf16.gmra.mrb[40].mxu1 %vm3313_vm13, %v19440_v40  ;;  %22452 = vst [vmem:[#allocation123_spill] sm:$0xff] %v19453_v19  ;;  %v19467_v10 = vsel %vm6719_vm7, %v19453_v19, %v9947_v41  ;;  %v19476_v39 = vsel %vm1512_vm3, %v4257_v8, %v4259_v52  ;;  %v22458_v41 = vld [vmem:[#allocation34_spill] sm:$0xff] }
 0x25b   : > { %14782 = vmatprep.mubr.msk.bf16.mxu1 %vm3313_vm13, %v19447_v30  ;;  %22454 = vst [vmem:[#allocation125_spill] sm:$0xff] %v19467_v10  ;;  %22456 = vst [vmem:[#allocation127_spill] sm:$0xff] %v19476_v39  ;;  %v8161_v46 = vrot.slane %v22458_v41, 1 }
 0x25d   : > { %14229 = vmatmul.mubr.msk.bf16.gmra.mrb[96].mxu0 %vm3313_vm13, %v19071_v61  ;;  %v19492_v8 = vsel %vm1512_vm3, %v8159_v31, %v8161_v46  ;;  %v4627_v61 = vrot.slane %v18858_v58, 1  ;;  %v4212_v58 = vrot.slane %v22342_v6, 1 }
 0x25e   : > { %14232 = vmatprep.mubr.msk.bf16.mxu0 %vm3313_vm13, %v19098_v28  ;;  %v19487_v28 = vsel %vm1512_vm3, %v4259_v52, %v8159_v31  ;;  %22460 = vst [vmem:[#allocation129_spill] sm:$0xff] %v19492_v8  ;;  %v4624_v52 = vrot.slane %v18811_v53, 2  ;;  %v22008_v31 = vrot.slane %v18807_v34, 1  ;;  %v4631_v53 = vrot.slane %v22464_v45, 1 }
 0x25f   : > { %22459 = vst [vmem:[#allocation128_spill] sm:$0xff] %v19487_v28 }
 0x260   : > { %v19507_v10 = vor.u32 %v4624_v52, %v4623_v0  ;;  %v22467_v52 = vld [vmem:[#allocation37_spill] sm:$0xff] }
 0x262   : > { %14783 = vmatmul.mubr.msk.bf16.gmra.mrb[44].mxu1 %vm3313_vm13, %v19471_v15 }
 0x263   : > { %14786 = vmatprep.mubr.msk.bf16.mxu1 %vm3313_vm13, %v19476_v39 }
 0x265   : > { %14233 = vmatmul.mubr.msk.bf16.gmra.mrb[100].mxu0 %vm3313_vm13, %v19107_v26  ;;  %v4628_v26 = vrot.slane %v18823_v44, 2  ;;  %v4213_v44 = vrot.slane %v22349_v32, 1  ;;  %v4215_v32 = vrot.slane %v22350_v35, 1 }
 0x266   : > { %14236 = vmatprep.mubr.msk.bf16.mxu0 %vm3313_vm13, %v22457_v43  ;;  %v22461_v43 = vld [vmem:[#allocation80_spill] sm:$0xff] }
 0x26a   : > { %14787 = vmatmul.mubr.msk.bf16.gmra.mrb[0].mxu1 %vm3313_vm13, %v19487_v28  ;;  %v4629_v28 = vor.u32 %v4628_v26, %v4627_v61  ;;  %v22466_v26 = vld [vmem:[#allocation5_spill] sm:$0xff] }
 0x26b   : > { %14790 = vmatprep.mubr.msk.bf16.mxu1 %vm3313_vm13, %v19492_v8  ;;  %v19512_v8 = vsel %vm1512_vm3, %v8161_v46, %v22008_v31  ;;  %v4635_v0 = vrot.slane %v22466_v26, 1  ;;  %v22468_v46 = vld [vmem:[#allocation86_spill] sm:$0xff]  ;;  %v4214_v31 = vsel %vm1512_vm3, %v4212_v58, %v4213_v44  ;;  %v22470_v58 = vld [vmem:[#allocation11_spill] sm:$0xff] }
 0x26c   : > { %22463 = vst [vmem:[#allocation130_spill] sm:$0xff] %v19512_v8  ;;  %v19520_v61 = vsel %vm4611_vm8, %v19507_v10, %v4629_v28  ;;  %v4640_v63 = vrot.slane %v22470_v58, 2  ;;  %v22480_v58 = vld [vmem:[#allocation22_spill] sm:$0xff] }
 0x26d   : > { %14237 = vmatmul.mubr.msk.bf16.gmra.mrb[104].mxu0 %vm3313_vm13, %v22461_v43  ;;  %v22465_v43 = vld [vmem:[#allocation36_spill] sm:$0xff] }
 0x26e   : > { %14240 = vmatprep.mubr.msk.bf16.mxu0 %vm3313_vm13, %v22462_v47  ;;  %v4632_v19 = vrot.slane %v22465_v43, 2  ;;  %v4636_v47 = vrot.slane %v22467_v52, 2  ;;  %v8769_v52 = vsel %vm3386_vm14, %v19269_v27, 0 }
 0x270   : > { %v4633_v17 = vor.u32 %v4632_v19, %v4631_v53  ;;  %v4637_v16 = vor.u32 %v4636_v47, %v4635_v0  ;;  %v19542_v47 = vld [vmem:[%s21744_s2 + $0x3c] sm:$0xf]  ;;  %v22474_v0 = vrot.slane %v22331_v9, 1 }
 0x272   : > { %14791 = vmatmul.mubr.msk.bf16.gmra.mrb[4].mxu1 %vm3313_vm13, %v19512_v8  ;;  %v853_v8 = vpop.f32.mrb[61].mxu0  ;;  %v19534_v34 = vsel %vm4611_vm8, %v4629_v28, %v4633_v17  ;;  %v19547_v27 = vsel %vm4611_vm8, %v4633_v17, %v4637_v16  ;;  %v4218_v17 = vsel %vm1512_vm3, %v4215_v32, %v22474_v0 }
 0x273   : > { %14796 = vmatprep.mubr.msk.bf16.mxu1 %vm3313_vm13, %v19520_v61  ;;  %v926_v43 = vmax.f32 %v853_v8, 0.0  ;;  %v14043_v45 = vpop.f32.mrb[62].mxu0  ;;  %v22472_v8 = vld [vmem:[#allocation41_spill] sm:$0xff] }
 0x274   : > { %v856_v26 = vpop.f32.mrb[63].mxu0  ;;  %v4644_v28 = vrot.slane %v22472_v8, 2  ;;  %v4786_v45 = vsel %vm3386_vm14, %v19422_v59, 0  ;;  %v22477_v8 = vld [vmem:[#allocation6_spill] sm:$0xff] }
 0x275   : > { %14241 = vmatmul.mubr.msk.bf16.gmra.mrb[108].mxu0 %vm3313_vm13, %v22468_v46  ;;  %v927_v6 = vmax.f32 %v856_v26, 0.0  ;;  %v22469_v46 = vld [vmem:[#allocation24_spill] sm:$0xff]  ;;  %v4216_v26 = vsel %vm1512_vm3, %v4213_v44, %v4215_v32  ;;  %v22476_v44 = vld [vmem:[#allocation42_spill] sm:$0xff] }
 0x276   : > { %14246 = vmatprep.mubr.msk.bf16.mxu0 %vm3313_vm13, %v4214_v31  ;;  %v4639_v41 = vrot.slane %v22469_v46, 1  ;;  %v22471_v31 = vld [vmem:[#allocation12_spill] sm:$0xff] }
 0x277   : > { %v4643_v19 = vrot.slane %v22471_v31, 1  ;;  %v19552_v53 = vpack.c.bf16 %v927_v6, %v926_v43  ;;  %v4648_v31 = vrot.slane %v22477_v8, 2  ;;  %v22486_v8 = vld [vmem:[#allocation31_spill] sm:$0xff] }
 0x278   : > { %v4641_v59 = vor.u32 %v4640_v63, %v4639_v41 }
 0x279   : > { %22473 = vst [vmem:[#allocation131_spill] sm:$0xff] %v19552_v53  ;;  %v4645_v6 = vor.u32 %v4644_v28, %v4643_v19  ;;  %v22482_v19 = vld [vmem:[#allocation46_spill] sm:$0xff] }
 0x27a   : > { %14797 = vmatmul.mubr.msk.bf16.vlgmr.msra.gmra.mrb[8].mxu1 %vm3313_vm13, %v19534_v34  ;;  %v19565_v43 = vsel %vm4611_vm8, %v4637_v16, %v4641_v59  ;;  %v4655_v28 = vrot.slane %v22482_v19, 1 }
 0x27b   : > { %14845 = vmatpush3.bf16.msra.mxu1 %v8769_v52  ;;  %14800 = vmatprep.mubr.msk.bf16.mxu1 %vm3313_vm13, %v19547_v27  ;;  %22475 = vst [vmem:[#allocation132_spill] sm:$0xff] %v19565_v43  ;;  %v4647_v52 = vrot.slane %v22476_v44, 1  ;;  %v19572_v32 = vsel %vm4611_vm8, %v4641_v59, %v4645_v6  ;;  %v4660_v44 = vrot.slane %v22486_v8, 2 }
 0x27c   : > { %16708 = vmatprep.subr.msk.bf16.mxu1 %vm3386_vm14, %v19542_v47  ;;  %22478 = vst [vmem:[#allocation133_spill] sm:$0xff] %v19572_v32 }
 0x27d   : > { %14247 = vmatmul.mubr.msk.bf16.vlgmr.msra.gmra.mrb[64].mxu0 %vm3313_vm13, %v4216_v26  ;;  %v22479_v26 = vld [vmem:[#allocation45_spill] sm:$0xff]  ;;  %v4649_v63 = vor.u32 %v4648_v31, %v4647_v52  ;;  %v22488_v52 = vld [vmem:[#allocation51_spill] sm:$0xff] }
 0x27e   : > { %14250 = vmatprep.mubr.msk.bf16.mxu0 %vm3313_vm13, %v4218_v17  ;;  %14295 = vmatpush3.bf16.msra.mxu0 %v4786_v45  ;;  %v4651_v0 = vrot.slane %v22479_v26, 1  ;;  %v4652_v17 = vrot.slane %v22480_v58, 2  ;;  %v22483_v45 = vld [vmem:[#allocation4_spill] sm:$0xff]  ;;  %v22485_v26 = vld [vmem:[#allocation50_spill] sm:$0xff] }
 0x27f   : > { %v19583_v41 = vsel %vm4611_vm8, %v4645_v6, %v4649_v63  ;;  %v4656_v59 = vrot.slane %v22483_v45, 2  ;;  %v22492_v45 = vld [vmem:[#allocation49_spill] sm:$0xff] }
 0x280   : > { %v4653_v16 = vor.u32 %v4652_v17, %v4651_v0  ;;  %22481 = vst [vmem:[#allocation134_spill] sm:$0xff] %v19583_v41  ;;  %v4663_v0 = vrot.slane %v22488_v52, 1  ;;  %v22489_v17 = vld [vmem:[#allocation9_spill] sm:$0xff]  ;;  %v4668_v19 = vrot.slane %v22492_v45, 2 }
 0x282   : > { %14801 = vmatmul.mubr.msk.bf16.gmra.mrb[12].mxu1 %vm3313_vm13, %v19565_v43  ;;  %v19590_v58 = vsel %vm4611_vm8, %v4649_v63, %v4653_v16  ;;  %v4664_v63 = vrot.slane %v22489_v17, 2  ;;  %v22498_v17 = vld [vmem:[#allocation55_spill] sm:$0xff] }
 0x283   : > { %14804 = vmatprep.mubr.msk.bf16.mxu1 %vm3313_vm13, %v19572_v32  ;;  %22484 = vst [vmem:[#allocation135_spill] sm:$0xff] %v19590_v58  ;;  %v4676_v52 = vrot.slane %v22498_v17, 2 }
 0x285   : > { %14251 = vmatmul.mubr.msk.bf16.gmra.mrb[68].mxu0 %vm3313_vm13, %v19242_v42  ;;  %v4659_v42 = vrot.slane %v22485_v26, 1  ;;  %v22491_v26 = vld [vmem:[#allocation56_spill] sm:$0xff] }
 0x286   : > { %14254 = vmatprep.mubr.msk.bf16.mxu0 %vm3313_vm13, %v19264_v29  ;;  %v4657_v29 = vor.u32 %v4656_v59, %v4655_v28  ;;  %v22494_v59 = vld [vmem:[#allocation57_spill] sm:$0xff] }
 0x287   : > { %v4661_v31 = vor.u32 %v4660_v44, %v4659_v42  ;;  %v4665_v44 = vor.u32 %v4664_v63, %v4663_v0  ;;  %v4671_v42 = vrot.slane %v22494_v59, 1  ;;  %v22500_v63 = vld [vmem:[#allocation63_spill] sm:$0xff] }
 0x288   : > { %v19601_v6 = vsel %vm4611_vm8, %v4653_v16, %v4657_v29 }
 0x289   : > { %22487 = vst [vmem:[#allocation136_spill] sm:$0xff] %v19601_v6  ;;  %v19608_v8 = vsel %vm4611_vm8, %v4657_v29, %v4661_v31  ;;  %v19619_v28 = vsel %vm4611_vm8, %v4661_v31, %v4665_v44  ;;  %v22495_v29 = vld [vmem:[#allocation52_spill] sm:$0xff] }
 0x28a   : > { %14805 = vmatmul.mubr.msk.bf16.gmra.mrb[16].mxu1 %vm3313_vm13, %v19583_v41  ;;  %22490 = vst [vmem:[#allocation137_spill] sm:$0xff] %v19608_v8  ;;  %22493 = vst [vmem:[#allocation138_spill] sm:$0xff] %v19619_v28 }
 0x28b   : > { %14808 = vmatprep.mubr.msk.bf16.mxu1 %vm3313_vm13, %v19590_v58 }
 0x28d   : > { %14255 = vmatmul.mubr.msk.bf16.gmra.mrb[72].mxu0 %vm3313_vm13, %v19274_v13  ;;  %v4667_v13 = vrot.slane %v22491_v26, 1  ;;  %v22497_v26 = vld [vmem:[#allocation62_spill] sm:$0xff] }
 0x28e   : > { %14258 = vmatprep.mubr.msk.bf16.mxu0 %vm3313_vm13, %v19291_v4  ;;  %v4672_v4 = vrot.slane %v22495_v29, 2  ;;  %v22504_v29 = vld [vmem:[#allocation61_spill] sm:$0xff] }
 0x28f   : > { %v4669_v16 = vor.u32 %v4668_v19, %v4667_v13  ;;  %v4679_v13 = vrot.slane %v22500_v63, 1  ;;  %v4684_v59 = vrot.slane %v22504_v29, 2 }
 0x290   : > { %v4673_v19 = vor.u32 %v4672_v4, %v4671_v42 }
 0x291   : > { %v19626_v45 = vsel %vm4611_vm8, %v4665_v44, %v4669_v16  ;;  %v22501_v44 = vld [vmem:[#allocation58_spill] sm:$0xff] }
 0x292   : > { %14809 = vmatmul.mubr.msk.bf16.gmra.mrb[20].mxu1 %vm3313_vm13, %v19601_v6  ;;  %22496 = vst [vmem:[#allocation139_spill] sm:$0xff] %v19626_v45  ;;  %v19637_v0 = vsel %vm4611_vm8, %v4669_v16, %v4673_v19  ;;  %v22506_v16 = vld [vmem:[#allocation69_spill] sm:$0xff] }
 0x293   : > { %14812 = vmatprep.mubr.msk.bf16.mxu1 %vm3313_vm13, %v19608_v8  ;;  %22499 = vst [vmem:[#allocation140_spill] sm:$0xff] %v19637_v0  ;;  %v4687_v42 = vrot.slane %v22506_v16, 1 }
 0x295   : > { %14259 = vmatmul.mubr.msk.bf16.gmra.mrb[76].mxu0 %vm3313_vm13, %v19296_v5  ;;  %v4675_v5 = vrot.slane %v22497_v26, 1  ;;  %v22503_v26 = vld [vmem:[#allocation68_spill] sm:$0xff] }
 0x296   : > { %14262 = vmatprep.mubr.msk.bf16.mxu0 %vm3313_vm13, %v19307_v20  ;;  %v4680_v20 = vrot.slane %v22501_v44, 2  ;;  %v22510_v44 = vld [vmem:[#allocation67_spill] sm:$0xff] }
 0x297   : > { %v4677_v31 = vor.u32 %v4676_v52, %v4675_v5  ;;  %v4692_v63 = vrot.slane %v22510_v44, 2 }
 0x298   : > { %v4681_v4 = vor.u32 %v4680_v20, %v4679_v13 }
 0x299   : > { %v19644_v17 = vsel %vm4611_vm8, %v4673_v19, %v4677_v31  ;;  %v22507_v19 = vld [vmem:[#allocation64_spill] sm:$0xff] }
 0x29a   : > { %14813 = vmatmul.mubr.msk.bf16.gmra.mrb[24].mxu1 %vm3313_vm13, %v19619_v28  ;;  %22502 = vst [vmem:[#allocation141_spill] sm:$0xff] %v19644_v17  ;;  %v19655_v52 = vsel %vm4611_vm8, %v4677_v31, %v4681_v4  ;;  %v22512_v31 = vld [vmem:[#allocation77_spill] sm:$0xff] }
 0x29b   : > { %14816 = vmatprep.mubr.msk.bf16.mxu1 %vm3313_vm13, %v19626_v45  ;;  %22505 = vst [vmem:[#allocation142_spill] sm:$0xff] %v19655_v52  ;;  %v4695_v13 = vrot.slane %v22512_v31, 1  ;;  %v22528_v31 = vld [vmem:[#allocation87_spill] sm:$0xff] }
 0x29c   : > { %v8457_v46 = vrot.slane %v22528_v31, 2  ;;  %v22570_v31 = vld [vmem:[#allocation19_spill] sm:$0xff] }
 0x29d   : > { %14263 = vmatmul.mubr.msk.bf16.gmra.mrb[80].mxu0 %vm3313_vm13, %v19312_v49  ;;  %v4683_v49 = vrot.slane %v22503_v26, 1  ;;  %v22509_v26 = vld [vmem:[#allocation76_spill] sm:$0xff] }
 0x29e   : > { %14266 = vmatprep.mubr.msk.bf16.mxu0 %vm3313_vm13, %v19331_v7  ;;  %v4688_v7 = vrot.slane %v22507_v19, 2  ;;  %v22516_v19 = vld [vmem:[#allocation74_spill] sm:$0xff] }
 0x29f   : > { %v4685_v5 = vor.u32 %v4684_v59, %v4683_v49  ;;  %v4700_v16 = vrot.slane %v22516_v19, 2 }
 0x2a0   : > { %v4689_v20 = vor.u32 %v4688_v7, %v4687_v42  ;;  %v22518_v42 = vld [vmem:[#allocation83_spill] sm:$0xff] }
 0x2a1   : > { %v19662_v29 = vsel %vm4611_vm8, %v4681_v4, %v4685_v5  ;;  %v22513_v4 = vld [vmem:[#allocation70_spill] sm:$0xff] }
 0x2a2   : > { %14817 = vmatmul.mubr.msk.bf16.gmra.mrb[28].mxu1 %vm3313_vm13, %v19637_v0  ;;  %22508 = vst [vmem:[#allocation143_spill] sm:$0xff] %v19662_v29  ;;  %v19673_v59 = vsel %vm4611_vm8, %v4685_v5, %v4689_v20 }
 0x2a3   : > { %14820 = vmatprep.mubr.msk.bf16.mxu1 %vm3313_vm13, %v19644_v17  ;;  %22511 = vst [vmem:[#allocation144_spill] sm:$0xff] %v19673_v59 }
 0x2a5   : > { %14267 = vmatmul.mubr.msk.bf16.gmra.mrb[84].mxu0 %vm3313_vm13, %v19336_v21  ;;  %v4691_v21 = vrot.slane %v22509_v26, 1  ;;  %v22515_v26 = vld [vmem:[#allocation82_spill] sm:$0xff] }
 0x2a6   : > { %14270 = vmatprep.mubr.msk.bf16.mxu0 %vm3313_vm13, %v19352_v11  ;;  %v4696_v11 = vrot.slane %v22513_v4, 2  ;;  %v22527_v4 = vld [vmem:[#allocation92_spill] sm:$0xff] }
 0x2a7   : > { %v4693_v49 = vor.u32 %v4692_v63, %v4691_v21  ;;  %v12647_v21 = vld [vmem:[%s21744_s2 + $0x10] sm:$0xf] }
 0x2a8   : > { %v4697_v7 = vor.u32 %v4696_v11, %v4695_v13  ;;  %16696 = vmatprep.subr.msk.bf16.mxu0 %vm3386_vm14, %v12647_v21  ;;  %v22521_v11 = vld [vmem:[#allocation88_spill] sm:$0xff] }
 0x2a9   : > { %v19680_v44 = vsel %vm4611_vm8, %v4689_v20, %v4693_v49  ;;  %v4703_v20 = vrot.slane %v22518_v42, 1  ;;  %v4709_v13 = vrot.slane %v22521_v11, 1  ;;  %v22525_v42 = vld [vmem:[#allocation84_spill] sm:$0xff] }
 0x2aa   : > { %14821 = vmatmul.mubr.msk.bf16.gmra.mrb[32].mxu1 %vm3313_vm13, %v19655_v52  ;;  %22514 = vst [vmem:[#allocation145_spill] sm:$0xff] %v19680_v44  ;;  %v19695_v5 = vsel %vm4611_vm8, %v4693_v49, %v4697_v7  ;;  %v8453_v11 = vrot.slane %v22525_v42, 2 }
 0x2ab   : > { %14824 = vmatprep.mubr.msk.bf16.mxu1 %vm3313_vm13, %v19662_v29  ;;  %22517 = vst [vmem:[#allocation146_spill] sm:$0xff] %v19695_v5 }
 0x2ad   : > { %14271 = vmatmul.mubr.msk.bf16.gmra.mrb[88].mxu0 %vm3313_vm13, %v19357_v18  ;;  %v4699_v18 = vrot.slane %v22515_v26, 1 }
 0x2ae   : > { %14274 = vmatprep.mubr.msk.bf16.mxu0 %vm3313_vm13, %v19368_v48  ;;  %v22519_v48 = vld [vmem:[#allocation78_spill] sm:$0xff] }
 0x2af   : > { %v4701_v63 = vor.u32 %v4700_v16, %v4699_v18  ;;  %v4704_v19 = vrot.slane %v22519_v48, 2 }
 0x2b1   : > { %v4705_v18 = vor.u32 %v4704_v19, %v4703_v20  ;;  %v8462_v20 = vrot.slane %v19414_v62, 1 }
 0x2b2   : > { %14825 = vmatmul.mubr.msk.bf16.gmra.mrb[36].mxu1 %vm3313_vm13, %v19673_v59 }
 0x2b3   : > { %14828 = vmatprep.mubr.msk.bf16.mxu1 %vm3313_vm13, %v19680_v44  ;;  %v19713_v49 = vsel %vm4611_vm8, %v4701_v63, %v4705_v18 }
 0x2b4   : > { %22523 = vst [vmem:[#allocation148_spill] sm:$0xff] %v19713_v49 }
 0x2b5   : > { %14275 = vmatmul.mubr.msk.bf16.gmra.mrb[92].mxu0 %vm3313_vm13, %v19373_v36  ;;  %v22522_v36 = vld [vmem:[#allocation81_spill] sm:$0xff] }
 0x2b6   : > { %14278 = vmatprep.mubr.msk.bf16.mxu0 %vm3313_vm13, %v19384_v22  ;;  %v19702_v22 = vsel %vm4611_vm8, %v4697_v7, %v4701_v63  ;;  %v4710_v26 = vrot.slane %v22522_v36, 2  ;;  %v22524_v7 = vld [vmem:[#allocation89_spill] sm:$0xff] }
 0x2b7   : > { %22520 = vst [vmem:[#allocation147_spill] sm:$0xff] %v19702_v22  ;;  %v8452_v48 = vrot.slane %v22524_v7, 1 }
 0x2b8   : > { %v4711_v16 = vor.u32 %v4710_v26, %v4709_v13  ;;  %v8463_v13 = vrot.slane %v19213_v1, 2 }
 0x2b9   : > { %v8454_v26 = vor.u32 %v8453_v11, %v8452_v48  ;;  %v4615_v48 = vrot.slane %v19257_v23, 1  ;;  %v9063_v23 = vsel %vm3386_vm14, %v19542_v47, 0 }
 0x2ba   : > { %14829 = vmatmul.mubr.msk.bf16.gmra.mrb[40].mxu1 %vm3313_vm13, %v19695_v5  ;;  %v19720_v36 = vsel %vm4611_vm8, %v4705_v18, %v4711_v16  ;;  %v19748_v11 = vor.u32 %v8463_v13, %v8462_v20  ;;  %v4619_v20 = vrot.slane %v19253_v57, 1  ;;  %v22535_v13 = vld [vmem:[#allocation95_spill] sm:$0xff]  ;;  %v22566_v57 = vld [vmem:[#allocation34_spill] sm:$0xff] }
 0x2bb   : > { %14832 = vmatprep.mubr.msk.bf16.mxu1 %vm3313_vm13, %v19702_v22  ;;  %22526 = vst [vmem:[#allocation149_spill] sm:$0xff] %v19720_v36  ;;  %v19731_v63 = vsel %vm4611_vm8, %v4711_v16, %v8454_v26  ;;  %v22533_v16 = vld [vmem:[#allocation2_spill] sm:$0xff] }
 0x2bc   : > { %22529 = vst [vmem:[#allocation150_spill] sm:$0xff] %v19731_v63  ;;  %22532 = vst [vmem:[#allocation152_spill] sm:$0xff] %v19748_v11 }
 0x2bd   : > { %14279 = vmatmul.mubr.msk.bf16.gmra.mrb[96].mxu0 %vm3313_vm13, %v19389_v14  ;;  %v8456_v14 = vrot.slane %v22527_v4, 1  ;;  %v22571_v4 = vld [vmem:[#allocation18_spill] sm:$0xff] }
 0x2be   : > { %14282 = vmatprep.mubr.msk.bf16.mxu0 %vm3313_vm13, %v19400_v25 }
 0x2bf   : > { %v8458_v19 = vor.u32 %v8457_v46, %v8456_v14  ;;  %v22531_v14 = vld [vmem:[#allocation94_spill] sm:$0xff] }
 0x2c0   : > { %v4616_v46 = vrot.slane %v22531_v14, 2 }
 0x2c1   : > { %v19738_v18 = vsel %vm4611_vm8, %v8454_v26, %v8458_v19  ;;  %v22038_v26 = vrot.slane %v22331_v9, 2 }
 0x2c2   : > { %14833 = vmatmul.mubr.msk.bf16.gmra.mrb[44].mxu1 %vm3313_vm13, %v19713_v49  ;;  %22530 = vst [vmem:[#allocation151_spill] sm:$0xff] %v19738_v18 }
 0x2c3   : > { %14836 = vmatprep.mubr.msk.bf16.mxu1 %vm3313_vm13, %v19720_v36 }
 0x2c5   : > { %14283 = vmatmul.mubr.msk.bf16.gmra.mrb[100].mxu0 %vm3313_vm13, %v19405_v12  ;;  %v22540_v12 = vld [vmem:[#allocation21_spill] sm:$0xff] }
 0x2c6   : > { %14286 = vmatprep.mubr.msk.bf16.mxu0 %vm3313_vm13, %v19440_v40  ;;  %v4617_v40 = vor.u32 %v4616_v46, %v4615_v48  ;;  %v22537_v48 = vld [vmem:[#allocation72_spill] sm:$0xff]  ;;  %v5075_v25 = vrot.slane %v22540_v12, 2 }
 0x2ca   : > { %14837 = vmatmul.mubr.msk.bf16.gmra.mrb[0].mxu1 %vm3313_vm13, %v19731_v63  ;;  %v5071_v63 = vrot.slane %v22533_v16, 2 }
 0x2cb   : > { %14840 = vmatprep.mubr.msk.bf16.mxu1 %vm3313_vm13, %v19738_v18  ;;  %v19754_v18 = vsel %vm4611_vm8, %v8458_v19, %v19748_v11  ;;  %v22536_v19 = vld [vmem:[#allocation75_spill] sm:$0xff] }
 0x2cc   : > { %22534 = vst [vmem:[#allocation2_spill] sm:$0xff] %v19754_v18  ;;  %v22538_v46 = vor.u32 %v22536_v19, %v22537_v48  ;;  %v5186_v19 = vsel %vm3386_vm14, %v12647_v21, 0  ;;  %v5079_v21 = vrot.slane %v22346_v24, 2 }
 0x2cd   : > { %14287 = vmatmul.mubr.msk.bf16.gmra.mrb[104].mxu0 %vm3313_vm13, %v19447_v30  ;;  %v19761_v30 = vsel %vm2107_vm4, %v22038_v26, %v5071_v63 }
 0x2ce   : > { %14290 = vmatprep.mubr.msk.bf16.mxu0 %vm3313_vm13, %v19471_v15  ;;  %v4620_v15 = vrot.slane %v22535_v13, 2  ;;  %v4618_v11 = vsel %vm4611_vm8, %v22538_v46, %v4617_v40 }
 0x2d0   : > { %v4621_v14 = vor.u32 %v4620_v15, %v4619_v20 }
 0x2d2   : > { %14841 = vmatmul.mubr.msk.bf16.gmra.mrb[4].mxu1 %vm3313_vm13, %v19754_v18  ;;  %v22539_v18 = vld [vmem:[#allocation15_spill] sm:$0xff]  ;;  %v4622_v15 = vsel %vm4611_vm8, %v4617_v40, %v4621_v14  ;;  %v4626_v47 = vsel %vm4611_vm8, %v4621_v14, %v19507_v10  ;;  %v5081_v10 = vrot.slane %v22352_v55, 2 }
 0x2d3   : > { %14846 = vmatprep.mubr.msk.bf16.mxu1 %vm3313_vm13, %v19761_v30  ;;  %v5073_v26 = vrot.slane %v22539_v18, 2  ;;  %v22543_v14 = vld [vmem:[#allocation27_spill] sm:$0xff]  ;;  %v5472_v62 = vrot.slane %v22539_v18, 4 }
 0x2d5   : > { %14291 = vmatmul.mubr.msk.bf16.gmra.mrb[108].mxu0 %vm3313_vm13, %v19476_v39  ;;  %v19779_v13 = vsel %vm2107_vm4, %v5071_v63, %v5073_v26  ;;  %v19784_v39 = vld [vmem:[%s21744_s2 + $0x40] sm:$0xf]  ;;  %v5077_v63 = vrot.slane %v22344_v33, 2 }
 0x2d6   : > { %14296 = vmatprep.mubr.msk.bf16.mxu0 %vm3313_vm13, %v4618_v11  ;;  %v19789_v11 = vsel %vm2107_vm4, %v5073_v26, %v5075_v25  ;;  %v19820_v26 = vsel %vm2107_vm4, %v5079_v21, %v5081_v10 }
 0x2d7   : > { %v19804_v40 = vsel %vm2107_vm4, %v5075_v25, %v5077_v63  ;;  %v5083_v25 = vrot.slane %v22543_v14, 2  ;;  %22544 = vst [vmem:[#allocation15_spill] sm:$0xff] %v19820_v26 }
 0x2d8   : > { %22541 = vst [vmem:[#allocation75_spill] sm:$0xff] %v19804_v40 }
 0x2d9   : > { %v19825_v20 = vsel %vm2107_vm4, %v5081_v10, %v5083_v25 }
 0x2da   : > { %14847 = vmatmul.mubr.msk.bf16.vlgmr.msra.gmra.mrb[8].mxu1 %vm3313_vm13, %v19779_v13  ;;  %22545 = vst [vmem:[#allocation21_spill] sm:$0xff] %v19825_v20 }
 0x2db   : > { %14895 = vmatpush3.bf16.msra.mxu1 %v9063_v23  ;;  %14850 = vmatprep.mubr.msk.bf16.mxu1 %vm3313_vm13, %v19789_v11  ;;  %v19809_v23 = vsel %vm2107_vm4, %v5077_v63, %v5079_v21  ;;  %v5093_v63 = vrot.slane %v22376_v3, 2  ;;  %v5095_v21 = vrot.slane %v22380_v54, 2 }
 0x2dc   : > { %16709 = vmatprep.subr.msk.bf16.mxu1 %vm3386_vm14, %v19784_v39  ;;  %22542 = vst [vmem:[#allocation72_spill] sm:$0xff] %v19809_v23 }
 0x2dd   : > { %14297 = vmatmul.mubr.msk.bf16.vlgmr.msra.gmra.mrb[64].mxu0 %vm3313_vm13, %v4622_v15 }
 0x2de   : > { %14300 = vmatprep.mubr.msk.bf16.mxu0 %vm3313_vm13, %v4626_v47  ;;  %14345 = vmatpush3.bf16.msra.mxu0 %v5186_v19  ;;  %v5091_v19 = vrot.slane %v22372_v56, 2 }
 0x2e0   : > { %v19868_v10 = vsel %vm2107_vm4, %v5091_v19, %v5093_v63 }
 0x2e1   : > { %22550 = vst [vmem:[#allocation156_spill] sm:$0xff] %v19868_v10 }
 0x2e2   : > { %14851 = vmatmul.mubr.msk.bf16.gmra.mrb[12].mxu1 %vm3313_vm13, %v19804_v40 }
 0x2e3   : > { %14854 = vmatprep.mubr.msk.bf16.mxu1 %vm3313_vm13, %v19809_v23 }
 0x2e5   : > { %14301 = vmatmul.mubr.msk.bf16.gmra.mrb[68].mxu0 %vm3313_vm13, %v19520_v61  ;;  %v5087_v61 = vrot.slane %v22364_v37, 2 }
 0x2e6   : > { %14304 = vmatprep.mubr.msk.bf16.mxu0 %vm3313_vm13, %v19534_v34  ;;  %v5085_v34 = vrot.slane %v22360_v2, 2 }
 0x2e8   : > { %v19836_v48 = vsel %vm2107_vm4, %v5083_v25, %v5085_v34  ;;  %v19841_v46 = vsel %vm2107_vm4, %v5085_v34, %v5087_v61  ;;  %v19873_v25 = vsel %vm2107_vm4, %v5093_v63, %v5095_v21  ;;  %v5097_v34 = vrot.slane %v22384_v60, 2 }
 0x2e9   : > { %22546 = vst [vmem:[#allocation27_spill] sm:$0xff] %v19836_v48  ;;  %22547 = vst [vmem:[#allocation153_spill] sm:$0xff] %v19841_v46 }
 0x2ea   : > { %14855 = vmatmul.mubr.msk.bf16.gmra.mrb[16].mxu1 %vm3313_vm13, %v19820_v26  ;;  %22551 = vst [vmem:[#allocation157_spill] sm:$0xff] %v19873_v25 }
 0x2eb   : > { %14858 = vmatprep.mubr.msk.bf16.mxu1 %vm3313_vm13, %v19825_v20 }
 0x2ed   : > { %14305 = vmatmul.mubr.msk.bf16.gmra.mrb[72].mxu0 %vm3313_vm13, %v19547_v27  ;;  %v5089_v27 = vrot.slane %v22368_v38, 2 }
 0x2ee   : > { %14308 = vmatprep.mubr.msk.bf16.mxu0 %vm3313_vm13, %v19565_v43 }
 0x2ef   : > { %v19852_v15 = vsel %vm2107_vm4, %v5087_v61, %v5089_v27  ;;  %v19857_v47 = vsel %vm2107_vm4, %v5089_v27, %v5091_v19  ;;  %v22552_v61 = vld [vmem:[#allocation8_spill] sm:$0xff]  ;;  %v19884_v19 = vsel %vm2107_vm4, %v5095_v21, %v5097_v34 }
 0x2f0   : > { %22548 = vst [vmem:[#allocation154_spill] sm:$0xff] %v19852_v15  ;;  %22549 = vst [vmem:[#allocation155_spill] sm:$0xff] %v19857_v47  ;;  %v5099_v27 = vrot.slane %v22552_v61, 2 }
 0x2f1   : > { %22553 = vst [vmem:[#allocation158_spill] sm:$0xff] %v19884_v19 }
 0x2f2   : > { %14859 = vmatmul.mubr.msk.bf16.gmra.mrb[20].mxu1 %vm3313_vm13, %v19836_v48  ;;  %v19889_v63 = vsel %vm2107_vm4, %v5097_v34, %v5099_v27 }
 0x2f3   : > { %14862 = vmatprep.mubr.msk.bf16.mxu1 %vm3313_vm13, %v19841_v46  ;;  %22554 = vst [vmem:[#allocation159_spill] sm:$0xff] %v19889_v63 }
 0x2f5   : > { %14309 = vmatmul.mubr.msk.bf16.gmra.mrb[76].mxu0 %vm3313_vm13, %v19572_v32 }
 0x2f6   : > { %14312 = vmatprep.mubr.msk.bf16.mxu0 %vm3313_vm13, %v19583_v41  ;;  %v22560_v41 = vld [vmem:[#allocation16_spill] sm:$0xff] }
 0x2f7   : > { %v5107_v32 = vrot.slane %v22560_v41, 2 }
 0x2fa   : > { %14863 = vmatmul.mubr.msk.bf16.gmra.mrb[24].mxu1 %vm3313_vm13, %v19852_v15 }
 0x2fb   : > { %14866 = vmatprep.mubr.msk.bf16.mxu1 %vm3313_vm13, %v19857_v47 }
 0x2fd   : > { %14313 = vmatmul.mubr.msk.bf16.gmra.mrb[80].mxu0 %vm3313_vm13, %v19590_v58 }
 0x2fe   : > { %14316 = vmatprep.mubr.msk.bf16.mxu0 %vm3313_vm13, %v19601_v6  ;;  %v22556_v6 = vld [vmem:[#allocation29_spill] sm:$0xff] }
 0x2ff   : > { %v5103_v21 = vrot.slane %v22556_v6, 2 }
 0x302   : > { %14867 = vmatmul.mubr.msk.bf16.gmra.mrb[28].mxu1 %vm3313_vm13, %v19868_v10 }
 0x303   : > { %14870 = vmatprep.mubr.msk.bf16.mxu1 %vm3313_vm13, %v19873_v25 }
 0x305   : > { %14317 = vmatmul.mubr.msk.bf16.gmra.mrb[84].mxu0 %vm3313_vm13, %v19608_v8 }
 0x306   : > { %14320 = vmatprep.mubr.msk.bf16.mxu0 %vm3313_vm13, %v19619_v28  ;;  %v22555_v28 = vld [vmem:[#allocation13_spill] sm:$0xff] }
 0x307   : > { %v5101_v8 = vrot.slane %v22555_v28, 2 }
 0x309   : > { %v19900_v58 = vsel %vm2107_vm4, %v5099_v27, %v5101_v8  ;;  %v19905_v34 = vsel %vm2107_vm4, %v5101_v8, %v5103_v21  ;;  %v12672_v27 = vld [vmem:[%s21744_s2 + $0x14] sm:$0xf] }
 0x30a   : > { %14871 = vmatmul.mubr.msk.bf16.gmra.mrb[32].mxu1 %vm3313_vm13, %v19884_v19  ;;  %22557 = vst [vmem:[#allocation160_spill] sm:$0xff] %v19900_v58  ;;  %22558 = vst [vmem:[#allocation161_spill] sm:$0xff] %v19905_v34  ;;  %16697 = vmatprep.subr.msk.bf16.mxu0 %vm3386_vm14, %v12672_v27 }
 0x30b   : > { %14874 = vmatprep.mubr.msk.bf16.mxu1 %vm3313_vm13, %v19889_v63 }
 0x30d   : > { %14321 = vmatmul.mubr.msk.bf16.gmra.mrb[88].mxu0 %vm3313_vm13, %v19626_v45 }
 0x30e   : > { %14324 = vmatprep.mubr.msk.bf16.mxu0 %vm3313_vm13, %v19637_v0  ;;  %v22559_v0 = vld [vmem:[#allocation28_spill] sm:$0xff] }
 0x30f   : > { %v5105_v45 = vrot.slane %v22559_v0, 2 }
 0x311   : > { %v19920_v8 = vsel %vm2107_vm4, %v5103_v21, %v5105_v45  ;;  %v5111_v21 = vrot.slane %v18779_v51, 2 }
 0x312   : > { %14875 = vmatmul.mubr.msk.bf16.gmra.mrb[36].mxu1 %vm3313_vm13, %v19900_v58  ;;  %22561 = vst [vmem:[#allocation162_spill] sm:$0xff] %v19920_v8 }
 0x313   : > { %14878 = vmatprep.mubr.msk.bf16.mxu1 %vm3313_vm13, %v19905_v34 }
 0x315   : > { %14325 = vmatmul.mubr.msk.bf16.gmra.mrb[92].mxu0 %vm3313_vm13, %v19644_v17  ;;  %v19925_v17 = vsel %vm2107_vm4, %v5105_v45, %v5107_v32 }
 0x316   : > { %14328 = vmatprep.mubr.msk.bf16.mxu0 %vm3313_vm13, %v19655_v52  ;;  %22562 = vst [vmem:[#allocation163_spill] sm:$0xff] %v19925_v17  ;;  %v5109_v52 = vrot.slane %v18749_v50, 2 }
 0x318   : > { %v19936_v43 = vsel %vm2107_vm4, %v5107_v32, %v5109_v52  ;;  %v19941_v45 = vsel %vm2107_vm4, %v5109_v52, %v5111_v21  ;;  %v8755_v32 = vrot.slane %v22566_v57, 2 }
 0x319   : > { %22563 = vst [vmem:[#allocation164_spill] sm:$0xff] %v19936_v43  ;;  %22564 = vst [vmem:[#allocation165_spill] sm:$0xff] %v19941_v45 }
 0x31a   : > { %14879 = vmatmul.mubr.msk.bf16.gmra.mrb[40].mxu1 %vm3313_vm13, %v19920_v8 }
 0x31b   : > { %14882 = vmatprep.mubr.msk.bf16.mxu1 %vm3313_vm13, %v19925_v17 }
 0x31d   : > { %14329 = vmatmul.mubr.msk.bf16.gmra.mrb[96].mxu0 %vm3313_vm13, %v19662_v29 }
 0x31e   : > { %14332 = vmatprep.mubr.msk.bf16.mxu0 %vm3313_vm13, %v19673_v59  ;;  %v22565_v59 = vld [vmem:[#allocation30_spill] sm:$0xff] }
 0x31f   : > { %v8753_v29 = vrot.slane %v22565_v59, 2 }
 0x321   : > { %v19952_v1 = vsel %vm2107_vm4, %v5111_v21, %v8753_v29  ;;  %v19957_v52 = vsel %vm2107_vm4, %v8753_v29, %v8755_v32  ;;  %v22070_v21 = vrot.slane %v22533_v16, 4  ;;  %v5065_v29 = vrot.slane %v22571_v4, 2 }
 0x322   : > { %14883 = vmatmul.mubr.msk.bf16.gmra.mrb[44].mxu1 %vm3313_vm13, %v19936_v43  ;;  %22567 = vst [vmem:[#allocation166_spill] sm:$0xff] %v19952_v1  ;;  %22568 = vst [vmem:[#allocation167_spill] sm:$0xff] %v19957_v52 }
 0x323   : > { %14886 = vmatprep.mubr.msk.bf16.mxu1 %vm3313_vm13, %v19941_v45 }
 0x325   : > { %14333 = vmatmul.mubr.msk.bf16.gmra.mrb[100].mxu0 %vm3313_vm13, %v19680_v44 }
 0x326   : > { %14336 = vmatprep.mubr.msk.bf16.mxu0 %vm3313_vm13, %v19695_v5  ;;  %v22569_v5 = vld [vmem:[#allocation33_spill] sm:$0xff] }
 0x327   : > { %v22068_v44 = vrot.slane %v22569_v5, 2 }
 0x32a   : > { %14887 = vmatmul.mubr.msk.bf16.gmra.mrb[0].mxu1 %vm3313_vm13, %v19952_v1  ;;  %v5064_v1 = vrot.slane %v22570_v31, 2 }
 0x32b   : > { %14890 = vmatprep.mubr.msk.bf16.mxu1 %vm3313_vm13, %v19957_v52  ;;  %v19973_v52 = vsel %vm2107_vm4, %v8755_v32, %v22068_v44  ;;  %v5474_v32 = vrot.slane %v22540_v12, 4  ;;  %v5476_v44 = vrot.slane %v22344_v33, 4 }
 0x32c   : > { %22572 = vst [vmem:[#allocation19_spill] sm:$0xff] %v19973_v52  ;;  %v5066_v31 = vsel %vm2107_vm4, %v5064_v1, %v5065_v29 }
 0x32d   : > { %14337 = vmatmul.mubr.msk.bf16.gmra.mrb[104].mxu0 %vm3313_vm13, %v19702_v22  ;;  %v19994_v22 = vsel %vm3386_vm14, %v5472_v62, %v5474_v32  ;;  %v20004_v1 = vsel %vm3386_vm14, %v5474_v32, %v5476_v44  ;;  %v5478_v32 = vrot.slane %v22346_v24, 4 }
 0x32e   : > { %14340 = vmatprep.mubr.msk.bf16.mxu0 %vm3313_vm13, %v19713_v49  ;;  %v19980_v49 = vsel %vm3386_vm14, %v22070_v21, %v5472_v62  ;;  %v9367_v21 = vsel %vm3386_vm14, %v19784_v39, 0  ;;  %v22573_v62 = vrot.slane %v22331_v9, 2 }
 0x332   : > { %14891 = vmatmul.mubr.msk.bf16.gmra.mrb[4].mxu1 %vm3313_vm13, %v19973_v52  ;;  %v5067_v52 = vrot.slane %v22350_v35, 2 }
 0x333   : > { %14896 = vmatprep.mubr.msk.bf16.mxu1 %vm3313_vm13, %v19980_v49 }
 0x334   : > { %v5068_v33 = vsel %vm2107_vm4, %v5065_v29, %v5067_v52  ;;  %v5070_v39 = vsel %vm2107_vm4, %v5067_v52, %v22573_v62  ;;  %v5482_v52 = vrot.slane %v22543_v14, 4 }
 0x335   : > { %14341 = vmatmul.mubr.msk.bf16.gmra.mrb[108].mxu0 %vm3313_vm13, %v19720_v36  ;;  %v19999_v36 = vld [vmem:[%s21744_s2 + $0x44] sm:$0xf] }
 0x336   : > { %14346 = vmatprep.mubr.msk.bf16.mxu0 %vm3313_vm13, %v5066_v31  ;;  %v5587_v31 = vsel %vm3386_vm14, %v12672_v27, 0  ;;  %v5480_v27 = vrot.slane %v22352_v55, 4 }
 0x338   : > { %v20036_v29 = vsel %vm3386_vm14, %v5480_v27, %v5482_v52 }
 0x33a   : > { %14897 = vmatmul.mubr.msk.bf16.vlgmr.msra.gmra.mrb[8].mxu1 %vm3313_vm13, %v19994_v22 }
 0x33b   : > { %14945 = vmatpush3.bf16.msra.mxu1 %v9367_v21  ;;  %14900 = vmatprep.mubr.msk.bf16.mxu1 %vm3313_vm13, %v20004_v1  ;;  %v20020_v21 = vsel %vm3386_vm14, %v5476_v44, %v5478_v32  ;;  %v5484_v44 = vrot.slane %v22360_v2, 4 }
 0x33c   : > { %16710 = vmatprep.subr.msk.bf16.mxu1 %vm3386_vm14, %v19999_v36 }
 0x33d   : > { %14347 = vmatmul.mubr.msk.bf16.vlgmr.msra.gmra.mrb[64].mxu0 %vm3313_vm13, %v5068_v33  ;;  %v20025_v33 = vsel %vm3386_vm14, %v5478_v32, %v5480_v27  ;;  %v5492_v32 = vrot.slane %v22376_v3, 4  ;;  %v22583_v3 = vshll.u32 %v19552_v53, 16 }
 0x33e   : > { %14350 = vmatprep.mubr.msk.bf16.mxu0 %vm3313_vm13, %v5070_v39  ;;  %14395 = vmatpush3.bf16.msra.mxu0 %v5587_v31  ;;  %v20041_v31 = vsel %vm3386_vm14, %v5482_v52, %v5484_v44 }
 0x342   : > { %14901 = vmatmul.mubr.msk.bf16.gmra.mrb[12].mxu1 %vm3313_vm13, %v20020_v21 }
 0x343   : > { %14904 = vmatprep.mubr.msk.bf16.mxu1 %vm3313_vm13, %v20025_v33 }
 0x345   : > { %14351 = vmatmul.mubr.msk.bf16.gmra.mrb[68].mxu0 %vm3313_vm13, %v19761_v30  ;;  %v5486_v30 = vrot.slane %v22364_v37, 4 }
 0x346   : > { %14354 = vmatprep.mubr.msk.bf16.mxu0 %vm3313_vm13, %v19779_v13  ;;  %v5488_v13 = vrot.slane %v22368_v38, 4 }
 0x347   : > { %v20052_v62 = vsel %vm3386_vm14, %v5484_v44, %v5486_v30  ;;  %v5494_v44 = vrot.slane %v22380_v54, 4 }
 0x348   : > { %v20057_v39 = vsel %vm3386_vm14, %v5486_v30, %v5488_v13  ;;  %v5496_v30 = vrot.slane %v22384_v60, 4  ;;  %v22582_v60 = vld [vmem:[#allocation24_spill] sm:$0xff] }
 0x349   : > { %v5888_v54 = vrot.slane %v22582_v60, 4 }
 0x34a   : > { %14905 = vmatmul.mubr.msk.bf16.gmra.mrb[16].mxu1 %vm3313_vm13, %v20036_v29 }
 0x34b   : > { %14908 = vmatprep.mubr.msk.bf16.mxu1 %vm3313_vm13, %v20041_v31 }
 0x34d   : > { %14355 = vmatmul.mubr.msk.bf16.gmra.mrb[72].mxu0 %vm3313_vm13, %v19789_v11  ;;  %v5490_v11 = vrot.slane %v22372_v56, 4 }
 0x34e   : > { %14358 = vmatprep.mubr.msk.bf16.mxu0 %vm3313_vm13, %v19804_v40 }
 0x34f   : > { %v20068_v27 = vsel %vm3386_vm14, %v5488_v13, %v5490_v11  ;;  %v20073_v52 = vsel %vm3386_vm14, %v5490_v11, %v5492_v32  ;;  %v20084_v13 = vsel %vm3386_vm14, %v5492_v32, %v5494_v44  ;;  %v20089_v11 = vsel %vm3386_vm14, %v5494_v44, %v5496_v30 }
 0x350   : > { %v5500_v32 = vrot.slane %v22555_v28, 4  ;;  %v22581_v28 = vld [vmem:[#allocation37_spill] sm:$0xff] }
 0x352   : > { %14909 = vmatmul.mubr.msk.bf16.gmra.mrb[20].mxu1 %vm3313_vm13, %v20052_v62 }
 0x353   : > { %14912 = vmatprep.mubr.msk.bf16.mxu1 %vm3313_vm13, %v20057_v39 }
 0x355   : > { %14359 = vmatmul.mubr.msk.bf16.gmra.mrb[76].mxu0 %vm3313_vm13, %v19809_v23  ;;  %v22574_v23 = vld [vmem:[#allocation38_spill] sm:$0xff] }
 0x356   : > { %14362 = vmatprep.mubr.msk.bf16.mxu0 %vm3313_vm13, %v19820_v26  ;;  %v5880_v40 = vrot.slane %v22574_v23, 4 }
 0x35a   : > { %14913 = vmatmul.mubr.msk.bf16.gmra.mrb[24].mxu1 %vm3313_vm13, %v20068_v27 }
 0x35b   : > { %14916 = vmatprep.mubr.msk.bf16.mxu1 %vm3313_vm13, %v20073_v52 }
 0x35d   : > { %14363 = vmatmul.mubr.msk.bf16.gmra.mrb[80].mxu0 %vm3313_vm13, %v19825_v20 }
 0x35e   : > { %14366 = vmatprep.mubr.msk.bf16.mxu0 %vm3313_vm13, %v19836_v48  ;;  %v5498_v48 = vrot.slane %v22552_v61, 4  ;;  %v5885_v61 = vrot.slane %v22581_v28, 5 }
 0x360   : > { %v20100_v20 = vsel %vm3386_vm14, %v5496_v30, %v5498_v48  ;;  %v20105_v44 = vsel %vm3386_vm14, %v5498_v48, %v5500_v32  ;;  %v5504_v30 = vrot.slane %v22559_v0, 4 }
 0x362   : > { %14917 = vmatmul.mubr.msk.bf16.gmra.mrb[28].mxu1 %vm3313_vm13, %v20084_v13 }
 0x363   : > { %14920 = vmatprep.mubr.msk.bf16.mxu1 %vm3313_vm13, %v20089_v11 }
 0x365   : > { %14367 = vmatmul.mubr.msk.bf16.gmra.mrb[84].mxu0 %vm3313_vm13, %v19841_v46 }
 0x366   : > { %14370 = vmatprep.mubr.msk.bf16.mxu0 %vm3313_vm13, %v19852_v15  ;;  %v5502_v15 = vrot.slane %v22556_v6, 4 }
 0x368   : > { %v20116_v46 = vsel %vm3386_vm14, %v5500_v32, %v5502_v15  ;;  %v20121_v48 = vsel %vm3386_vm14, %v5502_v15, %v5504_v30  ;;  %v20133_v32 = vld [vmem:[%s21744_s2 + $0x18] sm:$0xf] }
 0x369   : > { %16698 = vmatprep.subr.msk.bf16.mxu0 %vm3386_vm14, %v20133_v32 }
 0x36a   : > { %14921 = vmatmul.mubr.msk.bf16.gmra.mrb[32].mxu1 %vm3313_vm13, %v20100_v20 }
 0x36b   : > { %14924 = vmatprep.mubr.msk.bf16.mxu1 %vm3313_vm13, %v20105_v44 }
 0x36d   : > { %14371 = vmatmul.mubr.msk.bf16.gmra.mrb[88].mxu0 %vm3313_vm13, %v19857_v47  ;;  %v5508_v47 = vrot.slane %v18749_v50, 4 }
 0x36e   : > { %14374 = vmatprep.mubr.msk.bf16.mxu0 %vm3313_vm13, %v19868_v10  ;;  %v5506_v10 = vrot.slane %v22560_v41, 4 }
 0x370   : > { %v20139_v15 = vsel %vm3386_vm14, %v5504_v30, %v5506_v10  ;;  %v5512_v30 = vrot.slane %v22565_v59, 4  ;;  %v22575_v59 = vld [vmem:[#allocation36_spill] sm:$0xff] }
 0x372   : > { %14925 = vmatmul.mubr.msk.bf16.gmra.mrb[36].mxu1 %vm3313_vm13, %v20116_v46 }
 0x373   : > { %14928 = vmatprep.mubr.msk.bf16.mxu1 %vm3313_vm13, %v20121_v48 }
 0x375   : > { %14375 = vmatmul.mubr.msk.bf16.gmra.mrb[92].mxu0 %vm3313_vm13, %v19873_v25  ;;  %v5510_v25 = vrot.slane %v18779_v51, 4 }
 0x376   : > { %14378 = vmatprep.mubr.msk.bf16.mxu0 %vm3313_vm13, %v19884_v19  ;;  %v20144_v19 = vsel %vm3386_vm14, %v5506_v10, %v5508_v47 }
 0x377   : > { %v20155_v26 = vsel %vm3386_vm14, %v5508_v47, %v5510_v25  ;;  %v20160_v10 = vsel %vm3386_vm14, %v5510_v25, %v5512_v30  ;;  %v9049_v47 = vrot.slane %v22569_v5, 4  ;;  %v5881_v25 = vrot.slane %v22575_v59, 5 }
 0x379   : > { %v5882_v5 = vor.u32 %v5881_v25, %v5880_v40 }
 0x37a   : > { %14929 = vmatmul.mubr.msk.bf16.gmra.mrb[40].mxu1 %vm3313_vm13, %v20139_v15 }
 0x37b   : > { %14932 = vmatprep.mubr.msk.bf16.mxu1 %vm3313_vm13, %v20144_v19 }
 0x37d   : > { %14379 = vmatmul.mubr.msk.bf16.gmra.mrb[96].mxu0 %vm3313_vm13, %v19889_v63 }
 0x37e   : > { %14382 = vmatprep.mubr.msk.bf16.mxu0 %vm3313_vm13, %v19900_v58  ;;  %v9047_v58 = vrot.slane %v22566_v57, 4 }
 0x380   : > { %v9048_v63 = vsel %vm3386_vm14, %v5512_v30, %v9047_v58  ;;  %v9050_v51 = vsel %vm3386_vm14, %v9047_v58, %v9049_v47  ;;  %v22577_v30 = vld [vmem:[#allocation10_spill] sm:$0xff] }
 0x381   : > { %v22108_v57 = vshrl.u32 %v22577_v30, 16  ;;  %v22110_v59 = vshll.u32 %v22577_v30, 16  ;;  %v22579_v58 = vld [vmem:[#allocation118_spill] sm:$0xff] }
 0x382   : > { %14933 = vmatmul.mubr.msk.bf16.gmra.mrb[44].mxu1 %vm3313_vm13, %v20155_v26  ;;  %v11413_v41 = vrot.slane %v22579_v58, 2 }
 0x383   : > { %14936 = vmatprep.mubr.msk.bf16.mxu1 %vm3313_vm13, %v20160_v10  ;;  %v11416_v40 = vrot.slane %v22108_v57, 1  ;;  %v11417_v25 = vrot.slane %v22110_v59, 2 }
 0x385   : > { %14383 = vmatmul.mubr.msk.bf16.gmra.mrb[100].mxu0 %vm3313_vm13, %v19905_v34 }
 0x386   : > { %14386 = vmatprep.mubr.msk.bf16.mxu0 %vm3313_vm13, %v19920_v8  ;;  %v22576_v8 = vld [vmem:[#allocation35_spill] sm:$0xff] }
 0x387   : > { %v9051_v34 = vrot.slane %v22576_v8, 4  ;;  %v5466_v8 = vrot.slane %v22350_v35, 4  ;;  %v22584_v35 = vld [vmem:[#allocation103_spill] sm:$0xff] }
 0x389   : > { %v9052_v0 = vsel %vm3386_vm14, %v9049_v47, %v9051_v34  ;;  %v20202_v34 = vsel %vm5864_vm2, %v22584_v35, %v5882_v5  ;;  %v22585_v47 = vld [vmem:[#allocation11_spill] sm:$0xff] }
 0x38a   : > { %14937 = vmatmul.mubr.msk.bf16.gmra.mrb[0].mxu1 %vm3313_vm13, %v9048_v63  ;;  %v22578_v63 = vld [vmem:[#allocation117_spill] sm:$0xff]  ;;  %v5889_v57 = vrot.slane %v22585_v47, 5 }
 0x38b   : > { %14940 = vmatprep.mubr.msk.bf16.mxu1 %vm3313_vm13, %v9050_v51  ;;  %v11412_v50 = vrot.slane %v22578_v63, 1  ;;  %v11420_v51 = vshrl.u32 %v19552_v53, 16  ;;  %v22595_v53 = vld [vmem:[#allocation22_spill] sm:$0xff] }
 0x38d   : > { %14387 = vmatmul.mubr.msk.bf16.gmra.mrb[104].mxu0 %vm3313_vm13, %v19925_v17  ;;  %v5465_v17 = vrot.slane %v22571_v4, 4  ;;  %v11422_v23 = vrot.slane %v11420_v51, 1  ;;  %v11423_v4 = vrot.slane %v22583_v3, 2  ;;  %v20205_v30 = vor.u32 %v11413_v41, %v11412_v50 }
 0x38e   : > { %14390 = vmatprep.mubr.msk.bf16.mxu0 %vm3313_vm13, %v19936_v43  ;;  %v22580_v43 = vld [vmem:[#allocation5_spill] sm:$0xff]  ;;  %v11418_v51 = vor.u32 %v11417_v25, %v11416_v40  ;;  %v5890_v41 = vor.u32 %v5889_v57, %v5888_v54  ;;  %v5468_v40 = vrot.slane %v22331_v9, 4  ;;  %v22591_v57 = vld [vmem:[#allocation42_spill] sm:$0xff] }
 0x38f   : > { %v5884_v6 = vrot.slane %v22580_v43, 4  ;;  %22586 = vst [vmem:[#allocation5_spill] sm:$0xff] %v20205_v30  ;;  %v11424_v59 = vor.u32 %v11423_v4, %v11422_v23  ;;  %v5467_v3 = vsel %vm3386_vm14, %v5465_v17, %v5466_v8  ;;  %v9660_v4 = vsel %vm3386_vm14, %v19999_v36, 0  ;;  %v22589_v17 = vld [vmem:[#allocation12_spill] sm:$0xff] }
 0x390   : > { %v5892_v25 = vrot.slane %v22589_v17, 4  ;;  %v5896_v36 = vrot.slane %v22591_v57, 4  ;;  %v22597_v57 = vld [vmem:[#allocation4_spill] sm:$0xff] }
 0x391   : > { %v5886_v35 = vor.u32 %v5885_v61, %v5884_v6  ;;  %v20218_v50 = vsel %vm4611_vm8, %v11418_v51, %v11424_v59  ;;  %v20231_v6 = vld [vmem:[%s21744_s2 + $0x48] sm:$0xf]  ;;  %v22592_v59 = vld [vmem:[#allocation6_spill] sm:$0xff]  ;;  %v6042_v61 = vsel %vm3386_vm14, %v20133_v32, 0 }
 0x392   : > { %14941 = vmatmul.mubr.msk.bf16.gmra.mrb[4].mxu1 %vm3313_vm13, %v9052_v0  ;;  %v20214_v0 = vsel %vm4611_vm8, %v20205_v30, %v11418_v51  ;;  %22588 = vst [vmem:[#allocation24_spill] sm:$0xff] %v20218_v50  ;;  %v5469_v51 = vsel %vm3386_vm14, %v5466_v8, %v5468_v40 }
 0x393   : > { %14946 = vmatprep.mubr.msk.bf16.mxu1 %vm3313_vm13, %v20202_v34  ;;  %22587 = vst [vmem:[#allocation37_spill] sm:$0xff] %v20214_v0  ;;  %v20224_v23 = vsel %vm5864_vm2, %v5882_v5, %v5886_v35  ;;  %v20236_v54 = vsel %vm5864_vm2, %v5886_v35, %v5890_v41  ;;  %v5897_v5 = vrot.slane %v22592_v59, 5  ;;  %v5901_v59 = vrot.slane %v22595_v53, 5  ;;  %v22601_v53 = vld [vmem:[#allocation9_spill] sm:$0xff] }
 0x395   : > { %14391 = vmatmul.mubr.msk.bf16.gmra.mrb[108].mxu0 %vm3313_vm13, %v19941_v45  ;;  %v22590_v45 = vld [vmem:[#allocation41_spill] sm:$0xff]  ;;  %v5898_v32 = vor.u32 %v5897_v5, %v5896_v36  ;;  %v22599_v5 = vld [vmem:[#allocation31_spill] sm:$0xff] }
 0x396   : > { %14396 = vmatprep.mubr.msk.bf16.mxu0 %vm3313_vm13, %v5467_v3  ;;  %v5893_v30 = vrot.slane %v22590_v45, 5  ;;  %v22593_v3 = vrot.slane %v22533_v16, 4 }
 0x398   : > { %v5471_v35 = vsel %vm3386_vm14, %v5468_v40, %v22593_v3  ;;  %v5894_v50 = vor.u32 %v5893_v30, %v5892_v25 }
 0x39a   : > { %14947 = vmatmul.mubr.msk.bf16.vlgmr.msra.gmra.mrb[8].mxu1 %vm3313_vm13, %v20224_v23  ;;  %v20253_v8 = vsel %vm5864_vm2, %v5890_v41, %v5894_v50  ;;  %v20260_v40 = vsel %vm5864_vm2, %v5894_v50, %v5898_v32  ;;  %v22598_v50 = vld [vmem:[#allocation50_spill] sm:$0xff] }
 0x39b   : > { %14995 = vmatpush3.bf16.msra.mxu1 %v9660_v4  ;;  %14950 = vmatprep.mubr.msk.bf16.mxu1 %vm3313_vm13, %v20236_v54  ;;  %v22594_v4 = vld [vmem:[#allocation45_spill] sm:$0xff]  ;;  %v5908_v36 = vrot.slane %v22598_v50, 4 }
 0x39c   : > { %16711 = vmatprep.subr.msk.bf16.mxu1 %vm3386_vm14, %v20231_v6  ;;  %v5900_v0 = vrot.slane %v22594_v4, 4  ;;  %v5913_v4 = vrot.slane %v22601_v53, 5 }
 0x39d   : > { %14397 = vmatmul.mubr.msk.bf16.vlgmr.msra.gmra.mrb[64].mxu0 %vm3313_vm13, %v5469_v51  ;;  %v22596_v51 = vld [vmem:[#allocation46_spill] sm:$0xff] }
 0x39e   : > { %14400 = vmatprep.mubr.msk.bf16.mxu0 %vm3313_vm13, %v5471_v35  ;;  %14445 = vmatpush3.bf16.msra.mxu0 %v6042_v61  ;;  %v5904_v3 = vrot.slane %v22596_v51, 4  ;;  %v5905_v35 = vrot.slane %v22597_v57, 5  ;;  %v5902_v30 = vor.u32 %v5901_v59, %v5900_v0  ;;  %v5909_v61 = vrot.slane %v22599_v5, 5  ;;  %v22600_v51 = vld [vmem:[#allocation51_spill] sm:$0xff]  ;;  %v22605_v5 = vld [vmem:[#allocation52_spill] sm:$0xff] }
 0x39f   : > { %v5921_v50 = vrot.slane %v22605_v5, 5 }
 0x3a0   : > { %v5906_v41 = vor.u32 %v5905_v35, %v5904_v3  ;;  %v20271_v25 = vsel %vm5864_vm2, %v5898_v32, %v5902_v30  ;;  %v22602_v32 = vld [vmem:[#allocation56_spill] sm:$0xff]  ;;  %v22603_v35 = vld [vmem:[#allocation49_spill] sm:$0xff] }
 0x3a1   : > { %v5916_v3 = vrot.slane %v22602_v32, 4 }
 0x3a2   : > { %14951 = vmatmul.mubr.msk.bf16.gmra.mrb[12].mxu1 %vm3313_vm13, %v20253_v8  ;;  %v20278_v57 = vsel %vm5864_vm2, %v5902_v30, %v5906_v41  ;;  %v5917_v30 = vrot.slane %v22603_v35, 5  ;;  %v22609_v35 = vld [vmem:[#allocation58_spill] sm:$0xff] }
 0x3a3   : > { %14954 = vmatprep.mubr.msk.bf16.mxu1 %vm3313_vm13, %v20260_v40  ;;  %v5929_v32 = vrot.slane %v22609_v35, 5 }
 0x3a5   : > { %14401 = vmatmul.mubr.msk.bf16.gmra.mrb[68].mxu0 %vm3313_vm13, %v19980_v49  ;;  %v5912_v49 = vrot.slane %v22600_v51, 4  ;;  %v22604_v51 = vld [vmem:[#allocation57_spill] sm:$0xff] }
 0x3a6   : > { %14404 = vmatprep.mubr.msk.bf16.mxu0 %vm3313_vm13, %v19994_v22  ;;  %v5910_v22 = vor.u32 %v5909_v61, %v5908_v36  ;;  %v22606_v36 = vld [vmem:[#allocation62_spill] sm:$0xff] }
 0x3a7   : > { %v5914_v0 = vor.u32 %v5913_v4, %v5912_v49  ;;  %v5924_v61 = vrot.slane %v22606_v36, 4  ;;  %v22607_v49 = vld [vmem:[#allocation55_spill] sm:$0xff] }
 0x3a8   : > { %v20289_v59 = vsel %vm5864_vm2, %v5906_v41, %v5910_v22 }
 0x3a9   : > { %v20296_v53 = vsel %vm5864_vm2, %v5910_v22, %v5914_v0  ;;  %v5925_v22 = vrot.slane %v22607_v49, 5  ;;  %v22613_v49 = vld [vmem:[#allocation64_spill] sm:$0xff] }
 0x3aa   : > { %14955 = vmatmul.mubr.msk.bf16.gmra.mrb[16].mxu1 %vm3313_vm13, %v20271_v25  ;;  %v5937_v36 = vrot.slane %v22613_v49, 5 }
 0x3ab   : > { %14958 = vmatprep.mubr.msk.bf16.mxu1 %vm3313_vm13, %v20278_v57 }
 0x3ad   : > { %14405 = vmatmul.mubr.msk.bf16.gmra.mrb[72].mxu0 %vm3313_vm13, %v20004_v1  ;;  %v5920_v1 = vrot.slane %v22604_v51, 4  ;;  %v22608_v51 = vld [vmem:[#allocation63_spill] sm:$0xff] }
 0x3ae   : > { %14408 = vmatprep.mubr.msk.bf16.mxu0 %vm3313_vm13, %v20020_v21  ;;  %v5918_v21 = vor.u32 %v5917_v30, %v5916_v3  ;;  %v22610_v3 = vld [vmem:[#allocation68_spill] sm:$0xff] }
 0x3af   : > { %v5922_v4 = vor.u32 %v5921_v50, %v5920_v1  ;;  %v5932_v30 = vrot.slane %v22610_v3, 4  ;;  %v22611_v1 = vld [vmem:[#allocation61_spill] sm:$0xff] }
 0x3b0   : > { %v20307_v41 = vsel %vm5864_vm2, %v5914_v0, %v5918_v21 }
 0x3b1   : > { %v20314_v5 = vsel %vm5864_vm2, %v5918_v21, %v5922_v4  ;;  %v5933_v21 = vrot.slane %v22611_v1, 5  ;;  %v22617_v1 = vld [vmem:[#allocation70_spill] sm:$0xff] }
 0x3b2   : > { %14959 = vmatmul.mubr.msk.bf16.gmra.mrb[20].mxu1 %vm3313_vm13, %v20289_v59  ;;  %v5945_v3 = vrot.slane %v22617_v1, 5 }
 0x3b3   : > { %14962 = vmatprep.mubr.msk.bf16.mxu1 %vm3313_vm13, %v20296_v53 }
 0x3b5   : > { %14409 = vmatmul.mubr.msk.bf16.gmra.mrb[76].mxu0 %vm3313_vm13, %v20025_v33  ;;  %v5928_v33 = vrot.slane %v22608_v51, 4  ;;  %v22612_v51 = vld [vmem:[#allocation69_spill] sm:$0xff] }
 0x3b6   : > { %14412 = vmatprep.mubr.msk.bf16.mxu0 %vm3313_vm13, %v20036_v29  ;;  %v5926_v29 = vor.u32 %v5925_v22, %v5924_v61  ;;  %v22614_v61 = vld [vmem:[#allocation76_spill] sm:$0xff] }
 0x3b7   : > { %v5930_v50 = vor.u32 %v5929_v32, %v5928_v33  ;;  %v5940_v22 = vrot.slane %v22614_v61, 4  ;;  %v22615_v33 = vld [vmem:[#allocation67_spill] sm:$0xff] }
 0x3b8   : > { %v20325_v0 = vsel %vm5864_vm2, %v5922_v4, %v5926_v29 }
 0x3b9   : > { %v20332_v35 = vsel %vm5864_vm2, %v5926_v29, %v5930_v50  ;;  %v5941_v29 = vrot.slane %v22615_v33, 5  ;;  %v22621_v33 = vld [vmem:[#allocation78_spill] sm:$0xff] }
 0x3ba   : > { %14963 = vmatmul.mubr.msk.bf16.gmra.mrb[24].mxu1 %vm3313_vm13, %v20307_v41  ;;  %v5953_v61 = vrot.slane %v22621_v33, 5 }
 0x3bb   : > { %14966 = vmatprep.mubr.msk.bf16.mxu1 %vm3313_vm13, %v20314_v5 }
 0x3bd   : > { %14413 = vmatmul.mubr.msk.bf16.gmra.mrb[80].mxu0 %vm3313_vm13, %v20041_v31  ;;  %v5936_v31 = vrot.slane %v22612_v51, 4  ;;  %v22616_v51 = vld [vmem:[#allocation77_spill] sm:$0xff] }
 0x3be   : > { %14416 = vmatprep.mubr.msk.bf16.mxu0 %vm3313_vm13, %v20052_v62  ;;  %v5934_v62 = vor.u32 %v5933_v21, %v5932_v30  ;;  %v22618_v30 = vld [vmem:[#allocation82_spill] sm:$0xff] }
 0x3bf   : > { %v5938_v32 = vor.u32 %v5937_v36, %v5936_v31  ;;  %v5948_v21 = vrot.slane %v22618_v30, 4  ;;  %v22619_v31 = vld [vmem:[#allocation74_spill] sm:$0xff] }
 0x3c0   : > { %v20343_v4 = vsel %vm5864_vm2, %v5930_v50, %v5934_v62 }
 0x3c1   : > { %v20350_v49 = vsel %vm5864_vm2, %v5934_v62, %v5938_v32  ;;  %v5949_v62 = vrot.slane %v22619_v31, 5 }
 0x3c2   : > { %14967 = vmatmul.mubr.msk.bf16.gmra.mrb[28].mxu1 %vm3313_vm13, %v20325_v0 }
 0x3c3   : > { %14970 = vmatprep.mubr.msk.bf16.mxu1 %vm3313_vm13, %v20332_v35 }
 0x3c5   : > { %14417 = vmatmul.mubr.msk.bf16.gmra.mrb[84].mxu0 %vm3313_vm13, %v20057_v39  ;;  %v5944_v39 = vrot.slane %v22616_v51, 4  ;;  %v22620_v51 = vld [vmem:[#allocation83_spill] sm:$0xff] }
 0x3c6   : > { %14420 = vmatprep.mubr.msk.bf16.mxu0 %vm3313_vm13, %v20068_v27  ;;  %v5942_v27 = vor.u32 %v5941_v29, %v5940_v22  ;;  %v22622_v29 = vld [vmem:[#allocation88_spill] sm:$0xff] }
 0x3c7   : > { %v5946_v36 = vor.u32 %v5945_v3, %v5944_v39  ;;  %v12722_v3 = vld [vmem:[%s21744_s2 + $0x1c] sm:$0xf]  ;;  %v5956_v39 = vrot.slane %v22622_v29, 4  ;;  %v22626_v29 = vld [vmem:[#allocation116_spill] sm:$0xff] }
 0x3c8   : > { %v20361_v50 = vsel %vm5864_vm2, %v5938_v32, %v5942_v27  ;;  %16699 = vmatprep.subr.msk.bf16.mxu0 %vm3386_vm14, %v12722_v3 }
 0x3c9   : > { %v20368_v1 = vsel %vm5864_vm2, %v5942_v27, %v5946_v36  ;;  %v22623_v27 = vld [vmem:[#allocation81_spill] sm:$0xff] }
 0x3ca   : > { %14971 = vmatmul.mubr.msk.bf16.gmra.mrb[32].mxu1 %vm3313_vm13, %v20343_v4  ;;  %v5957_v33 = vrot.slane %v22623_v27, 5  ;;  %v22625_v27 = vld [vmem:[#allocation87_spill] sm:$0xff] }
 0x3cb   : > { %14974 = vmatprep.mubr.msk.bf16.mxu1 %vm3313_vm13, %v20350_v49 }
 0x3cd   : > { %14421 = vmatmul.mubr.msk.bf16.gmra.mrb[88].mxu0 %vm3313_vm13, %v20073_v52  ;;  %v5952_v52 = vrot.slane %v22620_v51, 4  ;;  %v22627_v51 = vld [vmem:[#allocation93_spill] sm:$0xff] }
 0x3ce   : > { %14424 = vmatprep.mubr.msk.bf16.mxu0 %vm3313_vm13, %v20084_v13  ;;  %v5950_v13 = vor.u32 %v5949_v62, %v5948_v21  ;;  %v5966_v21 = vrot.slane %v22525_v42, 5  ;;  %v9345_v31 = vrot.slane %v22627_v51, 5 }
 0x3cf   : > { %v5954_v32 = vor.u32 %v5953_v61, %v5952_v52  ;;  %v5958_v61 = vor.u32 %v5957_v33, %v5956_v39  ;;  %v22624_v52 = vld [vmem:[#allocation92_spill] sm:$0xff]  ;;  %v9351_v39 = vrot.slane %v22578_v63, 4 }
 0x3d0   : > { %v20383_v22 = vsel %vm5864_vm2, %v5946_v36, %v5950_v13 }
 0x3d1   : > { %v20401_v62 = vsel %vm5864_vm2, %v5954_v32, %v5958_v61 }
 0x3d2   : > { %14975 = vmatmul.mubr.msk.bf16.gmra.mrb[36].mxu1 %vm3313_vm13, %v20361_v50 }
 0x3d3   : > { %14978 = vmatprep.mubr.msk.bf16.mxu1 %vm3313_vm13, %v20368_v1 }
 0x3d5   : > { %14425 = vmatmul.mubr.msk.bf16.gmra.mrb[92].mxu0 %vm3313_vm13, %v20089_v11  ;;  %v5963_v11 = vrot.slane %v22524_v7, 4  ;;  %v9341_v7 = vrot.slane %v22625_v27, 5 }
 0x3d6   : > { %14428 = vmatprep.mubr.msk.bf16.mxu0 %vm3313_vm13, %v20100_v20  ;;  %v20390_v20 = vsel %vm5864_vm2, %v5950_v13, %v5954_v32  ;;  %v9340_v13 = vrot.slane %v22624_v52, 4 }
 0x3d7   : > { %v5967_v36 = vor.u32 %v5966_v21, %v5963_v11  ;;  %v9354_v11 = vrot.slane %v22579_v58, 5 }
 0x3d9   : > { %v20408_v42 = vsel %vm5864_vm2, %v5958_v61, %v5967_v36 }
 0x3da   : > { %14979 = vmatmul.mubr.msk.bf16.gmra.mrb[40].mxu1 %vm3313_vm13, %v20383_v22 }
 0x3db   : > { %14982 = vmatprep.mubr.msk.bf16.mxu1 %vm3313_vm13, %v20390_v20 }
 0x3dd   : > { %14429 = vmatmul.mubr.msk.bf16.gmra.mrb[96].mxu0 %vm3313_vm13, %v20105_v44  ;;  %v9344_v44 = vrot.slane %v22626_v29, 4 }
 0x3de   : > { %14432 = vmatprep.mubr.msk.bf16.mxu0 %vm3313_vm13, %v20116_v46  ;;  %v9342_v46 = vor.u32 %v9341_v7, %v9340_v13 }
 0x3df   : > { %v9346_v33 = vor.u32 %v9345_v31, %v9344_v44  ;;  %v9355_v31 = vor.u32 %v9354_v11, %v9351_v39  ;;  %v22631_v44 = vld [vmem:[#allocation94_spill] sm:$0xff] }
 0x3e0   : > { %v9343_v32 = vsel %vm5864_vm2, %v5967_v36, %v9342_v46  ;;  %v22630_v36 = vld [vmem:[#allocation98_spill] sm:$0xff]  ;;  %v5866_v29 = vrot.slane %v22631_v44, 5 }
 0x3e1   : > { %v9347_v21 = vsel %vm5864_vm2, %v9342_v46, %v9346_v33  ;;  %v5865_v13 = vrot.slane %v22630_v36, 4  ;;  %v6327_v46 = vrot.slane %v22539_v18, 5  ;;  %v9356_v51 = vsel %vm5864_vm2, %v9346_v33, %v9355_v31  ;;  %v22633_v31 = vld [vmem:[#allocation104_spill] sm:$0xff] }
 0x3e2   : > { %14983 = vmatmul.mubr.msk.bf16.gmra.mrb[44].mxu1 %vm3313_vm13, %v20401_v62  ;;  %v6329_v33 = vrot.slane %v22540_v12, 5 }
 0x3e3   : > { %14986 = vmatprep.mubr.msk.bf16.mxu1 %vm3313_vm13, %v20408_v42 }
 0x3e4   : > { %v20452_v11 = vsel %vm573_vm1, %v6327_v46, %v6329_v33 }
 0x3e5   : > { %14433 = vmatmul.mubr.msk.bf16.gmra.mrb[100].mxu0 %vm3313_vm13, %v20121_v48  ;;  %v22628_v48 = vld [vmem:[#allocation97_spill] sm:$0xff] }
 0x3e6   : > { %14436 = vmatprep.mubr.msk.bf16.mxu0 %vm3313_vm13, %v20139_v15  ;;  %v5868_v61 = vrot.slane %v22628_v48, 4  ;;  %v22629_v15 = vld [vmem:[#allocation95_spill] sm:$0xff] }
 0x3e7   : > { %v5869_v7 = vrot.slane %v22629_v15, 5 }
 0x3ea   : > { %14987 = vmatmul.mubr.msk.bf16.gmra.mrb[0].mxu1 %vm3313_vm13, %v9343_v32  ;;  %v22118_v32 = vrot.slane %v22533_v16, 5 }
 0x3eb   : > { %14990 = vmatprep.mubr.msk.bf16.mxu1 %vm3313_vm13, %v9347_v21  ;;  %v5870_v21 = vor.u32 %v5869_v7, %v5868_v61  ;;  %v20457_v61 = vld [vmem:[%s21744_s2 + $0x4c] sm:$0xf]  ;;  %v6442_v7 = vsel %vm3386_vm14, %v12722_v3, 0  ;;  %v6335_v3 = vrot.slane %v22352_v55, 5 }
 0x3ec   : > { %v20439_v63 = vsel %vm573_vm1, %v22118_v32, %v6327_v46  ;;  %v6333_v46 = vrot.slane %v22346_v24, 5  ;;  %v22641_v32 = vld [vmem:[#allocation28_spill] sm:$0xff] }
 0x3ed   : > { %14437 = vmatmul.mubr.msk.bf16.gmra.mrb[104].mxu0 %vm3313_vm13, %v20144_v19  ;;  %v5867_v19 = vor.u32 %v5866_v29, %v5865_v13  ;;  %v22632_v29 = vld [vmem:[#allocation3_spill] sm:$0xff]  ;;  %v5875_v13 = vsel %vm5864_vm2, %v5870_v21, %v22633_v31 }
 0x3ee   : > { %14440 = vmatprep.mubr.msk.bf16.mxu0 %vm3313_vm13, %v20155_v26  ;;  %v6331_v39 = vrot.slane %v22632_v29, 5 }
 0x3ef   : > { %v5871_v26 = vsel %vm5864_vm2, %v5867_v19, %v5870_v21  ;;  %v20482_v21 = vsel %vm573_vm1, %v6333_v46, %v6335_v3 }
 0x3f0   : > { %v20477_v19 = vsel %vm573_vm1, %v6331_v39, %v6333_v46 }
 0x3f2   : > { %14991 = vmatmul.mubr.msk.bf16.gmra.mrb[4].mxu1 %vm3313_vm13, %v9356_v51  ;;  %v9959_v51 = vsel %vm3386_vm14, %v20231_v6, 0  ;;  %v22634_v6 = vld [vmem:[#allocation107_spill] sm:$0xff] }
 0x3f3   : > { %14996 = vmatprep.mubr.msk.bf16.mxu1 %vm3313_vm13, %v20439_v63 }
 0x3f5   : > { %14441 = vmatmul.mubr.msk.bf16.gmra.mrb[108].mxu0 %vm3313_vm13, %v20160_v10  ;;  %v20462_v10 = vsel %vm573_vm1, %v6329_v33, %v6331_v39  ;;  %v6339_v33 = vrot.slane %v22360_v2, 5 }
 0x3f6   : > { %14446 = vmatprep.mubr.msk.bf16.mxu0 %vm3313_vm13, %v5871_v26  ;;  %v6337_v26 = vrot.slane %v22543_v14, 5 }
 0x3f8   : > { %v20493_v39 = vsel %vm573_vm1, %v6335_v3, %v6337_v26  ;;  %v22637_v3 = vld [vmem:[#allocation43_spill] sm:$0xff] }
 0x3fa   : > { %14997 = vmatmul.mubr.msk.bf16.vlgmr.msra.gmra.mrb[8].mxu1 %vm3313_vm13, %v20452_v11 }
 0x3fb   : > { %15045 = vmatpush3.bf16.msra.mxu1 %v9959_v51  ;;  %15000 = vmatprep.mubr.msk.bf16.mxu1 %vm3313_vm13, %v20462_v10  ;;  %v20498_v51 = vsel %vm573_vm1, %v6337_v26, %v6339_v33  ;;  %v6351_v26 = vrot.slane %v22637_v3, 5 }
 0x3fc   : > { %16712 = vmatprep.subr.msk.bf16.mxu1 %vm3386_vm14, %v20457_v61 }
 0x3fd   : > { %14447 = vmatmul.mubr.msk.bf16.vlgmr.msra.gmra.mrb[64].mxu0 %vm3313_vm13, %v5875_v13 }
 0x3fe   : > { %14450 = vmatprep.mubr.msk.bf16.mxu0 %vm3313_vm13, %v22634_v6  ;;  %14495 = vmatpush3.bf16.msra.mxu0 %v6442_v7 }
 0x402   : > { %15001 = vmatmul.mubr.msk.bf16.gmra.mrb[12].mxu1 %vm3313_vm13, %v20477_v19 }
 0x403   : > { %15004 = vmatprep.mubr.msk.bf16.mxu1 %vm3313_vm13, %v20482_v21 }
 0x405   : > { %14451 = vmatmul.mubr.msk.bf16.gmra.mrb[68].mxu0 %vm3313_vm13, %v20202_v34  ;;  %v6341_v34 = vrot.slane %v22364_v37, 5 }
 0x406   : > { %14454 = vmatprep.mubr.msk.bf16.mxu0 %vm3313_vm13, %v20224_v23  ;;  %v6343_v23 = vrot.slane %v22368_v38, 5 }
 0x407   : > { %v20509_v7 = vsel %vm573_vm1, %v6339_v33, %v6341_v34 }
 0x408   : > { %v20514_v31 = vsel %vm573_vm1, %v6341_v34, %v6343_v23 }
 0x40a   : > { %15005 = vmatmul.mubr.msk.bf16.gmra.mrb[16].mxu1 %vm3313_vm13, %v20493_v39 }
 0x40b   : > { %15008 = vmatprep.mubr.msk.bf16.mxu1 %vm3313_vm13, %v20498_v51 }
 0x40d   : > { %14455 = vmatmul.mubr.msk.bf16.gmra.mrb[72].mxu0 %vm3313_vm13, %v20236_v54  ;;  %v6345_v54 = vrot.slane %v22372_v56, 5 }
 0x40e   : > { %14458 = vmatprep.mubr.msk.bf16.mxu0 %vm3313_vm13, %v20253_v8  ;;  %v22635_v8 = vld [vmem:[#allocation39_spill] sm:$0xff] }
 0x40f   : > { %v6347_v13 = vrot.slane %v22635_v8, 5  ;;  %v20525_v6 = vsel %vm573_vm1, %v6343_v23, %v6345_v54  ;;  %v22639_v23 = vld [vmem:[#allocation13_spill] sm:$0xff] }
 0x411   : > { %v20530_v46 = vsel %vm573_vm1, %v6345_v54, %v6347_v13  ;;  %v6355_v54 = vrot.slane %v22639_v23, 5 }
 0x412   : > { %15009 = vmatmul.mubr.msk.bf16.gmra.mrb[20].mxu1 %vm3313_vm13, %v20509_v7 }
 0x413   : > { %15012 = vmatprep.mubr.msk.bf16.mxu1 %vm3313_vm13, %v20514_v31 }
 0x415   : > { %14459 = vmatmul.mubr.msk.bf16.gmra.mrb[76].mxu0 %vm3313_vm13, %v20260_v40  ;;  %v22636_v40 = vld [vmem:[#allocation44_spill] sm:$0xff] }
 0x416   : > { %14462 = vmatprep.mubr.msk.bf16.mxu0 %vm3313_vm13, %v20271_v25  ;;  %v6349_v25 = vrot.slane %v22636_v40, 5  ;;  %v22649_v40 = vld [vmem:[#allocation36_spill] sm:$0xff] }
 0x417   : > { %v6736_v8 = vrot.slane %v22649_v40, 6  ;;  %v22652_v40 = vld [vmem:[#allocation18_spill] sm:$0xff] }
 0x418   : > { %v20541_v33 = vsel %vm573_vm1, %v6347_v13, %v6349_v25  ;;  %v20546_v34 = vsel %vm573_vm1, %v6349_v25, %v6351_v26  ;;  %v6320_v56 = vrot.slane %v22652_v40, 5 }
 0x41a   : > { %15013 = vmatmul.mubr.msk.bf16.gmra.mrb[24].mxu1 %vm3313_vm13, %v20525_v6 }
 0x41b   : > { %15016 = vmatprep.mubr.msk.bf16.mxu1 %vm3313_vm13, %v20530_v46 }
 0x41d   : > { %14463 = vmatmul.mubr.msk.bf16.gmra.mrb[80].mxu0 %vm3313_vm13, %v20278_v57  ;;  %v22638_v57 = vld [vmem:[#allocation8_spill] sm:$0xff] }
 0x41e   : > { %14466 = vmatprep.mubr.msk.bf16.mxu0 %vm3313_vm13, %v20289_v59  ;;  %v6353_v59 = vrot.slane %v22638_v57, 5  ;;  %v22648_v57 = vld [vmem:[#allocation38_spill] sm:$0xff] }
 0x41f   : > { %v6735_v3 = vrot.slane %v22648_v57, 5  ;;  %v6740_v57 = vrot.slane %v22581_v28, 6 }
 0x420   : > { %v20557_v13 = vsel %vm573_vm1, %v6351_v26, %v6353_v59  ;;  %v20562_v25 = vsel %vm573_vm1, %v6353_v59, %v6355_v54  ;;  %v6359_v26 = vrot.slane %v22641_v32, 5  ;;  %v22643_v32 = vld [vmem:[#allocation14_spill] sm:$0xff] }
 0x422   : > { %15017 = vmatmul.mubr.msk.bf16.gmra.mrb[28].mxu1 %vm3313_vm13, %v20541_v33 }
 0x423   : > { %15020 = vmatprep.mubr.msk.bf16.mxu1 %vm3313_vm13, %v20546_v34 }
 0x425   : > { %14467 = vmatmul.mubr.msk.bf16.gmra.mrb[84].mxu0 %vm3313_vm13, %v20296_v53  ;;  %v22640_v53 = vld [vmem:[#allocation29_spill] sm:$0xff] }
 0x426   : > { %14470 = vmatprep.mubr.msk.bf16.mxu0 %vm3313_vm13, %v20307_v41  ;;  %v6357_v41 = vrot.slane %v22640_v53, 5  ;;  %v6363_v53 = vrot.slane %v22643_v32, 5 }
 0x428   : > { %v20573_v58 = vsel %vm573_vm1, %v6355_v54, %v6357_v41  ;;  %v20578_v59 = vsel %vm573_vm1, %v6357_v41, %v6359_v26  ;;  %v12747_v54 = vld [vmem:[%s21744_s2 + $0x20] sm:$0xf] }
 0x429   : > { %16700 = vmatprep.subr.msk.bf16.mxu0 %vm3386_vm14, %v12747_v54 }
 0x42a   : > { %15021 = vmatmul.mubr.msk.bf16.gmra.mrb[32].mxu1 %vm3313_vm13, %v20557_v13 }
 0x42b   : > { %15024 = vmatprep.mubr.msk.bf16.mxu1 %vm3313_vm13, %v20562_v25 }
 0x42d   : > { %14471 = vmatmul.mubr.msk.bf16.gmra.mrb[88].mxu0 %vm3313_vm13, %v20314_v5  ;;  %v22642_v5 = vld [vmem:[#allocation16_spill] sm:$0xff] }
 0x42e   : > { %14474 = vmatprep.mubr.msk.bf16.mxu0 %vm3313_vm13, %v20325_v0  ;;  %v6361_v0 = vrot.slane %v22642_v5, 5  ;;  %v22645_v5 = vld [vmem:[#allocation30_spill] sm:$0xff] }
 0x430   : > { %v20593_v41 = vsel %vm573_vm1, %v6359_v26, %v6361_v0  ;;  %v6367_v26 = vrot.slane %v22645_v5, 5  ;;  %v22647_v5 = vld [vmem:[#allocation33_spill] sm:$0xff] }
 0x432   : > { %15025 = vmatmul.mubr.msk.bf16.gmra.mrb[36].mxu1 %vm3313_vm13, %v20573_v58 }
 0x433   : > { %15028 = vmatprep.mubr.msk.bf16.mxu1 %vm3313_vm13, %v20578_v59 }
 0x435   : > { %14475 = vmatmul.mubr.msk.bf16.gmra.mrb[92].mxu0 %vm3313_vm13, %v20332_v35  ;;  %v20598_v35 = vsel %vm573_vm1, %v6361_v0, %v6363_v53 }
 0x436   : > { %14478 = vmatprep.mubr.msk.bf16.mxu0 %vm3313_vm13, %v20343_v4  ;;  %v22644_v4 = vld [vmem:[#allocation17_spill] sm:$0xff] }
 0x437   : > { %v6365_v32 = vrot.slane %v22644_v4, 5 }
 0x439   : > { %v20609_v23 = vsel %vm573_vm1, %v6363_v53, %v6365_v32  ;;  %v20614_v0 = vsel %vm573_vm1, %v6365_v32, %v6367_v26  ;;  %v9646_v53 = vrot.slane %v22647_v5, 5  ;;  %v6737_v5 = vor.u32 %v6736_v8, %v6735_v3 }
 0x43a   : > { %15029 = vmatmul.mubr.msk.bf16.gmra.mrb[40].mxu1 %vm3313_vm13, %v20593_v41  ;;  %v6744_v8 = vrot.slane %v22585_v47, 6  ;;  %v6747_v47 = vrot.slane %v22589_v17, 5 }
 0x43b   : > { %15032 = vmatprep.mubr.msk.bf16.mxu1 %vm3313_vm13, %v20598_v35 }
 0x43d   : > { %14479 = vmatmul.mubr.msk.bf16.gmra.mrb[96].mxu0 %vm3313_vm13, %v20350_v49  ;;  %v22646_v49 = vld [vmem:[#allocation34_spill] sm:$0xff] }
 0x43e   : > { %14482 = vmatprep.mubr.msk.bf16.mxu0 %vm3313_vm13, %v20361_v50  ;;  %v9644_v50 = vrot.slane %v22646_v49, 5 }
 0x440   : > { %v9645_v4 = vsel %vm573_vm1, %v6367_v26, %v9644_v50  ;;  %v9647_v32 = vsel %vm573_vm1, %v9644_v50, %v9646_v53  ;;  %v22651_v26 = vld [vmem:[#allocation20_spill] sm:$0xff]  ;;  %v6739_v50 = vrot.slane %v22580_v43, 5 }
 0x441   : > { %v6321_v49 = vrot.slane %v22651_v26, 5 }
 0x442   : > { %15033 = vmatmul.mubr.msk.bf16.gmra.mrb[44].mxu1 %vm3313_vm13, %v20609_v23  ;;  %v6741_v28 = vor.u32 %v6740_v57, %v6739_v50  ;;  %v22654_v50 = vld [vmem:[#allocation42_spill] sm:$0xff] }
 0x443   : > { %15036 = vmatprep.mubr.msk.bf16.mxu1 %vm3313_vm13, %v20614_v0  ;;  %v6322_v43 = vsel %vm573_vm1, %v6320_v56, %v6321_v49  ;;  %v20664_v56 = vld [vmem:[%s21744_s2 + $0x50] sm:$0xf]  ;;  %v22655_v57 = vld [vmem:[#allocation6_spill] sm:$0xff] }
 0x445   : > { %14483 = vmatmul.mubr.msk.bf16.gmra.mrb[100].mxu0 %vm3313_vm13, %v20368_v1  ;;  %v22650_v1 = vld [vmem:[#allocation35_spill] sm:$0xff] }
 0x446   : > { %14486 = vmatprep.mubr.msk.bf16.mxu0 %vm3313_vm13, %v20383_v22  ;;  %v9648_v22 = vrot.slane %v22650_v1, 5 }
 0x44a   : > { %15037 = vmatmul.mubr.msk.bf16.gmra.mrb[0].mxu1 %vm3313_vm13, %v9645_v4  ;;  %v9649_v4 = vsel %vm573_vm1, %v9646_v53, %v9648_v22  ;;  %v6323_v53 = vrot.slane %v22331_v9, 5  ;;  %v10252_v22 = vsel %vm3386_vm14, %v20457_v61, 0  ;;  %v6751_v61 = vrot.slane %v22654_v50, 5 }
 0x44b   : > { %15040 = vmatprep.mubr.msk.bf16.mxu1 %vm3313_vm13, %v9647_v32  ;;  %v22653_v32 = vld [vmem:[#allocation119_spill] sm:$0xff] }
 0x44c   : > { %v6324_v17 = vsel %vm573_vm1, %v6321_v49, %v6323_v53 }
 0x44d   : > { %14487 = vmatmul.mubr.msk.bf16.gmra.mrb[104].mxu0 %vm3313_vm13, %v20390_v20  ;;  %v20643_v20 = vsel %vm6719_vm7, %v22653_v32, %v6737_v5  ;;  %v6892_v32 = vsel %vm3386_vm14, %v12747_v54, 0 }
 0x44e   : > { %14490 = vmatprep.mubr.msk.bf16.mxu0 %vm3313_vm13, %v20401_v62  ;;  %v6743_v62 = vrot.slane %v22582_v60, 5  ;;  %v20657_v60 = vsel %vm6719_vm7, %v6737_v5, %v6741_v28  ;;  %v6752_v5 = vrot.slane %v22655_v57, 6  ;;  %v22659_v57 = vld [vmem:[#allocation46_spill] sm:$0xff] }
 0x450   : > { %v6745_v3 = vor.u32 %v6744_v8, %v6743_v62  ;;  %v6753_v54 = vor.u32 %v6752_v5, %v6751_v61  ;;  %v22661_v61 = vld [vmem:[#allocation50_spill] sm:$0xff] }
 0x451   : > { %v6763_v5 = vrot.slane %v22661_v61, 5 }
 0x452   : > { %15041 = vmatmul.mubr.msk.bf16.gmra.mrb[4].mxu1 %vm3313_vm13, %v9649_v4  ;;  %v6748_v4 = vrot.slane %v22590_v45, 6  ;;  %v22656_v45 = vrot.slane %v22533_v16, 5 }
 0x453   : > { %15046 = vmatprep.mubr.msk.bf16.mxu1 %vm3313_vm13, %v20643_v20 }
 0x454   : > { %v6326_v62 = vsel %vm573_vm1, %v6323_v53, %v22656_v45  ;;  %v6749_v8 = vor.u32 %v6748_v4, %v6747_v47  ;;  %v22660_v45 = vld [vmem:[#allocation4_spill] sm:$0xff] }
 0x455   : > { %14491 = vmatmul.mubr.msk.bf16.gmra.mrb[108].mxu0 %vm3313_vm13, %v20408_v42  ;;  %v20669_v42 = vsel %vm6719_vm7, %v6741_v28, %v6745_v3 }
 0x456   : > { %14496 = vmatprep.mubr.msk.bf16.mxu0 %vm3313_vm13, %v6322_v43  ;;  %v20685_v49 = vsel %vm6719_vm7, %v6745_v3, %v6749_v8  ;;  %v22657_v43 = vld [vmem:[#allocation45_spill] sm:$0xff]  ;;  %v20692_v53 = vsel %vm6719_vm7, %v6749_v8, %v6753_v54 }
 0x457   : > { %v6755_v28 = vrot.slane %v22657_v43, 5 }
 0x45a   : > { %15047 = vmatmul.mubr.msk.bf16.vlgmr.msra.gmra.mrb[8].mxu1 %vm3313_vm13, %v20657_v60 }
 0x45b   : > { %15095 = vmatpush3.bf16.msra.mxu1 %v10252_v22  ;;  %15050 = vmatprep.mubr.msk.bf16.mxu1 %vm3313_vm13, %v20669_v42  ;;  %v22658_v22 = vld [vmem:[#allocation22_spill] sm:$0xff] }
 0x45c   : > { %16713 = vmatprep.subr.msk.bf16.mxu1 %vm3386_vm14, %v20664_v56  ;;  %v6756_v50 = vrot.slane %v22658_v22, 6  ;;  %v22663_v22 = vld [vmem:[#allocation51_spill] sm:$0xff] }
 0x45d   : > { %14497 = vmatmul.mubr.msk.bf16.vlgmr.msra.gmra.mrb[64].mxu0 %vm3313_vm13, %v6324_v17  ;;  %v6759_v17 = vrot.slane %v22659_v57, 5  ;;  %v22664_v57 = vld [vmem:[#allocation9_spill] sm:$0xff] }
 0x45e   : > { %14500 = vmatprep.mubr.msk.bf16.mxu0 %vm3313_vm13, %v6326_v62  ;;  %14545 = vmatpush3.bf16.msra.mxu0 %v6892_v32  ;;  %v6760_v62 = vrot.slane %v22660_v45, 6  ;;  %v6757_v3 = vor.u32 %v6756_v50, %v6755_v28  ;;  %v22662_v32 = vld [vmem:[#allocation31_spill] sm:$0xff]  ;;  %v6768_v45 = vrot.slane %v22664_v57, 6  ;;  %v22665_v50 = vld [vmem:[#allocation56_spill] sm:$0xff] }
 0x45f   : > { %v6764_v8 = vrot.slane %v22662_v32, 6  ;;  %v22667_v32 = vld [vmem:[#allocation57_spill] sm:$0xff] }
 0x460   : > { %v6761_v47 = vor.u32 %v6760_v62, %v6759_v17  ;;  %v20703_v4 = vsel %vm6719_vm7, %v6753_v54, %v6757_v3  ;;  %v6771_v17 = vrot.slane %v22665_v50, 5  ;;  %v22666_v62 = vld [vmem:[#allocation49_spill] sm:$0xff] }
 0x462   : > { %15051 = vmatmul.mubr.msk.bf16.gmra.mrb[12].mxu1 %vm3313_vm13, %v20685_v49  ;;  %v20710_v43 = vsel %vm6719_vm7, %v6757_v3, %v6761_v47  ;;  %v6772_v3 = vrot.slane %v22666_v62, 6  ;;  %v22671_v62 = vld [vmem:[#allocation63_spill] sm:$0xff] }
 0x463   : > { %15054 = vmatprep.mubr.msk.bf16.mxu1 %vm3313_vm13, %v20692_v53 }
 0x465   : > { %14501 = vmatmul.mubr.msk.bf16.gmra.mrb[68].mxu0 %vm3313_vm13, %v20439_v63  ;;  %v6767_v63 = vrot.slane %v22663_v22, 5  ;;  %v22668_v22 = vld [vmem:[#allocation52_spill] sm:$0xff] }
 0x466   : > { %14504 = vmatprep.mubr.msk.bf16.mxu0 %vm3313_vm13, %v20452_v11  ;;  %v6765_v11 = vor.u32 %v6764_v8, %v6763_v5  ;;  %v6776_v57 = vrot.slane %v22668_v22, 6  ;;  %v22669_v8 = vld [vmem:[#allocation62_spill] sm:$0xff] }
 0x467   : > { %v6769_v54 = vor.u32 %v6768_v45, %v6767_v63  ;;  %v6779_v63 = vrot.slane %v22669_v8, 5  ;;  %v22670_v45 = vld [vmem:[#allocation55_spill] sm:$0xff] }
 0x468   : > { %v20721_v28 = vsel %vm6719_vm7, %v6761_v47, %v6765_v11 }
 0x469   : > { %v20728_v61 = vsel %vm6719_vm7, %v6765_v11, %v6769_v54  ;;  %v6780_v11 = vrot.slane %v22670_v45, 6  ;;  %v22675_v45 = vld [vmem:[#allocation69_spill] sm:$0xff] }
 0x46a   : > { %15055 = vmatmul.mubr.msk.bf16.gmra.mrb[16].mxu1 %vm3313_vm13, %v20703_v4 }
 0x46b   : > { %15058 = vmatprep.mubr.msk.bf16.mxu1 %vm3313_vm13, %v20710_v43 }
 0x46d   : > { %14505 = vmatmul.mubr.msk.bf16.gmra.mrb[72].mxu0 %vm3313_vm13, %v20462_v10  ;;  %v6775_v10 = vrot.slane %v22667_v32, 5  ;;  %v22672_v32 = vld [vmem:[#allocation58_spill] sm:$0xff] }
 0x46e   : > { %14508 = vmatprep.mubr.msk.bf16.mxu0 %vm3313_vm13, %v20477_v19  ;;  %v6773_v19 = vor.u32 %v6772_v3, %v6771_v17  ;;  %v6784_v22 = vrot.slane %v22672_v32, 6  ;;  %v22673_v3 = vld [vmem:[#allocation68_spill] sm:$0xff] }
 0x46f   : > { %v6777_v47 = vor.u32 %v6776_v57, %v6775_v10  ;;  %v6787_v10 = vrot.slane %v22673_v3, 5  ;;  %v22674_v57 = vld [vmem:[#allocation61_spill] sm:$0xff] }
 0x470   : > { %v20739_v5 = vsel %vm6719_vm7, %v6769_v54, %v6773_v19 }
 0x471   : > { %v20746_v50 = vsel %vm6719_vm7, %v6773_v19, %v6777_v47  ;;  %v6788_v19 = vrot.slane %v22674_v57, 6  ;;  %v22679_v57 = vld [vmem:[#allocation77_spill] sm:$0xff] }
 0x472   : > { %15059 = vmatmul.mubr.msk.bf16.gmra.mrb[20].mxu1 %vm3313_vm13, %v20721_v28 }
 0x473   : > { %15062 = vmatprep.mubr.msk.bf16.mxu1 %vm3313_vm13, %v20728_v61 }
 0x475   : > { %14509 = vmatmul.mubr.msk.bf16.gmra.mrb[76].mxu0 %vm3313_vm13, %v20482_v21  ;;  %v6783_v21 = vrot.slane %v22671_v62, 5  ;;  %v22676_v62 = vld [vmem:[#allocation64_spill] sm:$0xff] }
 0x476   : > { %14512 = vmatprep.mubr.msk.bf16.mxu0 %vm3313_vm13, %v20493_v39  ;;  %v6781_v39 = vor.u32 %v6780_v11, %v6779_v63  ;;  %v6792_v32 = vrot.slane %v22676_v62, 6  ;;  %v22677_v11 = vld [vmem:[#allocation76_spill] sm:$0xff] }
 0x477   : > { %v6785_v54 = vor.u32 %v6784_v22, %v6783_v21  ;;  %v6795_v21 = vrot.slane %v22677_v11, 5  ;;  %v22678_v22 = vld [vmem:[#allocation67_spill] sm:$0xff] }
 0x478   : > { %v20757_v17 = vsel %vm6719_vm7, %v6777_v47, %v6781_v39  ;;  %v22682_v11 = vld [vmem:[#allocation83_spill] sm:$0xff] }
 0x479   : > { %v20764_v8 = vsel %vm6719_vm7, %v6781_v39, %v6785_v54  ;;  %v6796_v39 = vrot.slane %v22678_v22, 6  ;;  %v22683_v22 = vld [vmem:[#allocation78_spill] sm:$0xff] }
 0x47a   : > { %15063 = vmatmul.mubr.msk.bf16.gmra.mrb[24].mxu1 %vm3313_vm13, %v20739_v5 }
 0x47b   : > { %15066 = vmatprep.mubr.msk.bf16.mxu1 %vm3313_vm13, %v20746_v50 }
 0x47d   : > { %14513 = vmatmul.mubr.msk.bf16.gmra.mrb[80].mxu0 %vm3313_vm13, %v20498_v51  ;;  %v6791_v51 = vrot.slane %v22675_v45, 5  ;;  %v22680_v45 = vld [vmem:[#allocation70_spill] sm:$0xff] }
 0x47e   : > { %14516 = vmatprep.mubr.msk.bf16.mxu0 %vm3313_vm13, %v20509_v7  ;;  %v6789_v7 = vor.u32 %v6788_v19, %v6787_v10  ;;  %v6800_v62 = vrot.slane %v22680_v45, 6  ;;  %v6803_v19 = vrot.slane %v22618_v30, 5  ;;  %v22685_v45 = vld [vmem:[#allocation81_spill] sm:$0xff] }
 0x47f   : > { %v6793_v47 = vor.u32 %v6792_v32, %v6791_v51  ;;  %v22681_v51 = vld [vmem:[#allocation74_spill] sm:$0xff] }
 0x480   : > { %v20775_v63 = vsel %vm6719_vm7, %v6785_v54, %v6789_v7  ;;  %v6804_v32 = vrot.slane %v22681_v51, 6 }
 0x481   : > { %v20782_v3 = vsel %vm6719_vm7, %v6789_v7, %v6793_v47 }
 0x482   : > { %15067 = vmatmul.mubr.msk.bf16.gmra.mrb[28].mxu1 %vm3313_vm13, %v20757_v17  ;;  %v6805_v30 = vor.u32 %v6804_v32, %v6803_v19  ;;  %v22687_v19 = vld [vmem:[#allocation84_spill] sm:$0xff] }
 0x483   : > { %15070 = vmatprep.mubr.msk.bf16.mxu1 %vm3313_vm13, %v20764_v8  ;;  %v6816_v51 = vrot.slane %v22687_v19, 6 }
 0x485   : > { %14517 = vmatmul.mubr.msk.bf16.gmra.mrb[84].mxu0 %vm3313_vm13, %v20514_v31  ;;  %v6799_v31 = vrot.slane %v22679_v57, 5  ;;  %v6808_v57 = vrot.slane %v22683_v22, 6  ;;  %v9938_v22 = vrot.slane %v22625_v27, 6  ;;  %v22688_v27 = vld [vmem:[#allocation123_spill] sm:$0xff] }
 0x486   : > { %14520 = vmatprep.mubr.msk.bf16.mxu0 %vm3313_vm13, %v20525_v6  ;;  %v6797_v6 = vor.u32 %v6796_v39, %v6795_v21  ;;  %v22684_v39 = vld [vmem:[#allocation88_spill] sm:$0xff] }
 0x487   : > { %v6801_v54 = vor.u32 %v6800_v62, %v6799_v31  ;;  %v6811_v31 = vrot.slane %v22684_v39, 5  ;;  %v6812_v62 = vrot.slane %v22685_v45, 6  ;;  %v7175_v39 = vrot.slane %v22533_v16, 6 }
 0x488   : > { %v20793_v10 = vsel %vm6719_vm7, %v6793_v47, %v6797_v6 }
 0x489   : > { %v20800_v7 = vsel %vm6719_vm7, %v6797_v6, %v6801_v54  ;;  %v20815_v21 = vsel %vm6719_vm7, %v6801_v54, %v6805_v30  ;;  %v6813_v54 = vor.u32 %v6812_v62, %v6811_v31  ;;  %v7177_v31 = vrot.slane %v22539_v18, 6 }
 0x48a   : > { %15071 = vmatmul.mubr.msk.bf16.gmra.mrb[32].mxu1 %vm3313_vm13, %v20775_v63 }
 0x48b   : > { %15074 = vmatprep.mubr.msk.bf16.mxu1 %vm3313_vm13, %v20782_v3 }
 0x48d   : > { %14521 = vmatmul.mubr.msk.bf16.gmra.mrb[88].mxu0 %vm3313_vm13, %v20530_v46  ;;  %v6807_v46 = vrot.slane %v22682_v11, 5 }
 0x48e   : > { %14524 = vmatprep.mubr.msk.bf16.mxu0 %vm3313_vm13, %v20541_v33  ;;  %v12772_v33 = vld [vmem:[%s21744_s2 + $0x24] sm:$0xf] }
 0x48f   : > { %v6809_v47 = vor.u32 %v6808_v57, %v6807_v46  ;;  %16701 = vmatprep.subr.msk.bf16.mxu0 %vm3386_vm14, %v12772_v33  ;;  %v9937_v46 = vrot.slane %v22624_v52, 5  ;;  %v7292_v19 = vsel %vm3386_vm14, %v12772_v33, 0  ;;  %v7185_v33 = vrot.slane %v22352_v55, 6 }
 0x491   : > { %v20833_v11 = vsel %vm6719_vm7, %v6809_v47, %v6813_v54 }
 0x492   : > { %15075 = vmatmul.mubr.msk.bf16.gmra.mrb[36].mxu1 %vm3313_vm13, %v20793_v10 }
 0x493   : > { %15078 = vmatprep.mubr.msk.bf16.mxu1 %vm3313_vm13, %v20800_v7 }
 0x495   : > { %14525 = vmatmul.mubr.msk.bf16.gmra.mrb[92].mxu0 %vm3313_vm13, %v20546_v34  ;;  %v20822_v34 = vsel %vm6719_vm7, %v6805_v30, %v6809_v47  ;;  %v6723_v30 = vrot.slane %v22628_v48, 5  ;;  %v6721_v47 = vrot.slane %v22631_v44, 6  ;;  %v20868_v48 = vsel %vm572_vm0, %v7175_v39, %v7177_v31 }
 0x496   : > { %14528 = vmatprep.mubr.msk.bf16.mxu0 %vm3313_vm13, %v20557_v13  ;;  %v22686_v13 = vld [vmem:[#allocation89_spill] sm:$0xff]  ;;  %v7181_v44 = vrot.slane %v22632_v29, 6 }
 0x497   : > { %v6815_v6 = vrot.slane %v22686_v13, 5  ;;  %v22689_v13 = vld [vmem:[#allocation125_spill] sm:$0xff] }
 0x499   : > { %v6817_v32 = vor.u32 %v6816_v51, %v6815_v6  ;;  %v20886_v6 = vld [vmem:[%s21744_s2 + $0x54] sm:$0xf]  ;;  %v22690_v51 = vld [vmem:[#allocation122_spill] sm:$0xff] }
 0x49a   : > { %15079 = vmatmul.mubr.msk.bf16.gmra.mrb[40].mxu1 %vm3313_vm13, %v20815_v21 }
 0x49b   : > { %15082 = vmatprep.mubr.msk.bf16.mxu1 %vm3313_vm13, %v20822_v34  ;;  %v20840_v57 = vsel %vm6719_vm7, %v6813_v54, %v6817_v32 }
 0x49d   : > { %14529 = vmatmul.mubr.msk.bf16.gmra.mrb[96].mxu0 %vm3313_vm13, %v20562_v25 }
 0x49e   : > { %14532 = vmatprep.mubr.msk.bf16.mxu0 %vm3313_vm13, %v20573_v58  ;;  %v9939_v58 = vor.u32 %v9938_v22, %v9937_v46  ;;  %v16792_v46 = vld [vmem:[%s21744_s2 + $0x28] sm:$0xf] }
 0x4a0   : > { %v9940_v52 = vsel %vm6719_vm7, %v6817_v32, %v9939_v58  ;;  %v9944_v25 = vsel %vm6719_vm7, %v9939_v58, %v22688_v27  ;;  %v7183_v32 = vrot.slane %v22346_v24, 6  ;;  %v7189_v27 = vrot.slane %v22360_v2, 6 }
 0x4a2   : > { %15083 = vmatmul.mubr.msk.bf16.gmra.mrb[44].mxu1 %vm3313_vm13, %v20833_v11  ;;  %v20910_v22 = vsel %vm572_vm0, %v7181_v44, %v7183_v32  ;;  %v20915_v58 = vsel %vm572_vm0, %v7183_v32, %v7185_v33 }
 0x4a3   : > { %15086 = vmatprep.mubr.msk.bf16.mxu1 %vm3313_vm13, %v20840_v57 }
 0x4a5   : > { %14533 = vmatmul.mubr.msk.bf16.gmra.mrb[100].mxu0 %vm3313_vm13, %v20578_v59  ;;  %v6724_v59 = vrot.slane %v22629_v15, 6 }
 0x4a6   : > { %14536 = vmatprep.mubr.msk.bf16.mxu0 %vm3313_vm13, %v20593_v41  ;;  %v6720_v41 = vrot.slane %v22630_v36, 5  ;;  %v7179_v36 = vrot.slane %v22540_v12, 6 }
 0x4a7   : > { %v6725_v45 = vor.u32 %v6724_v59, %v6723_v30 }
 0x4a8   : > { %v6722_v62 = vor.u32 %v6721_v47, %v6720_v41  ;;  %v22693_v47 = vld [vmem:[#allocation39_spill] sm:$0xff] }
 0x4a9   : > { %v6730_v54 = vsel %vm6719_vm7, %v6725_v45, %v22690_v51 }
 0x4aa   : > { %15087 = vmatmul.mubr.msk.bf16.gmra.mrb[0].mxu1 %vm3313_vm13, %v9940_v52  ;;  %v6726_v15 = vsel %vm6719_vm7, %v6722_v62, %v6725_v45  ;;  %v7187_v52 = vrot.slane %v22543_v14, 6 }
 0x4ab   : > { %15090 = vmatprep.mubr.msk.bf16.mxu1 %vm3313_vm13, %v9944_v25 }
 0x4ac   : > { %v20926_v25 = vsel %vm572_vm0, %v7185_v33, %v7187_v52  ;;  %v20931_v30 = vsel %vm572_vm0, %v7187_v52, %v7189_v27  ;;  %v22701_v52 = vld [vmem:[#allocation14_spill] sm:$0xff] }
 0x4ad   : > { %14537 = vmatmul.mubr.msk.bf16.gmra.mrb[104].mxu0 %vm3313_vm13, %v20598_v35  ;;  %v20881_v35 = vsel %vm572_vm0, %v7177_v31, %v7179_v36  ;;  %v7197_v31 = vrot.slane %v22693_v47, 6 }
 0x4ae   : > { %14540 = vmatprep.mubr.msk.bf16.mxu0 %vm3313_vm13, %v20609_v23  ;;  %v10537_v23 = vsel %vm3386_vm14, %v20664_v56, 0  ;;  %v22691_v56 = vld [vmem:[#allocation124_spill] sm:$0xff] }
 0x4b2   : > { %15091 = vmatmul.mubr.msk.bf16.gmra.mrb[4].mxu1 %vm3313_vm13, %v22689_v13  ;;  %v22695_v13 = vld [vmem:[#allocation43_spill] sm:$0xff] }
 0x4b3   : > { %15096 = vmatprep.mubr.msk.bf16.mxu1 %vm3313_vm13, %v20868_v48 }
 0x4b5   : > { %14541 = vmatmul.mubr.msk.bf16.gmra.mrb[108].mxu0 %vm3313_vm13, %v20614_v0  ;;  %v20891_v0 = vsel %vm572_vm0, %v7179_v36, %v7181_v44 }
 0x4b6   : > { %14546 = vmatprep.mubr.msk.bf16.mxu0 %vm3313_vm13, %v6726_v15  ;;  %v7201_v15 = vrot.slane %v22695_v13, 6 }
 0x4ba   : > { %15097 = vmatmul.mubr.msk.bf16.vlgmr.msra.gmra.mrb[8].mxu1 %vm3313_vm13, %v20881_v35 }
 0x4bb   : > { %15145 = vmatpush3.bf16.msra.mxu1 %v10537_v23  ;;  %15100 = vmatprep.mubr.msk.bf16.mxu1 %vm3313_vm13, %v20891_v0  ;;  %v22697_v23 = vld [vmem:[#allocation13_spill] sm:$0xff] }
 0x4bc   : > { %16714 = vmatprep.subr.msk.bf16.mxu1 %vm3386_vm14, %v20886_v6 }
 0x4bd   : > { %14547 = vmatmul.mubr.msk.bf16.vlgmr.msra.gmra.mrb[64].mxu0 %vm3313_vm13, %v6730_v54 }
 0x4be   : > { %14550 = vmatprep.mubr.msk.bf16.mxu0 %vm3313_vm13, %v22691_v56  ;;  %14595 = vmatpush3.bf16.msra.mxu0 %v7292_v19  ;;  %v7205_v19 = vrot.slane %v22697_v23, 6  ;;  %v22699_v56 = vld [vmem:[#allocation28_spill] sm:$0xff] }
 0x4bf   : > { %16702 = vmatprep.subr.msk.bf16.mxu0 %vm3386_vm14, %v16792_v46  ;;  %v7209_v32 = vrot.slane %v22699_v56, 6 }
 0x4c2   : > { %15101 = vmatmul.mubr.msk.bf16.gmra.mrb[12].mxu1 %vm3313_vm13, %v20910_v22 }
 0x4c3   : > { %15104 = vmatprep.mubr.msk.bf16.mxu1 %vm3313_vm13, %v20915_v58 }
 0x4c5   : > { %14551 = vmatmul.mubr.msk.bf16.gmra.mrb[68].mxu0 %vm3313_vm13, %v20643_v20  ;;  %v7191_v20 = vrot.slane %v22364_v37, 6 }
 0x4c6   : > { %14554 = vmatprep.mubr.msk.bf16.mxu0 %vm3313_vm13, %v20657_v60  ;;  %v7193_v60 = vrot.slane %v22368_v38, 6 }
 0x4c7   : > { %v20942_v59 = vsel %vm572_vm0, %v7189_v27, %v7191_v20  ;;  %v7213_v27 = vrot.slane %v22701_v52, 6 }
 0x4c8   : > { %v20947_v41 = vsel %vm572_vm0, %v7191_v20, %v7193_v60 }
 0x4ca   : > { %15105 = vmatmul.mubr.msk.bf16.gmra.mrb[16].mxu1 %vm3313_vm13, %v20926_v25 }
 0x4cb   : > { %15108 = vmatprep.mubr.msk.bf16.mxu1 %vm3313_vm13, %v20931_v30 }
 0x4cd   : > { %14555 = vmatmul.mubr.msk.bf16.gmra.mrb[72].mxu0 %vm3313_vm13, %v20669_v42  ;;  %v22692_v42 = vld [vmem:[#allocation40_spill] sm:$0xff] }
 0x4ce   : > { %14558 = vmatprep.mubr.msk.bf16.mxu0 %vm3313_vm13, %v20685_v49  ;;  %v7195_v49 = vrot.slane %v22692_v42, 6 }
 0x4d0   : > { %v20958_v45 = vsel %vm572_vm0, %v7193_v60, %v7195_v49  ;;  %v20963_v62 = vsel %vm572_vm0, %v7195_v49, %v7197_v31  ;;  %v22703_v49 = vld [vmem:[#allocation30_spill] sm:$0xff] }
 0x4d2   : > { %15109 = vmatmul.mubr.msk.bf16.gmra.mrb[20].mxu1 %vm3313_vm13, %v20942_v59 }
 0x4d3   : > { %15112 = vmatprep.mubr.msk.bf16.mxu1 %vm3313_vm13, %v20947_v41 }
 0x4d5   : > { %14559 = vmatmul.mubr.msk.bf16.gmra.mrb[76].mxu0 %vm3313_vm13, %v20692_v53  ;;  %v22694_v53 = vld [vmem:[#allocation44_spill] sm:$0xff] }
 0x4d6   : > { %14562 = vmatprep.mubr.msk.bf16.mxu0 %vm3313_vm13, %v20703_v4  ;;  %v7199_v4 = vrot.slane %v22694_v53, 6 }
 0x4d8   : > { %v20974_v36 = vsel %vm572_vm0, %v7197_v31, %v7199_v4  ;;  %v20979_v44 = vsel %vm572_vm0, %v7199_v4, %v7201_v15  ;;  %v7217_v31 = vrot.slane %v22703_v49, 6 }
 0x4da   : > { %15113 = vmatmul.mubr.msk.bf16.gmra.mrb[24].mxu1 %vm3313_vm13, %v20958_v45 }
 0x4db   : > { %15116 = vmatprep.mubr.msk.bf16.mxu1 %vm3313_vm13, %v20963_v62 }
 0x4dd   : > { %14563 = vmatmul.mubr.msk.bf16.gmra.mrb[80].mxu0 %vm3313_vm13, %v20710_v43  ;;  %v22696_v43 = vld [vmem:[#allocation8_spill] sm:$0xff] }
 0x4de   : > { %14566 = vmatprep.mubr.msk.bf16.mxu0 %vm3313_vm13, %v20721_v28  ;;  %v7203_v28 = vrot.slane %v22696_v43, 6 }
 0x4e0   : > { %v20990_v51 = vsel %vm572_vm0, %v7201_v15, %v7203_v28  ;;  %v20995_v54 = vsel %vm572_vm0, %v7203_v28, %v7205_v19  ;;  %v22705_v28 = vld [vmem:[#allocation33_spill] sm:$0xff] }
 0x4e2   : > { %15117 = vmatmul.mubr.msk.bf16.gmra.mrb[28].mxu1 %vm3313_vm13, %v20974_v36 }
 0x4e3   : > { %15120 = vmatprep.mubr.msk.bf16.mxu1 %vm3313_vm13, %v20979_v44 }
 0x4e5   : > { %14567 = vmatmul.mubr.msk.bf16.gmra.mrb[84].mxu0 %vm3313_vm13, %v20728_v61  ;;  %v22698_v61 = vld [vmem:[#allocation29_spill] sm:$0xff] }
 0x4e6   : > { %14570 = vmatprep.mubr.msk.bf16.mxu0 %vm3313_vm13, %v20739_v5  ;;  %v7207_v5 = vrot.slane %v22698_v61, 6 }
 0x4e8   : > { %v21006_v33 = vsel %vm572_vm0, %v7205_v19, %v7207_v5  ;;  %v21011_v46 = vsel %vm572_vm0, %v7207_v5, %v7209_v32  ;;  %v10238_v19 = vrot.slane %v22705_v28, 6 }
 0x4ea   : > { %15121 = vmatmul.mubr.msk.bf16.gmra.mrb[32].mxu1 %vm3313_vm13, %v20990_v51 }
 0x4eb   : > { %15124 = vmatprep.mubr.msk.bf16.mxu1 %vm3313_vm13, %v20995_v54 }
 0x4ed   : > { %14571 = vmatmul.mubr.msk.bf16.gmra.mrb[88].mxu0 %vm3313_vm13, %v20746_v50  ;;  %v22700_v50 = vld [vmem:[#allocation16_spill] sm:$0xff] }
 0x4ee   : > { %14574 = vmatprep.mubr.msk.bf16.mxu0 %vm3313_vm13, %v20757_v17  ;;  %v7211_v17 = vrot.slane %v22700_v50, 6 }
 0x4f0   : > { %v21022_v20 = vsel %vm572_vm0, %v7209_v32, %v7211_v17  ;;  %v21027_v60 = vsel %vm572_vm0, %v7211_v17, %v7213_v27 }
 0x4f2   : > { %15125 = vmatmul.mubr.msk.bf16.gmra.mrb[36].mxu1 %vm3313_vm13, %v21006_v33 }
 0x4f3   : > { %15128 = vmatprep.mubr.msk.bf16.mxu1 %vm3313_vm13, %v21011_v46 }
 0x4f5   : > { %14575 = vmatmul.mubr.msk.bf16.gmra.mrb[92].mxu0 %vm3313_vm13, %v20764_v8  ;;  %v22702_v8 = vld [vmem:[#allocation17_spill] sm:$0xff] }
 0x4f6   : > { %14578 = vmatprep.mubr.msk.bf16.mxu0 %vm3313_vm13, %v20775_v63  ;;  %v7215_v63 = vrot.slane %v22702_v8, 6 }
 0x4f8   : > { %v21038_v4 = vsel %vm572_vm0, %v7213_v27, %v7215_v63  ;;  %v21043_v15 = vsel %vm572_vm0, %v7215_v63, %v7217_v31  ;;  %v7170_v27 = vrot.slane %v22652_v40, 6  ;;  %v13097_v40 = vld [vmem:[%s21744_s2 + $0x58] sm:$0xf] }
 0x4fa   : > { %15129 = vmatmul.mubr.msk.bf16.gmra.mrb[40].mxu1 %vm3313_vm13, %v21022_v20 }
 0x4fb   : > { %15132 = vmatprep.mubr.msk.bf16.mxu1 %vm3313_vm13, %v21027_v60 }
 0x4fd   : > { %14579 = vmatmul.mubr.msk.bf16.gmra.mrb[96].mxu0 %vm3313_vm13, %v20782_v3  ;;  %v22704_v3 = vld [vmem:[#allocation34_spill] sm:$0xff] }
 0x4fe   : > { %14582 = vmatprep.mubr.msk.bf16.mxu0 %vm3313_vm13, %v20793_v10  ;;  %v10236_v10 = vrot.slane %v22704_v3, 6 }
 0x500   : > { %v10237_v5 = vsel %vm572_vm0, %v7217_v31, %v10236_v10  ;;  %v10239_v32 = vsel %vm572_vm0, %v10236_v10, %v10238_v19  ;;  %v22741_v10 = vld [vmem:[#allocation102_spill] sm:$0xff] }
 0x502   : > { %15133 = vmatmul.mubr.msk.bf16.gmra.mrb[44].mxu1 %vm3313_vm13, %v21038_v4 }
 0x503   : > { %15136 = vmatprep.mubr.msk.bf16.mxu1 %vm3313_vm13, %v21043_v15 }
 0x505   : > { %14583 = vmatmul.mubr.msk.bf16.gmra.mrb[100].mxu0 %vm3313_vm13, %v20800_v7  ;;  %v10240_v7 = vrot.slane %v22650_v1, 6 }
 0x506   : > { %14586 = vmatprep.mubr.msk.bf16.mxu0 %vm3313_vm13, %v20815_v21  ;;  %v7171_v21 = vrot.slane %v22651_v26, 6  ;;  %v10840_v26 = vsel %vm3386_vm14, %v20886_v6, 0  ;;  %v22706_v6 = vld [vmem:[#allocation32_spill] sm:$0xff] }
 0x507   : > { %v10241_v17 = vsel %vm572_vm0, %v10238_v19, %v10240_v7  ;;  %v22742_v19 = vld [vmem:[#allocation105_spill] sm:$0xff] }
 0x508   : > { %v22745_v7 = vld [vmem:[#allocation109_spill] sm:$0xff] }
 0x50a   : > { %15137 = vmatmul.mubr.msk.bf16.gmra.mrb[0].mxu1 %vm3313_vm13, %v10237_v5  ;;  %v22743_v5 = vld [vmem:[#allocation106_spill] sm:$0xff] }
 0x50b   : > { %15140 = vmatprep.mubr.msk.bf16.mxu1 %vm3313_vm13, %v10239_v32  ;;  %v22744_v32 = vld [vmem:[#allocation108_spill] sm:$0xff] }
 0x50d   : > { %14587 = vmatmul.mubr.msk.bf16.gmra.mrb[104].mxu0 %vm3313_vm13, %v20822_v34  ;;  %v7172_v34 = vsel %vm572_vm0, %v7170_v27, %v7171_v21  ;;  %v22748_v27 = vld [vmem:[#allocation112_spill] sm:$0xff] }
 0x50e   : > { %14590 = vmatprep.mubr.msk.bf16.mxu0 %vm3313_vm13, %v20833_v11  ;;  %v7173_v11 = vrot.slane %v22331_v9, 6 }
 0x510   : > { %v7174_v63 = vsel %vm572_vm0, %v7171_v21, %v7173_v11  ;;  %v22746_v21 = vld [vmem:[#allocation110_spill] sm:$0xff] }
 0x512   : > { %15141 = vmatmul.mubr.msk.bf16.gmra.mrb[4].mxu1 %vm3313_vm13, %v10241_v17  ;;  %v22747_v17 = vld [vmem:[#allocation111_spill] sm:$0xff] }
 0x513   : > { %15146 = vmatprep.mubr.msk.bf16.mxu1 %vm3313_vm13, %v22540_v12 }
 0x515   : > { %14591 = vmatmul.mubr.msk.bf16.gmra.mrb[108].mxu0 %vm3313_vm13, %v20840_v57  ;;  %v7176_v57 = vsel %vm572_vm0, %v7173_v11, %v7175_v39  ;;  %v22707_v39 = vld [vmem:[#allocation10_spill] sm:$0xff]  ;;  %vm12244_vm0 = vcmask 257024  }
 0x516   : > { %14596 = vmatprep.mubr.msk.bf16.mxu0 %vm3313_vm13, %v7172_v34  ;;  %v22749_v34 = vld [vmem:[#allocation113_spill] sm:$0xff]  ;;  %v22750_v11 = vld [vmem:[#allocation114_spill] sm:$0xff] }
 0x51a   : > { %15147 = vmatmul.mubr.msk.bf16.vlgmr.msra.gmra.mrb[8].mxu1 %vm3313_vm13, %v22632_v29 }
 0x51b   : > { %15195 = vmatpush3.bf16.msra.mxu1 %v10840_v26  ;;  %15150 = vmatprep.mubr.msk.bf16.mxu1 %vm3313_vm13, %v22346_v24  ;;  %v22751_v26 = vld [vmem:[#allocation115_spill] sm:$0xff] }
 0x51c   : > { %16715 = vmatprep.subr.msk.bf16.mxu1 %vm3386_vm14, %v13097_v40 }
 0x51d   : > { %14597 = vmatmul.mubr.msk.bf16.vlgmr.msra.gmra.mrb[64].mxu0 %vm3313_vm13, %v7174_v63  ;;  %v22753_v63 = vld [vmem:[#allocation121_spill] sm:$0xff] }
 0x51e   : > { %14600 = vmatprep.mubr.msk.bf16.mxu0 %vm3313_vm13, %v7176_v57  ;;  %14645 = vmatpush3.bf16.msra.mxu0 %v22706_v6  ;;  %v22754_v57 = vld [vmem:[#allocation126_spill] sm:$0xff]  ;;  %v22755_v6 = vld [vmem:[#allocation127_spill] sm:$0xff] }
 0x522   : > { %15151 = vmatmul.mubr.msk.bf16.gmra.mrb[12].mxu1 %vm3313_vm13, %v22352_v55 }
 0x523   : > { %15154 = vmatprep.mubr.msk.bf16.mxu1 %vm3313_vm13, %v22543_v14 }
 0x525   : > { %14601 = vmatmul.mubr.msk.bf16.gmra.mrb[68].mxu0 %vm3313_vm13, %v20868_v48  ;;  %v22708_v48 = vld [vmem:[#allocation26_spill] sm:$0xff] }
 0x526   : > { %14604 = vmatprep.mubr.msk.bf16.mxu0 %vm3313_vm13, %v20881_v35  ;;  %v11135_v35 = vsel %vm3386_vm14, %v13097_v40, 0  ;;  %v22752_v40 = vld [vmem:[#allocation120_spill] sm:$0xff] }
 0x52a   : > { %15155 = vmatmul.mubr.msk.bf16.gmra.mrb[16].mxu1 %vm3313_vm13, %v22360_v2 }
 0x52b   : > { %15158 = vmatprep.mubr.msk.bf16.mxu1 %vm3313_vm13, %v22364_v37 }
 0x52d   : > { %14605 = vmatmul.mubr.msk.bf16.gmra.mrb[72].mxu0 %vm3313_vm13, %v20891_v0  ;;  %v13122_v0 = vld [vmem:[%s21744_s2 + $0x5c] sm:$0xf] }
 0x52e   : > { %14608 = vmatprep.mubr.msk.bf16.mxu0 %vm3313_vm13, %v20910_v22  ;;  %v22709_v22 = vld [vmem:[#allocation25_spill] sm:$0xff]  ;;  %v11436_v31 = vsel %vm3386_vm14, %v13122_v0, 0 }
 0x532   : > { %15159 = vmatmul.mubr.msk.bf16.gmra.mrb[20].mxu1 %vm3313_vm13, %v22368_v38 }
 0x533   : > { %15162 = vmatprep.mubr.msk.bf16.mxu1 %vm3313_vm13, %v22692_v42 }
 0x535   : > { %14609 = vmatmul.mubr.msk.bf16.gmra.mrb[76].mxu0 %vm3313_vm13, %v20915_v58  ;;  %v22710_v58 = vld [vmem:[#allocation23_spill] sm:$0xff] }
 0x536   : > { %14612 = vmatprep.mubr.msk.bf16.mxu0 %vm3313_vm13, %v20926_v25  ;;  %v22712_v25 = vld [vmem:[#allocation47_spill] sm:$0xff] }
 0x53a   : > { %15163 = vmatmul.mubr.msk.bf16.gmra.mrb[24].mxu1 %vm3313_vm13, %v22693_v47 }
 0x53b   : > { %15166 = vmatprep.mubr.msk.bf16.mxu1 %vm3313_vm13, %v22694_v53 }
 0x53d   : > { %14613 = vmatmul.mubr.msk.bf16.gmra.mrb[80].mxu0 %vm3313_vm13, %v20931_v30  ;;  %v22713_v30 = vld [vmem:[#allocation48_spill] sm:$0xff] }
 0x53e   : > { %14616 = vmatprep.mubr.msk.bf16.mxu0 %vm3313_vm13, %v20942_v59  ;;  %v22716_v59 = vld [vmem:[#allocation59_spill] sm:$0xff] }
 0x542   : > { %15167 = vmatmul.mubr.msk.bf16.gmra.mrb[28].mxu1 %vm3313_vm13, %v22695_v13 }
 0x543   : > { %15170 = vmatprep.mubr.msk.bf16.mxu1 %vm3313_vm13, %v22696_v43 }
 0x545   : > { %14617 = vmatmul.mubr.msk.bf16.gmra.mrb[84].mxu0 %vm3313_vm13, %v20947_v41  ;;  %v22725_v41 = vld [vmem:[#allocation86_spill] sm:$0xff] }
 0x546   : > { %14620 = vmatprep.mubr.msk.bf16.mxu0 %vm3313_vm13, %v20958_v45  ;;  %v22728_v45 = vld [vmem:[#allocation96_spill] sm:$0xff] }
 0x54a   : > { %15171 = vmatmul.mubr.msk.bf16.gmra.mrb[32].mxu1 %vm3313_vm13, %v22697_v23 }
 0x54b   : > { %15174 = vmatprep.mubr.msk.bf16.mxu1 %vm3313_vm13, %v22698_v61 }
 0x54d   : > { %14621 = vmatmul.mubr.msk.bf16.gmra.mrb[88].mxu0 %vm3313_vm13, %v20963_v62  ;;  %v22729_v62 = vld [vmem:[#allocation118_spill] sm:$0xff] }
 0x54e   : > { %14624 = vmatprep.mubr.msk.bf16.mxu0 %vm3313_vm13, %v20974_v36 }
 0x552   : > { %15175 = vmatmul.mubr.msk.bf16.gmra.mrb[36].mxu1 %vm3313_vm13, %v22699_v56 }
 0x553   : > { %15178 = vmatprep.mubr.msk.bf16.mxu1 %vm3313_vm13, %v22700_v50 }
 0x555   : > { %14625 = vmatmul.mubr.msk.bf16.gmra.mrb[92].mxu0 %vm3313_vm13, %v20979_v44  ;;  %v22731_v44 = vld [vmem:[#allocation93_spill] sm:$0xff] }
 0x556   : > { %14628 = vmatprep.mubr.msk.bf16.mxu0 %vm3313_vm13, %v20990_v51 }
 0x55a   : > { %15179 = vmatmul.mubr.msk.bf16.gmra.mrb[40].mxu1 %vm3313_vm13, %v22701_v52  ;;  %v22736_v52 = vld [vmem:[#allocation131_spill] sm:$0xff] }
 0x55b   : > { %15182 = vmatprep.mubr.msk.bf16.mxu1 %vm3313_vm13, %v22702_v8 }
 0x55d   : > { %14629 = vmatmul.mubr.msk.bf16.gmra.mrb[96].mxu0 %vm3313_vm13, %v20995_v54  ;;  %v22734_v54 = vshll.u32 %v22707_v39, 16 }
 0x55e   : > { %14632 = vmatprep.mubr.msk.bf16.mxu0 %vm3313_vm13, %v21006_v33 }
 0x562   : > { %15183 = vmatmul.mubr.msk.bf16.gmra.mrb[44].mxu1 %vm3313_vm13, %v22703_v49  ;;  %v22738_v49 = vld [vmem:[#allocation99_spill] sm:$0xff] }
 0x563   : > { %15186 = vmatprep.mubr.msk.bf16.mxu1 %vm3313_vm13, %v22704_v3  ;;  %v22740_v3 = vld [vmem:[#allocation101_spill] sm:$0xff] }
 0x565   : > { %14633 = vmatmul.mubr.msk.bf16.gmra.mrb[100].mxu0 %vm3313_vm13, %v21011_v46  ;;  %v22735_v46 = vshrl.u32 %v22707_v39, 16 }
 0x566   : > { %14636 = vmatprep.mubr.msk.bf16.mxu0 %vm3313_vm13, %v21022_v20  ;;  %v22737_v20 = vshll.u32 %v22736_v52, 16 }
 0x56a   : > { %15187 = vmatmul.mubr.msk.bf16.gmra.mrb[0].mxu1 %vm3313_vm13, %v22705_v28 }
 0x56b   : > { %15190 = vmatprep.mubr.msk.bf16.mxu1 %vm3313_vm13, %v22650_v1 }
 0x56d   : > { %14637 = vmatmul.mubr.msk.bf16.gmra.mrb[104].mxu0 %vm3313_vm13, %v21027_v60  ;;  %v10828_v60 = vrot.slane %v22737_v20, 1  ;;  %v22770_v20 = vld [vmem:[#allocation142_spill] sm:$0xff] }
 0x56e   : > { %14640 = vmatprep.mubr.msk.bf16.mxu0 %vm3313_vm13, %v21038_v4  ;;  %v13147_v4 = vld [vmem:[%s21744_s2 + $0x60] sm:$0xf] }
 0x572   : > { %15191 = vmatmul.mubr.msk.bf16.gmra.mrb[4].mxu1 %vm3313_vm13, %v22707_v39 }
 0x573   : > { %15196 = vmatprep.mubr.msk.bf16.mxu1 %vm3313_vm13, %v22708_v48  ;;  %v22756_v48 = vld [vmem:[#allocation128_spill] sm:$0xff] }
 0x575   : > { %14641 = vmatmul.mubr.msk.bf16.gmra.mrb[108].mxu0 %vm3313_vm13, %v21043_v15  ;;  %v22739_v15 = vld [vmem:[#allocation100_spill] sm:$0xff] }
 0x576   : > { %14646 = vmatprep.mubr.msk.bf16.mxu0 %vm3313_vm13, %v22331_v9  ;;  %v22711_v9 = vld [vmem:[#allocation7_spill] sm:$0xff] }
 0x57a   : > { %15197 = vmatmul.mubr.msk.bf16.vlgmr.msra.gmra.mrb[8].mxu1 %vm3313_vm13, %v22709_v22  ;;  %v11119_v22 = vrot.slane %v22650_v1, 1 }
 0x57b   : > { %15245 = vmatpush3.bf16.msra.mxu1 %v11135_v35  ;;  %15200 = vmatprep.mubr.msk.bf16.mxu1 %vm3313_vm13, %v22710_v58  ;;  %v22757_v35 = vld [vmem:[#allocation129_spill] sm:$0xff]  ;;  %v11121_v58 = vrot.slane %v22707_v39, 1 }
 0x57c   : > { %16716 = vmatprep.subr.msk.bf16.mxu1 %vm3386_vm14, %v13122_v0  ;;  %v22758_v0 = vld [vmem:[#allocation130_spill] sm:$0xff] }
 0x57d   : > { %14647 = vmatmul.mubr.msk.bf16.vlgmr.msra.gmra.mrb[64].mxu0 %vm3313_vm13, %v22533_v16  ;;  %v22714_v16 = vld [vmem:[#allocation53_spill] sm:$0xff] }
 0x57e   : > { %14650 = vmatprep.mubr.msk.bf16.mxu0 %vm3313_vm13, %v22539_v18  ;;  %v22715_v18 = vld [vmem:[#allocation54_spill] sm:$0xff] }
 0x582   : > { %15201 = vmatmul.mubr.msk.bf16.gmra.mrb[12].mxu1 %vm3313_vm13, %v22711_v9  ;;  %v22759_v9 = vrot.slane %v22705_v28, 1 }
 0x583   : > { %15204 = vmatprep.mubr.msk.bf16.mxu1 %vm3313_vm13, %v22712_v25 }
 0x584   : > { %v11120_v25 = vsel %vm1512_vm3, %v22759_v9, %v11119_v22 }
 0x585   : > { %14651 = vmatmul.mubr.msk.bf16.gmra.mrb[68].mxu0 %vm3313_vm13, %v22540_v12  ;;  %v22717_v12 = vld [vmem:[#allocation60_spill] sm:$0xff] }
 0x586   : > { %14654 = vmatprep.mubr.msk.bf16.mxu0 %vm3313_vm13, %v22632_v29  ;;  %v22718_v29 = vld [vmem:[#allocation65_spill] sm:$0xff] }
 0x58a   : > { %15205 = vmatmul.mubr.msk.bf16.gmra.mrb[16].mxu1 %vm3313_vm13, %v22713_v30  ;;  %v11122_v30 = vsel %vm1512_vm3, %v11119_v22, %v11121_v58 }
 0x58b   : > { %15208 = vmatprep.mubr.msk.bf16.mxu1 %vm3313_vm13, %v22714_v16  ;;  %v11123_v16 = vrot.slane %v22736_v52, 1 }
 0x58d   : > { %14655 = vmatmul.mubr.msk.bf16.gmra.mrb[72].mxu0 %vm3313_vm13, %v22346_v24  ;;  %v22719_v24 = vld [vmem:[#allocation66_spill] sm:$0xff] }
 0x58e   : > { %14658 = vmatprep.mubr.msk.bf16.mxu0 %vm3313_vm13, %v22352_v55  ;;  %v22720_v55 = vld [vmem:[#allocation71_spill] sm:$0xff] }
 0x592   : > { %15209 = vmatmul.mubr.msk.bf16.gmra.mrb[20].mxu1 %vm3313_vm13, %v22715_v18  ;;  %v11124_v18 = vsel %vm1512_vm3, %v11121_v58, %v11123_v16 }
 0x593   : > { %15212 = vmatprep.mubr.msk.bf16.mxu1 %vm3313_vm13, %v22716_v59  ;;  %v22760_v59 = vld [vmem:[#allocation132_spill] sm:$0xff] }
 0x595   : > { %14659 = vmatmul.mubr.msk.bf16.gmra.mrb[76].mxu0 %vm3313_vm13, %v22543_v14  ;;  %v22722_v14 = vld [vmem:[#allocation79_spill] sm:$0xff] }
 0x596   : > { %14662 = vmatprep.mubr.msk.bf16.mxu0 %vm3313_vm13, %v22360_v2  ;;  %v22721_v2 = vld [vmem:[#allocation73_spill] sm:$0xff] }
 0x59a   : > { %15213 = vmatmul.mubr.msk.bf16.gmra.mrb[24].mxu1 %vm3313_vm13, %v22717_v12  ;;  %v11729_v12 = vsel %vm3386_vm14, %v13147_v4, 0 }
 0x59b   : > { %15216 = vmatprep.mubr.msk.bf16.mxu1 %vm3313_vm13, %v22718_v29  ;;  %v22761_v29 = vld [vmem:[#allocation133_spill] sm:$0xff] }
 0x59d   : > { %14663 = vmatmul.mubr.msk.bf16.gmra.mrb[80].mxu0 %vm3313_vm13, %v22364_v37  ;;  %v22723_v37 = vld [vmem:[#allocation80_spill] sm:$0xff] }
 0x59e   : > { %14666 = vmatprep.mubr.msk.bf16.mxu0 %vm3313_vm13, %v22368_v38  ;;  %v22724_v38 = vld [vmem:[#allocation85_spill] sm:$0xff] }
 0x5a2   : > { %15217 = vmatmul.mubr.msk.bf16.gmra.mrb[28].mxu1 %vm3313_vm13, %v22719_v24  ;;  %v22762_v24 = vld [vmem:[#allocation134_spill] sm:$0xff] }
 0x5a3   : > { %15220 = vmatprep.mubr.msk.bf16.mxu1 %vm3313_vm13, %v22720_v55 }
 0x5a5   : > { %14667 = vmatmul.mubr.msk.bf16.gmra.mrb[84].mxu0 %vm3313_vm13, %v22692_v42  ;;  %v22726_v42 = vld [vmem:[#allocation90_spill] sm:$0xff] }
 0x5a6   : > { %14670 = vmatprep.mubr.msk.bf16.mxu0 %vm3313_vm13, %v22693_v47  ;;  %v22727_v47 = vld [vmem:[#allocation91_spill] sm:$0xff] }
 0x5aa   : > { %15221 = vmatmul.mubr.msk.bf16.gmra.mrb[32].mxu1 %vm3313_vm13, %v22721_v2 }
 0x5ab   : > { %15224 = vmatprep.mubr.msk.bf16.mxu1 %vm3313_vm13, %v22722_v14 }
 0x5ad   : > { %14671 = vmatmul.mubr.msk.bf16.gmra.mrb[88].mxu0 %vm3313_vm13, %v22694_v53  ;;  %v10815_v53 = vrot.slane %v22729_v62, 1 }
 0x5ae   : > { %14674 = vmatprep.mubr.msk.bf16.mxu0 %vm3313_vm13, %v22695_v13  ;;  %v22730_v13 = vld [vmem:[#allocation117_spill] sm:$0xff] }
 0x5af   : > { %v10817_v36 = vor.u32 %v10815_v53, %v22730_v13  ;;  %v22766_v13 = vld [vmem:[#allocation138_spill] sm:$0xff] }
 0x5b2   : > { %15225 = vmatmul.mubr.msk.bf16.gmra.mrb[36].mxu1 %vm3313_vm13, %v22723_v37 }
 0x5b3   : > { %15228 = vmatprep.mubr.msk.bf16.mxu1 %vm3313_vm13, %v22724_v38  ;;  %v22763_v38 = vld [vmem:[#allocation135_spill] sm:$0xff] }
 0x5b5   : > { %14675 = vmatmul.mubr.msk.bf16.gmra.mrb[92].mxu0 %vm3313_vm13, %v22696_v43  ;;  %v22732_v43 = vrot.slane %v22731_v44, 1 }
 0x5b6   : > { %14678 = vmatprep.mubr.msk.bf16.mxu0 %vm3313_vm13, %v22697_v23  ;;  %v22733_v23 = vld [vmem:[#allocation116_spill] sm:$0xff] }
 0x5b7   : > { %v10814_v51 = vor.u32 %v22733_v23, %v22732_v43 }
 0x5ba   : > { %15229 = vmatmul.mubr.msk.bf16.gmra.mrb[40].mxu1 %vm3313_vm13, %v22725_v41  ;;  %v22764_v41 = vld [vmem:[#allocation136_spill] sm:$0xff] }
 0x5bb   : > { %15232 = vmatprep.mubr.msk.bf16.mxu1 %vm3313_vm13, %v22726_v42 }
 0x5bd   : > { %14679 = vmatmul.mubr.msk.bf16.gmra.mrb[96].mxu0 %vm3313_vm13, %v22698_v61  ;;  %v10820_v61 = vrot.slane %v22734_v54, 1  ;;  %v22768_v54 = vld [vmem:[#allocation140_spill] sm:$0xff] }
 0x5be   : > { %14682 = vmatprep.mubr.msk.bf16.mxu0 %vm3313_vm13, %v22699_v56  ;;  %v10816_v56 = vsel %vm2767_vm6, %v10814_v51, %v10815_v53  ;;  %v22765_v53 = vld [vmem:[#allocation137_spill] sm:$0xff]  ;;  %v22767_v51 = vld [vmem:[#allocation139_spill] sm:$0xff] }
 0x5bf   : > { %v10821_v33 = vsel %vm2767_vm6, %v10817_v36, %v10820_v61 }
 0x5c2   : > { %15233 = vmatmul.mubr.msk.bf16.gmra.mrb[44].mxu1 %vm3313_vm13, %v22727_v47 }
 0x5c3   : > { %15236 = vmatprep.mubr.msk.bf16.mxu1 %vm3313_vm13, %v22728_v45 }
 0x5c5   : > { %14683 = vmatmul.mubr.msk.bf16.gmra.mrb[100].mxu0 %vm3313_vm13, %v22700_v50  ;;  %v10824_v50 = vor.u32 %v22735_v46, %v10820_v61 }
 0x5c7   : > { %v10829_v8 = vsel %vm2767_vm6, %v10824_v50, %v10828_v60  ;;  %v22769_v50 = vld [vmem:[#allocation141_spill] sm:$0xff] }
 0x5ca   : > { %15237 = vmatmul.mubr.msk.bf16.gmra.mrb[0].mxu1 %vm3313_vm13, %v10816_v56 }
 0x5cb   : > { %15240 = vmatprep.mubr.msk.bf16.mxu1 %vm3313_vm13, %v10821_v33 }
 0x5d2   : > { %15241 = vmatmul.mubr.msk.bf16.gmra.mrb[4].mxu1 %vm3313_vm13, %v10829_v8 }
 0x5d3   : > { %15246 = vmatprep.mubr.msk.bf16.mxu1 %vm3313_vm13, %v22738_v49 }
 0x5da   : > { %15247 = vmatmul.mubr.msk.bf16.vlgmr.msra.gmra.mrb[8].mxu1 %vm3313_vm13, %v22739_v15  ;;  %v22772_v15 = vld [vmem:[#allocation144_spill] sm:$0xff] }
 0x5db   : > { %15295 = vmatpush3.bf16.msra.mxu1 %v11436_v31  ;;  %15250 = vmatprep.mubr.msk.bf16.mxu1 %vm3313_vm13, %v22740_v3 }
 0x5dc   : > { %16717 = vmatprep.subr.msk.bf16.mxu1 %vm3386_vm14, %v13147_v4  ;;  %v22771_v4 = vld [vmem:[#allocation143_spill] sm:$0xff] }
 0x5e2   : > { %15251 = vmatmul.mubr.msk.bf16.gmra.mrb[12].mxu1 %vm3313_vm13, %v22741_v10 }
 0x5e3   : > { %15254 = vmatprep.mubr.msk.bf16.mxu1 %vm3313_vm13, %v22742_v19 }
 0x5ea   : > { %15255 = vmatmul.mubr.msk.bf16.gmra.mrb[16].mxu1 %vm3313_vm13, %v22743_v5 }
 0x5eb   : > { %15258 = vmatprep.mubr.msk.bf16.mxu1 %vm3313_vm13, %v22744_v32  ;;  %v22773_v32 = vld [vmem:[#allocation145_spill] sm:$0xff] }
 0x5f2   : > { %15259 = vmatmul.mubr.msk.bf16.gmra.mrb[20].mxu1 %vm3313_vm13, %v22745_v7  ;;  %v22774_v7 = vld [vmem:[#allocation146_spill] sm:$0xff] }
 0x5f3   : > { %15262 = vmatprep.mubr.msk.bf16.mxu1 %vm3313_vm13, %v22746_v21 }
 0x5fa   : > { %15263 = vmatmul.mubr.msk.bf16.gmra.mrb[24].mxu1 %vm3313_vm13, %v22747_v17 }
 0x5fb   : > { %15266 = vmatprep.mubr.msk.bf16.mxu1 %vm3313_vm13, %v22748_v27 }
 0x602   : > { %15267 = vmatmul.mubr.msk.bf16.gmra.mrb[28].mxu1 %vm3313_vm13, %v22749_v34 }
 0x603   : > { %15270 = vmatprep.mubr.msk.bf16.mxu1 %vm3313_vm13, %v22750_v11  ;;  %v22775_v11 = vld [vmem:[#allocation147_spill] sm:$0xff] }
 0x60a   : > { %15271 = vmatmul.mubr.msk.bf16.gmra.mrb[32].mxu1 %vm3313_vm13, %v22751_v26  ;;  %v22776_v26 = vld [vmem:[#allocation148_spill] sm:$0xff] }
 0x60b   : > { %15274 = vmatprep.mubr.msk.bf16.mxu1 %vm3313_vm13, %v22752_v40 }
 0x612   : > { %15275 = vmatmul.mubr.msk.bf16.gmra.mrb[36].mxu1 %vm3313_vm13, %v22753_v63 }
 0x613   : > { %15278 = vmatprep.mubr.msk.bf16.mxu1 %vm3313_vm13, %v22754_v57 }
 0x61a   : > { %15279 = vmatmul.mubr.msk.bf16.gmra.mrb[40].mxu1 %vm3313_vm13, %v22755_v6 }
 0x61b   : > { %15282 = vmatprep.mubr.msk.bf16.mxu1 %vm3313_vm13, %v22756_v48  ;;  %v22777_v48 = vld [vmem:[#allocation149_spill] sm:$0xff] }
 0x622   : > { %15283 = vmatmul.mubr.msk.bf16.gmra.mrb[44].mxu1 %vm3313_vm13, %v22757_v35  ;;  %v22778_v35 = vld [vmem:[#allocation150_spill] sm:$0xff] }
 0x623   : > { %15286 = vmatprep.mubr.msk.bf16.mxu1 %vm3313_vm13, %v22758_v0 }
 0x62a   : > { %15287 = vmatmul.mubr.msk.bf16.gmra.mrb[0].mxu1 %vm3313_vm13, %v11120_v25  ;;  %v22779_v25 = vld [vmem:[#allocation151_spill] sm:$0xff] }
 0x62b   : > { %15290 = vmatprep.mubr.msk.bf16.mxu1 %vm3313_vm13, %v11122_v30  ;;  %v22780_v30 = vld [vmem:[#allocation2_spill] sm:$0xff] }
 0x632   : > { %15291 = vmatmul.mubr.msk.bf16.gmra.mrb[4].mxu1 %vm3313_vm13, %v11124_v18 }
 0x633   : > { %15296 = vmatprep.mubr.msk.bf16.mxu1 %vm3313_vm13, %v22760_v59 }
 0x63a   : > { %15297 = vmatmul.mubr.msk.bf16.vlgmr.msra.gmra.mrb[8].mxu1 %vm3313_vm13, %v22761_v29  ;;  %v22782_v29 = vld [vmem:[#allocation152_spill] sm:$0xff] }
 0x63b   : > { %15345 = vmatpush3.bf16.msra.mxu1 %v11729_v12  ;;  %15300 = vmatprep.mubr.msk.bf16.mxu1 %vm3313_vm13, %v22762_v24  ;;  %v22781_v12 = vld [vmem:[#allocation5_spill] sm:$0xff] }
 0x63c   : > { %v11415_v24 = vsel %vm4611_vm8, %v22782_v29, %v22781_v12  ;;  %v22792_v12 = vld [vmem:[#allocation155_spill] sm:$0xff]  ;;  %v22793_v29 = vld [vmem:[#allocation156_spill] sm:$0xff] }
 0x640   : > { %v21343_v55 = vpop.f32.mrb[104].mxu0 }
 0x641   : > { %v21345_v2 = vpop.f32.mrb[105].mxu0 }
 0x642   : > { %v21347_v14 = vpop.f32.mrb[106].mxu0  ;;  %15301 = vmatmul.mubr.msk.bf16.gmra.mrb[12].mxu1 %vm3313_vm13, %v22763_v38 }
 0x643   : > { %v21349_v37 = vpop.f32.mrb[107].mxu0  ;;  %15304 = vmatprep.mubr.msk.bf16.mxu1 %vm3313_vm13, %v22764_v41  ;;  %v22783_v41 = vld [vmem:[#allocation37_spill] sm:$0xff] }
 0x648   : > { %v21355_v42 = vpop.f32.mrb[108].mxu0 }
 0x649   : > { %v21357_v47 = vpop.f32.mrb[109].mxu0 }
 0x64a   : > { %v21359_v45 = vpop.f32.mrb[110].mxu0  ;;  %15305 = vmatmul.mubr.msk.bf16.gmra.mrb[16].mxu1 %vm3313_vm13, %v22765_v53 }
 0x64b   : > { %v21361_v62 = vpop.f32.mrb[111].mxu0  ;;  %15308 = vmatprep.mubr.msk.bf16.mxu1 %vm3313_vm13, %v22766_v13 }
 0x650   : > { %v21367_v36 = vpop.f32.mrb[64].mxu0 }
 0x651   : > { %v21369_v44 = vpop.f32.mrb[65].mxu0 }
 0x652   : > { %v21371_v43 = vpop.f32.mrb[66].mxu0  ;;  %15309 = vmatmul.mubr.msk.bf16.gmra.mrb[20].mxu1 %vm3313_vm13, %v22767_v51 }
 0x653   : > { %v21373_v23 = vpop.f32.mrb[67].mxu0  ;;  %15312 = vmatprep.mubr.msk.bf16.mxu1 %vm3313_vm13, %v22768_v54 }
 0x658   : > { %v21379_v61 = vpop.f32.mrb[68].mxu0 }
 0x659   : > { %v21381_v56 = vpop.f32.mrb[69].mxu0 }
 0x65a   : > { %v21383_v33 = vpop.f32.mrb[70].mxu0  ;;  %15313 = vmatmul.mubr.msk.bf16.gmra.mrb[24].mxu1 %vm3313_vm13, %v22769_v50  ;;  %v22784_v50 = vld [vmem:[#allocation24_spill] sm:$0xff] }
 0x65b   : > { %v21385_v46 = vpop.f32.mrb[71].mxu0  ;;  %15316 = vmatprep.mubr.msk.bf16.mxu1 %vm3313_vm13, %v22770_v20  ;;  %v22785_v20 = vld [vmem:[#allocation75_spill] sm:$0xff] }
 0x660   : > { %v21391_v60 = vpop.f32.mrb[72].mxu0 }
 0x661   : > { %v21393_v8 = vpop.f32.mrb[73].mxu0 }
 0x662   : > { %v21395_v49 = vpop.f32.mrb[74].mxu0  ;;  %15317 = vmatmul.mubr.msk.bf16.gmra.mrb[28].mxu1 %vm3313_vm13, %v22771_v4 }
 0x663   : > { %v21397_v31 = vpop.f32.mrb[75].mxu0  ;;  %15320 = vmatprep.mubr.msk.bf16.mxu1 %vm3313_vm13, %v22772_v15 }
 0x668   : > { %v21403_v3 = vpop.f32.mrb[76].mxu0 }
 0x669   : > { %v21405_v10 = vpop.f32.mrb[77].mxu0 }
 0x66a   : > { %v21407_v19 = vpop.f32.mrb[78].mxu0  ;;  %15321 = vmatmul.mubr.msk.bf16.gmra.mrb[32].mxu1 %vm3313_vm13, %v22773_v32 }
 0x66b   : > { %v21409_v5 = vpop.f32.mrb[79].mxu0  ;;  %15324 = vmatprep.mubr.msk.bf16.mxu1 %vm3313_vm13, %v22774_v7 }
 0x670   : > { %v21415_v21 = vpop.f32.mrb[80].mxu0 }
 0x671   : > { %v21417_v17 = vpop.f32.mrb[81].mxu0 }
 0x672   : > { %v21419_v27 = vpop.f32.mrb[82].mxu0  ;;  %15325 = vmatmul.mubr.msk.bf16.gmra.mrb[36].mxu1 %vm3313_vm13, %v22775_v11  ;;  %v22786_v11 = vld [vmem:[#allocation72_spill] sm:$0xff] }
 0x673   : > { %v21421_v34 = vpop.f32.mrb[83].mxu0  ;;  %15328 = vmatprep.mubr.msk.bf16.mxu1 %vm3313_vm13, %v22776_v26  ;;  %v22787_v26 = vld [vmem:[#allocation15_spill] sm:$0xff] }
 0x678   : > { %v21427_v40 = vpop.f32.mrb[84].mxu0 }
 0x679   : > { %v21429_v63 = vpop.f32.mrb[85].mxu0 }
 0x67a   : > { %v21431_v57 = vpop.f32.mrb[86].mxu0  ;;  %15329 = vmatmul.mubr.msk.bf16.gmra.mrb[40].mxu1 %vm3313_vm13, %v22777_v48  ;;  %v22788_v48 = vld [vmem:[#allocation21_spill] sm:$0xff] }
 0x67b   : > { %v21433_v6 = vpop.f32.mrb[87].mxu0  ;;  %15332 = vmatprep.mubr.msk.bf16.mxu1 %vm3313_vm13, %v22778_v35  ;;  %v22789_v35 = vld [vmem:[#allocation27_spill] sm:$0xff] }
 0x680   : > { %v21439_v0 = vpop.f32.mrb[88].mxu0 }
 0x681   : > { %v21441_v22 = vpop.f32.mrb[89].mxu0 }
 0x682   : > { %v21443_v58 = vpop.f32.mrb[90].mxu0  ;;  %15333 = vmatmul.mubr.msk.bf16.gmra.mrb[44].mxu1 %vm3313_vm13, %v22779_v25  ;;  %v22790_v25 = vld [vmem:[#allocation153_spill] sm:$0xff] }
 0x683   : > { %v21445_v9 = vpop.f32.mrb[91].mxu0  ;;  %15336 = vmatprep.mubr.msk.bf16.mxu1 %vm3313_vm13, %v22780_v30  ;;  %v22791_v30 = vld [vmem:[#allocation154_spill] sm:$0xff] }
 0x688   : > { %v21451_v16 = vpop.f32.mrb[92].mxu0 }
 0x689   : > { %v21453_v18 = vpop.f32.mrb[93].mxu0 }
 0x68a   : > { %v21455_v59 = vpop.f32.mrb[94].mxu0  ;;  %15337 = vmatmul.mubr.msk.bf16.gmra.mrb[0].mxu1 %vm3313_vm13, %v11415_v24  ;;  %v22794_v24 = vld [vmem:[#allocation157_spill] sm:$0xff] }
 0x68b   : > { %v21460_v38 = vpop.f32.mrb[95].mxu0  ;;  %15340 = vmatprep.mubr.msk.bf16.mxu1 %vm3313_vm13, %v22783_v41  ;;  %v22795_v41 = vld [vmem:[#allocation158_spill] sm:$0xff] }
 0x690   : > { %v21465_v53 = vpop.f32.mrb[96].mxu0 }
 0x691   : > { %v21467_v13 = vpop.f32.mrb[97].mxu0 }
 0x692   : > { %v21469_v51 = vpop.f32.mrb[98].mxu0  ;;  %15341 = vmatmul.mubr.msk.bf16.gmra.mrb[4].mxu1 %vm3313_vm13, %v22784_v50  ;;  %v22796_v50 = vld [vmem:[#allocation159_spill] sm:$0xff] }
 0x693   : > { %v21471_v54 = vpop.f32.mrb[99].mxu0  ;;  %15346 = vmatprep.mubr.msk.bf16.mxu1 %vm3313_vm13, %v22785_v20  ;;  %v22797_v20 = vld [vmem:[#allocation160_spill] sm:$0xff] }
 0x698   : > { %v21477_v4 = vpop.f32.mrb[100].mxu0 }
 0x699   : > { %v21479_v15 = vpop.f32.mrb[101].mxu0 }
 0x69a   : > { %v21481_v32 = vpop.f32.mrb[102].mxu0  ;;  %15347 = vmatmul.mubr.msk.bf16.vlgmr.msra.gmra.mrb[8].mxu1 %vm3313_vm13, %v22786_v11  ;;  %v22798_v11 = vld [vmem:[#allocation161_spill] sm:$0xff] }
 0x69b   : > { %v21483_v7 = vpop.f32.mrb[103].mxu0  ;;  %15350 = vmatprep.mubr.msk.bf16.mxu1 %vm3313_vm13, %v22787_v26  ;;  %v22799_v26 = vld [vmem:[#allocation162_spill] sm:$0xff] }
 0x6a2   : > { %15351 = vmatmul.mubr.msk.bf16.gmra.mrb[12].mxu1 %vm3313_vm13, %v22788_v48  ;;  %v22800_v48 = vld [vmem:[#allocation163_spill] sm:$0xff] }
 0x6a3   : > { %15354 = vmatprep.mubr.msk.bf16.mxu1 %vm3313_vm13, %v22789_v35  ;;  %v22801_v35 = vld [vmem:[#allocation164_spill] sm:$0xff] }
 0x6aa   : > { %15355 = vmatmul.mubr.msk.bf16.gmra.mrb[16].mxu1 %vm3313_vm13, %v22790_v25  ;;  %v22802_v25 = vld [vmem:[#allocation165_spill] sm:$0xff] }
 0x6ab   : > { %15358 = vmatprep.mubr.msk.bf16.mxu1 %vm3313_vm13, %v22791_v30  ;;  %v22803_v30 = vld [vmem:[#allocation166_spill] sm:$0xff] }
 0x6b2   : > { %15359 = vmatmul.mubr.msk.bf16.gmra.mrb[20].mxu1 %vm3313_vm13, %v22792_v12  ;;  %v22804_v12 = vld [vmem:[#allocation167_spill] sm:$0xff] }
 0x6b3   : > { %15362 = vmatprep.mubr.msk.bf16.mxu1 %vm3313_vm13, %v22793_v29  ;;  %v22805_v29 = vld [vmem:[#allocation19_spill] sm:$0xff] }
 0x6ba   : > { %15363 = vmatmul.mubr.msk.bf16.gmra.mrb[24].mxu1 %vm3313_vm13, %v22794_v24  ;;  %v11713_v24 = vrot.slane %v22650_v1, 2  ;;  %v21539_v1 = vld [vmem:[%s21747_s5] ss:$0 sm:$0xff] }
 0x6bb   : > { %15366 = vmatprep.mubr.msk.bf16.mxu1 %vm3313_vm13, %v22795_v41  ;;  %v11715_v41 = vrot.slane %v22707_v39, 2  ;;  %v15398_v39 = vadd.f32 %v21539_v1, %v21369_v44 }
 0x6c2   : > { %15367 = vmatmul.mubr.msk.bf16.gmra.mrb[28].mxu1 %vm3313_vm13, %v22796_v50  ;;  %v22806_v50 = vrot.slane %v22705_v28, 2  ;;  %v15396_v28 = vadd.f32 %v21367_v36, %v21539_v1 }
 0x6c3   : > { %15370 = vmatprep.mubr.msk.bf16.mxu1 %vm3313_vm13, %v22797_v20 }
 0x6c4   : > { %v11714_v20 = vsel %vm2107_vm4, %v22806_v50, %v11713_v24 }
 0x6ca   : > { %15371 = vmatmul.mubr.msk.bf16.gmra.mrb[32].mxu1 %vm3313_vm13, %v22798_v11  ;;  %v11716_v11 = vsel %vm2107_vm4, %v11713_v24, %v11715_v41 }
 0x6cb   : > { %15374 = vmatprep.mubr.msk.bf16.mxu1 %vm3313_vm13, %v22799_v26  ;;  %v11717_v26 = vrot.slane %v22736_v52, 2  ;;  %v15400_v52 = vadd.f32 %v21371_v43, %v21539_v1 }
 0x6d2   : > { %15375 = vmatmul.mubr.msk.bf16.gmra.mrb[36].mxu1 %vm3313_vm13, %v22800_v48  ;;  %v11718_v48 = vsel %vm2107_vm4, %v11715_v41, %v11717_v26 }
 0x6d3   : > { %15378 = vmatprep.mubr.msk.bf16.mxu1 %vm3313_vm13, %v22801_v35 }
 0x6da   : > { %15379 = vmatmul.mubr.msk.bf16.gmra.mrb[40].mxu1 %vm3313_vm13, %v22802_v25 }
 0x6db   : > { %15382 = vmatprep.mubr.msk.bf16.mxu1 %vm3313_vm13, %v22803_v30 }
 0x6e2   : > { %15383 = vmatmul.mubr.msk.bf16.gmra.mrb[44].mxu1 %vm3313_vm13, %v22804_v12  ;;  %v15402_v12 = vadd.f32 %v21539_v1, %v21373_v23 }
 0x6e3   : > { %15386 = vmatprep.mubr.msk.bf16.mxu1 %vm3313_vm13, %v22805_v29 }
 0x6ea   : > { %15387 = vmatmul.mubr.msk.bf16.gmra.mrb[0].mxu1 %vm3313_vm13, %v11714_v20 }
 0x6eb   : > { %15390 = vmatprep.mubr.msk.bf16.mxu1 %vm3313_vm13, %v11716_v11 }
 0x6f2   : > { %15391 = vmatmul.mubr.msk.bf16.gmra.mrb[4].mxu1 %vm3313_vm13, %v11718_v48  ;;  %v15404_v48 = vadd.f32 %v21379_v61, %v21539_v1  ;;  %v15410_v61 = vadd.f32 %v21539_v1, %v21385_v46 }
 0x76d   : > { %v15348_v35 = vpop.f32.mrb[8].mxu1 }
 0x76e   : > { %v15397_v25 = vadd.f32 %v15396_v28, %v15348_v35  ;;  %v11765_v30 = vpop.f32.mrb[9].mxu1 }
 0x76f   : > { %v15399_v29 = vadd.f32 %v15398_v39, %v11765_v30  ;;  %v15349_v24 = vpop.f32.mrb[10].mxu1  ;;  %v15406_v39 = vadd.f32 %v21539_v1, %v21381_v56 }
 0x770   : > { %v12006_v41 = vmax.f32 %v15397_v25, 0.0  ;;  %v15401_v50 = vadd.f32 %v15400_v52, %v15349_v24  ;;  %v11768_v20 = vpop.f32.mrb[11].mxu1  ;;  %v15408_v25 = vadd.f32 %v21383_v33, %v21539_v1 }
 0x771   : > { %v12004_v36 = vmax.f32 %v15399_v29, 0.0  ;;  %v15403_v44 = vadd.f32 %v15402_v12, %v11768_v20 }
 0x772   : > { %v13224_v43 = vpack.c.bf16 %v12006_v41, %v12006_v41  ;;  %v12007_v11 = vmax.f32 %v15401_v50, 0.0 }
 0x773   : > { %v13222_v23 = vpack.c.bf16 %v12004_v36, %v12004_v36  ;;  %v12005_v26 = vmax.f32 %v15403_v44, 0.0 }
 0x774   : > { %12247 = vst.msk [vmem:[%s21553_s24 + $0x8] sm:$0xf] %vm12244_vm0, %v13224_v43  ;;  %v13225_v28 = vpack.c.bf16 %v12007_v11, %v12007_v11 }
 0x775   : > { %12245 = vst.msk [vmem:[%s21553_s24] sm:$0xf] %vm12244_vm0, %v13222_v23  ;;  %v13223_v35 = vpack.c.bf16 %v12005_v26, %v12005_v26  ;;  %v15352_v52 = vpop.f32.mrb[12].mxu1  ;;  %v15412_v23 = vadd.f32 %v21391_v60, %v21539_v1  ;;  %v15414_v26 = vadd.f32 %v21539_v1, %v21393_v8  ;;  %v15418_v60 = vadd.f32 %v21539_v1, %v21397_v31 }
 0x776   : > { %12248 = vst.msk [vmem:[%s21553_s24 + $0xc] sm:$0xf] %vm12244_vm0, %v13225_v28  ;;  %v15405_v30 = vadd.f32 %v15404_v48, %v15352_v52  ;;  %v11781_v12 = vpop.f32.mrb[13].mxu1 }
 0x777   : > { %12246 = vst.msk [vmem:[%s21553_s24 + $0x4] sm:$0xf] %vm12244_vm0, %v13223_v35  ;;  %v15407_v29 = vadd.f32 %v15406_v39, %v11781_v12  ;;  %v15353_v56 = vpop.f32.mrb[14].mxu1  ;;  %v15416_v39 = vadd.f32 %v21395_v49, %v21539_v1 }
 0x778   : > { %v12010_v24 = vmax.f32 %v15405_v30, 0.0  ;;  %v15409_v41 = vadd.f32 %v15408_v25, %v15353_v56  ;;  %v11784_v50 = vpop.f32.mrb[15].mxu1 }
 0x779   : > { %v12008_v20 = vmax.f32 %v15407_v29, 0.0  ;;  %v15411_v36 = vadd.f32 %v15410_v61, %v11784_v50 }
 0x77a   : > { %v13228_v33 = vpack.c.bf16 %v12010_v24, %v12010_v24  ;;  %v12011_v44 = vmax.f32 %v15409_v41, 0.0 }
 0x77b   : > { %v13226_v43 = vpack.c.bf16 %v12008_v20, %v12008_v20  ;;  %v12009_v11 = vmax.f32 %v15411_v36, 0.0  ;;  %v15420_v20 = vadd.f32 %v21403_v3, %v21539_v1  ;;  %v15422_v36 = vadd.f32 %v21539_v1, %v21405_v10 }
 0x77c   : > { %12251 = vst.msk [vmem:[%s21553_s24 + $0x18] sm:$0xf] %vm12244_vm0, %v13228_v33  ;;  %v13229_v46 = vpack.c.bf16 %v12011_v44, %v12011_v44  ;;  %v15426_v3 = vadd.f32 %v21539_v1, %v21409_v5 }
 0x77d   : > { %12249 = vst.msk [vmem:[%s21553_s24 + $0x10] sm:$0xf] %vm12244_vm0, %v13226_v43  ;;  %v13227_v48 = vpack.c.bf16 %v12009_v11, %v12009_v11  ;;  %v15356_v28 = vpop.f32.mrb[16].mxu1  ;;  %v15424_v43 = vadd.f32 %v21407_v19, %v21539_v1 }
 0x77e   : > { %12252 = vst.msk [vmem:[%s21553_s24 + $0x1c] sm:$0xf] %vm12244_vm0, %v13229_v46  ;;  %v15413_v35 = vadd.f32 %v15412_v23, %v15356_v28  ;;  %v11797_v52 = vpop.f32.mrb[17].mxu1 }
 0x77f   : > { %12250 = vst.msk [vmem:[%s21553_s24 + $0x14] sm:$0xf] %vm12244_vm0, %v13227_v48  ;;  %v15415_v25 = vadd.f32 %v15414_v26, %v11797_v52  ;;  %v15357_v8 = vpop.f32.mrb[18].mxu1 }
 0x780   : > { %v12014_v30 = vmax.f32 %v15413_v35, 0.0  ;;  %v15417_v12 = vadd.f32 %v15416_v39, %v15357_v8  ;;  %v11800_v61 = vpop.f32.mrb[19].mxu1  ;;  %v15428_v8 = vadd.f32 %v21415_v21, %v21539_v1  ;;  %v15434_v21 = vadd.f32 %v21539_v1, %v21421_v34 }
 0x781   : > { %v12012_v29 = vmax.f32 %v15415_v25, 0.0  ;;  %v15419_v56 = vadd.f32 %v15418_v60, %v11800_v61 }
 0x782   : > { %v13232_v49 = vpack.c.bf16 %v12014_v30, %v12014_v30  ;;  %v12015_v24 = vmax.f32 %v15417_v12, 0.0  ;;  %v15430_v30 = vadd.f32 %v21539_v1, %v21417_v17 }
 0x783   : > { %v13230_v41 = vpack.c.bf16 %v12012_v29, %v12012_v29  ;;  %v12013_v50 = vmax.f32 %v15419_v56, 0.0  ;;  %v15432_v29 = vadd.f32 %v21419_v27, %v21539_v1 }
 0x784   : > { %12255 = vst.msk [vmem:[%s21553_s24 + $0x28] sm:$0xf] %vm12244_vm0, %v13232_v49  ;;  %v13233_v31 = vpack.c.bf16 %v12015_v24, %v12015_v24 }
 0x785   : > { %12253 = vst.msk [vmem:[%s21553_s24 + $0x20] sm:$0xf] %vm12244_vm0, %v13230_v41  ;;  %v13231_v33 = vpack.c.bf16 %v12013_v50, %v12013_v50  ;;  %v15360_v44 = vpop.f32.mrb[20].mxu1 }
 0x786   : > { %12256 = vst.msk [vmem:[%s21553_s24 + $0x2c] sm:$0xf] %vm12244_vm0, %v13233_v31  ;;  %v15421_v11 = vadd.f32 %v15420_v20, %v15360_v44  ;;  %v11813_v23 = vpop.f32.mrb[21].mxu1 }
 0x787   : > { %12254 = vst.msk [vmem:[%s21553_s24 + $0x24] sm:$0xf] %vm12244_vm0, %v13231_v33  ;;  %v15423_v46 = vadd.f32 %v15422_v36, %v11813_v23  ;;  %v15361_v10 = vpop.f32.mrb[22].mxu1  ;;  %v15438_v23 = vadd.f32 %v21539_v1, %v21429_v63 }
 0x788   : > { %v12018_v26 = vmax.f32 %v15421_v11, 0.0  ;;  %v15425_v48 = vadd.f32 %v15424_v43, %v15361_v10  ;;  %v11816_v28 = vpop.f32.mrb[23].mxu1  ;;  %v15436_v11 = vadd.f32 %v21427_v40, %v21539_v1  ;;  %v15440_v10 = vadd.f32 %v21431_v57, %v21539_v1 }
 0x789   : > { %v12016_v39 = vmax.f32 %v15423_v46, 0.0  ;;  %v15427_v35 = vadd.f32 %v15426_v3, %v11816_v28  ;;  %v15442_v40 = vadd.f32 %v21539_v1, %v21433_v6 }
 0x78a   : > { %v13236_v19 = vpack.c.bf16 %v12018_v26, %v12018_v26  ;;  %v12019_v52 = vmax.f32 %v15425_v48, 0.0 }
 0x78b   : > { %v13234_v60 = vpack.c.bf16 %v12016_v39, %v12016_v39  ;;  %v12017_v25 = vmax.f32 %v15427_v35, 0.0 }
 0x78c   : > { %12259 = vst.msk [vmem:[%s21553_s24 + $0x38] sm:$0xf] %vm12244_vm0, %v13236_v19  ;;  %v13237_v5 = vpack.c.bf16 %v12019_v52, %v12019_v52 }
 0x78d   : > { %12257 = vst.msk [vmem:[%s21553_s24 + $0x30] sm:$0xf] %vm12244_vm0, %v13234_v60  ;;  %v13235_v12 = vpack.c.bf16 %v12017_v25, %v12017_v25  ;;  %v15364_v61 = vpop.f32.mrb[24].mxu1 }
 0x78e   : > { %12260 = vst.msk [vmem:[%s21553_s24 + $0x3c] sm:$0xf] %vm12244_vm0, %v13237_v5  ;;  %v15429_v56 = vadd.f32 %v15428_v8, %v15364_v61  ;;  %v11829_v49 = vpop.f32.mrb[25].mxu1 }
 0x78f   : > { %12258 = vst.msk [vmem:[%s21553_s24 + $0x34] sm:$0xf] %vm12244_vm0, %v13235_v12  ;;  %v15431_v24 = vadd.f32 %v15430_v30, %v11829_v49  ;;  %v15365_v17 = vpop.f32.mrb[26].mxu1  ;;  %v15444_v30 = vadd.f32 %v21439_v0, %v21539_v1  ;;  %v15446_v12 = vadd.f32 %v21539_v1, %v21441_v22  ;;  %v15450_v0 = vadd.f32 %v21539_v1, %v21445_v9 }
 0x790   : > { %v12022_v41 = vmax.f32 %v15429_v56, 0.0  ;;  %v15433_v50 = vadd.f32 %v15432_v29, %v15365_v17  ;;  %v11832_v20 = vpop.f32.mrb[27].mxu1  ;;  %v15448_v56 = vadd.f32 %v21443_v58, %v21539_v1 }
 0x791   : > { %v12020_v31 = vmax.f32 %v15431_v24, 0.0  ;;  %v15435_v36 = vadd.f32 %v15434_v21, %v11832_v20 }
 0x792   : > { %v13240_v27 = vpack.c.bf16 %v12022_v41, %v12022_v41  ;;  %v12023_v33 = vmax.f32 %v15433_v50, 0.0 }
 0x793   : > { %v13238_v44 = vpack.c.bf16 %v12020_v31, %v12020_v31  ;;  %v12021_v43 = vmax.f32 %v15435_v36, 0.0 }
 0x794   : > { %12263 = vst.msk [vmem:[%s21553_s24 + $0x48] sm:$0xf] %vm12244_vm0, %v13240_v27  ;;  %v13241_v34 = vpack.c.bf16 %v12023_v33, %v12023_v33 }
 0x795   : > { %12261 = vst.msk [vmem:[%s21553_s24 + $0x40] sm:$0xf] %vm12244_vm0, %v13238_v44  ;;  %v13239_v3 = vpack.c.bf16 %v12021_v43, %v12021_v43  ;;  %v15368_v46 = vpop.f32.mrb[28].mxu1  ;;  %v15452_v44 = vadd.f32 %v21451_v16, %v21539_v1  ;;  %v15454_v43 = vadd.f32 %v21539_v1, %v21453_v18  ;;  %v15458_v16 = vadd.f32 %v21539_v1, %v21460_v38 }
 0x796   : > { %12264 = vst.msk [vmem:[%s21553_s24 + $0x4c] sm:$0xf] %vm12244_vm0, %v13241_v34  ;;  %v15437_v26 = vadd.f32 %v15436_v11, %v15368_v46  ;;  %v11845_v48 = vpop.f32.mrb[29].mxu1 }
 0x797   : > { %12262 = vst.msk [vmem:[%s21553_s24 + $0x44] sm:$0xf] %vm12244_vm0, %v13239_v3  ;;  %v15439_v28 = vadd.f32 %v15438_v23, %v11845_v48  ;;  %v15369_v63 = vpop.f32.mrb[30].mxu1  ;;  %v15456_v23 = vadd.f32 %v21455_v59, %v21539_v1 }
 0x798   : > { %v12026_v39 = vmax.f32 %v15437_v26, 0.0  ;;  %v15441_v35 = vadd.f32 %v15440_v10, %v15369_v63  ;;  %v11848_v19 = vpop.f32.mrb[31].mxu1 }
 0x799   : > { %v12024_v52 = vmax.f32 %v15439_v28, 0.0  ;;  %v15443_v60 = vadd.f32 %v15442_v40, %v11848_v19 }
 0x79a   : > { %v13244_v57 = vpack.c.bf16 %v12026_v39, %v12026_v39  ;;  %v12027_v25 = vmax.f32 %v15441_v35, 0.0 }
 0x79b   : > { %v13242_v8 = vpack.c.bf16 %v12024_v52, %v12024_v52  ;;  %v12025_v5 = vmax.f32 %v15443_v60, 0.0  ;;  %v15460_v52 = vadd.f32 %v21465_v53, %v21539_v1  ;;  %v15462_v60 = vadd.f32 %v21539_v1, %v21467_v13 }
 0x79c   : > { %12267 = vst.msk [vmem:[%s21553_s24 + $0x58] sm:$0xf] %vm12244_vm0, %v13244_v57  ;;  %v13245_v6 = vpack.c.bf16 %v12027_v25, %v12027_v25  ;;  %v15466_v53 = vadd.f32 %v21539_v1, %v21471_v54 }
 0x79d   : > { %12265 = vst.msk [vmem:[%s21553_s24 + $0x50] sm:$0xf] %vm12244_vm0, %v13242_v8  ;;  %v13243_v61 = vpack.c.bf16 %v12025_v5, %v12025_v5  ;;  %v15372_v29 = vpop.f32.mrb[32].mxu1  ;;  %v15464_v8 = vadd.f32 %v21469_v51, %v21539_v1 }
 0x79e   : > { %12268 = vst.msk [vmem:[%s21553_s24 + $0x5c] sm:$0xf] %vm12244_vm0, %v13245_v6  ;;  %v15445_v49 = vadd.f32 %v15444_v30, %v15372_v29  ;;  %v11861_v21 = vpop.f32.mrb[33].mxu1 }
 0x79f   : > { %12266 = vst.msk [vmem:[%s21553_s24 + $0x54] sm:$0xf] %vm12244_vm0, %v13243_v61  ;;  %v15447_v24 = vadd.f32 %v15446_v12, %v11861_v21  ;;  %v15373_v22 = vpop.f32.mrb[34].mxu1 }
 0x7a0   : > { %v12030_v17 = vmax.f32 %v15445_v49, 0.0  ;;  %v15449_v41 = vadd.f32 %v15448_v56, %v15373_v22  ;;  %v11864_v50 = vpop.f32.mrb[35].mxu1  ;;  %v15468_v22 = vadd.f32 %v21477_v4, %v21539_v1  ;;  %v15474_v4 = vadd.f32 %v21539_v1, %v21483_v7 }
 0x7a1   : > { %v12028_v20 = vmax.f32 %v15447_v24, 0.0  ;;  %v15451_v31 = vadd.f32 %v15450_v0, %v11864_v50 }
 0x7a2   : > { %v13248_v58 = vpack.c.bf16 %v12030_v17, %v12030_v17  ;;  %v12031_v36 = vmax.f32 %v15449_v41, 0.0  ;;  %v15470_v17 = vadd.f32 %v21539_v1, %v21479_v15 }
 0x7a3   : > { %v13246_v27 = vpack.c.bf16 %v12028_v20, %v12028_v20  ;;  %v12029_v33 = vmax.f32 %v15451_v31, 0.0  ;;  %v15472_v20 = vadd.f32 %v21481_v32, %v21539_v1 }
 0x7a4   : > { %12271 = vst.msk [vmem:[%s21553_s24 + $0x68] sm:$0xf] %vm12244_vm0, %v13248_v58  ;;  %v13249_v9 = vpack.c.bf16 %v12031_v36, %v12031_v36 }
 0x7a5   : > { %12269 = vst.msk [vmem:[%s21553_s24 + $0x60] sm:$0xf] %vm12244_vm0, %v13246_v27  ;;  %v13247_v11 = vpack.c.bf16 %v12029_v33, %v12029_v33  ;;  %v15376_v34 = vpop.f32.mrb[36].mxu1 }
 0x7a6   : > { %12272 = vst.msk [vmem:[%s21553_s24 + $0x6c] sm:$0xf] %vm12244_vm0, %v13249_v9  ;;  %v15453_v3 = vadd.f32 %v15452_v44, %v15376_v34  ;;  %v11877_v46 = vpop.f32.mrb[37].mxu1 }
 0x7a7   : > { %12270 = vst.msk [vmem:[%s21553_s24 + $0x64] sm:$0xf] %vm12244_vm0, %v13247_v11  ;;  %v15455_v10 = vadd.f32 %v15454_v43, %v11877_v46  ;;  %v15377_v18 = vpop.f32.mrb[38].mxu1  ;;  %v15478_v46 = vadd.f32 %v21539_v1, %v21345_v2 }
 0x7a8   : > { %v12034_v26 = vmax.f32 %v15453_v3, 0.0  ;;  %v15457_v48 = vadd.f32 %v15456_v23, %v15377_v18  ;;  %v11880_v40 = vpop.f32.mrb[39].mxu1  ;;  %v15476_v3 = vadd.f32 %v21343_v55, %v21539_v1  ;;  %v15480_v18 = vadd.f32 %v21347_v14, %v21539_v1 }
 0x7a9   : > { %v12032_v28 = vmax.f32 %v15455_v10, 0.0  ;;  %v15459_v63 = vadd.f32 %v15458_v16, %v11880_v40  ;;  %v15482_v55 = vadd.f32 %v21539_v1, %v21349_v37 }
 0x7aa   : > { %v13252_v59 = vpack.c.bf16 %v12034_v26, %v12034_v26  ;;  %v12035_v39 = vmax.f32 %v15457_v48, 0.0 }
 0x7ab   : > { %v13250_v35 = vpack.c.bf16 %v12032_v28, %v12032_v28  ;;  %v12033_v19 = vmax.f32 %v15459_v63, 0.0 }
 0x7ac   : > { %12275 = vst.msk [vmem:[%s21553_s24 + $0x78] sm:$0xf] %vm12244_vm0, %v13252_v59  ;;  %v13253_v38 = vpack.c.bf16 %v12035_v39, %v12035_v39 }
 0x7ad   : > { %12273 = vst.msk [vmem:[%s21553_s24 + $0x70] sm:$0xf] %vm12244_vm0, %v13250_v35  ;;  %v13251_v57 = vpack.c.bf16 %v12033_v19, %v12033_v19  ;;  %v15380_v25 = vpop.f32.mrb[40].mxu1 }
 0x7ae   : > { %12276 = vst.msk [vmem:[%s21553_s24 + $0x7c] sm:$0xf] %vm12244_vm0, %v13253_v38  ;;  %v15461_v5 = vadd.f32 %v15460_v52, %v15380_v25  ;;  %v11893_v30 = vpop.f32.mrb[41].mxu1 }
 0x7af   : > { %12274 = vst.msk [vmem:[%s21553_s24 + $0x74] sm:$0xf] %vm12244_vm0, %v13251_v57  ;;  %v15463_v6 = vadd.f32 %v15462_v60, %v11893_v30  ;;  %v15381_v13 = vpop.f32.mrb[42].mxu1  ;;  %v15484_v60 = vadd.f32 %v21355_v42, %v21539_v1  ;;  %v15486_v57 = vadd.f32 %v21539_v1, %v21357_v47  ;;  %v15490_v42 = vadd.f32 %v21539_v1, %v21361_v62 }
 0x7b0   : > { %v12038_v12 = vmax.f32 %v15461_v5, 0.0  ;;  %v15465_v61 = vadd.f32 %v15464_v8, %v15381_v13  ;;  %v11896_v29 = vpop.f32.mrb[43].mxu1  ;;  %v15488_v5 = vadd.f32 %v21359_v45, %v21539_v1 }
 0x7b1   : > { %v12036_v56 = vmax.f32 %v15463_v6, 0.0  ;;  %v15467_v49 = vadd.f32 %v15466_v53, %v11896_v29 }
 0x7b2   : > { %v13256_v51 = vpack.c.bf16 %v12038_v12, %v12038_v12  ;;  %v12039_v21 = vmax.f32 %v15465_v61, 0.0 }
 0x7b3   : > { %v13254_v0 = vpack.c.bf16 %v12036_v56, %v12036_v56  ;;  %v12037_v24 = vmax.f32 %v15467_v49, 0.0 }
 0x7b4   : > { %12279 = vst.msk [vmem:[%s21553_s24 + $0x88] sm:$0xf] %vm12244_vm0, %v13256_v51  ;;  %v13257_v54 = vpack.c.bf16 %v12039_v21, %v12039_v21 }
 0x7b5   : > { %12277 = vst.msk [vmem:[%s21553_s24 + $0x80] sm:$0xf] %vm12244_vm0, %v13254_v0  ;;  %v13255_v41 = vpack.c.bf16 %v12037_v24, %v12037_v24  ;;  %v15384_v50 = vpop.f32.mrb[44].mxu1 }
 0x7b6   : > { %12280 = vst.msk [vmem:[%s21553_s24 + $0x8c] sm:$0xf] %vm12244_vm0, %v13257_v54  ;;  %v15469_v31 = vadd.f32 %v15468_v22, %v15384_v50  ;;  %v11909_v58 = vpop.f32.mrb[45].mxu1 }
 0x7b7   : > { %12278 = vst.msk [vmem:[%s21553_s24 + $0x84] sm:$0xf] %vm12244_vm0, %v13255_v41  ;;  %v15471_v36 = vadd.f32 %v15470_v17, %v11909_v58  ;;  %v15385_v15 = vpop.f32.mrb[46].mxu1 }
 0x7b8   : > { %v12042_v27 = vmax.f32 %v15469_v31, 0.0  ;;  %v15473_v33 = vadd.f32 %v15472_v20, %v15385_v15  ;;  %v11912_v44 = vpop.f32.mrb[47].mxu1 }
 0x7b9   : > { %v12040_v9 = vmax.f32 %v15471_v36, 0.0  ;;  %v15475_v43 = vadd.f32 %v15474_v4, %v11912_v44 }
 0x7ba   : > { %v13260_v32 = vpack.c.bf16 %v12042_v27, %v12042_v27  ;;  %v12043_v11 = vmax.f32 %v15473_v33, 0.0 }
 0x7bb   : > { %v13258_v34 = vpack.c.bf16 %v12040_v9, %v12040_v9  ;;  %v12041_v23 = vmax.f32 %v15475_v43, 0.0 }
 0x7bc   : > { %12283 = vst.msk [vmem:[%s21553_s24 + $0x98] sm:$0xf] %vm12244_vm0, %v13260_v32  ;;  %v13261_v7 = vpack.c.bf16 %v12043_v11, %v12043_v11 }
 0x7bd   : > { %12281 = vst.msk [vmem:[%s21553_s24 + $0x90] sm:$0xf] %vm12244_vm0, %v13258_v34  ;;  %v13259_v16 = vpack.c.bf16 %v12041_v23, %v12041_v23  ;;  %v15388_v10 = vpop.f32.mrb[0].mxu1 }
 0x7be   : > { %12284 = vst.msk [vmem:[%s21553_s24 + $0x9c] sm:$0xf] %vm12244_vm0, %v13261_v7  ;;  %v15477_v26 = vadd.f32 %v15476_v3, %v15388_v10  ;;  %v11925_v48 = vpop.f32.mrb[1].mxu1 }
 0x7bf   : > { %12282 = vst.msk [vmem:[%s21553_s24 + $0x94] sm:$0xf] %vm12244_vm0, %v13259_v16  ;;  %v15479_v40 = vadd.f32 %v15478_v46, %v11925_v48  ;;  %v15389_v2 = vpop.f32.mrb[2].mxu1 }
 0x7c0   : > { %v12046_v28 = vmax.f32 %v15477_v26, 0.0  ;;  %v15481_v63 = vadd.f32 %v15480_v18, %v15389_v2  ;;  %v11928_v59 = vpop.f32.mrb[3].mxu1 }
 0x7c1   : > { %v12044_v39 = vmax.f32 %v15479_v40, 0.0  ;;  %v15483_v35 = vadd.f32 %v15482_v55, %v11928_v59 }
 0x7c2   : > { %v13264_v14 = vpack.c.bf16 %v12046_v28, %v12046_v28  ;;  %v12047_v19 = vmax.f32 %v15481_v63, 0.0 }
 0x7c3   : > { %v13262_v52 = vpack.c.bf16 %v12044_v39, %v12044_v39  ;;  %v12045_v38 = vmax.f32 %v15483_v35, 0.0 }
 0x7c4   : > { %12287 = vst.msk [vmem:[%s21553_s24 + $0xa8] sm:$0xf] %vm12244_vm0, %v13264_v14  ;;  %v13265_v37 = vpack.c.bf16 %v12047_v19, %v12047_v19 }
 0x7c5   : > { %12285 = vst.msk [vmem:[%s21553_s24 + $0xa0] sm:$0xf] %vm12244_vm0, %v13262_v52  ;;  %v13263_v25 = vpack.c.bf16 %v12045_v38, %v12045_v38  ;;  %v15392_v8 = vpop.f32.mrb[4].mxu1 }
 0x7c6   : > { %12288 = vst.msk [vmem:[%s21553_s24 + $0xac] sm:$0xf] %vm12244_vm0, %v13265_v37  ;;  %v15485_v30 = vadd.f32 %v15484_v60, %v15392_v8  ;;  %v11941_v53 = vpop.f32.mrb[5].mxu1 }
 0x7c7   : > { %12286 = vst.msk [vmem:[%s21553_s24 + $0xa4] sm:$0xf] %vm12244_vm0, %v13263_v25  ;;  %v15487_v47 = vadd.f32 %v15486_v57, %v11941_v53  ;;  %v15393_v6 = vpop.f32.mrb[6].mxu1 }
 0x7c8   : > { %v12050_v13 = vmax.f32 %v15485_v30, 0.0  ;;  %v15489_v12 = vadd.f32 %v15488_v5, %v15393_v6  ;;  %v11944_v61 = vpop.f32.mrb[7].mxu1 }
 0x7c9   : > { %v12048_v29 = vmax.f32 %v15487_v47, 0.0  ;;  %v15491_v45 = vadd.f32 %v15490_v42, %v11944_v61 }
 0x7ca   : > { %v13268_v56 = vpack.c.bf16 %v12050_v13, %v12050_v13  ;;  %v12051_v49 = vmax.f32 %v15489_v12, 0.0 }
 0x7cb   : > { %v13266_v51 = vpack.c.bf16 %v12048_v29, %v12048_v29  ;;  %v12049_v21 = vmax.f32 %v15491_v45, 0.0 }
 0x7cc   : > { %12291 = vst.msk [vmem:[%s21553_s24 + $0xb8] sm:$0xf] %vm12244_vm0, %v13268_v56  ;;  %v13269_v0 = vpack.c.bf16 %v12051_v49, %v12051_v49 }
 0x7cd   : > { %12289 = vst.msk [vmem:[%s21553_s24 + $0xb0] sm:$0xf] %vm12244_vm0, %v13266_v51  ;;  %v13267_v62 = vpack.c.bf16 %v12049_v21, %v12049_v21 }
 0x7ce   : > { %12292 = vst.msk [vmem:[%s21553_s24 + $0xbc] sm:$0xf] %vm12244_vm0, %v13269_v0 }
 0x7cf   : > { %12290 = vst.msk [vmem:[%s21553_s24 + $0xb4] sm:$0xf] %vm12244_vm0, %v13267_v62 }
 0x7d0 PF: > { %s16_s21 = sadd.s32 1, %s16799_s21  }
 0x7d1   : > { %p13_p4 = scmp.ge.s32.totalorder %s16_s21, 4  }
 0x7d3   :  { %15 = sbr.rel (!%p13_p4) target bundleno = 1 (0x1), region = 98 }

</bundles_post_ra>
